<compile_context>
chip_gen: v6e
topology: v6e:2x2x1
jax: 0.10.0
libtpu: 0.0.40
codegen_flags: <defaults>
</compile_context>

<pallas_src>
import functools
import numpy as np
import jax
import jax.numpy as jnp
from jax.experimental import pallas as pl
from jax.experimental.pallas import tpu as pltpu

# ----- deterministic "config" (module __init__) ------------------------------
GAMMA = 0.5
ALPHA = 0.1
IS_UPDATE_THETA_ITERATIVELY = True
IS_UPDATE_THETA_ITERATIVELY_BC = False


# ----------------------------- kernel ----------------------------------------
def _param_update_kernel(theta_ref, tl_ref, x_ref, m2t_ref, myt_ref,
                         fh_ref, fw_ref, out_ref, *, gamma, alpha):
    # Block shapes:
    #   theta_ref, out_ref : (1, 2C, H, W) f32   rows [:C]=real, [C:]=imag
    #   tl_ref             : (1, 2C, H, W) bf16
    #   x_ref              : (1, 2, H, W)  f32
    #   m2t_ref            : (1, W, H)     f32   mask^2, transposed
    #   myt_ref            : (1, 2C, W, H) f32   mask*y, transposed
    #   fh_ref / fw_ref    : (8, N, N)     bf16  [Fr,Fi,Fr+Fi,Fr-Fi] hi | lo
    C = theta_ref.shape[1] // 2
    f32 = jnp.float32
    bf16 = jnp.bfloat16

    def split(a):
        # f32 -> (hi, lo) bf16 pair with hi + lo ~= a (error O(eps_bf16^2))
        hi = a.astype(bf16)
        lo = (a - hi.astype(f32)).astype(bf16)
        return hi, lo

    def mm3(a_hi, a_lo, f_hi, f_lo):
        # bf16x3: one f32-accuracy matmul as three 1-pass bf16 MXU matmuls
        return (jnp.dot(a_hi, f_hi, preferred_element_type=f32)
                + jnp.dot(a_hi, f_lo, preferred_element_type=f32)
                + jnp.dot(a_lo, f_hi, preferred_element_type=f32))

    def gauss(ar, ai, f_ref, conj):
        # (ar + i*ai) @ (Fr + i*Fi)   [conj=False]   via 3 real matmuls
        # (ar + i*ai) @ (Fr - i*Fi)   [conj=True]
        frh, frl = f_ref[0], f_ref[4]
        fih, fil = f_ref[1], f_ref[5]
        sidx = 3 if conj else 2                  # Fr-Fi for conj, Fr+Fi for fwd
        fsh, fsl = f_ref[sidx], f_ref[sidx + 4]
        arh, arl = split(ar)
        aih, ail = split(ai)
        ash, asl = split(ar + ai)
        m1 = mm3(arh, arl, frh, frl)
        m2 = mm3(aih, ail, fih, fil)
        m3 = mm3(ash, asl, fsh, fsl)
        if conj:
            return m1 + m2, m3 - m1 + m2
        return m1 - m2, m3 - m1 - m2

    H = fh_ref.shape[-1]
    W = fw_ref.shape[-1]

    th = theta_ref[0]                            # [2C, H, W]
    thr, thi = th[:C], th[C:]
    xr = x_ref[0, 0]                             # [H, W], broadcasts over coils
    xi = x_ref[0, 1]

    # s = theta * x
    sr = thr * xr - thi * xi                     # [C, H, W]
    si = thr * xi + thi * xr

    # k = FFT2(s) = F_H @ s @ F_W, coils folded into the matmul M dim.
    ur, ui = gauss(sr.reshape(C * H, W), si.reshape(C * H, W), fw_ref, conj=False)
    utr = jnp.swapaxes(ur.reshape(C, H, W), 1, 2).reshape(C * W, H)   # u^T per coil
    uti = jnp.swapaxes(ui.reshape(C, H, W), 1, 2).reshape(C * W, H)
    ktr, kti = gauss(utr, uti, fh_ref, conj=False)                    # k^T, [C*W, H]

    # residual in (transposed) k-space:  r = mask^2 * k - mask * y
    m2t = m2t_ref[0]                             # [W, H]
    myt = myt_ref[0]                             # [2C, W, H]
    rtr = m2t * ktr.reshape(C, W, H) - myt[:C]
    rti = m2t * kti.reshape(C, W, H) - myt[C:]

    # g = IFFT2(r) = conj(F_H) @ r @ conj(F_W)
    vtr, vti = gauss(rtr.reshape(C * W, H), rti.reshape(C * W, H), fh_ref, conj=True)
    vr = jnp.swapaxes(vtr.reshape(C, W, H), 1, 2).reshape(C * H, W)
    vi = jnp.swapaxes(vti.reshape(C, W, H), 1, 2).reshape(C * H, W)
    gr, gi = gauss(vr, vi, fw_ref, conj=True)
    gr = gr.reshape(C, H, W)
    gi = gi.reshape(C, H, W)

    # dc = conj(x) * g ; theta update
    dcr = xr * gr + xi * gi
    dci = xr * gi - xi * gr

    tl = tl_ref[0]                               # bf16 stream
    out_ref[0, :C] = thr - gamma * (dcr + alpha * (thr - tl[:C].astype(f32)))
    out_ref[0, C:] = thi - gamma * (dci + alpha * (thi - tl[C:].astype(f32)))


# ----------------------------- host helpers ----------------------------------
def _dft_pack_bf16x3(n):
    """Orthonormal DFT factors for bf16x3 matmuls, shape [8, n, n] bf16.

    Rows 0..3: bf16 hi parts of [Fr, Fi, Fr+Fi, Fr-Fi]; rows 4..7: bf16 lo
    residuals.  Same VMEM footprint as a [4,n,n] f32 pack, but single-buffered
    in the kernel and ready for 3-pass bf16x3 matmuls with no in-kernel split
    of the (grid-invariant) weight operand.
    """
    k = np.arange(n)
    ang = -2.0 * np.pi * np.outer(k, k) / n
    fr = np.cos(ang) / np.sqrt(n)
    fi = np.sin(ang) / np.sqrt(n)
    m = jnp.asarray(np.stack([fr, fi, fr + fi, fr - fi]).astype(np.float32))
    hi = m.astype(jnp.bfloat16)
    lo = (m - hi.astype(jnp.float32)).astype(jnp.bfloat16)
    return jnp.concatenate([hi, lo], axis=0)


def _pack_ri(z, cb, dtype=jnp.float32):
    """[B,C,H,W] complex -> [B,(C//cb)*2*cb,H,W]; per group: cb real then cb imag rows."""
    b, c, h, w = z.shape
    g = c // cb
    zr = jnp.real(z).astype(dtype).reshape(b, g, cb, h, w)
    zi = jnp.imag(z).astype(dtype).reshape(b, g, cb, h, w)
    return jnp.stack([zr, zi], axis=2).reshape(b, g * 2 * cb, h, w)


def _unpack_ri(p, c, cb):
    """Inverse of _pack_ri -> [B,C,H,W] complex64."""
    b = p.shape[0]
    h, w = p.shape[-2:]
    g = c // cb
    p = p.reshape(b, g, 2, cb, h, w)
    zr = p[:, :, 0].reshape(b, c, h, w)
    zi = p[:, :, 1].reshape(b, c, h, w)
    return (zr + 1j * zi).astype(jnp.complex64)


def _tpu_vmem_capacity_bytes():
    # Physical VMEM: 128 MiB on v5e/v6e, 64 MiB per TensorCore on v7x.
    try:
        info = pltpu.get_tpu_info()
        cap = getattr(info, "vmem_capacity_bytes", None)
        if cap:
            return int(cap)
    except Exception:
        pass
    return 64 * 1024 * 1024       # conservative fallback valid on every generation


def _default_coil_block(B, C, H, W, vmem_budget_bytes):
    """Per-generation coil_block sizing.

    Per-step VMEM model (bytes):
      double-buffered big blocks (theta f32, out f32, myt f32, tl bf16) ~ 56*Cb*H*W
      live matmul/split/transpose intermediates                        ~ 30*Cb*H*W
      single-buffered bf16 DFT packs + small x/mask blocks (fixed)
    """
    per_cb = 86 * H * W
    fixed = 16 * (H * H + W * W) + 24 * H * W
    cb_max = max(1, min(C, (vmem_budget_bytes - fixed) // per_cb))
    # v7x megacore: prefer the largest Cb <= cb_max giving an even number of
    # grid steps (>= 2) so both TensorCores get balanced work; this only costs
    # a negligible amount of per-step overhead on single-core v5e/v6e.
    for cb in range(int(cb_max), 0, -1):
        steps = B * (-(-C // cb))
        if steps >= 2 and steps % 2 == 0:
            return cb
    return int(cb_max)


# ----------------------------- public wrapper ---------------------------------
def parameter_update(theta, x, mask, y, theta_label, *,
                     gamma=GAMMA, alpha=ALPHA, coil_block=None):
    """theta, y, theta_label: [B,C,H,W] complex64 ; x: [B,H,W] complex64 ; mask: [B,H,W] f32."""
    if not IS_UPDATE_THETA_ITERATIVELY:
        return theta
    # TODO(synk): is_update_theta_iteratively_bc=True branch requires the external
    # net_theta CNN (calibrate_complex / divided_by_rss); not translated.

    B, C, H, W = theta.shape
    f32 = jnp.float32

    vmem_limit = int(_tpu_vmem_capacity_bytes() * 0.82)   # ~105 MiB (128 MiB parts) / ~52 MiB (v7x)

    if coil_block is None:
        Cb = _default_coil_block(B, C, H, W, vmem_limit)
    else:
        Cb = max(1, min(int(coil_block), C))
    G = -(-C // Cb)
    Cpad = G * Cb

    # Zero-pad the coil axis when Cb does not divide C (zero coils contribute
    # zero everywhere and are sliced off at the end).
    if Cpad != C:
        pad = ((0, 0), (0, Cpad - C), (0, 0), (0, 0))
        theta_c = jnp.pad(theta, pad)
        tl_c = jnp.pad(theta_label, pad)
        y_c = jnp.pad(y, pad)
    else:
        theta_c, tl_c, y_c = theta, theta_label, y

    theta_p = _pack_ri(theta_c, Cb)                                   # [B, 2Cp, H, W] f32
    tl_p = _pack_ri(tl_c, Cb, jnp.bfloat16)                           # [B, 2Cp, H, W] bf16
    x_p = jnp.stack([jnp.real(x), jnp.imag(x)], axis=1).astype(f32)   # [B, 2, H, W]
    m = mask.astype(f32)
    m2t = jnp.swapaxes(m * m, -1, -2)                                 # [B, W, H]
    my = mask[:, None, :, :] * y_c                                    # [B, Cp, H, W] complex
    myt_p = jnp.swapaxes(_pack_ri(my, Cb), -1, -2)                    # [B, 2Cp, W, H] f32

    fh = _dft_pack_bf16x3(H)                                          # [8, H, H] bf16
    fw = _dft_pack_bf16x3(W)                                          # [8, W, W] bf16

    kernel = functools.partial(_param_update_kernel, gamma=gamma, alpha=alpha)

    big_spec = pl.BlockSpec((1, 2 * Cb, H, W), lambda b, g: (b, g, 0, 0))
    x_spec = pl.BlockSpec((1, 2, H, W), lambda b, g: (b, 0, 0, 0))
    m2_spec = pl.BlockSpec((1, W, H), lambda b, g: (b, 0, 0))
    myt_spec = pl.BlockSpec((1, 2 * Cb, W, H), lambda b, g: (b, g, 0, 0))

    # Advisory cost: 36 bf16 MXU matmuls per (b, g) step.
    flops = 36 * B * Cpad * H * W * (H + W)
    bytes_acc = (28 * B * Cpad * H * W + 12 * B * H * W
                 + 16 * (H * H + W * W))
    cost = pl.CostEstimate(flops=int(flops), transcendentals=0,
                           bytes_accessed=int(bytes_acc))

    def run(f_pipeline_mode):
        if f_pipeline_mode is not None:
            fh_spec = pl.BlockSpec((8, H, H), lambda b, g: (0, 0, 0),
                                   pipeline_mode=f_pipeline_mode)
            fw_spec = pl.BlockSpec((8, W, W), lambda b, g: (0, 0, 0),
                                   pipeline_mode=f_pipeline_mode)
        else:
            fh_spec = pl.BlockSpec((8, H, H), lambda b, g: (0, 0, 0))
            fw_spec = pl.BlockSpec((8, W, W), lambda b, g: (0, 0, 0))
        return pl.pallas_call(
            kernel,
            out_shape=jax.ShapeDtypeStruct((B, 2 * Cpad, H, W), f32),
            grid_spec=pltpu.PrefetchScalarGridSpec(
                num_scalar_prefetch=0,
                grid=(B, G),
                in_specs=[big_spec, big_spec, x_spec, m2_spec, myt_spec,
                          fh_spec, fw_spec],
                out_specs=big_spec,
            ),
            compiler_params=pltpu.CompilerParams(
                dimension_semantics=("parallel", "parallel"),
                vmem_limit_bytes=vmem_limit),
            cost_estimate=cost,
            input_output_aliases={0: 0},   # reuse packed-theta HBM buffer for the output
        )(theta_p, tl_p, x_p, m2t, myt_p, fh, fw)

    try:
        # grid-invariant DFT packs: single-buffered (no prefetch benefit).
        out_p = run(pl.Buffered(1))
    except Exception:
        # TODO(synk): this jax version rejects single-buffering of grid-invariant
        # blocks via pl.Buffered(1); fall back to default double-buffering.
        out_p = run(None)

    out_c = _unpack_ri(out_p, Cpad, Cb)
    return out_c[:, :C]


# ----------------------------- reference & test --------------------------------
def _reference(theta, x, mask, y, theta_label, gamma, alpha):
    s = theta * x[:, None]
    k = jnp.fft.fft2(s, norm="ortho")
    res = mask[:, None] * k - y
    g = jnp.fft.ifft2(mask[:, None] * res, norm="ortho")
    dc = jnp.conj(x)[:, None] * g
    prior = theta - theta_label
    return theta - gamma * (dc + alpha * prior)


if __name__ == "__main__":
    B, C, H, W = 2, 4, 16, 16
    key = jax.random.PRNGKey(0)
    ks = jax.random.split(key, 10)

    def crandn(k1, k2, shape):
        return (jax.random.normal(k1, shape, jnp.float32)
                + 1j * jax.random.normal(k2, shape, jnp.float32)).astype(jnp.complex64)

    theta = crandn(ks[0], ks[1], (B, C, H, W))
    x = crandn(ks[2], ks[3], (B, H, W))
    y = crandn(ks[4], ks[5], (B, C, H, W))
    theta_label = crandn(ks[6], ks[7], (B, C, H, W))
    mask = (jax.random.uniform(ks[8], (B, H, W)) > 0.5).astype(jnp.float32)

    ref = jax.block_until_ready(_reference(theta, x, mask, y, theta_label, GAMMA, ALPHA))

    # default: auto coil_block (all coils here -> grid = (B, 1), even step count)
    out = jax.block_until_ready(parameter_update(theta, x, mask, y, theta_label))
    np.testing.assert_allclose(np.asarray(out), np.asarray(ref), rtol=1e-2, atol=1e-2)

    # coil-blocked + coil-padding path (Cb=3 does not divide C=4 -> zero-pad to 6)
    out2 = jax.block_until_ready(
        parameter_update(theta, x, mask, y, theta_label, coil_block=3))
    np.testing.assert_allclose(np.asarray(out2), np.asarray(ref), rtol=1e-2, atol=1e-2)

    print("KERNEL_OK")
</pallas_src>

<mosaic_0001>
module attributes {stable_mosaic.version = 11 : i64} {
  func.func @_param_update_kernel(%arg0: i32, %arg1: i32, %arg2: memref<1x8x16x16xf32, #tpu.memory_space<vmem>>, %arg3: memref<1x8x16x16xbf16, #tpu.memory_space<vmem>>, %arg4: memref<1x2x16x16xf32, #tpu.memory_space<vmem>>, %arg5: memref<1x16x16xf32, #tpu.memory_space<vmem>>, %arg6: memref<1x8x16x16xf32, #tpu.memory_space<vmem>>, %arg7: memref<8x16x16xbf16, #tpu.memory_space<vmem>>, %arg8: memref<8x16x16xbf16, #tpu.memory_space<vmem>>, %arg9: memref<1x8x16x16xf32, #tpu.memory_space<vmem>>) attributes {dimension_semantics = [#tpu.dimension_semantics<parallel>, #tpu.dimension_semantics<parallel>], iteration_bounds = array<i64: 2, 1>, scalar_prefetch = 0 : i64, scratch_operands = 0 : i64, tpu.core_type = #tpu.core_type<tc>, window_params = [{transform_indices = @transform_0, window_bounds = array<i64: 1, 8, 16, 16>}, {transform_indices = @transform_1, window_bounds = array<i64: 1, 8, 16, 16>}, {transform_indices = @transform_2, window_bounds = array<i64: 1, 2, 16, 16>}, {transform_indices = @transform_3, window_bounds = array<i64: 1, 16, 16>}, {transform_indices = @transform_4, window_bounds = array<i64: 1, 8, 16, 16>}, {pipeline_mode = #tpu.pipeline_mode<synchronous>, transform_indices = @transform_5, window_bounds = array<i64: 8, 16, 16>}, {pipeline_mode = #tpu.pipeline_mode<synchronous>, transform_indices = @transform_6, window_bounds = array<i64: 8, 16, 16>}, {transform_indices = @transform_7, window_bounds = array<i64: 1, 8, 16, 16>}]} {
    %c0 = arith.constant 0 : index
    %c0_0 = arith.constant 0 : index
    %c0_1 = arith.constant 0 : index
    %c0_2 = arith.constant 0 : index
    %0 = vector.load %arg2[%c0, %c0_0, %c0_1, %c0_2] : memref<1x8x16x16xf32, #tpu.memory_space<vmem>>, vector<1x8x16x16xf32>
    %1 = vector.shape_cast %0 : vector<1x8x16x16xf32> to vector<8x16x16xf32>
    %2 = vector.extract_strided_slice %1 {offsets = [0, 0, 0], sizes = [4, 16, 16], strides = [1, 1, 1]} : vector<8x16x16xf32> to vector<4x16x16xf32>
    %3 = vector.extract_strided_slice %1 {offsets = [4, 0, 0], sizes = [4, 16, 16], strides = [1, 1, 1]} : vector<8x16x16xf32> to vector<4x16x16xf32>
    %c0_3 = arith.constant 0 : index
    %c0_4 = arith.constant 0 : index
    %c0_5 = arith.constant 0 : index
    %c0_6 = arith.constant 0 : index
    %4 = vector.load %arg4[%c0_3, %c0_4, %c0_5, %c0_6] : memref<1x2x16x16xf32, #tpu.memory_space<vmem>>, vector<1x1x16x16xf32>
    %5 = vector.shape_cast %4 : vector<1x1x16x16xf32> to vector<16x16xf32>
    %c0_7 = arith.constant 0 : index
    %c1 = arith.constant 1 : index
    %c0_8 = arith.constant 0 : index
    %c0_9 = arith.constant 0 : index
    %6 = vector.load %arg4[%c0_7, %c1, %c0_8, %c0_9] : memref<1x2x16x16xf32, #tpu.memory_space<vmem>>, vector<1x1x16x16xf32>
    %7 = vector.shape_cast %6 : vector<1x1x16x16xf32> to vector<16x16xf32>
    %8 = vector.shape_cast %5 : vector<16x16xf32> to vector<1x16x16xf32>
    %9 = vector.broadcast %8 : vector<1x16x16xf32> to vector<4x16x16xf32>
    %10 = arith.mulf %2, %9 : vector<4x16x16xf32>
    %11 = vector.shape_cast %7 : vector<16x16xf32> to vector<1x16x16xf32>
    %12 = vector.broadcast %11 : vector<1x16x16xf32> to vector<4x16x16xf32>
    %13 = arith.mulf %3, %12 : vector<4x16x16xf32>
    %14 = arith.subf %10, %13 : vector<4x16x16xf32>
    %15 = vector.shape_cast %7 : vector<16x16xf32> to vector<1x16x16xf32>
    %16 = vector.broadcast %15 : vector<1x16x16xf32> to vector<4x16x16xf32>
    %17 = arith.mulf %2, %16 : vector<4x16x16xf32>
    %18 = vector.shape_cast %5 : vector<16x16xf32> to vector<1x16x16xf32>
    %19 = vector.broadcast %18 : vector<1x16x16xf32> to vector<4x16x16xf32>
    %20 = arith.mulf %3, %19 : vector<4x16x16xf32>
    %21 = arith.addf %17, %20 : vector<4x16x16xf32>
    %22 = vector.shape_cast %14 : vector<4x16x16xf32> to vector<64x16xf32>
    %23 = vector.shape_cast %21 : vector<4x16x16xf32> to vector<64x16xf32>
    %c0_10 = arith.constant 0 : index
    %c0_11 = arith.constant 0 : index
    %c0_12 = arith.constant 0 : index
    %24 = vector.load %arg8[%c0_10, %c0_11, %c0_12] : memref<8x16x16xbf16, #tpu.memory_space<vmem>>, vector<1x16x16xbf16>
    %25 = vector.shape_cast %24 : vector<1x16x16xbf16> to vector<16x16xbf16>
    %c4 = arith.constant 4 : index
    %c0_13 = arith.constant 0 : index
    %c0_14 = arith.constant 0 : index
    %26 = vector.load %arg8[%c4, %c0_13, %c0_14] : memref<8x16x16xbf16, #tpu.memory_space<vmem>>, vector<1x16x16xbf16>
    %27 = vector.shape_cast %26 : vector<1x16x16xbf16> to vector<16x16xbf16>
    %c1_15 = arith.constant 1 : index
    %c0_16 = arith.constant 0 : index
    %c0_17 = arith.constant 0 : index
    %28 = vector.load %arg8[%c1_15, %c0_16, %c0_17] : memref<8x16x16xbf16, #tpu.memory_space<vmem>>, vector<1x16x16xbf16>
    %29 = vector.shape_cast %28 : vector<1x16x16xbf16> to vector<16x16xbf16>
    %c5 = arith.constant 5 : index
    %c0_18 = arith.constant 0 : index
    %c0_19 = arith.constant 0 : index
    %30 = vector.load %arg8[%c5, %c0_18, %c0_19] : memref<8x16x16xbf16, #tpu.memory_space<vmem>>, vector<1x16x16xbf16>
    %31 = vector.shape_cast %30 : vector<1x16x16xbf16> to vector<16x16xbf16>
    %c2 = arith.constant 2 : index
    %c0_20 = arith.constant 0 : index
    %c0_21 = arith.constant 0 : index
    %32 = vector.load %arg8[%c2, %c0_20, %c0_21] : memref<8x16x16xbf16, #tpu.memory_space<vmem>>, vector<1x16x16xbf16>
    %33 = vector.shape_cast %32 : vector<1x16x16xbf16> to vector<16x16xbf16>
    %c6 = arith.constant 6 : index
    %c0_22 = arith.constant 0 : index
    %c0_23 = arith.constant 0 : index
    %34 = vector.load %arg8[%c6, %c0_22, %c0_23] : memref<8x16x16xbf16, #tpu.memory_space<vmem>>, vector<1x16x16xbf16>
    %35 = vector.shape_cast %34 : vector<1x16x16xbf16> to vector<16x16xbf16>
    %36 = arith.truncf %22 : vector<64x16xf32> to vector<64x16xbf16>
    %37 = arith.extf %36 : vector<64x16xbf16> to vector<64x16xf32>
    %38 = arith.subf %22, %37 : vector<64x16xf32>
    %39 = arith.truncf %38 : vector<64x16xf32> to vector<64x16xbf16>
    %40 = arith.truncf %23 : vector<64x16xf32> to vector<64x16xbf16>
    %41 = arith.extf %40 : vector<64x16xbf16> to vector<64x16xf32>
    %42 = arith.subf %23, %41 : vector<64x16xf32>
    %43 = arith.truncf %42 : vector<64x16xf32> to vector<64x16xbf16>
    %44 = arith.addf %22, %23 : vector<64x16xf32>
    %45 = arith.truncf %44 : vector<64x16xf32> to vector<64x16xbf16>
    %46 = arith.extf %45 : vector<64x16xbf16> to vector<64x16xf32>
    %47 = arith.subf %44, %46 : vector<64x16xf32>
    %48 = arith.truncf %47 : vector<64x16xf32> to vector<64x16xbf16>
    %cst = arith.constant dense<0.000000e+00> : vector<64x16xf32>
    %49 = tpu.matmul %36, %25, %cst {dimension_numbers = #tpu.dot_dimension_numbers<[1], [0], [0], [1], [0, 0, 1, 1], [], []>} : vector<64x16xbf16>, vector<16x16xbf16>, vector<64x16xf32> -> vector<64x16xf32>
    %cst_24 = arith.constant dense<0.000000e+00> : vector<64x16xf32>
    %50 = tpu.matmul %36, %27, %cst_24 {dimension_numbers = #tpu.dot_dimension_numbers<[1], [0], [0], [1], [0, 0, 1, 1], [], []>} : vector<64x16xbf16>, vector<16x16xbf16>, vector<64x16xf32> -> vector<64x16xf32>
    %51 = arith.addf %49, %50 : vector<64x16xf32>
    %cst_25 = arith.constant dense<0.000000e+00> : vector<64x16xf32>
    %52 = tpu.matmul %39, %25, %cst_25 {dimension_numbers = #tpu.dot_dimension_numbers<[1], [0], [0], [1], [0, 0, 1, 1], [], []>} : vector<64x16xbf16>, vector<16x16xbf16>, vector<64x16xf32> -> vector<64x16xf32>
    %53 = arith.addf %51, %52 : vector<64x16xf32>
    %cst_26 = arith.constant dense<0.000000e+00> : vector<64x16xf32>
    %54 = tpu.matmul %40, %29, %cst_26 {dimension_numbers = #tpu.dot_dimension_numbers<[1], [0], [0], [1], [0, 0, 1, 1], [], []>} : vector<64x16xbf16>, vector<16x16xbf16>, vector<64x16xf32> -> vector<64x16xf32>
    %cst_27 = arith.constant dense<0.000000e+00> : vector<64x16xf32>
    %55 = tpu.matmul %40, %31, %cst_27 {dimension_numbers = #tpu.dot_dimension_numbers<[1], [0], [0], [1], [0, 0, 1, 1], [], []>} : vector<64x16xbf16>, vector<16x16xbf16>, vector<64x16xf32> -> vector<64x16xf32>
    %56 = arith.addf %54, %55 : vector<64x16xf32>
    %cst_28 = arith.constant dense<0.000000e+00> : vector<64x16xf32>
    %57 = tpu.matmul %43, %29, %cst_28 {dimension_numbers = #tpu.dot_dimension_numbers<[1], [0], [0], [1], [0, 0, 1, 1], [], []>} : vector<64x16xbf16>, vector<16x16xbf16>, vector<64x16xf32> -> vector<64x16xf32>
    %58 = arith.addf %56, %57 : vector<64x16xf32>
    %cst_29 = arith.constant dense<0.000000e+00> : vector<64x16xf32>
    %59 = tpu.matmul %45, %33, %cst_29 {dimension_numbers = #tpu.dot_dimension_numbers<[1], [0], [0], [1], [0, 0, 1, 1], [], []>} : vector<64x16xbf16>, vector<16x16xbf16>, vector<64x16xf32> -> vector<64x16xf32>
    %cst_30 = arith.constant dense<0.000000e+00> : vector<64x16xf32>
    %60 = tpu.matmul %45, %35, %cst_30 {dimension_numbers = #tpu.dot_dimension_numbers<[1], [0], [0], [1], [0, 0, 1, 1], [], []>} : vector<64x16xbf16>, vector<16x16xbf16>, vector<64x16xf32> -> vector<64x16xf32>
    %61 = arith.addf %59, %60 : vector<64x16xf32>
    %cst_31 = arith.constant dense<0.000000e+00> : vector<64x16xf32>
    %62 = tpu.matmul %48, %33, %cst_31 {dimension_numbers = #tpu.dot_dimension_numbers<[1], [0], [0], [1], [0, 0, 1, 1], [], []>} : vector<64x16xbf16>, vector<16x16xbf16>, vector<64x16xf32> -> vector<64x16xf32>
    %63 = arith.addf %61, %62 : vector<64x16xf32>
    %64 = arith.subf %53, %58 : vector<64x16xf32>
    %65 = arith.subf %63, %53 : vector<64x16xf32>
    %66 = arith.subf %65, %58 : vector<64x16xf32>
    %67 = vector.shape_cast %64 : vector<64x16xf32> to vector<4x16x16xf32>
    %68 = tpu.transpose %67, [0, 2, 1] : vector<4x16x16xf32> -> vector<4x16x16xf32>
    %69 = vector.shape_cast %68 : vector<4x16x16xf32> to vector<64x16xf32>
    %70 = vector.shape_cast %66 : vector<64x16xf32> to vector<4x16x16xf32>
    %71 = tpu.transpose %70, [0, 2, 1] : vector<4x16x16xf32> -> vector<4x16x16xf32>
    %72 = vector.shape_cast %71 : vector<4x16x16xf32> to vector<64x16xf32>
    %c0_32 = arith.constant 0 : index
    %c0_33 = arith.constant 0 : index
    %c0_34 = arith.constant 0 : index
    %73 = vector.load %arg7[%c0_32, %c0_33, %c0_34] : memref<8x16x16xbf16, #tpu.memory_space<vmem>>, vector<1x16x16xbf16>
    %74 = vector.shape_cast %73 : vector<1x16x16xbf16> to vector<16x16xbf16>
    %c4_35 = arith.constant 4 : index
    %c0_36 = arith.constant 0 : index
    %c0_37 = arith.constant 0 : index
    %75 = vector.load %arg7[%c4_35, %c0_36, %c0_37] : memref<8x16x16xbf16, #tpu.memory_space<vmem>>, vector<1x16x16xbf16>
    %76 = vector.shape_cast %75 : vector<1x16x16xbf16> to vector<16x16xbf16>
    %c1_38 = arith.constant 1 : index
    %c0_39 = arith.constant 0 : index
    %c0_40 = arith.constant 0 : index
    %77 = vector.load %arg7[%c1_38, %c0_39, %c0_40] : memref<8x16x16xbf16, #tpu.memory_space<vmem>>, vector<1x16x16xbf16>
    %78 = vector.shape_cast %77 : vector<1x16x16xbf16> to vector<16x16xbf16>
    %c5_41 = arith.constant 5 : index
    %c0_42 = arith.constant 0 : index
    %c0_43 = arith.constant 0 : index
    %79 = vector.load %arg7[%c5_41, %c0_42, %c0_43] : memref<8x16x16xbf16, #tpu.memory_space<vmem>>, vector<1x16x16xbf16>
    %80 = vector.shape_cast %79 : vector<1x16x16xbf16> to vector<16x16xbf16>
    %c2_44 = arith.constant 2 : index
    %c0_45 = arith.constant 0 : index
    %c0_46 = arith.constant 0 : index
    %81 = vector.load %arg7[%c2_44, %c0_45, %c0_46] : memref<8x16x16xbf16, #tpu.memory_space<vmem>>, vector<1x16x16xbf16>
    %82 = vector.shape_cast %81 : vector<1x16x16xbf16> to vector<16x16xbf16>
    %c6_47 = arith.constant 6 : index
    %c0_48 = arith.constant 0 : index
    %c0_49 = arith.constant 0 : index
    %83 = vector.load %arg7[%c6_47, %c0_48, %c0_49] : memref<8x16x16xbf16, #tpu.memory_space<vmem>>, vector<1x16x16xbf16>
    %84 = vector.shape_cast %83 : vector<1x16x16xbf16> to vector<16x16xbf16>
    %85 = arith.truncf %69 : vector<64x16xf32> to vector<64x16xbf16>
    %86 = arith.extf %85 : vector<64x16xbf16> to vector<64x16xf32>
    %87 = arith.subf %69, %86 : vector<64x16xf32>
    %88 = arith.truncf %87 : vector<64x16xf32> to vector<64x16xbf16>
    %89 = arith.truncf %72 : vector<64x16xf32> to vector<64x16xbf16>
    %90 = arith.extf %89 : vector<64x16xbf16> to vector<64x16xf32>
    %91 = arith.subf %72, %90 : vector<64x16xf32>
    %92 = arith.truncf %91 : vector<64x16xf32> to vector<64x16xbf16>
    %93 = arith.addf %69, %72 : vector<64x16xf32>
    %94 = arith.truncf %93 : vector<64x16xf32> to vector<64x16xbf16>
    %95 = arith.extf %94 : vector<64x16xbf16> to vector<64x16xf32>
    %96 = arith.subf %93, %95 : vector<64x16xf32>
    %97 = arith.truncf %96 : vector<64x16xf32> to vector<64x16xbf16>
    %cst_50 = arith.constant dense<0.000000e+00> : vector<64x16xf32>
    %98 = tpu.matmul %85, %74, %cst_50 {dimension_numbers = #tpu.dot_dimension_numbers<[1], [0], [0], [1], [0, 0, 1, 1], [], []>} : vector<64x16xbf16>, vector<16x16xbf16>, vector<64x16xf32> -> vector<64x16xf32>
    %cst_51 = arith.constant dense<0.000000e+00> : vector<64x16xf32>
    %99 = tpu.matmul %85, %76, %cst_51 {dimension_numbers = #tpu.dot_dimension_numbers<[1], [0], [0], [1], [0, 0, 1, 1], [], []>} : vector<64x16xbf16>, vector<16x16xbf16>, vector<64x16xf32> -> vector<64x16xf32>
    %100 = arith.addf %98, %99 : vector<64x16xf32>
    %cst_52 = arith.constant dense<0.000000e+00> : vector<64x16xf32>
    %101 = tpu.matmul %88, %74, %cst_52 {dimension_numbers = #tpu.dot_dimension_numbers<[1], [0], [0], [1], [0, 0, 1, 1], [], []>} : vector<64x16xbf16>, vector<16x16xbf16>, vector<64x16xf32> -> vector<64x16xf32>
    %102 = arith.addf %100, %101 : vector<64x16xf32>
    %cst_53 = arith.constant dense<0.000000e+00> : vector<64x16xf32>
    %103 = tpu.matmul %89, %78, %cst_53 {dimension_numbers = #tpu.dot_dimension_numbers<[1], [0], [0], [1], [0, 0, 1, 1], [], []>} : vector<64x16xbf16>, vector<16x16xbf16>, vector<64x16xf32> -> vector<64x16xf32>
    %cst_54 = arith.constant dense<0.000000e+00> : vector<64x16xf32>
    %104 = tpu.matmul %89, %80, %cst_54 {dimension_numbers = #tpu.dot_dimension_numbers<[1], [0], [0], [1], [0, 0, 1, 1], [], []>} : vector<64x16xbf16>, vector<16x16xbf16>, vector<64x16xf32> -> vector<64x16xf32>
    %105 = arith.addf %103, %104 : vector<64x16xf32>
    %cst_55 = arith.constant dense<0.000000e+00> : vector<64x16xf32>
    %106 = tpu.matmul %92, %78, %cst_55 {dimension_numbers = #tpu.dot_dimension_numbers<[1], [0], [0], [1], [0, 0, 1, 1], [], []>} : vector<64x16xbf16>, vector<16x16xbf16>, vector<64x16xf32> -> vector<64x16xf32>
    %107 = arith.addf %105, %106 : vector<64x16xf32>
    %cst_56 = arith.constant dense<0.000000e+00> : vector<64x16xf32>
    %108 = tpu.matmul %94, %82, %cst_56 {dimension_numbers = #tpu.dot_dimension_numbers<[1], [0], [0], [1], [0, 0, 1, 1], [], []>} : vector<64x16xbf16>, vector<16x16xbf16>, vector<64x16xf32> -> vector<64x16xf32>
    %cst_57 = arith.constant dense<0.000000e+00> : vector<64x16xf32>
    %109 = tpu.matmul %94, %84, %cst_57 {dimension_numbers = #tpu.dot_dimension_numbers<[1], [0], [0], [1], [0, 0, 1, 1], [], []>} : vector<64x16xbf16>, vector<16x16xbf16>, vector<64x16xf32> -> vector<64x16xf32>
    %110 = arith.addf %108, %109 : vector<64x16xf32>
    %cst_58 = arith.constant dense<0.000000e+00> : vector<64x16xf32>
    %111 = tpu.matmul %97, %82, %cst_58 {dimension_numbers = #tpu.dot_dimension_numbers<[1], [0], [0], [1], [0, 0, 1, 1], [], []>} : vector<64x16xbf16>, vector<16x16xbf16>, vector<64x16xf32> -> vector<64x16xf32>
    %112 = arith.addf %110, %111 : vector<64x16xf32>
    %113 = arith.subf %102, %107 : vector<64x16xf32>
    %114 = arith.subf %112, %102 : vector<64x16xf32>
    %115 = arith.subf %114, %107 : vector<64x16xf32>
    %c0_59 = arith.constant 0 : index
    %c0_60 = arith.constant 0 : index
    %c0_61 = arith.constant 0 : index
    %116 = vector.load %arg5[%c0_59, %c0_60, %c0_61] : memref<1x16x16xf32, #tpu.memory_space<vmem>>, vector<1x16x16xf32>
    %117 = vector.shape_cast %116 : vector<1x16x16xf32> to vector<16x16xf32>
    %c0_62 = arith.constant 0 : index
    %c0_63 = arith.constant 0 : index
    %c0_64 = arith.constant 0 : index
    %c0_65 = arith.constant 0 : index
    %118 = vector.load %arg6[%c0_62, %c0_63, %c0_64, %c0_65] : memref<1x8x16x16xf32, #tpu.memory_space<vmem>>, vector<1x8x16x16xf32>
    %119 = vector.shape_cast %118 : vector<1x8x16x16xf32> to vector<8x16x16xf32>
    %120 = vector.shape_cast %113 : vector<64x16xf32> to vector<4x16x16xf32>
    %121 = vector.shape_cast %117 : vector<16x16xf32> to vector<1x16x16xf32>
    %122 = vector.broadcast %121 : vector<1x16x16xf32> to vector<4x16x16xf32>
    %123 = arith.mulf %122, %120 : vector<4x16x16xf32>
    %124 = vector.extract_strided_slice %119 {offsets = [0, 0, 0], sizes = [4, 16, 16], strides = [1, 1, 1]} : vector<8x16x16xf32> to vector<4x16x16xf32>
    %125 = arith.subf %123, %124 : vector<4x16x16xf32>
    %126 = vector.shape_cast %115 : vector<64x16xf32> to vector<4x16x16xf32>
    %127 = vector.shape_cast %117 : vector<16x16xf32> to vector<1x16x16xf32>
    %128 = vector.broadcast %127 : vector<1x16x16xf32> to vector<4x16x16xf32>
    %129 = arith.mulf %128, %126 : vector<4x16x16xf32>
    %130 = vector.extract_strided_slice %119 {offsets = [4, 0, 0], sizes = [4, 16, 16], strides = [1, 1, 1]} : vector<8x16x16xf32> to vector<4x16x16xf32>
    %131 = arith.subf %129, %130 : vector<4x16x16xf32>
    %132 = vector.shape_cast %125 : vector<4x16x16xf32> to vector<64x16xf32>
    %133 = vector.shape_cast %131 : vector<4x16x16xf32> to vector<64x16xf32>
    %c0_66 = arith.constant 0 : index
    %c0_67 = arith.constant 0 : index
    %c0_68 = arith.constant 0 : index
    %134 = vector.load %arg7[%c0_66, %c0_67, %c0_68] : memref<8x16x16xbf16, #tpu.memory_space<vmem>>, vector<1x16x16xbf16>
    %135 = vector.shape_cast %134 : vector<1x16x16xbf16> to vector<16x16xbf16>
    %c4_69 = arith.constant 4 : index
    %c0_70 = arith.constant 0 : index
    %c0_71 = arith.constant 0 : index
    %136 = vector.load %arg7[%c4_69, %c0_70, %c0_71] : memref<8x16x16xbf16, #tpu.memory_space<vmem>>, vector<1x16x16xbf16>
    %137 = vector.shape_cast %136 : vector<1x16x16xbf16> to vector<16x16xbf16>
    %c1_72 = arith.constant 1 : index
    %c0_73 = arith.constant 0 : index
    %c0_74 = arith.constant 0 : index
    %138 = vector.load %arg7[%c1_72, %c0_73, %c0_74] : memref<8x16x16xbf16, #tpu.memory_space<vmem>>, vector<1x16x16xbf16>
    %139 = vector.shape_cast %138 : vector<1x16x16xbf16> to vector<16x16xbf16>
    %c5_75 = arith.constant 5 : index
    %c0_76 = arith.constant 0 : index
    %c0_77 = arith.constant 0 : index
    %140 = vector.load %arg7[%c5_75, %c0_76, %c0_77] : memref<8x16x16xbf16, #tpu.memory_space<vmem>>, vector<1x16x16xbf16>
    %141 = vector.shape_cast %140 : vector<1x16x16xbf16> to vector<16x16xbf16>
    %c3 = arith.constant 3 : index
    %c0_78 = arith.constant 0 : index
    %c0_79 = arith.constant 0 : index
    %142 = vector.load %arg7[%c3, %c0_78, %c0_79] : memref<8x16x16xbf16, #tpu.memory_space<vmem>>, vector<1x16x16xbf16>
    %143 = vector.shape_cast %142 : vector<1x16x16xbf16> to vector<16x16xbf16>
    %c7 = arith.constant 7 : index
    %c0_80 = arith.constant 0 : index
    %c0_81 = arith.constant 0 : index
    %144 = vector.load %arg7[%c7, %c0_80, %c0_81] : memref<8x16x16xbf16, #tpu.memory_space<vmem>>, vector<1x16x16xbf16>
    %145 = vector.shape_cast %144 : vector<1x16x16xbf16> to vector<16x16xbf16>
    %146 = arith.truncf %132 : vector<64x16xf32> to vector<64x16xbf16>
    %147 = arith.extf %146 : vector<64x16xbf16> to vector<64x16xf32>
    %148 = arith.subf %132, %147 : vector<64x16xf32>
    %149 = arith.truncf %148 : vector<64x16xf32> to vector<64x16xbf16>
    %150 = arith.truncf %133 : vector<64x16xf32> to vector<64x16xbf16>
    %151 = arith.extf %150 : vector<64x16xbf16> to vector<64x16xf32>
    %152 = arith.subf %133, %151 : vector<64x16xf32>
    %153 = arith.truncf %152 : vector<64x16xf32> to vector<64x16xbf16>
    %154 = arith.addf %132, %133 : vector<64x16xf32>
    %155 = arith.truncf %154 : vector<64x16xf32> to vector<64x16xbf16>
    %156 = arith.extf %155 : vector<64x16xbf16> to vector<64x16xf32>
    %157 = arith.subf %154, %156 : vector<64x16xf32>
    %158 = arith.truncf %157 : vector<64x16xf32> to vector<64x16xbf16>
    %cst_82 = arith.constant dense<0.000000e+00> : vector<64x16xf32>
    %159 = tpu.matmul %146, %135, %cst_82 {dimension_numbers = #tpu.dot_dimension_numbers<[1], [0], [0], [1], [0, 0, 1, 1], [], []>} : vector<64x16xbf16>, vector<16x16xbf16>, vector<64x16xf32> -> vector<64x16xf32>
    %cst_83 = arith.constant dense<0.000000e+00> : vector<64x16xf32>
    %160 = tpu.matmul %146, %137, %cst_83 {dimension_numbers = #tpu.dot_dimension_numbers<[1], [0], [0], [1], [0, 0, 1, 1], [], []>} : vector<64x16xbf16>, vector<16x16xbf16>, vector<64x16xf32> -> vector<64x16xf32>
    %161 = arith.addf %159, %160 : vector<64x16xf32>
    %cst_84 = arith.constant dense<0.000000e+00> : vector<64x16xf32>
    %162 = tpu.matmul %149, %135, %cst_84 {dimension_numbers = #tpu.dot_dimension_numbers<[1], [0], [0], [1], [0, 0, 1, 1], [], []>} : vector<64x16xbf16>, vector<16x16xbf16>, vector<64x16xf32> -> vector<64x16xf32>
    %163 = arith.addf %161, %162 : vector<64x16xf32>
    %cst_85 = arith.constant dense<0.000000e+00> : vector<64x16xf32>
    %164 = tpu.matmul %150, %139, %cst_85 {dimension_numbers = #tpu.dot_dimension_numbers<[1], [0], [0], [1], [0, 0, 1, 1], [], []>} : vector<64x16xbf16>, vector<16x16xbf16>, vector<64x16xf32> -> vector<64x16xf32>
    %cst_86 = arith.constant dense<0.000000e+00> : vector<64x16xf32>
    %165 = tpu.matmul %150, %141, %cst_86 {dimension_numbers = #tpu.dot_dimension_numbers<[1], [0], [0], [1], [0, 0, 1, 1], [], []>} : vector<64x16xbf16>, vector<16x16xbf16>, vector<64x16xf32> -> vector<64x16xf32>
    %166 = arith.addf %164, %165 : vector<64x16xf32>
    %cst_87 = arith.constant dense<0.000000e+00> : vector<64x16xf32>
    %167 = tpu.matmul %153, %139, %cst_87 {dimension_numbers = #tpu.dot_dimension_numbers<[1], [0], [0], [1], [0, 0, 1, 1], [], []>} : vector<64x16xbf16>, vector<16x16xbf16>, vector<64x16xf32> -> vector<64x16xf32>
    %168 = arith.addf %166, %167 : vector<64x16xf32>
    %cst_88 = arith.constant dense<0.000000e+00> : vector<64x16xf32>
    %169 = tpu.matmul %155, %143, %cst_88 {dimension_numbers = #tpu.dot_dimension_numbers<[1], [0], [0], [1], [0, 0, 1, 1], [], []>} : vector<64x16xbf16>, vector<16x16xbf16>, vector<64x16xf32> -> vector<64x16xf32>
    %cst_89 = arith.constant dense<0.000000e+00> : vector<64x16xf32>
    %170 = tpu.matmul %155, %145, %cst_89 {dimension_numbers = #tpu.dot_dimension_numbers<[1], [0], [0], [1], [0, 0, 1, 1], [], []>} : vector<64x16xbf16>, vector<16x16xbf16>, vector<64x16xf32> -> vector<64x16xf32>
    %171 = arith.addf %169, %170 : vector<64x16xf32>
    %cst_90 = arith.constant dense<0.000000e+00> : vector<64x16xf32>
    %172 = tpu.matmul %158, %143, %cst_90 {dimension_numbers = #tpu.dot_dimension_numbers<[1], [0], [0], [1], [0, 0, 1, 1], [], []>} : vector<64x16xbf16>, vector<16x16xbf16>, vector<64x16xf32> -> vector<64x16xf32>
    %173 = arith.addf %171, %172 : vector<64x16xf32>
    %174 = arith.addf %163, %168 : vector<64x16xf32>
    %175 = arith.subf %173, %163 : vector<64x16xf32>
    %176 = arith.addf %175, %168 : vector<64x16xf32>
    %177 = vector.shape_cast %174 : vector<64x16xf32> to vector<4x16x16xf32>
    %178 = tpu.transpose %177, [0, 2, 1] : vector<4x16x16xf32> -> vector<4x16x16xf32>
    %179 = vector.shape_cast %178 : vector<4x16x16xf32> to vector<64x16xf32>
    %180 = vector.shape_cast %176 : vector<64x16xf32> to vector<4x16x16xf32>
    %181 = tpu.transpose %180, [0, 2, 1] : vector<4x16x16xf32> -> vector<4x16x16xf32>
    %182 = vector.shape_cast %181 : vector<4x16x16xf32> to vector<64x16xf32>
    %c0_91 = arith.constant 0 : index
    %c0_92 = arith.constant 0 : index
    %c0_93 = arith.constant 0 : index
    %183 = vector.load %arg8[%c0_91, %c0_92, %c0_93] : memref<8x16x16xbf16, #tpu.memory_space<vmem>>, vector<1x16x16xbf16>
    %184 = vector.shape_cast %183 : vector<1x16x16xbf16> to vector<16x16xbf16>
    %c4_94 = arith.constant 4 : index
    %c0_95 = arith.constant 0 : index
    %c0_96 = arith.constant 0 : index
    %185 = vector.load %arg8[%c4_94, %c0_95, %c0_96] : memref<8x16x16xbf16, #tpu.memory_space<vmem>>, vector<1x16x16xbf16>
    %186 = vector.shape_cast %185 : vector<1x16x16xbf16> to vector<16x16xbf16>
    %c1_97 = arith.constant 1 : index
    %c0_98 = arith.constant 0 : index
    %c0_99 = arith.constant 0 : index
    %187 = vector.load %arg8[%c1_97, %c0_98, %c0_99] : memref<8x16x16xbf16, #tpu.memory_space<vmem>>, vector<1x16x16xbf16>
    %188 = vector.shape_cast %187 : vector<1x16x16xbf16> to vector<16x16xbf16>
    %c5_100 = arith.constant 5 : index
    %c0_101 = arith.constant 0 : index
    %c0_102 = arith.constant 0 : index
    %189 = vector.load %arg8[%c5_100, %c0_101, %c0_102] : memref<8x16x16xbf16, #tpu.memory_space<vmem>>, vector<1x16x16xbf16>
    %190 = vector.shape_cast %189 : vector<1x16x16xbf16> to vector<16x16xbf16>
    %c3_103 = arith.constant 3 : index
    %c0_104 = arith.constant 0 : index
    %c0_105 = arith.constant 0 : index
    %191 = vector.load %arg8[%c3_103, %c0_104, %c0_105] : memref<8x16x16xbf16, #tpu.memory_space<vmem>>, vector<1x16x16xbf16>
    %192 = vector.shape_cast %191 : vector<1x16x16xbf16> to vector<16x16xbf16>
    %c7_106 = arith.constant 7 : index
    %c0_107 = arith.constant 0 : index
    %c0_108 = arith.constant 0 : index
    %193 = vector.load %arg8[%c7_106, %c0_107, %c0_108] : memref<8x16x16xbf16, #tpu.memory_space<vmem>>, vector<1x16x16xbf16>
    %194 = vector.shape_cast %193 : vector<1x16x16xbf16> to vector<16x16xbf16>
    %195 = arith.truncf %179 : vector<64x16xf32> to vector<64x16xbf16>
    %196 = arith.extf %195 : vector<64x16xbf16> to vector<64x16xf32>
    %197 = arith.subf %179, %196 : vector<64x16xf32>
    %198 = arith.truncf %197 : vector<64x16xf32> to vector<64x16xbf16>
    %199 = arith.truncf %182 : vector<64x16xf32> to vector<64x16xbf16>
    %200 = arith.extf %199 : vector<64x16xbf16> to vector<64x16xf32>
    %201 = arith.subf %182, %200 : vector<64x16xf32>
    %202 = arith.truncf %201 : vector<64x16xf32> to vector<64x16xbf16>
    %203 = arith.addf %179, %182 : vector<64x16xf32>
    %204 = arith.truncf %203 : vector<64x16xf32> to vector<64x16xbf16>
    %205 = arith.extf %204 : vector<64x16xbf16> to vector<64x16xf32>
    %206 = arith.subf %203, %205 : vector<64x16xf32>
    %207 = arith.truncf %206 : vector<64x16xf32> to vector<64x16xbf16>
    %cst_109 = arith.constant dense<0.000000e+00> : vector<64x16xf32>
    %208 = tpu.matmul %195, %184, %cst_109 {dimension_numbers = #tpu.dot_dimension_numbers<[1], [0], [0], [1], [0, 0, 1, 1], [], []>} : vector<64x16xbf16>, vector<16x16xbf16>, vector<64x16xf32> -> vector<64x16xf32>
    %cst_110 = arith.constant dense<0.000000e+00> : vector<64x16xf32>
    %209 = tpu.matmul %195, %186, %cst_110 {dimension_numbers = #tpu.dot_dimension_numbers<[1], [0], [0], [1], [0, 0, 1, 1], [], []>} : vector<64x16xbf16>, vector<16x16xbf16>, vector<64x16xf32> -> vector<64x16xf32>
    %210 = arith.addf %208, %209 : vector<64x16xf32>
    %cst_111 = arith.constant dense<0.000000e+00> : vector<64x16xf32>
    %211 = tpu.matmul %198, %184, %cst_111 {dimension_numbers = #tpu.dot_dimension_numbers<[1], [0], [0], [1], [0, 0, 1, 1], [], []>} : vector<64x16xbf16>, vector<16x16xbf16>, vector<64x16xf32> -> vector<64x16xf32>
    %212 = arith.addf %210, %211 : vector<64x16xf32>
    %cst_112 = arith.constant dense<0.000000e+00> : vector<64x16xf32>
    %213 = tpu.matmul %199, %188, %cst_112 {dimension_numbers = #tpu.dot_dimension_numbers<[1], [0], [0], [1], [0, 0, 1, 1], [], []>} : vector<64x16xbf16>, vector<16x16xbf16>, vector<64x16xf32> -> vector<64x16xf32>
    %cst_113 = arith.constant dense<0.000000e+00> : vector<64x16xf32>
    %214 = tpu.matmul %199, %190, %cst_113 {dimension_numbers = #tpu.dot_dimension_numbers<[1], [0], [0], [1], [0, 0, 1, 1], [], []>} : vector<64x16xbf16>, vector<16x16xbf16>, vector<64x16xf32> -> vector<64x16xf32>
    %215 = arith.addf %213, %214 : vector<64x16xf32>
    %cst_114 = arith.constant dense<0.000000e+00> : vector<64x16xf32>
    %216 = tpu.matmul %202, %188, %cst_114 {dimension_numbers = #tpu.dot_dimension_numbers<[1], [0], [0], [1], [0, 0, 1, 1], [], []>} : vector<64x16xbf16>, vector<16x16xbf16>, vector<64x16xf32> -> vector<64x16xf32>
    %217 = arith.addf %215, %216 : vector<64x16xf32>
    %cst_115 = arith.constant dense<0.000000e+00> : vector<64x16xf32>
    %218 = tpu.matmul %204, %192, %cst_115 {dimension_numbers = #tpu.dot_dimension_numbers<[1], [0], [0], [1], [0, 0, 1, 1], [], []>} : vector<64x16xbf16>, vector<16x16xbf16>, vector<64x16xf32> -> vector<64x16xf32>
    %cst_116 = arith.constant dense<0.000000e+00> : vector<64x16xf32>
    %219 = tpu.matmul %204, %194, %cst_116 {dimension_numbers = #tpu.dot_dimension_numbers<[1], [0], [0], [1], [0, 0, 1, 1], [], []>} : vector<64x16xbf16>, vector<16x16xbf16>, vector<64x16xf32> -> vector<64x16xf32>
    %220 = arith.addf %218, %219 : vector<64x16xf32>
    %cst_117 = arith.constant dense<0.000000e+00> : vector<64x16xf32>
    %221 = tpu.matmul %207, %192, %cst_117 {dimension_numbers = #tpu.dot_dimension_numbers<[1], [0], [0], [1], [0, 0, 1, 1], [], []>} : vector<64x16xbf16>, vector<16x16xbf16>, vector<64x16xf32> -> vector<64x16xf32>
    %222 = arith.addf %220, %221 : vector<64x16xf32>
    %223 = arith.addf %212, %217 : vector<64x16xf32>
    %224 = arith.subf %222, %212 : vector<64x16xf32>
    %225 = arith.addf %224, %217 : vector<64x16xf32>
    %226 = vector.shape_cast %223 : vector<64x16xf32> to vector<4x16x16xf32>
    %227 = vector.shape_cast %225 : vector<64x16xf32> to vector<4x16x16xf32>
    %228 = vector.shape_cast %5 : vector<16x16xf32> to vector<1x16x16xf32>
    %229 = vector.broadcast %228 : vector<1x16x16xf32> to vector<4x16x16xf32>
    %230 = arith.mulf %229, %226 : vector<4x16x16xf32>
    %231 = vector.shape_cast %7 : vector<16x16xf32> to vector<1x16x16xf32>
    %232 = vector.broadcast %231 : vector<1x16x16xf32> to vector<4x16x16xf32>
    %233 = arith.mulf %232, %227 : vector<4x16x16xf32>
    %234 = arith.addf %230, %233 : vector<4x16x16xf32>
    %235 = vector.shape_cast %5 : vector<16x16xf32> to vector<1x16x16xf32>
    %236 = vector.broadcast %235 : vector<1x16x16xf32> to vector<4x16x16xf32>
    %237 = arith.mulf %236, %227 : vector<4x16x16xf32>
    %238 = vector.shape_cast %7 : vector<16x16xf32> to vector<1x16x16xf32>
    %239 = vector.broadcast %238 : vector<1x16x16xf32> to vector<4x16x16xf32>
    %240 = arith.mulf %239, %226 : vector<4x16x16xf32>
    %241 = arith.subf %237, %240 : vector<4x16x16xf32>
    %c0_118 = arith.constant 0 : index
    %c0_119 = arith.constant 0 : index
    %c0_120 = arith.constant 0 : index
    %c0_121 = arith.constant 0 : index
    %242 = vector.load %arg3[%c0_118, %c0_119, %c0_120, %c0_121] : memref<1x8x16x16xbf16, #tpu.memory_space<vmem>>, vector<1x8x16x16xbf16>
    %243 = vector.shape_cast %242 : vector<1x8x16x16xbf16> to vector<8x16x16xbf16>
    %244 = vector.extract_strided_slice %243 {offsets = [0, 0, 0], sizes = [4, 16, 16], strides = [1, 1, 1]} : vector<8x16x16xbf16> to vector<4x16x16xbf16>
    %245 = arith.extf %244 : vector<4x16x16xbf16> to vector<4x16x16xf32>
    %246 = arith.subf %2, %245 : vector<4x16x16xf32>
    %cst_122 = arith.constant 1.000000e-01 : f32
    %247 = vector.broadcast %cst_122 : f32 to vector<4x16x16xf32>
    %248 = arith.mulf %247, %246 : vector<4x16x16xf32>
    %249 = arith.addf %234, %248 : vector<4x16x16xf32>
    %cst_123 = arith.constant 5.000000e-01 : f32
    %250 = vector.broadcast %cst_123 : f32 to vector<4x16x16xf32>
    %251 = arith.mulf %250, %249 : vector<4x16x16xf32>
    %252 = arith.subf %2, %251 : vector<4x16x16xf32>
    %c0_124 = arith.constant 0 : index
    %c0_125 = arith.constant 0 : index
    %c0_126 = arith.constant 0 : index
    %c0_127 = arith.constant 0 : index
    %253 = vector.load %arg9[%c0_124, %c0_125, %c0_126, %c0_127] : memref<1x8x16x16xf32, #tpu.memory_space<vmem>>, vector<1x4x16x16xf32>
    %254 = vector.shape_cast %253 : vector<1x4x16x16xf32> to vector<4x16x16xf32>
    %255 = vector.shape_cast %252 : vector<4x16x16xf32> to vector<1x4x16x16xf32>
    tpu.vector_store %arg9[%c0_124, %c0_125, %c0_126, %c0_127], %255 {strides = array<i32>} : memref<1x8x16x16xf32, #tpu.memory_space<vmem>>, vector<1x4x16x16xf32>,
    %256 = vector.extract_strided_slice %243 {offsets = [4, 0, 0], sizes = [4, 16, 16], strides = [1, 1, 1]} : vector<8x16x16xbf16> to vector<4x16x16xbf16>
    %257 = arith.extf %256 : vector<4x16x16xbf16> to vector<4x16x16xf32>
    %258 = arith.subf %3, %257 : vector<4x16x16xf32>
    %cst_128 = arith.constant 1.000000e-01 : f32
    %259 = vector.broadcast %cst_128 : f32 to vector<4x16x16xf32>
    %260 = arith.mulf %259, %258 : vector<4x16x16xf32>
    %261 = arith.addf %241, %260 : vector<4x16x16xf32>
    %cst_129 = arith.constant 5.000000e-01 : f32
    %262 = vector.broadcast %cst_129 : f32 to vector<4x16x16xf32>
    %263 = arith.mulf %262, %261 : vector<4x16x16xf32>
    %264 = arith.subf %3, %263 : vector<4x16x16xf32>
    %c0_130 = arith.constant 0 : index
    %c4_131 = arith.constant 4 : index
    %c0_132 = arith.constant 0 : index
    %c0_133 = arith.constant 0 : index
    %265 = vector.load %arg9[%c0_130, %c4_131, %c0_132, %c0_133] : memref<1x8x16x16xf32, #tpu.memory_space<vmem>>, vector<1x4x16x16xf32>
    %266 = vector.shape_cast %265 : vector<1x4x16x16xf32> to vector<4x16x16xf32>
    %267 = vector.shape_cast %264 : vector<4x16x16xf32> to vector<1x4x16x16xf32>
    tpu.vector_store %arg9[%c0_130, %c4_131, %c0_132, %c0_133], %267 {strides = array<i32>} : memref<1x8x16x16xf32, #tpu.memory_space<vmem>>, vector<1x4x16x16xf32>,
    return
  }
  func.func @transform_0(%arg0: i32, %arg1: i32) -> (i32, i32, i32, i32) {
    %c0_i32 = arith.constant 0 : i32
    %c0_i32_0 = arith.constant 0 : i32
    %c0_i32_1 = arith.constant 0 : i32
    return %arg0, %arg1, %c0_i32, %c0_i32_0 : i32, i32, i32, i32
  }
  func.func @transform_1(%arg0: i32, %arg1: i32) -> (i32, i32, i32, i32) {
    %c0_i32 = arith.constant 0 : i32
    %c0_i32_0 = arith.constant 0 : i32
    %c0_i32_1 = arith.constant 0 : i32
    return %arg0, %arg1, %c0_i32, %c0_i32_0 : i32, i32, i32, i32
  }
  func.func @transform_2(%arg0: i32, %arg1: i32) -> (i32, i32, i32, i32) {
    %c0_i32 = arith.constant 0 : i32
    %c0_i32_0 = arith.constant 0 : i32
    %c0_i32_1 = arith.constant 0 : i32
    %c0_i32_2 = arith.constant 0 : i32
    return %arg0, %c0_i32, %c0_i32_0, %c0_i32_1 : i32, i32, i32, i32
  }
  func.func @transform_3(%arg0: i32, %arg1: i32) -> (i32, i32, i32) {
    %c0_i32 = arith.constant 0 : i32
    %c0_i32_0 = arith.constant 0 : i32
    %c0_i32_1 = arith.constant 0 : i32
    return %arg0, %c0_i32, %c0_i32_0 : i32, i32, i32
  }
  func.func @transform_4(%arg0: i32, %arg1: i32) -> (i32, i32, i32, i32) {
    %c0_i32 = arith.constant 0 : i32
    %c0_i32_0 = arith.constant 0 : i32
    %c0_i32_1 = arith.constant 0 : i32
    return %arg0, %arg1, %c0_i32, %c0_i32_0 : i32, i32, i32, i32
  }
  func.func @transform_5(%arg0: i32, %arg1: i32) -> (i32, i32, i32) {
    %c0_i32 = arith.constant 0 : i32
    %c0_i32_0 = arith.constant 0 : i32
    %c0_i32_1 = arith.constant 0 : i32
    %c0_i32_2 = arith.constant 0 : i32
    return %c0_i32, %c0_i32_0, %c0_i32_1 : i32, i32, i32
  }
  func.func @transform_6(%arg0: i32, %arg1: i32) -> (i32, i32, i32) {
    %c0_i32 = arith.constant 0 : i32
    %c0_i32_0 = arith.constant 0 : i32
    %c0_i32_1 = arith.constant 0 : i32
    %c0_i32_2 = arith.constant 0 : i32
    return %c0_i32, %c0_i32_0, %c0_i32_1 : i32, i32, i32
  }
  func.func @transform_7(%arg0: i32, %arg1: i32) -> (i32, i32, i32, i32) {
    %c0_i32 = arith.constant 0 : i32
    %c0_i32_0 = arith.constant 0 : i32
    %c0_i32_1 = arith.constant 0 : i32
    return %arg0, %arg1, %c0_i32, %c0_i32_0 : i32, i32, i32, i32
  }
}

module attributes {stable_mosaic.version = 11 : i64} {
  func.func @_param_update_kernel(%arg0: i32, %arg1: i32, %arg2: memref<1x8x16x16xf32, #tpu.memory_space<vmem>>, %arg3: memref<1x8x16x16xbf16, #tpu.memory_space<vmem>>, %arg4: memref<1x2x16x16xf32, #tpu.memory_space<vmem>>, %arg5: memref<1x16x16xf32, #tpu.memory_space<vmem>>, %arg6: memref<1x8x16x16xf32, #tpu.memory_space<vmem>>, %arg7: memref<8x16x16xbf16, #tpu.memory_space<vmem>>, %arg8: memref<8x16x16xbf16, #tpu.memory_space<vmem>>, %arg9: memref<1x8x16x16xf32, #tpu.memory_space<vmem>>) attributes {dimension_semantics = [#tpu.dimension_semantics<parallel>, #tpu.dimension_semantics<parallel>], iteration_bounds = array<i64: 2, 1>, scalar_prefetch = 0 : i64, scratch_operands = 0 : i64, tpu.core_type = #tpu.core_type<tc>, window_params = [{transform_indices = @transform_0, window_bounds = array<i64: 1, 8, 16, 16>}, {transform_indices = @transform_1, window_bounds = array<i64: 1, 8, 16, 16>}, {transform_indices = @transform_2, window_bounds = array<i64: 1, 2, 16, 16>}, {transform_indices = @transform_3, window_bounds = array<i64: 1, 16, 16>}, {transform_indices = @transform_4, window_bounds = array<i64: 1, 8, 16, 16>}, {pipeline_mode = #tpu.pipeline_mode<synchronous>, transform_indices = @transform_5, window_bounds = array<i64: 8, 16, 16>}, {pipeline_mode = #tpu.pipeline_mode<synchronous>, transform_indices = @transform_6, window_bounds = array<i64: 8, 16, 16>}, {transform_indices = @transform_7, window_bounds = array<i64: 1, 8, 16, 16>}]} {
    %c0 = arith.constant 0 : index
    %c0_0 = arith.constant 0 : index
    %c0_1 = arith.constant 0 : index
    %c0_2 = arith.constant 0 : index
    %0 = vector.load %arg2[%c0, %c0_0, %c0_1, %c0_2] : memref<1x8x16x16xf32, #tpu.memory_space<vmem>>, vector<1x8x16x16xf32>
    %1 = vector.shape_cast %0 : vector<1x8x16x16xf32> to vector<8x16x16xf32>
    %2 = vector.extract_strided_slice %1 {offsets = [0, 0, 0], sizes = [4, 16, 16], strides = [1, 1, 1]} : vector<8x16x16xf32> to vector<4x16x16xf32>
    %3 = vector.extract_strided_slice %1 {offsets = [4, 0, 0], sizes = [4, 16, 16], strides = [1, 1, 1]} : vector<8x16x16xf32> to vector<4x16x16xf32>
    %c0_3 = arith.constant 0 : index
    %c0_4 = arith.constant 0 : index
    %c0_5 = arith.constant 0 : index
    %c0_6 = arith.constant 0 : index
    %4 = vector.load %arg4[%c0_3, %c0_4, %c0_5, %c0_6] : memref<1x2x16x16xf32, #tpu.memory_space<vmem>>, vector<1x1x16x16xf32>
    %5 = vector.shape_cast %4 : vector<1x1x16x16xf32> to vector<16x16xf32>
    %c0_7 = arith.constant 0 : index
    %c1 = arith.constant 1 : index
    %c0_8 = arith.constant 0 : index
    %c0_9 = arith.constant 0 : index
    %6 = vector.load %arg4[%c0_7, %c1, %c0_8, %c0_9] : memref<1x2x16x16xf32, #tpu.memory_space<vmem>>, vector<1x1x16x16xf32>
    %7 = vector.shape_cast %6 : vector<1x1x16x16xf32> to vector<16x16xf32>
    %8 = vector.shape_cast %5 : vector<16x16xf32> to vector<1x16x16xf32>
    %9 = vector.broadcast %8 : vector<1x16x16xf32> to vector<4x16x16xf32>
    %10 = arith.mulf %2, %9 : vector<4x16x16xf32>
    %11 = vector.shape_cast %7 : vector<16x16xf32> to vector<1x16x16xf32>
    %12 = vector.broadcast %11 : vector<1x16x16xf32> to vector<4x16x16xf32>
    %13 = arith.mulf %3, %12 : vector<4x16x16xf32>
    %14 = arith.subf %10, %13 : vector<4x16x16xf32>
    %15 = vector.shape_cast %7 : vector<16x16xf32> to vector<1x16x16xf32>
    %16 = vector.broadcast %15 : vector<1x16x16xf32> to vector<4x16x16xf32>
    %17 = arith.mulf %2, %16 : vector<4x16x16xf32>
    %18 = vector.shape_cast %5 : vector<16x16xf32> to vector<1x16x16xf32>
    %19 = vector.broadcast %18 : vector<1x16x16xf32> to vector<4x16x16xf32>
    %20 = arith.mulf %3, %19 : vector<4x16x16xf32>
    %21 = arith.addf %17, %20 : vector<4x16x16xf32>
    %22 = vector.shape_cast %14 : vector<4x16x16xf32> to vector<64x16xf32>
    %23 = vector.shape_cast %21 : vector<4x16x16xf32> to vector<64x16xf32>
    %c0_10 = arith.constant 0 : index
    %c0_11 = arith.constant 0 : index
    %c0_12 = arith.constant 0 : index
    %24 = vector.load %arg8[%c0_10, %c0_11, %c0_12] : memref<8x16x16xbf16, #tpu.memory_space<vmem>>, vector<1x16x16xbf16>
    %25 = vector.shape_cast %24 : vector<1x16x16xbf16> to vector<16x16xbf16>
    %c4 = arith.constant 4 : index
    %c0_13 = arith.constant 0 : index
    %c0_14 = arith.constant 0 : index
    %26 = vector.load %arg8[%c4, %c0_13, %c0_14] : memref<8x16x16xbf16, #tpu.memory_space<vmem>>, vector<1x16x16xbf16>
    %27 = vector.shape_cast %26 : vector<1x16x16xbf16> to vector<16x16xbf16>
    %c1_15 = arith.constant 1 : index
    %c0_16 = arith.constant 0 : index
    %c0_17 = arith.constant 0 : index
    %28 = vector.load %arg8[%c1_15, %c0_16, %c0_17] : memref<8x16x16xbf16, #tpu.memory_space<vmem>>, vector<1x16x16xbf16>
    %29 = vector.shape_cast %28 : vector<1x16x16xbf16> to vector<16x16xbf16>
    %c5 = arith.constant 5 : index
    %c0_18 = arith.constant 0 : index
    %c0_19 = arith.constant 0 : index
    %30 = vector.load %arg8[%c5, %c0_18, %c0_19] : memref<8x16x16xbf16, #tpu.memory_space<vmem>>, vector<1x16x16xbf16>
    %31 = vector.shape_cast %30 : vector<1x16x16xbf16> to vector<16x16xbf16>
    %c2 = arith.constant 2 : index
    %c0_20 = arith.constant 0 : index
    %c0_21 = arith.constant 0 : index
    %32 = vector.load %arg8[%c2, %c0_20, %c0_21] : memref<8x16x16xbf16, #tpu.memory_space<vmem>>, vector<1x16x16xbf16>
    %33 = vector.shape_cast %32 : vector<1x16x16xbf16> to vector<16x16xbf16>
    %c6 = arith.constant 6 : index
    %c0_22 = arith.constant 0 : index
    %c0_23 = arith.constant 0 : index
    %34 = vector.load %arg8[%c6, %c0_22, %c0_23] : memref<8x16x16xbf16, #tpu.memory_space<vmem>>, vector<1x16x16xbf16>
    %35 = vector.shape_cast %34 : vector<1x16x16xbf16> to vector<16x16xbf16>
    %36 = arith.truncf %22 : vector<64x16xf32> to vector<64x16xbf16>
    %37 = arith.extf %36 : vector<64x16xbf16> to vector<64x16xf32>
    %38 = arith.subf %22, %37 : vector<64x16xf32>
    %39 = arith.truncf %38 : vector<64x16xf32> to vector<64x16xbf16>
    %40 = arith.truncf %23 : vector<64x16xf32> to vector<64x16xbf16>
    %41 = arith.extf %40 : vector<64x16xbf16> to vector<64x16xf32>
    %42 = arith.subf %23, %41 : vector<64x16xf32>
    %43 = arith.truncf %42 : vector<64x16xf32> to vector<64x16xbf16>
    %44 = arith.addf %22, %23 : vector<64x16xf32>
    %45 = arith.truncf %44 : vector<64x16xf32> to vector<64x16xbf16>
    %46 = arith.extf %45 : vector<64x16xbf16> to vector<64x16xf32>
    %47 = arith.subf %44, %46 : vector<64x16xf32>
    %48 = arith.truncf %47 : vector<64x16xf32> to vector<64x16xbf16>
    %cst = arith.constant dense<0.000000e+00> : vector<64x16xf32>
    %49 = tpu.matmul %36, %25, %cst {dimension_numbers = #tpu.dot_dimension_numbers<[1], [0], [0], [1], [0, 0, 1, 1], [], []>} : vector<64x16xbf16>, vector<16x16xbf16>, vector<64x16xf32> -> vector<64x16xf32>
    %cst_24 = arith.constant dense<0.000000e+00> : vector<64x16xf32>
    %50 = tpu.matmul %36, %27, %cst_24 {dimension_numbers = #tpu.dot_dimension_numbers<[1], [0], [0], [1], [0, 0, 1, 1], [], []>} : vector<64x16xbf16>, vector<16x16xbf16>, vector<64x16xf32> -> vector<64x16xf32>
    %51 = arith.addf %49, %50 : vector<64x16xf32>
    %cst_25 = arith.constant dense<0.000000e+00> : vector<64x16xf32>
    %52 = tpu.matmul %39, %25, %cst_25 {dimension_numbers = #tpu.dot_dimension_numbers<[1], [0], [0], [1], [0, 0, 1, 1], [], []>} : vector<64x16xbf16>, vector<16x16xbf16>, vector<64x16xf32> -> vector<64x16xf32>
    %53 = arith.addf %51, %52 : vector<64x16xf32>
    %cst_26 = arith.constant dense<0.000000e+00> : vector<64x16xf32>
    %54 = tpu.matmul %40, %29, %cst_26 {dimension_numbers = #tpu.dot_dimension_numbers<[1], [0], [0], [1], [0, 0, 1, 1], [], []>} : vector<64x16xbf16>, vector<16x16xbf16>, vector<64x16xf32> -> vector<64x16xf32>
    %cst_27 = arith.constant dense<0.000000e+00> : vector<64x16xf32>
    %55 = tpu.matmul %40, %31, %cst_27 {dimension_numbers = #tpu.dot_dimension_numbers<[1], [0], [0], [1], [0, 0, 1, 1], [], []>} : vector<64x16xbf16>, vector<16x16xbf16>, vector<64x16xf32> -> vector<64x16xf32>
    %56 = arith.addf %54, %55 : vector<64x16xf32>
    %cst_28 = arith.constant dense<0.000000e+00> : vector<64x16xf32>
    %57 = tpu.matmul %43, %29, %cst_28 {dimension_numbers = #tpu.dot_dimension_numbers<[1], [0], [0], [1], [0, 0, 1, 1], [], []>} : vector<64x16xbf16>, vector<16x16xbf16>, vector<64x16xf32> -> vector<64x16xf32>
    %58 = arith.addf %56, %57 : vector<64x16xf32>
    %cst_29 = arith.constant dense<0.000000e+00> : vector<64x16xf32>
    %59 = tpu.matmul %45, %33, %cst_29 {dimension_numbers = #tpu.dot_dimension_numbers<[1], [0], [0], [1], [0, 0, 1, 1], [], []>} : vector<64x16xbf16>, vector<16x16xbf16>, vector<64x16xf32> -> vector<64x16xf32>
    %cst_30 = arith.constant dense<0.000000e+00> : vector<64x16xf32>
    %60 = tpu.matmul %45, %35, %cst_30 {dimension_numbers = #tpu.dot_dimension_numbers<[1], [0], [0], [1], [0, 0, 1, 1], [], []>} : vector<64x16xbf16>, vector<16x16xbf16>, vector<64x16xf32> -> vector<64x16xf32>
    %61 = arith.addf %59, %60 : vector<64x16xf32>
    %cst_31 = arith.constant dense<0.000000e+00> : vector<64x16xf32>
    %62 = tpu.matmul %48, %33, %cst_31 {dimension_numbers = #tpu.dot_dimension_numbers<[1], [0], [0], [1], [0, 0, 1, 1], [], []>} : vector<64x16xbf16>, vector<16x16xbf16>, vector<64x16xf32> -> vector<64x16xf32>
    %63 = arith.addf %61, %62 : vector<64x16xf32>
    %64 = arith.subf %53, %58 : vector<64x16xf32>
    %65 = arith.subf %63, %53 : vector<64x16xf32>
    %66 = arith.subf %65, %58 : vector<64x16xf32>
    %67 = vector.shape_cast %64 : vector<64x16xf32> to vector<4x16x16xf32>
    %68 = tpu.transpose %67, [0, 2, 1] : vector<4x16x16xf32> -> vector<4x16x16xf32>
    %69 = vector.shape_cast %68 : vector<4x16x16xf32> to vector<64x16xf32>
    %70 = vector.shape_cast %66 : vector<64x16xf32> to vector<4x16x16xf32>
    %71 = tpu.transpose %70, [0, 2, 1] : vector<4x16x16xf32> -> vector<4x16x16xf32>
    %72 = vector.shape_cast %71 : vector<4x16x16xf32> to vector<64x16xf32>
    %c0_32 = arith.constant 0 : index
    %c0_33 = arith.constant 0 : index
    %c0_34 = arith.constant 0 : index
    %73 = vector.load %arg7[%c0_32, %c0_33, %c0_34] : memref<8x16x16xbf16, #tpu.memory_space<vmem>>, vector<1x16x16xbf16>
    %74 = vector.shape_cast %73 : vector<1x16x16xbf16> to vector<16x16xbf16>
    %c4_35 = arith.constant 4 : index
    %c0_36 = arith.constant 0 : index
    %c0_37 = arith.constant 0 : index
    %75 = vector.load %arg7[%c4_35, %c0_36, %c0_37] : memref<8x16x16xbf16, #tpu.memory_space<vmem>>, vector<1x16x16xbf16>
    %76 = vector.shape_cast %75 : vector<1x16x16xbf16> to vector<16x16xbf16>
    %c1_38 = arith.constant 1 : index
    %c0_39 = arith.constant 0 : index
    %c0_40 = arith.constant 0 : index
    %77 = vector.load %arg7[%c1_38, %c0_39, %c0_40] : memref<8x16x16xbf16, #tpu.memory_space<vmem>>, vector<1x16x16xbf16>
    %78 = vector.shape_cast %77 : vector<1x16x16xbf16> to vector<16x16xbf16>
    %c5_41 = arith.constant 5 : index
    %c0_42 = arith.constant 0 : index
    %c0_43 = arith.constant 0 : index
    %79 = vector.load %arg7[%c5_41, %c0_42, %c0_43] : memref<8x16x16xbf16, #tpu.memory_space<vmem>>, vector<1x16x16xbf16>
    %80 = vector.shape_cast %79 : vector<1x16x16xbf16> to vector<16x16xbf16>
    %c2_44 = arith.constant 2 : index
    %c0_45 = arith.constant 0 : index
    %c0_46 = arith.constant 0 : index
    %81 = vector.load %arg7[%c2_44, %c0_45, %c0_46] : memref<8x16x16xbf16, #tpu.memory_space<vmem>>, vector<1x16x16xbf16>
    %82 = vector.shape_cast %81 : vector<1x16x16xbf16> to vector<16x16xbf16>
    %c6_47 = arith.constant 6 : index
    %c0_48 = arith.constant 0 : index
    %c0_49 = arith.constant 0 : index
    %83 = vector.load %arg7[%c6_47, %c0_48, %c0_49] : memref<8x16x16xbf16, #tpu.memory_space<vmem>>, vector<1x16x16xbf16>
    %84 = vector.shape_cast %83 : vector<1x16x16xbf16> to vector<16x16xbf16>
    %85 = arith.truncf %69 : vector<64x16xf32> to vector<64x16xbf16>
    %86 = arith.extf %85 : vector<64x16xbf16> to vector<64x16xf32>
    %87 = arith.subf %69, %86 : vector<64x16xf32>
    %88 = arith.truncf %87 : vector<64x16xf32> to vector<64x16xbf16>
    %89 = arith.truncf %72 : vector<64x16xf32> to vector<64x16xbf16>
    %90 = arith.extf %89 : vector<64x16xbf16> to vector<64x16xf32>
    %91 = arith.subf %72, %90 : vector<64x16xf32>
    %92 = arith.truncf %91 : vector<64x16xf32> to vector<64x16xbf16>
    %93 = arith.addf %69, %72 : vector<64x16xf32>
    %94 = arith.truncf %93 : vector<64x16xf32> to vector<64x16xbf16>
    %95 = arith.extf %94 : vector<64x16xbf16> to vector<64x16xf32>
    %96 = arith.subf %93, %95 : vector<64x16xf32>
    %97 = arith.truncf %96 : vector<64x16xf32> to vector<64x16xbf16>
    %cst_50 = arith.constant dense<0.000000e+00> : vector<64x16xf32>
    %98 = tpu.matmul %85, %74, %cst_50 {dimension_numbers = #tpu.dot_dimension_numbers<[1], [0], [0], [1], [0, 0, 1, 1], [], []>} : vector<64x16xbf16>, vector<16x16xbf16>, vector<64x16xf32> -> vector<64x16xf32>
    %cst_51 = arith.constant dense<0.000000e+00> : vector<64x16xf32>
    %99 = tpu.matmul %85, %76, %cst_51 {dimension_numbers = #tpu.dot_dimension_numbers<[1], [0], [0], [1], [0, 0, 1, 1], [], []>} : vector<64x16xbf16>, vector<16x16xbf16>, vector<64x16xf32> -> vector<64x16xf32>
    %100 = arith.addf %98, %99 : vector<64x16xf32>
    %cst_52 = arith.constant dense<0.000000e+00> : vector<64x16xf32>
    %101 = tpu.matmul %88, %74, %cst_52 {dimension_numbers = #tpu.dot_dimension_numbers<[1], [0], [0], [1], [0, 0, 1, 1], [], []>} : vector<64x16xbf16>, vector<16x16xbf16>, vector<64x16xf32> -> vector<64x16xf32>
    %102 = arith.addf %100, %101 : vector<64x16xf32>
    %cst_53 = arith.constant dense<0.000000e+00> : vector<64x16xf32>
    %103 = tpu.matmul %89, %78, %cst_53 {dimension_numbers = #tpu.dot_dimension_numbers<[1], [0], [0], [1], [0, 0, 1, 1], [], []>} : vector<64x16xbf16>, vector<16x16xbf16>, vector<64x16xf32> -> vector<64x16xf32>
    %cst_54 = arith.constant dense<0.000000e+00> : vector<64x16xf32>
    %104 = tpu.matmul %89, %80, %cst_54 {dimension_numbers = #tpu.dot_dimension_numbers<[1], [0], [0], [1], [0, 0, 1, 1], [], []>} : vector<64x16xbf16>, vector<16x16xbf16>, vector<64x16xf32> -> vector<64x16xf32>
    %105 = arith.addf %103, %104 : vector<64x16xf32>
    %cst_55 = arith.constant dense<0.000000e+00> : vector<64x16xf32>
    %106 = tpu.matmul %92, %78, %cst_55 {dimension_numbers = #tpu.dot_dimension_numbers<[1], [0], [0], [1], [0, 0, 1, 1], [], []>} : vector<64x16xbf16>, vector<16x16xbf16>, vector<64x16xf32> -> vector<64x16xf32>
    %107 = arith.addf %105, %106 : vector<64x16xf32>
    %cst_56 = arith.constant dense<0.000000e+00> : vector<64x16xf32>
    %108 = tpu.matmul %94, %82, %cst_56 {dimension_numbers = #tpu.dot_dimension_numbers<[1], [0], [0], [1], [0, 0, 1, 1], [], []>} : vector<64x16xbf16>, vector<16x16xbf16>, vector<64x16xf32> -> vector<64x16xf32>
    %cst_57 = arith.constant dense<0.000000e+00> : vector<64x16xf32>
    %109 = tpu.matmul %94, %84, %cst_57 {dimension_numbers = #tpu.dot_dimension_numbers<[1], [0], [0], [1], [0, 0, 1, 1], [], []>} : vector<64x16xbf16>, vector<16x16xbf16>, vector<64x16xf32> -> vector<64x16xf32>
    %110 = arith.addf %108, %109 : vector<64x16xf32>
    %cst_58 = arith.constant dense<0.000000e+00> : vector<64x16xf32>
    %111 = tpu.matmul %97, %82, %cst_58 {dimension_numbers = #tpu.dot_dimension_numbers<[1], [0], [0], [1], [0, 0, 1, 1], [], []>} : vector<64x16xbf16>, vector<16x16xbf16>, vector<64x16xf32> -> vector<64x16xf32>
    %112 = arith.addf %110, %111 : vector<64x16xf32>
    %113 = arith.subf %102, %107 : vector<64x16xf32>
    %114 = arith.subf %112, %102 : vector<64x16xf32>
    %115 = arith.subf %114, %107 : vector<64x16xf32>
    %c0_59 = arith.constant 0 : index
    %c0_60 = arith.constant 0 : index
    %c0_61 = arith.constant 0 : index
    %116 = vector.load %arg5[%c0_59, %c0_60, %c0_61] : memref<1x16x16xf32, #tpu.memory_space<vmem>>, vector<1x16x16xf32>
    %117 = vector.shape_cast %116 : vector<1x16x16xf32> to vector<16x16xf32>
    %c0_62 = arith.constant 0 : index
    %c0_63 = arith.constant 0 : index
    %c0_64 = arith.constant 0 : index
    %c0_65 = arith.constant 0 : index
    %118 = vector.load %arg6[%c0_62, %c0_63, %c0_64, %c0_65] : memref<1x8x16x16xf32, #tpu.memory_space<vmem>>, vector<1x8x16x16xf32>
    %119 = vector.shape_cast %118 : vector<1x8x16x16xf32> to vector<8x16x16xf32>
    %120 = vector.shape_cast %113 : vector<64x16xf32> to vector<4x16x16xf32>
    %121 = vector.shape_cast %117 : vector<16x16xf32> to vector<1x16x16xf32>
    %122 = vector.broadcast %121 : vector<1x16x16xf32> to vector<4x16x16xf32>
    %123 = arith.mulf %122, %120 : vector<4x16x16xf32>
    %124 = vector.extract_strided_slice %119 {offsets = [0, 0, 0], sizes = [4, 16, 16], strides = [1, 1, 1]} : vector<8x16x16xf32> to vector<4x16x16xf32>
    %125 = arith.subf %123, %124 : vector<4x16x16xf32>
    %126 = vector.shape_cast %115 : vector<64x16xf32> to vector<4x16x16xf32>
    %127 = vector.shape_cast %117 : vector<16x16xf32> to vector<1x16x16xf32>
    %128 = vector.broadcast %127 : vector<1x16x16xf32> to vector<4x16x16xf32>
    %129 = arith.mulf %128, %126 : vector<4x16x16xf32>
    %130 = vector.extract_strided_slice %119 {offsets = [4, 0, 0], sizes = [4, 16, 16], strides = [1, 1, 1]} : vector<8x16x16xf32> to vector<4x16x16xf32>
    %131 = arith.subf %129, %130 : vector<4x16x16xf32>
    %132 = vector.shape_cast %125 : vector<4x16x16xf32> to vector<64x16xf32>
    %133 = vector.shape_cast %131 : vector<4x16x16xf32> to vector<64x16xf32>
    %c0_66 = arith.constant 0 : index
    %c0_67 = arith.constant 0 : index
    %c0_68 = arith.constant 0 : index
    %134 = vector.load %arg7[%c0_66, %c0_67, %c0_68] : memref<8x16x16xbf16, #tpu.memory_space<vmem>>, vector<1x16x16xbf16>
    %135 = vector.shape_cast %134 : vector<1x16x16xbf16> to vector<16x16xbf16>
    %c4_69 = arith.constant 4 : index
    %c0_70 = arith.constant 0 : index
    %c0_71 = arith.constant 0 : index
    %136 = vector.load %arg7[%c4_69, %c0_70, %c0_71] : memref<8x16x16xbf16, #tpu.memory_space<vmem>>, vector<1x16x16xbf16>
    %137 = vector.shape_cast %136 : vector<1x16x16xbf16> to vector<16x16xbf16>
    %c1_72 = arith.constant 1 : index
    %c0_73 = arith.constant 0 : index
    %c0_74 = arith.constant 0 : index
    %138 = vector.load %arg7[%c1_72, %c0_73, %c0_74] : memref<8x16x16xbf16, #tpu.memory_space<vmem>>, vector<1x16x16xbf16>
    %139 = vector.shape_cast %138 : vector<1x16x16xbf16> to vector<16x16xbf16>
    %c5_75 = arith.constant 5 : index
    %c0_76 = arith.constant 0 : index
    %c0_77 = arith.constant 0 : index
    %140 = vector.load %arg7[%c5_75, %c0_76, %c0_77] : memref<8x16x16xbf16, #tpu.memory_space<vmem>>, vector<1x16x16xbf16>
    %141 = vector.shape_cast %140 : vector<1x16x16xbf16> to vector<16x16xbf16>
    %c3 = arith.constant 3 : index
    %c0_78 = arith.constant 0 : index
    %c0_79 = arith.constant 0 : index
    %142 = vector.load %arg7[%c3, %c0_78, %c0_79] : memref<8x16x16xbf16, #tpu.memory_space<vmem>>, vector<1x16x16xbf16>
    %143 = vector.shape_cast %142 : vector<1x16x16xbf16> to vector<16x16xbf16>
    %c7 = arith.constant 7 : index
    %c0_80 = arith.constant 0 : index
    %c0_81 = arith.constant 0 : index
    %144 = vector.load %arg7[%c7, %c0_80, %c0_81] : memref<8x16x16xbf16, #tpu.memory_space<vmem>>, vector<1x16x16xbf16>
    %145 = vector.shape_cast %144 : vector<1x16x16xbf16> to vector<16x16xbf16>
    %146 = arith.truncf %132 : vector<64x16xf32> to vector<64x16xbf16>
    %147 = arith.extf %146 : vector<64x16xbf16> to vector<64x16xf32>
    %148 = arith.subf %132, %147 : vector<64x16xf32>
    %149 = arith.truncf %148 : vector<64x16xf32> to vector<64x16xbf16>
    %150 = arith.truncf %133 : vector<64x16xf32> to vector<64x16xbf16>
    %151 = arith.extf %150 : vector<64x16xbf16> to vector<64x16xf32>
    %152 = arith.subf %133, %151 : vector<64x16xf32>
    %153 = arith.truncf %152 : vector<64x16xf32> to vector<64x16xbf16>
    %154 = arith.addf %132, %133 : vector<64x16xf32>
    %155 = arith.truncf %154 : vector<64x16xf32> to vector<64x16xbf16>
    %156 = arith.extf %155 : vector<64x16xbf16> to vector<64x16xf32>
    %157 = arith.subf %154, %156 : vector<64x16xf32>
    %158 = arith.truncf %157 : vector<64x16xf32> to vector<64x16xbf16>
    %cst_82 = arith.constant dense<0.000000e+00> : vector<64x16xf32>
    %159 = tpu.matmul %146, %135, %cst_82 {dimension_numbers = #tpu.dot_dimension_numbers<[1], [0], [0], [1], [0, 0, 1, 1], [], []>} : vector<64x16xbf16>, vector<16x16xbf16>, vector<64x16xf32> -> vector<64x16xf32>
    %cst_83 = arith.constant dense<0.000000e+00> : vector<64x16xf32>
    %160 = tpu.matmul %146, %137, %cst_83 {dimension_numbers = #tpu.dot_dimension_numbers<[1], [0], [0], [1], [0, 0, 1, 1], [], []>} : vector<64x16xbf16>, vector<16x16xbf16>, vector<64x16xf32> -> vector<64x16xf32>
    %161 = arith.addf %159, %160 : vector<64x16xf32>
    %cst_84 = arith.constant dense<0.000000e+00> : vector<64x16xf32>
    %162 = tpu.matmul %149, %135, %cst_84 {dimension_numbers = #tpu.dot_dimension_numbers<[1], [0], [0], [1], [0, 0, 1, 1], [], []>} : vector<64x16xbf16>, vector<16x16xbf16>, vector<64x16xf32> -> vector<64x16xf32>
    %163 = arith.addf %161, %162 : vector<64x16xf32>
    %cst_85 = arith.constant dense<0.000000e+00> : vector<64x16xf32>
    %164 = tpu.matmul %150, %139, %cst_85 {dimension_numbers = #tpu.dot_dimension_numbers<[1], [0], [0], [1], [0, 0, 1, 1], [], []>} : vector<64x16xbf16>, vector<16x16xbf16>, vector<64x16xf32> -> vector<64x16xf32>
    %cst_86 = arith.constant dense<0.000000e+00> : vector<64x16xf32>
    %165 = tpu.matmul %150, %141, %cst_86 {dimension_numbers = #tpu.dot_dimension_numbers<[1], [0], [0], [1], [0, 0, 1, 1], [], []>} : vector<64x16xbf16>, vector<16x16xbf16>, vector<64x16xf32> -> vector<64x16xf32>
    %166 = arith.addf %164, %165 : vector<64x16xf32>
    %cst_87 = arith.constant dense<0.000000e+00> : vector<64x16xf32>
    %167 = tpu.matmul %153, %139, %cst_87 {dimension_numbers = #tpu.dot_dimension_numbers<[1], [0], [0], [1], [0, 0, 1, 1], [], []>} : vector<64x16xbf16>, vector<16x16xbf16>, vector<64x16xf32> -> vector<64x16xf32>
    %168 = arith.addf %166, %167 : vector<64x16xf32>
    %cst_88 = arith.constant dense<0.000000e+00> : vector<64x16xf32>
    %169 = tpu.matmul %155, %143, %cst_88 {dimension_numbers = #tpu.dot_dimension_numbers<[1], [0], [0], [1], [0, 0, 1, 1], [], []>} : vector<64x16xbf16>, vector<16x16xbf16>, vector<64x16xf32> -> vector<64x16xf32>
    %cst_89 = arith.constant dense<0.000000e+00> : vector<64x16xf32>
    %170 = tpu.matmul %155, %145, %cst_89 {dimension_numbers = #tpu.dot_dimension_numbers<[1], [0], [0], [1], [0, 0, 1, 1], [], []>} : vector<64x16xbf16>, vector<16x16xbf16>, vector<64x16xf32> -> vector<64x16xf32>
    %171 = arith.addf %169, %170 : vector<64x16xf32>
    %cst_90 = arith.constant dense<0.000000e+00> : vector<64x16xf32>
    %172 = tpu.matmul %158, %143, %cst_90 {dimension_numbers = #tpu.dot_dimension_numbers<[1], [0], [0], [1], [0, 0, 1, 1], [], []>} : vector<64x16xbf16>, vector<16x16xbf16>, vector<64x16xf32> -> vector<64x16xf32>
    %173 = arith.addf %171, %172 : vector<64x16xf32>
    %174 = arith.addf %163, %168 : vector<64x16xf32>
    %175 = arith.subf %173, %163 : vector<64x16xf32>
    %176 = arith.addf %175, %168 : vector<64x16xf32>
    %177 = vector.shape_cast %174 : vector<64x16xf32> to vector<4x16x16xf32>
    %178 = tpu.transpose %177, [0, 2, 1] : vector<4x16x16xf32> -> vector<4x16x16xf32>
    %179 = vector.shape_cast %178 : vector<4x16x16xf32> to vector<64x16xf32>
    %180 = vector.shape_cast %176 : vector<64x16xf32> to vector<4x16x16xf32>
    %181 = tpu.transpose %180, [0, 2, 1] : vector<4x16x16xf32> -> vector<4x16x16xf32>
    %182 = vector.shape_cast %181 : vector<4x16x16xf32> to vector<64x16xf32>
    %c0_91 = arith.constant 0 : index
    %c0_92 = arith.constant 0 : index
    %c0_93 = arith.constant 0 : index
    %183 = vector.load %arg8[%c0_91, %c0_92, %c0_93] : memref<8x16x16xbf16, #tpu.memory_space<vmem>>, vector<1x16x16xbf16>
    %184 = vector.shape_cast %183 : vector<1x16x16xbf16> to vector<16x16xbf16>
    %c4_94 = arith.constant 4 : index
    %c0_95 = arith.constant 0 : index
    %c0_96 = arith.constant 0 : index
    %185 = vector.load %arg8[%c4_94, %c0_95, %c0_96] : memref<8x16x16xbf16, #tpu.memory_space<vmem>>, vector<1x16x16xbf16>
    %186 = vector.shape_cast %185 : vector<1x16x16xbf16> to vector<16x16xbf16>
    %c1_97 = arith.constant 1 : index
    %c0_98 = arith.constant 0 : index
    %c0_99 = arith.constant 0 : index
    %187 = vector.load %arg8[%c1_97, %c0_98, %c0_99] : memref<8x16x16xbf16, #tpu.memory_space<vmem>>, vector<1x16x16xbf16>
    %188 = vector.shape_cast %187 : vector<1x16x16xbf16> to vector<16x16xbf16>
    %c5_100 = arith.constant 5 : index
    %c0_101 = arith.constant 0 : index
    %c0_102 = arith.constant 0 : index
    %189 = vector.load %arg8[%c5_100, %c0_101, %c0_102] : memref<8x16x16xbf16, #tpu.memory_space<vmem>>, vector<1x16x16xbf16>
    %190 = vector.shape_cast %189 : vector<1x16x16xbf16> to vector<16x16xbf16>
    %c3_103 = arith.constant 3 : index
    %c0_104 = arith.constant 0 : index
    %c0_105 = arith.constant 0 : index
    %191 = vector.load %arg8[%c3_103, %c0_104, %c0_105] : memref<8x16x16xbf16, #tpu.memory_space<vmem>>, vector<1x16x16xbf16>
    %192 = vector.shape_cast %191 : vector<1x16x16xbf16> to vector<16x16xbf16>
    %c7_106 = arith.constant 7 : index
    %c0_107 = arith.constant 0 : index
    %c0_108 = arith.constant 0 : index
    %193 = vector.load %arg8[%c7_106, %c0_107, %c0_108] : memref<8x16x16xbf16, #tpu.memory_space<vmem>>, vector<1x16x16xbf16>
    %194 = vector.shape_cast %193 : vector<1x16x16xbf16> to vector<16x16xbf16>
    %195 = arith.truncf %179 : vector<64x16xf32> to vector<64x16xbf16>
    %196 = arith.extf %195 : vector<64x16xbf16> to vector<64x16xf32>
    %197 = arith.subf %179, %196 : vector<64x16xf32>
    %198 = arith.truncf %197 : vector<64x16xf32> to vector<64x16xbf16>
    %199 = arith.truncf %182 : vector<64x16xf32> to vector<64x16xbf16>
    %200 = arith.extf %199 : vector<64x16xbf16> to vector<64x16xf32>
    %201 = arith.subf %182, %200 : vector<64x16xf32>
    %202 = arith.truncf %201 : vector<64x16xf32> to vector<64x16xbf16>
    %203 = arith.addf %179, %182 : vector<64x16xf32>
    %204 = arith.truncf %203 : vector<64x16xf32> to vector<64x16xbf16>
    %205 = arith.extf %204 : vector<64x16xbf16> to vector<64x16xf32>
    %206 = arith.subf %203, %205 : vector<64x16xf32>
    %207 = arith.truncf %206 : vector<64x16xf32> to vector<64x16xbf16>
    %cst_109 = arith.constant dense<0.000000e+00> : vector<64x16xf32>
    %208 = tpu.matmul %195, %184, %cst_109 {dimension_numbers = #tpu.dot_dimension_numbers<[1], [0], [0], [1], [0, 0, 1, 1], [], []>} : vector<64x16xbf16>, vector<16x16xbf16>, vector<64x16xf32> -> vector<64x16xf32>
    %cst_110 = arith.constant dense<0.000000e+00> : vector<64x16xf32>
    %209 = tpu.matmul %195, %186, %cst_110 {dimension_numbers = #tpu.dot_dimension_numbers<[1], [0], [0], [1], [0, 0, 1, 1], [], []>} : vector<64x16xbf16>, vector<16x16xbf16>, vector<64x16xf32> -> vector<64x16xf32>
    %210 = arith.addf %208, %209 : vector<64x16xf32>
    %cst_111 = arith.constant dense<0.000000e+00> : vector<64x16xf32>
    %211 = tpu.matmul %198, %184, %cst_111 {dimension_numbers = #tpu.dot_dimension_numbers<[1], [0], [0], [1], [0, 0, 1, 1], [], []>} : vector<64x16xbf16>, vector<16x16xbf16>, vector<64x16xf32> -> vector<64x16xf32>
    %212 = arith.addf %210, %211 : vector<64x16xf32>
    %cst_112 = arith.constant dense<0.000000e+00> : vector<64x16xf32>
    %213 = tpu.matmul %199, %188, %cst_112 {dimension_numbers = #tpu.dot_dimension_numbers<[1], [0], [0], [1], [0, 0, 1, 1], [], []>} : vector<64x16xbf16>, vector<16x16xbf16>, vector<64x16xf32> -> vector<64x16xf32>
    %cst_113 = arith.constant dense<0.000000e+00> : vector<64x16xf32>
    %214 = tpu.matmul %199, %190, %cst_113 {dimension_numbers = #tpu.dot_dimension_numbers<[1], [0], [0], [1], [0, 0, 1, 1], [], []>} : vector<64x16xbf16>, vector<16x16xbf16>, vector<64x16xf32> -> vector<64x16xf32>
    %215 = arith.addf %213, %214 : vector<64x16xf32>
    %cst_114 = arith.constant dense<0.000000e+00> : vector<64x16xf32>
    %216 = tpu.matmul %202, %188, %cst_114 {dimension_numbers = #tpu.dot_dimension_numbers<[1], [0], [0], [1], [0, 0, 1, 1], [], []>} : vector<64x16xbf16>, vector<16x16xbf16>, vector<64x16xf32> -> vector<64x16xf32>
    %217 = arith.addf %215, %216 : vector<64x16xf32>
    %cst_115 = arith.constant dense<0.000000e+00> : vector<64x16xf32>
    %218 = tpu.matmul %204, %192, %cst_115 {dimension_numbers = #tpu.dot_dimension_numbers<[1], [0], [0], [1], [0, 0, 1, 1], [], []>} : vector<64x16xbf16>, vector<16x16xbf16>, vector<64x16xf32> -> vector<64x16xf32>
    %cst_116 = arith.constant dense<0.000000e+00> : vector<64x16xf32>
    %219 = tpu.matmul %204, %194, %cst_116 {dimension_numbers = #tpu.dot_dimension_numbers<[1], [0], [0], [1], [0, 0, 1, 1], [], []>} : vector<64x16xbf16>, vector<16x16xbf16>, vector<64x16xf32> -> vector<64x16xf32>
    %220 = arith.addf %218, %219 : vector<64x16xf32>
    %cst_117 = arith.constant dense<0.000000e+00> : vector<64x16xf32>
    %221 = tpu.matmul %207, %192, %cst_117 {dimension_numbers = #tpu.dot_dimension_numbers<[1], [0], [0], [1], [0, 0, 1, 1], [], []>} : vector<64x16xbf16>, vector<16x16xbf16>, vector<64x16xf32> -> vector<64x16xf32>
    %222 = arith.addf %220, %221 : vector<64x16xf32>
    %223 = arith.addf %212, %217 : vector<64x16xf32>
    %224 = arith.subf %222, %212 : vector<64x16xf32>
    %225 = arith.addf %224, %217 : vector<64x16xf32>
    %226 = vector.shape_cast %223 : vector<64x16xf32> to vector<4x16x16xf32>
    %227 = vector.shape_cast %225 : vector<64x16xf32> to vector<4x16x16xf32>
    %228 = vector.shape_cast %5 : vector<16x16xf32> to vector<1x16x16xf32>
    %229 = vector.broadcast %228 : vector<1x16x16xf32> to vector<4x16x16xf32>
    %230 = arith.mulf %229, %226 : vector<4x16x16xf32>
    %231 = vector.shape_cast %7 : vector<16x16xf32> to vector<1x16x16xf32>
    %232 = vector.broadcast %231 : vector<1x16x16xf32> to vector<4x16x16xf32>
    %233 = arith.mulf %232, %227 : vector<4x16x16xf32>
    %234 = arith.addf %230, %233 : vector<4x16x16xf32>
    %235 = vector.shape_cast %5 : vector<16x16xf32> to vector<1x16x16xf32>
    %236 = vector.broadcast %235 : vector<1x16x16xf32> to vector<4x16x16xf32>
    %237 = arith.mulf %236, %227 : vector<4x16x16xf32>
    %238 = vector.shape_cast %7 : vector<16x16xf32> to vector<1x16x16xf32>
    %239 = vector.broadcast %238 : vector<1x16x16xf32> to vector<4x16x16xf32>
    %240 = arith.mulf %239, %226 : vector<4x16x16xf32>
    %241 = arith.subf %237, %240 : vector<4x16x16xf32>
    %c0_118 = arith.constant 0 : index
    %c0_119 = arith.constant 0 : index
    %c0_120 = arith.constant 0 : index
    %c0_121 = arith.constant 0 : index
    %242 = vector.load %arg3[%c0_118, %c0_119, %c0_120, %c0_121] : memref<1x8x16x16xbf16, #tpu.memory_space<vmem>>, vector<1x8x16x16xbf16>
    %243 = vector.shape_cast %242 : vector<1x8x16x16xbf16> to vector<8x16x16xbf16>
    %244 = vector.extract_strided_slice %243 {offsets = [0, 0, 0], sizes = [4, 16, 16], strides = [1, 1, 1]} : vector<8x16x16xbf16> to vector<4x16x16xbf16>
    %245 = arith.extf %244 : vector<4x16x16xbf16> to vector<4x16x16xf32>
    %246 = arith.subf %2, %245 : vector<4x16x16xf32>
    %cst_122 = arith.constant 1.000000e-01 : f32
    %247 = vector.broadcast %cst_122 : f32 to vector<4x16x16xf32>
    %248 = arith.mulf %247, %246 : vector<4x16x16xf32>
    %249 = arith.addf %234, %248 : vector<4x16x16xf32>
    %cst_123 = arith.constant 5.000000e-01 : f32
    %250 = vector.broadcast %cst_123 : f32 to vector<4x16x16xf32>
    %251 = arith.mulf %250, %249 : vector<4x16x16xf32>
    %252 = arith.subf %2, %251 : vector<4x16x16xf32>
    %c0_124 = arith.constant 0 : index
    %c0_125 = arith.constant 0 : index
    %c0_126 = arith.constant 0 : index
    %c0_127 = arith.constant 0 : index
    %253 = vector.load %arg9[%c0_124, %c0_125, %c0_126, %c0_127] : memref<1x8x16x16xf32, #tpu.memory_space<vmem>>, vector<1x4x16x16xf32>
    %254 = vector.shape_cast %253 : vector<1x4x16x16xf32> to vector<4x16x16xf32>
    %255 = vector.shape_cast %252 : vector<4x16x16xf32> to vector<1x4x16x16xf32>
    tpu.vector_store %arg9[%c0_124, %c0_125, %c0_126, %c0_127], %255 {strides = array<i32>} : memref<1x8x16x16xf32, #tpu.memory_space<vmem>>, vector<1x4x16x16xf32>,
    %256 = vector.extract_strided_slice %243 {offsets = [4, 0, 0], sizes = [4, 16, 16], strides = [1, 1, 1]} : vector<8x16x16xbf16> to vector<4x16x16xbf16>
    %257 = arith.extf %256 : vector<4x16x16xbf16> to vector<4x16x16xf32>
    %258 = arith.subf %3, %257 : vector<4x16x16xf32>
    %cst_128 = arith.constant 1.000000e-01 : f32
    %259 = vector.broadcast %cst_128 : f32 to vector<4x16x16xf32>
    %260 = arith.mulf %259, %258 : vector<4x16x16xf32>
    %261 = arith.addf %241, %260 : vector<4x16x16xf32>
    %cst_129 = arith.constant 5.000000e-01 : f32
    %262 = vector.broadcast %cst_129 : f32 to vector<4x16x16xf32>
    %263 = arith.mulf %262, %261 : vector<4x16x16xf32>
    %264 = arith.subf %3, %263 : vector<4x16x16xf32>
    %c0_130 = arith.constant 0 : index
    %c4_131 = arith.constant 4 : index
    %c0_132 = arith.constant 0 : index
    %c0_133 = arith.constant 0 : index
    %265 = vector.load %arg9[%c0_130, %c4_131, %c0_132, %c0_133] : memref<1x8x16x16xf32, #tpu.memory_space<vmem>>, vector<1x4x16x16xf32>
    %266 = vector.shape_cast %265 : vector<1x4x16x16xf32> to vector<4x16x16xf32>
    %267 = vector.shape_cast %264 : vector<4x16x16xf32> to vector<1x4x16x16xf32>
    tpu.vector_store %arg9[%c0_130, %c4_131, %c0_132, %c0_133], %267 {strides = array<i32>} : memref<1x8x16x16xf32, #tpu.memory_space<vmem>>, vector<1x4x16x16xf32>,
    return
  }
  func.func @transform_0(%arg0: i32, %arg1: i32) -> (i32, i32, i32, i32) {
    %c0_i32 = arith.constant 0 : i32
    %c0_i32_0 = arith.constant 0 : i32
    %c0_i32_1 = arith.constant 0 : i32
    return %arg0, %arg1, %c0_i32, %c0_i32_0 : i32, i32, i32, i32
  }
  func.func @transform_1(%arg0: i32, %arg1: i32) -> (i32, i32, i32, i32) {
    %c0_i32 = arith.constant 0 : i32
    %c0_i32_0 = arith.constant 0 : i32
    %c0_i32_1 = arith.constant 0 : i32
    return %arg0, %arg1, %c0_i32, %c0_i32_0 : i32, i32, i32, i32
  }
  func.func @transform_2(%arg0: i32, %arg1: i32) -> (i32, i32, i32, i32) {
    %c0_i32 = arith.constant 0 : i32
    %c0_i32_0 = arith.constant 0 : i32
    %c0_i32_1 = arith.constant 0 : i32
    %c0_i32_2 = arith.constant 0 : i32
    return %arg0, %c0_i32, %c0_i32_0, %c0_i32_1 : i32, i32, i32, i32
  }
  func.func @transform_3(%arg0: i32, %arg1: i32) -> (i32, i32, i32) {
    %c0_i32 = arith.constant 0 : i32
    %c0_i32_0 = arith.constant 0 : i32
    %c0_i32_1 = arith.constant 0 : i32
    return %arg0, %c0_i32, %c0_i32_0 : i32, i32, i32
  }
  func.func @transform_4(%arg0: i32, %arg1: i32) -> (i32, i32, i32, i32) {
    %c0_i32 = arith.constant 0 : i32
    %c0_i32_0 = arith.constant 0 : i32
    %c0_i32_1 = arith.constant 0 : i32
    return %arg0, %arg1, %c0_i32, %c0_i32_0 : i32, i32, i32, i32
  }
  func.func @transform_5(%arg0: i32, %arg1: i32) -> (i32, i32, i32) {
    %c0_i32 = arith.constant 0 : i32
    %c0_i32_0 = arith.constant 0 : i32
    %c0_i32_1 = arith.constant 0 : i32
    %c0_i32_2 = arith.constant 0 : i32
    return %c0_i32, %c0_i32_0, %c0_i32_1 : i32, i32, i32
  }
  func.func @transform_6(%arg0: i32, %arg1: i32) -> (i32, i32, i32) {
    %c0_i32 = arith.constant 0 : i32
    %c0_i32_0 = arith.constant 0 : i32
    %c0_i32_1 = arith.constant 0 : i32
    %c0_i32_2 = arith.constant 0 : i32
    return %c0_i32, %c0_i32_0, %c0_i32_1 : i32, i32, i32
  }
  func.func @transform_7(%arg0: i32, %arg1: i32) -> (i32, i32, i32, i32) {
    %c0_i32 = arith.constant 0 : i32
    %c0_i32_0 = arith.constant 0 : i32
    %c0_i32_1 = arith.constant 0 : i32
    return %arg0, %arg1, %c0_i32, %c0_i32_0 : i32, i32, i32, i32
  }
}

</mosaic_0001>

<bundles_post_ra>
// kernel: tpu_custom_call.1
= control target key start
LH: loop header
LB: loop body
LE: loop exit
PB: predicated region body
PF: predicated region fallthrough
CT: control target
= control target key end

     0   :  { %s7388_s0 = inlined_call_operand.hbm [shape: f32[2,8,16,16], index: 0, kind: input, shape index: {}, may-alias: {0,7}]   ;;  %s7389_s1 = inlined_call_operand.vmem [shape: bf16[2,8,16,16], index: 1, kind: input, shape index: {}]   ;;  %s7390_s2 = inlined_call_operand.vmem [shape: f32[2,2,16,16], index: 2, kind: input, shape index: {}]   ;;  %s7391_s3 = inlined_call_operand.hbm [shape: f32[2,16,16], index: 3, kind: input, shape index: {}]   ;;  %s7392_s4 = inlined_call_operand.vmem [shape: f32[2,8,16,16], index: 4, kind: input, shape index: {}]   ;;  %s7393_s5 = inlined_call_operand.vmem [shape: bf16[8,16,16], index: 5, kind: input, shape index: {}]   ;;  %s7394_s6 = inlined_call_operand.hbm [shape: bf16[8,16,16], index: 6, kind: input, shape index: {}]   ;;  %s7395_s7 = inlined_call_operand.hbm [shape: f32[2,8,16,16], index: 7, kind: output, shape index: {}, may-alias: {0,7}]  }
   0x1   :  { %7419 = sst [smem:[#allocation49_spill]] %s7388_s0 }
   0x2   :  { %7420 = sst [smem:[#allocation50_spill]] %s7394_s6 }
   0x3   :  { %7421 = sst [smem:[#allocation51_spill]] %s7395_s7 }
   0x4   :  { %12 = vsyncpa [#allocation3], 0 }
   0x5   :  { %14 = vsyncpa [#allocation3 + $0x1], 0 }
   0x6   :  { %15 = vsyncpa [#allocation6], 0 }
   0x7   :  { %17 = vsyncpa [#allocation6 + $0x1], 0 }
   0x8   :  { %18 = vsyncpa [#allocation4], 0 }
   0x9   :  { %20 = vsyncpa [#allocation4 + $0x1], 0  ;;  %s5895_s24 = smov 0   ;;  %s5897_s25 = smov 0  }
   0xa   :  { %s5899_s26 = smov 0   ;;  %s5901_s27 = smov 0  }
   0xb   :  { %s5903_s28 = smov 0   ;;  %s5905_s29 = smov 0  }
   0xc LB: > { %7422 = sst [smem:[#allocation13_spill]] %s5823_s24  ;;  %s5926_s30 = sadd.s32 4294967295, %s5843_s29   ;;  %s5843_s29 = sphi %s5905_s29, %s26_s29   ;;  %s5839_s28 = sphi %s5903_s28, %s7509_s28   ;;  %s5835_s27 = sphi %s5901_s27, %s7508_s27   ;;  %s5831_s26 = sphi %s5899_s26, %s7504_s26   ;;  %s5827_s25 = sphi %s5897_s25, %s7507_s25   ;;  %s5823_s24 = sphi %s5895_s24, %s7506_s24  }
   0xd   : > { %7423 = sst [smem:[#allocation14_spill]] %s5831_s26  ;;  %s4753_s8 = sadd.s32 4294967294, %s5843_s29  }
   0xe   : > { %7424 = sst [smem:[#allocation15_spill]] %s5843_s29  ;;  %p60_p0 = scmp.ne.s32.totalorder %s5827_s25, %s5823_s24 }
   0xf   : > { %p61_p1 = scmp.eq.s32.totalorder %s5926_s30, 0  ;;  %p242_p3 = scmp.eq.s32.totalorder %s4753_s8, 1 }
  0x10   : > { %p4754_p5 = scmp.ge.s32.totalorder %s5843_s29, 1  ;;  %p249_p7 = scmp.lt.s32.totalorder %s5843_s29, 3 }
  0x11   : > { %p5935_p4 = por %p61_p1, %p60_p0  ;;  %p5940_p6 = por %p242_p3, %p60_p0 }
  0x12   : > { %p5945_p8 = pnand %p4754_p5, %p249_p7  ;;  %s5845_s12 = smov [#allocation7]  }
  0x13   : > { %s7426_s10 = scalar_select %p5940_p6, 1, 0 }
  0x14   : > { %s264_s13 = sshll.u32 %s5845_s12, 4  ;;  %p5558_p9 = pneg %p5945_p8  ;;  %s265_s13 = int_to_ptr.vmem [resolvable:$true] %s264_s13 }
  0x15   : > { %7427 = sst [smem:[#allocation16_spill]] %s7426_s10  ;;  %p4756_p10 = scmp.ge.s32.totalorder %s5843_s29, 2 }
  0x16   : > { %p5954_p11 = pnand %p5558_p9, %p61_p1  ;;  %s38_s15 = sadd.s32 1, %s5839_s28 }
  0x17   : > { %s5684_s16 = scalar_lea.vmem %s265_s13, 1024  ;;  %p5692_p5 = scmp.lt.s32.totalorder %s265_s13, %s265_s13 }
  0x18   : > { %p5675_p12 = pneg %p5954_p11  ;;  %p5685_p13 = scmp.ne.s32.totalorder %s265_s13, %s5684_s16 }
  0x19   : > { %p5693_p7 = scmp.lt.s32.totalorder %s5684_s16, %s5684_s16 }
  0x1a   : > { %p5687_p0 = pnand %p5685_p13, %p5675_p12 }
  0x1b   : > { %p5694_p2 = por %p5693_p7, %p5692_p5 }
  0x1c   : > { %p5688_p3 = pneg %p5687_p0 }
  0x1e   : > { %p5695_p6 = pnand %p5694_p2, %p5688_p3 }
  0x20   : > { %5698 = shalt.err (!%p5695_p6)
}
  0x21   : > { %s5846_s17 = smov 64   ;;  %s5847_s18 = smov 4  }
  0x22   : > { %s7430_s6 = sld [smem:[#allocation50_spill]]  ;;  %p40_p2 = scmp.ge.s32.totalorder %s38_s15, 2 }
  0x23   : > { %s47_s21 = sadd.s32 1, %s5831_s26  ;;  %p54_p6 = scmp.ne.s32.totalorder %s5831_s26, %s5827_s25 }
  0x24   : > { %p55_p9 = scmp.eq.s32.totalorder %s5843_s29, 0  ;;  %s7511_s15 = smov (%p40_p2, %s38_s15), 0 }
  0x25   : > { %7431 = sst [smem:[#allocation17_spill]] %s7511_s15  ;;  %p7433_p13 = scmp.eq.s32.totalorder %s5926_s30, 1 }
  0x26   : > { %p5972_p12 = por %p55_p9, %p54_p6  ;;  %s42_s8 = ssub.s32 %s5839_s28, %s7511_s15 }
  0x27   : > { %p5978_p0 = por %p7433_p13, %p54_p6  ;;  %p45_p3 = scmp.eq.s32.totalorder %s42_s8, 0 }
  0x28   : > { %5561 = dma.hbm_to_vmem [thread:$0]  (!%p5954_p11), %s7430_s6, 1024, %s265_s13, [#allocation6], %s5846_s17, %s5846_s17, %s5847_s18  }
  0x29   : > { %p5574_p11 = scmp.lt.s32.totalorder %s5843_s29, 2  ;;  %s5986_s12 = sand.u32 1, %s5831_s26  }
  0x2a   : > { %s4757_s13 = sshll.u32 %s5986_s12, 7  ;;  %s4963_s16 = sshll.u32 %s5839_s28, 11 }
  0x2b   : > { %s5990_s14 = scalar_select %p45_p3, %s5831_s26, %s47_s21  }
  0x2c   : > { %s7436_s0 = sld [smem:[#allocation49_spill]]  ;;  %s282_s20 = scalar_lea.vmem [#allocation2], %s4757_s13 }
  0x2d   : > { %7435 = sst [smem:[#allocation18_spill]] %s5990_s14  ;;  %s292_s6 = sshll.u32 %s282_s20, 4  ;;  %s293_s6 = int_to_ptr.vmem [resolvable:$true] %s292_s6 }
  0x2e   : > { %p5998_p5 = pnand %p5574_p11, %p5972_p12  ;;  %s324_s8 = sand.u32 1, %s5843_s29  }
  0x2f   : > { %s279_s10 = scalar_lea.sflag [#allocation3], %s5986_s12  ;;  %s5712_s21 = scalar_lea.vmem %s293_s6, 2048 }
  0x30   : > { %p5701_p7 = pneg %p5998_p5  ;;  %p5713_p2 = scmp.ne.s32.totalorder %s293_s6, %s5712_s21 }
  0x31   : > { %s5848_s13 = smov [#allocation2]  }
  0x32   : > { %s291_s19 = scalar_lea.hbm %s7436_s0, %s4963_s16  ;;  %p5715_p6 = pnand %p5713_p2, %p5701_p7 }
  0x33   : > { %s5717_s16 = sshll.u32 %s5848_s13, 4  ;;  %s5718_s16 = int_to_ptr.vmem [resolvable:$false] %s5717_s16 }
  0x34   : > { %p5716_p9 = pneg %p5715_p6  ;;  %s5719_s22 = scalar_lea.vmem %s5718_s16, 4096 }
  0x35   : > { %p5720_p12 = scmp.lt.s32.totalorder %s293_s6, %s5718_s16  ;;  %p5721_p13 = scmp.lt.s32.totalorder %s5719_s22, %s5712_s21 }
  0x37   : > { %p5722_p11 = por %p5721_p13, %p5720_p12 }
  0x39   : > { %p5723_p3 = pnand %p5722_p11, %p5716_p9 }
  0x3b   : > { %5726 = shalt.err (!%p5723_p3)
}
  0x3c   : > { %s5849_s17 = smov 128   ;;  %s5850_s18 = smov 8  }
  0x3d   : > { %5565 = dma.hbm_to_vmem [thread:$0]  (!%p5998_p5), %s291_s19, 2048, %s293_s6, %s279_s10, %s5849_s17, %s5849_s17, %s5850_s18  }
  0x3e   : > { %s4760_s20 = sshll.u32 %s5986_s12, 4  ;;  %s4964_s0 = sshll.u32 %s5839_s28, 8 }
  0x3f   : > { %s334_s13 = scalar_lea.hbm %s7391_s3, %s4964_s0  ;;  %s328_s29 = scalar_lea.vmem [#allocation5], %s4760_s20 }
  0x40   : > { %s335_s16 = sshll.u32 %s328_s29, 4  ;;  %s325_s21 = scalar_lea.sflag [#allocation6], %s324_s8  ;;  %s336_s16 = int_to_ptr.vmem [resolvable:$true] %s335_s16 }
  0x41   : > { %s5740_s22 = scalar_lea.vmem %s336_s16, 256  ;;  %s5851_s24 = smov [#allocation5]  }
  0x42   : > { %p5741_p2 = scmp.ne.s32.totalorder %s336_s16, %s5740_s22  ;;  %s5745_s7 = sshll.u32 %s5851_s24, 4  ;;  %s5746_s7 = int_to_ptr.vmem [resolvable:$false] %s5745_s7 }
  0x43   : > { %s5747_s6 = scalar_lea.vmem %s5746_s7, 512  ;;  %p5748_p12 = scmp.lt.s32.totalorder %s336_s16, %s5746_s7 }
  0x44   : > { %p5743_p6 = pnand %p5741_p2, %p5701_p7  ;;  %p5749_p13 = scmp.lt.s32.totalorder %s5747_s6, %s5740_s22 }
  0x46   : > { %p5744_p9 = pneg %p5743_p6  ;;  %p5750_p11 = por %p5749_p13, %p5748_p12 }
  0x48   : > { %p5751_p3 = pnand %p5750_p11, %p5744_p9 }
  0x4a   : > { %5754 = shalt.err (!%p5751_p3)
}
  0x4b   : > { %5568 = dma.hbm_to_vmem [thread:$0]  (!%p5998_p5), %s334_s13, 256, %s336_s16, %s325_s21, %s5849_s17, %s5849_s17, %s5850_s18  }
  0x4c   : > { %361 = sbr.rel (%p5945_p8) target bundleno = 1406 (0x57e), region = 48 }
  0x51   : > { %s6024_s0 = sand.u32 1, %s5827_s25  }
  0x52   : > { %s4764_s24 = sshll.u32 %s6024_s0, 7  ;;  %s364_s26 = scalar_lea.sflag [#allocation3], %s6024_s0 }
  0x53   : > { %s6030_s7 = scalar_lea.vmem [#allocation2], %s4764_s24 }
  0x54   : > { %5806 = dma.done.wait (%p5935_p4), %s364_s26, 2048  }
  0x55   : > { %5808 = vsyncadd (%p5935_p4), %s364_s26, 4294965248  ;;  %s372_s29 = sand.u32 1, %s5926_s30   ;;  %s4765_s10 = sshll.u32 %s6024_s0, 4 }
  0x56   : > { %s373_s11 = scalar_lea.sflag [#allocation6], %s372_s29  ;;  %s6038_s15 = scalar_lea.vmem [#allocation5], %s4765_s10 }
  0x57   : > { %5810 = dma.done.wait (%p5935_p4), %s373_s11, 256  }
  0x58   : > { %5812 = vsyncadd (%p5935_p4), %s373_s11, 4294967040 }
  0x59   : > { %5814 = dma.done.wait (%p61_p1), [#allocation6], 1024  }
  0x5a   : > { %5816 = vsyncadd (%p61_p1), [#allocation6], 4294966272  ;;  %p443_p8 = scmp.lt.s32.totalorder %s5835_s27, 1  ;;  %v5633_v0 = vld [vmem:[#allocation7 + $0x20] sm:$0xff]   ;;  %v6064_v3 = vld [vmem:[%s6030_s7 + $0x8] sm:$0xff]  ;;  %vm643_vm0 = vcmask 130048  }
  0x5b   : > { %v6058_v1 = vld [vmem:[#allocation7] sm:$0xff]   ;;  %5188 = vmatprep.subr.bf16.mxu0 %v5633_v0  ;;  %v6069_v5 = vld [vmem:[%s6030_s7 + $0x48] sm:$0xff]  ;;  %v473_v12 = vld [vmem:[%s6030_s7 + $0x10] sm:$0xff]  ;;  %s7494_s6 = sld [smem:[#allocation51_spill]]  ;;  %s5852_s10 = smov [#allocation8]  }
  0x5c   : > { %s6050_s12 = scalar_select %p443_p8, %s5835_s27, 1  ;;  %v6061_v2 = vld [vmem:[%s6030_s7] sm:$0xff]  ;;  %5189 = vmatpush3.bf16.msra.mxu0 %v5633_v0  ;;  %5198 = vmatprep.subr.bf16.mxu1 %v6058_v1  ;;  %v474_v15 = vld [vmem:[%s6030_s7 + $0x18] sm:$0xff]  ;;  %v481_v16 = vld [vmem:[%s6030_s7 + $0x50] sm:$0xff] }
  0x5d   : > { %v479_v4 = vld [vmem:[%s6030_s7 + $0x40] sm:$0xff]  ;;  %5199 = vmatpush3.bf16.msra.mxu1 %v6058_v1  ;;  %5208 = vmatprep.subr.bf16.mxu0 %v6058_v1  ;;  %v482_v17 = vld [vmem:[%s6030_s7 + $0x58] sm:$0xff]  ;;  %v5635_v22 = vld [vmem:[#allocation7 + $0x28] sm:$0xff]  }
  0x5e   : > { %s4966_s14 = sshll.u32 %s6050_s12, 5  ;;  %v475_v25 = vld [vmem:[%s6030_s7 + $0x20] sm:$0xff]  ;;  %v476_v26 = vld [vmem:[%s6030_s7 + $0x28] sm:$0xff]  ;;  %5218 = vmatprep.subr.bf16.mxu1 %v5635_v22  ;;  %v6115_v33 = vld [vmem:[%s6030_s7 + $0x30] sm:$0xff]  ;;  %s4967_s11 = sshll.u32 %s6050_s12, 7 }
  0x5f   : > { %s6056_s8 = scalar_lea.vmem %s7390_s2, %s4966_s14  ;;  %v483_v27 = vld [vmem:[%s6030_s7 + $0x60] sm:$0xff]  ;;  %v484_v30 = vld [vmem:[%s6030_s7 + $0x68] sm:$0xff]  ;;  %v6118_v34 = vld [vmem:[%s6030_s7 + $0x38] sm:$0xff]  ;;  %s6523_s19 = scalar_lea.vmem %s7392_s4, %s4967_s11 }
  0x60   : > { %v6072_v6 = vld [vmem:[%s6056_s8] sm:$0xff]  ;;  %v6075_v7 = vld [vmem:[%s6056_s8 + $0x8] sm:$0xff]  ;;  %v6079_v8 = vld [vmem:[%s6056_s8 + $0x10] sm:$0xff]  ;;  %s4965_s20 = sshll.u32 %s6050_s12, 6  ;;  %s5759_s11 = sshll.u32 %s5852_s10, 4  ;;  %s5760_s11 = int_to_ptr.vmem [resolvable:$false] %s5759_s11 }
  0x61   : > { %v6082_v9 = vld [vmem:[%s6056_s8 + $0x18] sm:$0xff]  ;;  %v492_v10 = vmul.f32 %v6072_v6, %v6061_v2  ;;  %v493_v11 = vmul.f32 %v6075_v7, %v6064_v3  ;;  %v500_v13 = vmul.f32 %v6079_v8, %v479_v4  ;;  %v494_v18 = vmul.f32 %v6072_v6, %v473_v12  ;;  %v6125_v38 = vld [vmem:[%s6030_s7 + $0x70] sm:$0xff]  ;;  %v6137_v45 = vld [vmem:[#allocation7 + $0x8] sm:$0xff]   ;;  %s451_s21 = scalar_lea.vmem %s7389_s1, %s4965_s20  ;;  %s5761_s14 = scalar_lea.vmem %s5760_s11, 4096 }
  0x62   : > { %v501_v14 = vmul.f32 %v6082_v9, %v6069_v5  ;;  %v495_v19 = vmul.f32 %v6075_v7, %v474_v15  ;;  %v502_v20 = vmul.f32 %v6079_v8, %v481_v16  ;;  %v503_v21 = vmul.f32 %v6082_v9, %v482_v17  ;;  %v6128_v39 = vld [vmem:[%s6030_s7 + $0x78] sm:$0xff] }
  0x63   : > { %v6100_v23 = vsub.f32 %v492_v10, %v500_v13  ;;  %v496_v31 = vmul.f32 %v6072_v6, %v475_v25  ;;  %v497_v32 = vmul.f32 %v6075_v7, %v476_v26  ;;  %v518_v36 = vmul.f32 %v6079_v8, %v473_v12 }
  0x64   : > { %v6102_v24 = vsub.f32 %v493_v11, %v501_v14  ;;  %v6107_v28 = vsub.f32 %v494_v18, %v502_v20  ;;  %v6109_v29 = vsub.f32 %v495_v19, %v503_v21  ;;  %v504_v37 = vmul.f32 %v6079_v8, %v483_v27 }
  0x65   : > { %v524_v40 = vmul.f32 %v6072_v6, %v479_v4  ;;  %v519_v41 = vmul.f32 %v6082_v9, %v474_v15  ;;  %v505_v43 = vmul.f32 %v6082_v9, %v484_v30  ;;  %v498_v44 = vmul.f32 %v6072_v6, %v6115_v33 }
  0x66   : > { %v557_v35 = vpack.c.bf16 %v6102_v24, %v6100_v23  ;;  %v558_v42 = vpack.c.bf16 %v6109_v29, %v6107_v28  ;;  %v526_v46 = vmul.f32 %v6072_v6, %v481_v16  ;;  %v6142_v47 = vsub.f32 %v496_v31, %v504_v37 }
  0x67   : > { %v499_v48 = vmul.f32 %v6075_v7, %v6118_v34  ;;  %v527_v50 = vmul.f32 %v6075_v7, %v482_v17  ;;  %v6149_v51 = vsub.f32 %v497_v32, %v505_v43  ;;  %v506_v52 = vmul.f32 %v6079_v8, %v6125_v38 }
  0x68   : > { %5190 = vmatprep.mubr.msk.bf16.mxu0 %vm643_vm0, %v557_v35  ;;  %5200 = vmatprep.mubr.msk.bf16.mxu1 %vm643_vm0, %v557_v35  ;;  %v561_v49 = vunpack.c.l.bf16 %v557_v35  ;;  %v507_v53 = vmul.f32 %v6082_v9, %v6128_v39  ;;  %v562_v54 = vunpack.c.h.bf16 %v557_v35  ;;  %v516_v56 = vmul.f32 %v6079_v8, %v6061_v2 }
  0x69   : > { %5191 = vmatmul.mubr.msk.bf16.vlgmr.msra.gmra.mxu0 %vm643_vm0, %v558_v42  ;;  %5201 = vmatmul.mubr.msk.bf16.vlgmr.msra.gmra.mxu1 %vm643_vm0, %v558_v42  ;;  %v563_v57 = vunpack.c.l.bf16 %v558_v42  ;;  %v564_v58 = vunpack.c.h.bf16 %v558_v42  ;;  %v559_v59 = vpack.c.bf16 %v6149_v51, %v6142_v47  ;;  %v6161_v60 = vsub.f32 %v498_v44, %v506_v52 }
  0x6a   : > { %5209 = vmatpush3.bf16.msra.mxu0 %v6058_v1  ;;  %5219 = vmatpush3.bf16.msra.mxu1 %v5635_v22  ;;  %v569_v55 = vsub.f32 %v6100_v23, %v561_v49  ;;  %v6164_v61 = vsub.f32 %v499_v48, %v507_v53  ;;  %v570_v62 = vsub.f32 %v6102_v24, %v562_v54  ;;  %v5638_v48 = vld [vmem:[#allocation7 + $0x10] sm:$0xff]  }
  0x6b   : > { %5228 = vmatprep.subr.bf16.mxu0 %v6137_v45  ;;  %v517_v63 = vmul.f32 %v6082_v9, %v6064_v3  ;;  %v525_v0 = vmul.f32 %v6075_v7, %v6069_v5  ;;  %5238 = vmatprep.subr.bf16.mxu1 %v6137_v45  ;;  %v6172_v1 = vadd.f32 %v526_v46, %v518_v36  ;;  %v565_v12 = vunpack.c.l.bf16 %v559_v59  ;;  %v5637_v46 = vld [vmem:[#allocation7 + $0x30] sm:$0xff]  }
  0x6c   : > { %v6174_v2 = vadd.f32 %v527_v50, %v519_v41  ;;  %5194 = vmatprep.mubr.msk.bf16.mxu0 %vm643_vm0, %v559_v59  ;;  %5204 = vmatprep.mubr.msk.bf16.mxu1 %vm643_vm0, %v559_v59  ;;  %v6178_v4 = vadd.f32 %v524_v40, %v516_v56  ;;  %v560_v10 = vpack.c.bf16 %v6164_v61, %v6161_v60  ;;  %v566_v5 = vunpack.c.h.bf16 %v559_v59 }
  0x6d   : > { %v577_v11 = vpack.c.bf16 %v570_v62, %v569_v55  ;;  %v6182_v3 = vadd.f32 %v525_v0, %v517_v63  ;;  %v520_v13 = vmul.f32 %v6079_v8, %v475_v25  ;;  %v521_v14 = vmul.f32 %v6082_v9, %v476_v26 }
  0x6e   : > { %v528_v15 = vmul.f32 %v6072_v6, %v483_v27  ;;  %v571_v16 = vsub.f32 %v6107_v28, %v563_v57  ;;  %v572_v17 = vsub.f32 %v6109_v29, %v564_v58  ;;  %v529_v19 = vmul.f32 %v6075_v7, %v484_v30 }
  0x6f   : > { %v581_v18 = vpack.c.bf16 %v6182_v3, %v6178_v4  ;;  %v573_v20 = vsub.f32 %v6142_v47, %v565_v12  ;;  %v574_v21 = vsub.f32 %v6149_v51, %v566_v5  ;;  %v582_v27 = vpack.c.bf16 %v6174_v2, %v6172_v1 }
  0x70   : > { %v6198_v22 = vadd.f32 %v528_v15, %v520_v13  ;;  %v6200_v25 = vadd.f32 %v529_v19, %v521_v14  ;;  %v578_v26 = vpack.c.bf16 %v572_v17, %v571_v16  ;;  %v567_v30 = vunpack.c.l.bf16 %v560_v10 }
  0x71   : > { %5195 = vmatmul.mubr.msk.bf16.gmra.mxu0 %vm643_vm0, %v560_v10  ;;  %5205 = vmatmul.mubr.msk.bf16.gmra.mxu1 %vm643_vm0, %v560_v10  ;;  %v568_v31 = vunpack.c.h.bf16 %v560_v10  ;;  %v522_v32 = vmul.f32 %v6079_v8, %v6115_v33  ;;  %v523_v35 = vmul.f32 %v6082_v9, %v6118_v34  ;;  %v530_v36 = vmul.f32 %v6072_v6, %v6125_v38 }
  0x72   : > { %5210 = vmatprep.mubr.msk.bf16.mxu0 %vm643_vm0, %v577_v11  ;;  %5220 = vmatprep.mubr.msk.bf16.mxu1 %vm643_vm0, %v581_v18  ;;  %v531_v37 = vmul.f32 %v6075_v7, %v6128_v39  ;;  %v585_v40 = vunpack.c.l.bf16 %v581_v18  ;;  %v586_v41 = vunpack.c.h.bf16 %v581_v18  ;;  %v579_v42 = vpack.c.bf16 %v574_v21, %v573_v20 }
  0x73   : > { %v583_v43 = vpack.c.bf16 %v6200_v25, %v6198_v22  ;;  %v575_v44 = vsub.f32 %v6161_v60, %v567_v30  ;;  %v576_v8 = vsub.f32 %v6164_v61, %v568_v31  ;;  %v538_v6 = vadd.f32 %v530_v36, %v522_v32  ;;  %v6267_v36 = vld [vmem:[%s7393_s5 + $0x20] sm:$0xff]  }
  0x74   : > { %v539_v9 = vadd.f32 %v531_v37, %v523_v35  ;;  %v593_v7 = vsub.f32 %v6178_v4, %v585_v40  ;;  %v594_v33 = vsub.f32 %v6182_v3, %v586_v41  ;;  %v587_v39 = vunpack.c.l.bf16 %v582_v27 }
  0x75   : > { %v580_v34 = vpack.c.bf16 %v576_v8, %v575_v44  ;;  %v588_v49 = vunpack.c.h.bf16 %v582_v27  ;;  %v589_v52 = vunpack.c.l.bf16 %v583_v43  ;;  %v590_v53 = vunpack.c.h.bf16 %v583_v43 }
  0x76   : > { %v584_v38 = vpack.c.bf16 %v539_v9, %v538_v6  ;;  %v601_v50 = vpack.c.bf16 %v594_v33, %v593_v7  ;;  %v605_v10 = vadd.f32 %v6178_v4, %v6100_v23  ;;  %v606_v11 = vadd.f32 %v6182_v3, %v6102_v24 }
  0x77   : > { %v596_v54 = vsub.f32 %v6174_v2, %v588_v49  ;;  %v597_v55 = vsub.f32 %v6198_v22, %v589_v52  ;;  %v598_v56 = vsub.f32 %v6200_v25, %v590_v53  ;;  %v607_v13 = vadd.f32 %v6172_v1, %v6107_v28 }
  0x78   : > { %v591_v58 = vunpack.c.l.bf16 %v584_v38  ;;  %v592_v59 = vunpack.c.h.bf16 %v584_v38  ;;  %v613_v5 = vpack.c.bf16 %v606_v11, %v605_v10  ;;  %v608_v14 = vadd.f32 %v6174_v2, %v6109_v29 }
  0x79   : > { %5211 = vmatmul.mubr.msk.bf16.vlgmr.msra.gmra.mxu0 %vm643_vm0, %v578_v26  ;;  %5221 = vmatmul.mubr.msk.bf16.vlgmr.msra.gmra.mxu1 %vm643_vm0, %v582_v27  ;;  %v603_v62 = vpack.c.bf16 %v598_v56, %v597_v55  ;;  %v609_v23 = vadd.f32 %v6198_v22, %v6142_v47  ;;  %v610_v24 = vadd.f32 %v6200_v25, %v6149_v51 }
  0x7a   : > { %5229 = vmatpush3.bf16.msra.mxu0 %v6137_v45  ;;  %5239 = vmatpush3.bf16.msra.mxu1 %v6137_v45  ;;  %v595_v45 = vsub.f32 %v6172_v1, %v587_v39  ;;  %v599_v63 = vsub.f32 %v538_v6, %v591_v58  ;;  %v600_v0 = vsub.f32 %v539_v9, %v592_v59  ;;  %v617_v28 = vunpack.c.l.bf16 %v613_v5 }
  0x7b   : > { %5214 = vmatprep.mubr.msk.bf16.mxu0 %vm643_vm0, %v579_v42  ;;  %5224 = vmatprep.mubr.msk.bf16.mxu1 %vm643_vm0, %v583_v43  ;;  %v614_v4 = vpack.c.bf16 %v608_v14, %v607_v13  ;;  %v615_v3 = vpack.c.bf16 %v610_v24, %v609_v23  ;;  %v618_v1 = vunpack.c.h.bf16 %v613_v5  ;;  %v611_v29 = vadd.f32 %v538_v6, %v6161_v60 }
  0x7c   : > { %5248 = vmatprep.subr.bf16.mxu0 %v5637_v46  ;;  %5258 = vmatprep.subr.bf16.mxu1 %v5638_v48  ;;  %v602_v57 = vpack.c.bf16 %v596_v54, %v595_v45  ;;  %v604_v12 = vpack.c.bf16 %v600_v0, %v599_v63  ;;  %v612_v2 = vadd.f32 %v539_v9, %v6164_v61 }
  0x7d   : > { %v625_v15 = vsub.f32 %v605_v10, %v617_v28  ;;  %v626_v47 = vsub.f32 %v606_v11, %v618_v1  ;;  %v619_v16 = vunpack.c.l.bf16 %v614_v4  ;;  %v620_v17 = vunpack.c.h.bf16 %v614_v4 }
  0x7e   : > { %v616_v51 = vpack.c.bf16 %v612_v2, %v611_v29  ;;  %v621_v19 = vunpack.c.l.bf16 %v615_v3  ;;  %v622_v20 = vunpack.c.h.bf16 %v615_v3 }
  0x7f   : > { %v627_v60 = vsub.f32 %v607_v13, %v619_v16  ;;  %v628_v21 = vsub.f32 %v608_v14, %v620_v17 }
  0x80   : > { %v629_v61 = vsub.f32 %v609_v23, %v621_v19  ;;  %v630_v22 = vsub.f32 %v610_v24, %v622_v20  ;;  %v623_v26 = vunpack.c.l.bf16 %v616_v51 }
  0x81   : > { %5215 = vmatmul.mubr.msk.bf16.gmra.mxu0 %vm643_vm0, %v580_v34  ;;  %5225 = vmatmul.mubr.msk.bf16.gmra.mxu1 %vm643_vm0, %v584_v38  ;;  %v634_v25 = vpack.c.bf16 %v628_v21, %v627_v60 }
  0x82   : > { %5230 = vmatprep.mubr.msk.bf16.mxu0 %vm643_vm0, %v581_v18  ;;  %5240 = vmatprep.mubr.msk.bf16.mxu1 %vm643_vm0, %v601_v50  ;;  %v633_v18 = vpack.c.bf16 %v626_v47, %v625_v15  ;;  %v635_v30 = vpack.c.bf16 %v630_v22, %v629_v61  ;;  %v631_v31 = vsub.f32 %v611_v29, %v623_v26 }
  0x89   : > { %5231 = vmatmul.mubr.msk.bf16.vlgmr.msra.gmra.mxu0 %vm643_vm0, %v582_v27  ;;  %5241 = vmatmul.mubr.msk.bf16.vlgmr.msra.gmra.mxu1 %vm643_vm0, %v602_v57  ;;  %v624_v27 = vunpack.c.h.bf16 %v616_v51 }
  0x8a   : > { %5249 = vmatpush3.bf16.msra.mxu0 %v5637_v46  ;;  %5234 = vmatprep.mubr.msk.bf16.mxu0 %vm643_vm0, %v583_v43 }
  0x8b   : > { %5244 = vmatprep.mubr.msk.bf16.mxu1 %vm643_vm0, %v603_v62  ;;  %5259 = vmatpush3.bf16.msra.mxu1 %v5638_v48  ;;  %v632_v32 = vsub.f32 %v612_v2, %v624_v27 }
  0x8c   : > { %5268 = vmatprep.subr.bf16.mxu0 %v5638_v48  ;;  %5278 = vmatprep.subr.bf16.mxu1 %v6267_v36 }
  0x8d   : > { %v636_v35 = vpack.c.bf16 %v632_v32, %v631_v31 }
  0x91   : > { %5235 = vmatmul.mubr.msk.bf16.gmra.mxu0 %vm643_vm0, %v584_v38  ;;  %5245 = vmatmul.mubr.msk.bf16.gmra.mxu1 %vm643_vm0, %v604_v12 }
  0x92   : > { %5250 = vmatprep.mubr.msk.bf16.mxu0 %vm643_vm0, %v613_v5  ;;  %5260 = vmatprep.mubr.msk.bf16.mxu1 %vm643_vm0, %v613_v5 }
  0x99   : > { %5251 = vmatmul.mubr.msk.bf16.vlgmr.msra.gmra.mxu0 %vm643_vm0, %v614_v4  ;;  %5261 = vmatmul.mubr.msk.bf16.vlgmr.msra.gmra.mxu1 %vm643_vm0, %v614_v4 }
  0x9a   : > { %5269 = vmatpush3.bf16.msra.mxu0 %v5638_v48  ;;  %5254 = vmatprep.mubr.msk.bf16.mxu0 %vm643_vm0, %v615_v3 }
  0x9b   : > { %5264 = vmatprep.mubr.msk.bf16.mxu1 %vm643_vm0, %v615_v3  ;;  %5279 = vmatpush3.bf16.msra.mxu1 %v6267_v36 }
  0xa1   : > { %5255 = vmatmul.mubr.msk.bf16.gmra.mxu0 %vm643_vm0, %v616_v51  ;;  %5265 = vmatmul.mubr.msk.bf16.gmra.mxu1 %vm643_vm0, %v616_v51 }
  0xa2   : > { %5270 = vmatprep.mubr.msk.bf16.mxu0 %vm643_vm0, %v633_v18 }
  0xa9   : > { %5271 = vmatmul.mubr.msk.bf16.vlgmr.msra.gmra.mxu0 %vm643_vm0, %v634_v25  ;;  %v6300_v25 = vld [vmem:[%s7393_s5] sm:$0xff]  }
  0xaa   : > { %5274 = vmatprep.mubr.msk.bf16.mxu0 %vm643_vm0, %v635_v30  ;;  %5288 = vmatprep.subr.bf16.mxu0 %v6300_v25 }
  0xab   : > { %5289 = vmatpush3.bf16.msra.mxu0 %v6300_v25  ;;  %5298 = vmatprep.subr.bf16.mxu1 %v6300_v25 }
  0xb1   : > { %5275 = vmatmul.mubr.msk.bf16.gmra.mxu0 %vm643_vm0, %v636_v35 }
 0x129   : > { %v5192_v37 = vpop.f32.mrf.mxu0  ;;  %v5202_v40 = vpop.f32.mrf.mxu1 }
 0x12a   : > { %v770_v13 = vadd.f32 %v5202_v40, %v5192_v37 }
 0x12b   : > { %v690_v41 = vpop.f32.mrf.mxu0  ;;  %v761_v42 = vpop.f32.mrf.mxu1 }
 0x12c   : > { %v762_v4 = vadd.f32 %v761_v42, %v690_v41 }
 0x12d   : > { %v5193_v43 = vpop.f32.mrf.mxu0  ;;  %v5203_v44 = vpop.f32.mrf.mxu1 }
 0x12e   : > { %v773_v29 = vadd.f32 %v5203_v44, %v5193_v43 }
 0x12f   : > { %v693_v46 = vpop.f32.mrf.mxu0  ;;  %v764_v48 = vpop.f32.mrf.mxu1 }
 0x130   : > { %v765_v18 = vadd.f32 %v764_v48, %v693_v46 }
 0x131   : > { %v5196_v8 = vpop.f32.mrf.mxu0  ;;  %v5206_v6 = vpop.f32.mrf.mxu1 }
 0x132   : > { %v786_v26 = vadd.f32 %v5206_v6, %v5196_v8 }
 0x133   : > { %v706_v9 = vpop.f32.mrf.mxu0  ;;  %v777_v7 = vpop.f32.mrf.mxu1 }
 0x134   : > { %v778_v40 = vadd.f32 %v777_v7, %v706_v9 }
 0x135   : > { %v6271_v33 = vpop.f32.mrf.mxu0  ;;  %v6273_v34 = vpop.f32.mrf.mxu1 }
 0x136   : > { %v789_v8 = vadd.f32 %v6273_v34, %v6271_v33 }
 0x137   : > { %v6275_v38 = vpop.f32.mrf.mxu0  ;;  %v6277_v39 = vpop.f32.mrf.mxu1 }
 0x139   : > { %v5212_v49 = vpop.f32.mrf.mxu0  ;;  %v5222_v50 = vpop.f32.mrf.mxu1 }
 0x13a   : > { %v6281_v3 = vadd.f32 %v5212_v49, %v770_v13 }
 0x13b   : > { %v838_v52 = vpop.f32.mrf.mxu0  ;;  %v929_v53 = vpop.f32.mrf.mxu1 }
 0x13c   : > { %v6285_v47 = vadd.f32 %v838_v52, %v762_v4 }
 0x13d   : > { %v5213_v45 = vpop.f32.mrf.mxu0  ;;  %v5223_v54 = vpop.f32.mrf.mxu1 }
 0x13e   : > { %v6291_v60 = vadd.f32 %v5213_v45, %v773_v29 }
 0x13f   : > { %v841_v55 = vpop.f32.mrf.mxu0  ;;  %v932_v56 = vpop.f32.mrf.mxu1 }
 0x140   : > { %v6302_v27 = vadd.f32 %v841_v55, %v765_v18 }
 0x141   : > { %v5216_v57 = vpop.f32.mrf.mxu0  ;;  %v5226_v58 = vpop.f32.mrf.mxu1 }
 0x142   : > { %v6311_v43 = vadd.f32 %v5216_v57, %v786_v26 }
 0x143   : > { %v854_v59 = vpop.f32.mrf.mxu0  ;;  %v945_v62 = vpop.f32.mrf.mxu1 }
 0x144   : > { %v6319_v7 = vadd.f32 %v854_v59, %v778_v40 }
 0x145   : > { %v5217_v63 = vpop.f32.mrf.mxu0  ;;  %v5227_v0 = vpop.f32.mrf.mxu1 }
 0x146   : > { %v6327_v55 = vadd.f32 %v5217_v63, %v789_v8 }
 0x147   : > { %v6279_v10 = vpop.f32.mrf.mxu0  ;;  %v948_v11 = vpop.f32.mrf.mxu1 }
 0x149   : > { %v5232_v12 = vpop.f32.mrf.mxu0  ;;  %v5242_v5 = vpop.f32.mrf.mxu1 }
 0x14a   : > { %v1009_v14 = vadd.f32 %v5232_v12, %v5222_v50 }
 0x14b   : > { %v1000_v23 = vpop.f32.mrf.mxu0  ;;  %v1077_v24 = vpop.f32.mrf.mxu1 }
 0x14c   : > { %v6283_v28 = vadd.f32 %v5242_v5, %v1009_v14  ;;  %v1001_v1 = vadd.f32 %v1000_v23, %v929_v53  ;;  %v781_v53 = vadd.f32 %v6277_v39, %v6275_v38 }
 0x14d   : > { %v5233_v2 = vpop.f32.mrf.mxu0  ;;  %v5243_v15 = vpop.f32.mrf.mxu1 }
 0x14e   : > { %v6287_v51 = vadd.f32 %v1077_v24, %v1001_v1  ;;  %v1012_v16 = vadd.f32 %v5233_v2, %v5223_v54  ;;  %v1357_v17 = vsub.f32 %v6281_v3, %v6283_v28  ;;  %v6334_v59 = vadd.f32 %v6279_v10, %v781_v53  ;;  %v6345_v10 = vld [vmem:[%s7393_s5 + $0x28] sm:$0xff]  }
 0x14f   : > { %v1003_v19 = vpop.f32.mrf.mxu0  ;;  %v1080_v20 = vpop.f32.mrf.mxu1  ;;  %5308 = vmatprep.subr.bf16.mxu0 %v6345_v10 }
 0x150   : > { %v6293_v21 = vadd.f32 %v5243_v15, %v1012_v16  ;;  %v1004_v61 = vadd.f32 %v1003_v19, %v932_v56  ;;  %1411 = vxpose.xlu1.b32.start [1/2] (short) (narrow) %v1357_v17, 16  ;;  %v1355_v22 = vsub.f32 %v6285_v47, %v6287_v51 }
 0x151   : > { %v5236_v30 = vpop.f32.mrf.mxu0  ;;  %v5246_v31 = vpop.f32.mrf.mxu1 }
 0x152   : > { %v6304_v32 = vadd.f32 %v1080_v20, %v1004_v61  ;;  %v1025_v35 = vadd.f32 %v5236_v30, %v5226_v58  ;;  %1379 = vxpose.xlu0.b32.start [1/2] (short) (narrow) %v1355_v22, 16  ;;  %v1358_v37 = vsub.f32 %v6291_v60, %v6293_v21 }
 0x153   : > { %v1016_v41 = vpop.f32.mrf.mxu0  ;;  %v1093_v42 = vpop.f32.mrf.mxu1 }
 0x154   : > { %v6313_v44 = vadd.f32 %v5246_v31, %v1025_v35  ;;  %v1017_v46 = vadd.f32 %v1016_v41, %v945_v62  ;;  %1412 = vxpose.xlu1.b32.end [2/2] (short) (narrow) %v1358_v37, 16  ;;  %v1356_v48 = vsub.f32 %v6302_v27, %v6304_v32 }
 0x155   : > { %v5237_v6 = vpop.f32.mrf.mxu0  ;;  %v5247_v9 = vpop.f32.mrf.mxu1 }
 0x156   : > { %v6321_v49 = vadd.f32 %v1093_v42, %v1017_v46  ;;  %v1028_v50 = vadd.f32 %v5237_v6, %v5227_v0  ;;  %1380 = vxpose.xlu0.b32.end [2/2] (short) (narrow) %v1356_v48, 16  ;;  %v1361_v52 = vsub.f32 %v6311_v43, %v6313_v44 }
 0x157   : > { %v1019_v45 = vpop.f32.mrf.mxu0  ;;  %v1096_v54 = vpop.f32.mrf.mxu1 }
 0x158   : > { %v6329_v56 = vadd.f32 %v5247_v9, %v1028_v50  ;;  %v1020_v33 = vadd.f32 %v1019_v45, %v948_v11  ;;  %1475 = vxpose.xlu1.b32.start [1/2] (short) (narrow) %v1361_v52, 16  ;;  %v1359_v34 = vsub.f32 %v6319_v7, %v6321_v49 }
 0x159   : > { %v5252_v57 = vpop.f32.mrf.mxu0  ;;  %v5262_v58 = vpop.f32.mrf.mxu1 }
 0x15a   : > { %v1362_v62 = vsub.f32 %v6327_v55, %v6329_v56  ;;  %v6338_v38 = vadd.f32 %v1096_v54, %v1020_v33  ;;  %1443 = vxpose.xlu0.b32.start [1/2] (short) (narrow) %v1359_v34, 16  ;;  %v1248_v29 = vadd.f32 %v5262_v58, %v5252_v57 }
 0x15b   : > { %v1168_v39 = vpop.f32.mrf.mxu0  ;;  %v1239_v63 = vpop.f32.mrf.mxu1 }
 0x15c   : > { %v1360_v0 = vsub.f32 %v6334_v59, %v6338_v38  ;;  %1476 = vxpose.xlu1.b32.end [2/2] (short) (narrow) %v1362_v62, 16  ;;  %v1240_v15 = vadd.f32 %v1239_v63, %v1168_v39 }
 0x15d   : > { %v5253_v11 = vpop.f32.mrf.mxu0  ;;  %v5263_v12 = vpop.f32.mrf.mxu1 }
 0x15e   : > { %1444 = vxpose.xlu0.b32.end [2/2] (short) (narrow) %v1360_v0, 16  ;;  %v1251_v19 = vadd.f32 %v5263_v12, %v5253_v11 }
 0x15f   : > { %v1171_v5 = vpop.f32.mrf.mxu0  ;;  %v1242_v14 = vpop.f32.mrf.mxu1 }
 0x160   : > { %v1243_v26 = vadd.f32 %v1242_v14, %v1171_v5 }
 0x161   : > { %v5256_v13 = vpop.f32.mrf.mxu0  ;;  %v5266_v4 = vpop.f32.mrf.mxu1 }
 0x162   : > { %v1264_v41 = vadd.f32 %v5266_v4, %v5256_v13 }
 0x163   : > { %v1184_v23 = vpop.f32.mrf.mxu0  ;;  %v1255_v17 = vpop.f32.mrf.mxu1 }
 0x164   : > { %v1256_v6 = vadd.f32 %v1255_v17, %v1184_v23 }
 0x165   : > { %v5257_v24 = vpop.f32.mrf.mxu0  ;;  %v5267_v37 = vpop.f32.mrf.mxu1 }
 0x167   : > { %v1187_v1 = vpop.f32.mrf.mxu0  ;;  %v1258_v50 = vpop.f32.mrf.mxu1 }
 0x168   : > { %v1259_v33 = vadd.f32 %v1258_v50, %v1187_v1 }
 0x169   : > { %v5272_v2 = vpop.f32.mrf.mxu0 }
 0x16a   : > { %v1349_v16 = vadd.f32 %v5272_v2, %v1248_v29 }
 0x16b   : > { %v1316_v18 = vpop.f32.mrf.mxu0 }
 0x16c   : > { %v1365_v20 = vsub.f32 %v1349_v16, %v6281_v3  ;;  %v1347_v61 = vadd.f32 %v1316_v18, %v1240_v15 }
 0x16d   : > { %v5273_v22 = vpop.f32.mrf.mxu0 }
 0x16e   : > { %v1363_v30 = vsub.f32 %v1347_v61, %v6285_v47  ;;  %v1350_v31 = vadd.f32 %v5273_v22, %v1251_v19  ;;  %v1373_v35 = vsub.f32 %v1365_v20, %v6283_v28  ;;  %v1267_v28 = vadd.f32 %v5267_v37, %v5257_v24 }
 0x16f   : > { %v1319_v40 = vpop.f32.mrf.mxu0 }
 0x170   : > { %v1366_v42 = vsub.f32 %v1350_v31, %v6291_v60  ;;  %v1348_v46 = vadd.f32 %v1319_v40, %v1243_v26  ;;  %1539 = vxpose.xlu1.b32.start [1/2] (short) (narrow) %v1373_v35, 16  ;;  %v1371_v48 = vsub.f32 %v1363_v30, %v6287_v51  ;;  %v5643_v30 = vld [vmem:[%s7393_s5 + $0x30] sm:$0xff]  }
 0x171   : > { %v5276_v8 = vpop.f32.mrf.mxu0 }
 0x172   : > { %v1364_v3 = vsub.f32 %v1348_v46, %v6302_v27  ;;  %v1353_v9 = vadd.f32 %v5276_v8, %v1264_v41  ;;  %1507 = vxpose.xlu0.b32.start [1/2] (short) (narrow) %v1371_v48, 16  ;;  %v1374_v47 = vsub.f32 %v1366_v42, %v6293_v21 }
 0x173   : > { %v1332_v52 = vpop.f32.mrf.mxu0 }
 0x174   : > { %v1369_v53 = vsub.f32 %v1353_v9, %v6311_v43  ;;  %v1351_v45 = vadd.f32 %v1332_v52, %v1256_v6  ;;  %1540 = vxpose.xlu1.b32.end [2/2] (short) (narrow) %v1374_v47, 16  ;;  %v1372_v60 = vsub.f32 %v1364_v3, %v6304_v32  ;;  %v5644_v9 = vld [vmem:[%s7393_s5 + $0x10] sm:$0xff]  }
 0x175   : > { %v5277_v54 = vpop.f32.mrf.mxu0 }
 0x176   : > { %v1367_v51 = vsub.f32 %v1351_v45, %v6319_v7  ;;  %v1354_v34 = vadd.f32 %v5277_v54, %v1267_v28  ;;  %1508 = vxpose.xlu0.b32.end [2/2] (short) (narrow) %v1372_v60, 16  ;;  %v1377_v27 = vsub.f32 %v1369_v53, %v6313_v44 }
 0x177   : > { %v1335_v57 = vpop.f32.mrf.mxu0 }
 0x178   : > { %v1370_v21 = vsub.f32 %v1354_v34, %v6327_v55  ;;  %v1352_v58 = vadd.f32 %v1335_v57, %v1259_v33  ;;  %1603 = vxpose.xlu1.b32.start [1/2] (short) (narrow) %v1377_v27, 16  ;;  %v1375_v62 = vsub.f32 %v1367_v51, %v6321_v49 }
 0x17a   : > { %v1368_v43 = vsub.f32 %v1352_v58, %v6334_v59  ;;  %1571 = vxpose.xlu0.b32.start [1/2] (short) (narrow) %v1375_v62, 16  ;;  %v1378_v32 = vsub.f32 %v1370_v21, %v6329_v56  ;;  %v6381_v56 = vld [vmem:[%s7393_s5 + $0x8] sm:$0xff]  }
 0x17c   : > { %1604 = vxpose.xlu1.b32.end [2/2] (short) (narrow) %v1378_v32, 16  ;;  %v1376_v39 = vsub.f32 %v1368_v43, %v6338_v38 }
 0x17e   : > { %1572 = vxpose.xlu0.b32.end [2/2] (short) (narrow) %v1376_v39, 16 }
 0x1cc   : > { %v6364_v7 = vpop.trf.xlu1 }
 0x1ce   : > { %v6366_v63 = vpop.trf.xlu0 }
 0x1d0   : > { %v6368_v44 = vpop.trf.xlu1 }
 0x1d1   : > { %v1653_v59 = vpack.c.bf16 %v6368_v44, %v6364_v7 }
 0x1d2   : > { %v6370_v55 = vpop.trf.xlu0 }
 0x1d3   : > { %v1652_v49 = vpack.c.bf16 %v6370_v55, %v6366_v63  ;;  %v1658_v4 = vunpack.c.l.bf16 %v1653_v59  ;;  %v1659_v1 = vunpack.c.h.bf16 %v1653_v59 }
 0x1d4   : > { %v6376_v0 = vpop.trf.xlu1 }
 0x1d5   : > { %v1656_v38 = vunpack.c.l.bf16 %v1652_v49  ;;  %v1657_v11 = vunpack.c.h.bf16 %v1652_v49  ;;  %5280 = vmatprep.mubr.msk.bf16.mxu1 %vm643_vm0, %v1652_v49  ;;  %5290 = vmatprep.mubr.msk.bf16.mxu0 %vm643_vm0, %v1652_v49  ;;  %v1666_v17 = vsub.f32 %v6364_v7, %v1658_v4  ;;  %v1667_v18 = vsub.f32 %v6368_v44, %v1659_v1 }
 0x1d6   : > { %5281 = vmatmul.mubr.msk.bf16.vlgmr.msra.gmra.mxu1 %vm643_vm0, %v1653_v59  ;;  %5291 = vmatmul.mubr.msk.bf16.vlgmr.msra.gmra.mxu0 %vm643_vm0, %v1653_v59  ;;  %v6387_v12 = vpop.trf.xlu0 }
 0x1d7   : > { %5299 = vmatpush3.bf16.msra.mxu1 %v6300_v25  ;;  %5309 = vmatpush3.bf16.msra.mxu0 %v6345_v10  ;;  %v1664_v5 = vsub.f32 %v6366_v63, %v1656_v38  ;;  %v1665_v13 = vsub.f32 %v6370_v55, %v1657_v11  ;;  %v1673_v61 = vpack.c.bf16 %v1667_v18, %v1666_v17 }
 0x1d8   : > { %5318 = vmatprep.subr.bf16.mxu1 %v6381_v56  ;;  %5328 = vmatprep.subr.bf16.mxu0 %v6381_v56  ;;  %v6395_v14 = vpop.trf.xlu1 }
 0x1d9   : > { %v1655_v29 = vpack.c.bf16 %v6395_v14, %v6376_v0  ;;  %v1672_v2 = vpack.c.bf16 %v1665_v13, %v1664_v5 }
 0x1da   : > { %v6397_v23 = vpop.trf.xlu0 }
 0x1db   : > { %v1654_v24 = vpack.c.bf16 %v6397_v23, %v6387_v12  ;;  %v1662_v22 = vunpack.c.l.bf16 %v1655_v29  ;;  %v1663_v26 = vunpack.c.h.bf16 %v1655_v29 }
 0x1dd   : > { %v1660_v15 = vunpack.c.l.bf16 %v1654_v24  ;;  %v1661_v16 = vunpack.c.h.bf16 %v1654_v24  ;;  %5284 = vmatprep.mubr.msk.bf16.mxu1 %vm643_vm0, %v1654_v24  ;;  %5294 = vmatprep.mubr.msk.bf16.mxu0 %vm643_vm0, %v1654_v24  ;;  %v1670_v35 = vsub.f32 %v6376_v0, %v1662_v22  ;;  %v1671_v37 = vsub.f32 %v6395_v14, %v1663_v26 }
 0x1de   : > { %5285 = vmatmul.mubr.msk.bf16.gmra.mxu1 %vm643_vm0, %v1655_v29  ;;  %5295 = vmatmul.mubr.msk.bf16.gmra.mxu0 %vm643_vm0, %v1655_v29 }
 0x1df   : > { %5300 = vmatprep.mubr.msk.bf16.mxu1 %vm643_vm0, %v1672_v2  ;;  %v1668_v19 = vsub.f32 %v6387_v12, %v1660_v15  ;;  %v1669_v20 = vsub.f32 %v6397_v23, %v1661_v16  ;;  %v1675_v40 = vpack.c.bf16 %v1671_v37, %v1670_v35 }
 0x1e1   : > { %v1674_v31 = vpack.c.bf16 %v1669_v20, %v1668_v19 }
 0x1e6   : > { %5301 = vmatmul.mubr.msk.bf16.vlgmr.msra.gmra.mxu1 %vm643_vm0, %v1673_v61 }
 0x1e7   : > { %5304 = vmatprep.mubr.msk.bf16.mxu1 %vm643_vm0, %v1674_v31  ;;  %5319 = vmatpush3.bf16.msra.mxu1 %v6381_v56 }
 0x1e8   : > { %5338 = vmatprep.subr.bf16.mxu1 %v5643_v30 }
 0x1ec   : > { %v1555_v41 = vpop.trf.xlu1 }
 0x1ee   : > { %5305 = vmatmul.mubr.msk.bf16.gmra.mxu1 %vm643_vm0, %v1675_v40  ;;  %v1523_v42 = vpop.trf.xlu0 }
 0x1ef   : > { %v1700_v33 = vadd.f32 %v1523_v42, %v6366_v63 }
 0x1f0   : > { %v1556_v46 = vpop.trf.xlu1 }
 0x1f1   : > { %v1677_v6 = vpack.c.bf16 %v1556_v46, %v1555_v41  ;;  %v1703_v32 = vadd.f32 %v1556_v46, %v6368_v44 }
 0x1f2   : > { %v1524_v48 = vpop.trf.xlu0 }
 0x1f3   : > { %v1676_v8 = vpack.c.bf16 %v1524_v48, %v1523_v42  ;;  %v1701_v45 = vadd.f32 %v1524_v48, %v6370_v55  ;;  %v1682_v34 = vunpack.c.l.bf16 %v1677_v6  ;;  %v1683_v27 = vunpack.c.h.bf16 %v1677_v6 }
 0x1f4   : > { %v1619_v3 = vpop.trf.xlu1  ;;  %v1702_v55 = vadd.f32 %v1555_v41, %v6364_v7 }
 0x1f5   : > { %5310 = vmatprep.mubr.msk.bf16.mxu0 %vm643_vm0, %v1676_v8  ;;  %5320 = vmatprep.mubr.msk.bf16.mxu1 %vm643_vm0, %v1676_v8  ;;  %v1680_v47 = vunpack.c.l.bf16 %v1676_v8  ;;  %v1681_v50 = vunpack.c.h.bf16 %v1676_v8  ;;  %v1708_v58 = vpack.c.bf16 %v1701_v45, %v1700_v33  ;;  %v1690_v39 = vsub.f32 %v1555_v41, %v1682_v34 }
 0x1f6   : > { %5311 = vmatmul.mubr.msk.bf16.vlgmr.msra.gmra.mxu0 %vm643_vm0, %v1677_v6  ;;  %5321 = vmatmul.mubr.msk.bf16.vlgmr.msra.gmra.mxu1 %vm643_vm0, %v1677_v6  ;;  %v1587_v52 = vpop.trf.xlu0  ;;  %v1691_v63 = vsub.f32 %v1556_v46, %v1683_v27  ;;  %v1709_v11 = vpack.c.bf16 %v1703_v32, %v1702_v55  ;;  %v1706_v17 = vadd.f32 %v1619_v3, %v6376_v0 }
 0x1f7   : > { %5329 = vmatpush3.bf16.msra.mxu0 %v6381_v56  ;;  %5339 = vmatpush3.bf16.msra.mxu1 %v5643_v30  ;;  %v1688_v28 = vsub.f32 %v1523_v42, %v1680_v47  ;;  %v1689_v53 = vsub.f32 %v1524_v48, %v1681_v50  ;;  %v1704_v13 = vadd.f32 %v1587_v52, %v6387_v12  ;;  %v1713_v1 = vunpack.c.h.bf16 %v1708_v58 }
 0x1f8   : > { %5348 = vmatprep.subr.bf16.mxu0 %v5644_v9  ;;  %v1620_v60 = vpop.trf.xlu1  ;;  %5358 = vmatprep.subr.bf16.mxu1 %v5644_v9  ;;  %v1697_v5 = vpack.c.bf16 %v1691_v63, %v1690_v39  ;;  %v1712_v29 = vunpack.c.l.bf16 %v1708_v58  ;;  %v1714_v18 = vunpack.c.l.bf16 %v1709_v11  ;;  %v1715_v19 = vunpack.c.h.bf16 %v1709_v11 }
 0x1f9   : > { %v1679_v57 = vpack.c.bf16 %v1620_v60, %v1619_v3  ;;  %v1696_v21 = vpack.c.bf16 %v1689_v53, %v1688_v28  ;;  %v1721_v12 = vsub.f32 %v1701_v45, %v1713_v1 }
 0x1fa   : > { %v1588_v54 = vpop.trf.xlu0  ;;  %v1720_v16 = vsub.f32 %v1700_v33, %v1712_v29  ;;  %v1723_v31 = vsub.f32 %v1703_v32, %v1715_v19 }
 0x1fb   : > { %v1678_v51 = vpack.c.bf16 %v1588_v54, %v1587_v52  ;;  %v1705_v38 = vadd.f32 %v1588_v54, %v6397_v23  ;;  %v1686_v24 = vunpack.c.l.bf16 %v1679_v57  ;;  %v1687_v4 = vunpack.c.h.bf16 %v1679_v57 }
 0x1fc   : > { %v1707_v23 = vadd.f32 %v1620_v60, %v6395_v14  ;;  %v1728_v26 = vpack.c.bf16 %v1721_v12, %v1720_v16  ;;  %v1722_v14 = vsub.f32 %v1702_v55, %v1714_v18 }
 0x1fd   : > { %v1684_v62 = vunpack.c.l.bf16 %v1678_v51  ;;  %5314 = vmatprep.mubr.msk.bf16.mxu0 %vm643_vm0, %v1678_v51  ;;  %5324 = vmatprep.mubr.msk.bf16.mxu1 %vm643_vm0, %v1678_v51  ;;  %v1685_v43 = vunpack.c.h.bf16 %v1678_v51  ;;  %v1710_v2 = vpack.c.bf16 %v1705_v38, %v1704_v13  ;;  %v1694_v7 = vsub.f32 %v1619_v3, %v1686_v24 }
 0x1fe   : > { %5315 = vmatmul.mubr.msk.bf16.gmra.mxu0 %vm643_vm0, %v1679_v57  ;;  %5325 = vmatmul.mubr.msk.bf16.gmra.mxu1 %vm643_vm0, %v1679_v57  ;;  %v1695_v15 = vsub.f32 %v1620_v60, %v1687_v4  ;;  %v1711_v61 = vpack.c.bf16 %v1707_v23, %v1706_v17  ;;  %v1729_v0 = vpack.c.bf16 %v1723_v31, %v1722_v14 }
 0x1ff   : > { %5330 = vmatprep.mubr.msk.bf16.mxu0 %vm643_vm0, %v1696_v21  ;;  %5340 = vmatprep.mubr.msk.bf16.mxu1 %vm643_vm0, %v1708_v58  ;;  %v1692_v49 = vsub.f32 %v1587_v52, %v1684_v62  ;;  %v1693_v59 = vsub.f32 %v1588_v54, %v1685_v43  ;;  %v1717_v22 = vunpack.c.h.bf16 %v1710_v2  ;;  %v1716_v30 = vunpack.c.l.bf16 %v1710_v2 }
 0x200   : > { %v1699_v20 = vpack.c.bf16 %v1695_v15, %v1694_v7  ;;  %v1719_v40 = vunpack.c.h.bf16 %v1711_v61  ;;  %v1718_v41 = vunpack.c.l.bf16 %v1711_v61 }
 0x201   : > { %v1698_v44 = vpack.c.bf16 %v1693_v59, %v1692_v49  ;;  %v1725_v35 = vsub.f32 %v1705_v38, %v1717_v22  ;;  %v1724_v37 = vsub.f32 %v1704_v13, %v1716_v30 }
 0x202   : > { %v1727_v46 = vsub.f32 %v1707_v23, %v1719_v40  ;;  %v1726_v48 = vsub.f32 %v1706_v17, %v1718_v41 }
 0x203   : > { %v1730_v42 = vpack.c.bf16 %v1725_v35, %v1724_v37 }
 0x204   : > { %v1731_v8 = vpack.c.bf16 %v1727_v46, %v1726_v48 }
 0x206   : > { %5331 = vmatmul.mubr.msk.bf16.vlgmr.msra.gmra.mxu0 %vm643_vm0, %v1697_v5  ;;  %5341 = vmatmul.mubr.msk.bf16.vlgmr.msra.gmra.mxu1 %vm643_vm0, %v1709_v11 }
 0x207   : > { %5349 = vmatpush3.bf16.msra.mxu0 %v5644_v9  ;;  %5334 = vmatprep.mubr.msk.bf16.mxu0 %vm643_vm0, %v1698_v44 }
 0x208   : > { %5344 = vmatprep.mubr.msk.bf16.mxu1 %vm643_vm0, %v1710_v2  ;;  %5359 = vmatpush3.bf16.msra.mxu1 %v5644_v9 }
 0x209   : > { %5368 = vmatprep.subr.bf16.mxu0 %v6267_v36  ;;  %5378 = vmatprep.subr.bf16.mxu1 %v6300_v25 }
 0x20e   : > { %5335 = vmatmul.mubr.msk.bf16.gmra.mxu0 %vm643_vm0, %v1699_v20  ;;  %5345 = vmatmul.mubr.msk.bf16.gmra.mxu1 %vm643_vm0, %v1711_v61 }
 0x20f   : > { %5350 = vmatprep.mubr.msk.bf16.mxu0 %vm643_vm0, %v1708_v58  ;;  %5360 = vmatprep.mubr.msk.bf16.mxu1 %vm643_vm0, %v1728_v26 }
 0x216   : > { %5351 = vmatmul.mubr.msk.bf16.vlgmr.msra.gmra.mxu0 %vm643_vm0, %v1709_v11  ;;  %5361 = vmatmul.mubr.msk.bf16.vlgmr.msra.gmra.mxu1 %vm643_vm0, %v1729_v0 }
 0x217   : > { %5354 = vmatprep.mubr.msk.bf16.mxu0 %vm643_vm0, %v1710_v2  ;;  %5364 = vmatprep.mubr.msk.bf16.mxu1 %vm643_vm0, %v1730_v42 }
 0x218   : > { %5369 = vmatpush3.bf16.msra.mxu0 %v6267_v36  ;;  %5379 = vmatpush3.bf16.msra.mxu1 %v6300_v25 }
 0x219   : > { %5388 = vmatprep.subr.bf16.mxu0 %v6300_v25  ;;  %5398 = vmatprep.subr.bf16.mxu1 %v6345_v10 }
 0x21e   : > { %5355 = vmatmul.mubr.msk.bf16.gmra.mxu0 %vm643_vm0, %v1711_v61  ;;  %5365 = vmatmul.mubr.msk.bf16.gmra.mxu1 %vm643_vm0, %v1731_v8 }
 0x296   : > { %v5282_v6 = vpop.f32.mrf.mxu1  ;;  %v5292_v3 = vpop.f32.mrf.mxu0 }
 0x297   : > { %v1864_v19 = vadd.f32 %v5292_v3, %v5282_v6  ;;  %v6507_v3 = vld [vmem:[%s6038_s15 + $0x8] sm:$0xff] }
 0x298   : > { %v1784_v9 = vpop.f32.mrf.mxu1  ;;  %v1855_v50 = vpop.f32.mrf.mxu0 }
 0x299   : > { %v1856_v20 = vadd.f32 %v1855_v50, %v1784_v9 }
 0x29a   : > { %v5283_v47 = vpop.f32.mrf.mxu1  ;;  %v5293_v36 = vpop.f32.mrf.mxu0 }
 0x29b   : > { %v1867_v30 = vadd.f32 %v5293_v36, %v5283_v47 }
 0x29c   : > { %v1787_v52 = vpop.f32.mrf.mxu1  ;;  %v1858_v60 = vpop.f32.mrf.mxu0 }
 0x29d   : > { %v1859_v41 = vadd.f32 %v1858_v60, %v1787_v52  ;;  %v6514_v52 = vld [vmem:[%s6038_s15] sm:$0xff] }
 0x29e   : > { %v6463_v28 = vpop.f32.mrf.mxu1  ;;  %v6469_v51 = vpop.f32.mrf.mxu0 }
 0x2a0   : > { %v1800_v53 = vpop.f32.mrf.mxu1  ;;  %v1871_v57 = vpop.f32.mrf.mxu0 }
 0x2a2   : > { %v6465_v45 = vpop.f32.mrf.mxu1  ;;  %v5297_v62 = vpop.f32.mrf.mxu0 }
 0x2a4   : > { %v6467_v54 = vpop.f32.mrf.mxu1  ;;  %v6477_v39 = vpop.f32.mrf.mxu0 }
 0x2a6   : > { %v5302_v33 = vpop.f32.mrf.mxu1 }
 0x2a7   : > { %v6491_v35 = vadd.f32 %v5302_v33, %v1864_v19  ;;  %v1872_v33 = vadd.f32 %v1871_v57, %v1800_v53  ;;  %v1880_v57 = vadd.f32 %v6469_v51, %v6463_v28 }
 0x2a8   : > { %v1932_v34 = vpop.f32.mrf.mxu1 }
 0x2a9   : > { %v6493_v37 = vadd.f32 %v1932_v34, %v1856_v20 }
 0x2aa   : > { %v5303_v27 = vpop.f32.mrf.mxu1 }
 0x2ab   : > { %v6497_v42 = vadd.f32 %v5303_v27, %v1867_v30 }
 0x2ac   : > { %v1935_v21 = vpop.f32.mrf.mxu1 }
 0x2ad   : > { %v6511_v50 = vadd.f32 %v1935_v21, %v1859_v41 }
 0x2ae   : > { %v6471_v58 = vpop.f32.mrf.mxu1 }
 0x2b0   : > { %v6473_v43 = vpop.f32.mrf.mxu1 }
 0x2b2   : > { %v6475_v32 = vpop.f32.mrf.mxu1 }
 0x2b4   : > { %v6479_v63 = vpop.f32.mrf.mxu1 }
 0x2b6   : > { %v5312_v55 = vpop.f32.mrf.mxu0  ;;  %v5322_v49 = vpop.f32.mrf.mxu1 }
 0x2b7   : > { %v2103_v12 = vadd.f32 %v5322_v49, %v5312_v55  ;;  %v2478_v49 = vld [vmem:[%s6523_s19 + $0x18] sm:$0xff] }
 0x2b8   : > { %v2023_v59 = vpop.f32.mrf.mxu0  ;;  %v2094_v38 = vpop.f32.mrf.mxu1 }
 0x2b9   : > { %v2095_v18 = vadd.f32 %v2094_v38, %v2023_v59  ;;  %v1883_v38 = vadd.f32 %v5297_v62, %v6465_v45  ;;  %v1875_v45 = vadd.f32 %v6477_v39, %v6467_v54 }
 0x2ba   : > { %v5313_v11 = vpop.f32.mrf.mxu0  ;;  %v5323_v5 = vpop.f32.mrf.mxu1 }
 0x2bb   : > { %v2106_v14 = vadd.f32 %v5323_v5, %v5313_v11  ;;  %v6559_v20 = vadd.f32 %v6475_v32, %v1883_v38  ;;  %v6575_v32 = vadd.f32 %v6479_v63, %v1875_v45  ;;  %v2480_v38 = vld [vmem:[%s6523_s19 + $0x28] sm:$0xff] }
 0x2bc   : > { %v2026_v13 = vpop.f32.mrf.mxu0  ;;  %v2097_v24 = vpop.f32.mrf.mxu1 }
 0x2bd   : > { %v2098_v46 = vadd.f32 %v2097_v24, %v2026_v13  ;;  %v2476_v13 = vld [vmem:[%s6523_s19 + $0x8] sm:$0xff] }
 0x2be   : > { %v5316_v4 = vpop.f32.mrf.mxu0  ;;  %v5326_v1 = vpop.f32.mrf.mxu1 }
 0x2bf   : > { %v2119_v21 = vadd.f32 %v5326_v1, %v5316_v4  ;;  %v6540_v4 = vadd.f32 %v6473_v43, %v1872_v33  ;;  %v2477_v1 = vld [vmem:[%s6523_s19 + $0x10] sm:$0xff]  ;;  %v6556_v43 = vadd.f32 %v6471_v58, %v1880_v57  ;;  %v2479_v57 = vld [vmem:[%s6523_s19 + $0x20] sm:$0xff] }
 0x2c0   : > { %v2039_v44 = vpop.f32.mrf.mxu0  ;;  %v2110_v29 = vpop.f32.mrf.mxu1 }
 0x2c1   : > { %v2111_v55 = vadd.f32 %v2110_v29, %v2039_v44  ;;  %v2475_v44 = vld [vmem:[%s6523_s19] sm:$0xff] }
 0x2c2   : > { %v5317_v2 = vpop.f32.mrf.mxu0  ;;  %v5327_v7 = vpop.f32.mrf.mxu1 }
 0x2c3   : > { %v2122_v51 = vadd.f32 %v5327_v7, %v5317_v2 }
 0x2c4   : > { %v6481_v15 = vpop.f32.mrf.mxu0  ;;  %v2113_v23 = vpop.f32.mrf.mxu1 }
 0x2c6   : > { %v5332_v16 = vpop.f32.mrf.mxu0  ;;  %v6483_v17 = vpop.f32.mrf.mxu1 }
 0x2c7   : > { %v6485_v61 = vadd.f32 %v5332_v16, %v2103_v12 }
 0x2c8   : > { %v2171_v22 = vpop.f32.mrf.mxu0  ;;  %v6487_v26 = vpop.f32.mrf.mxu1 }
 0x2c9   : > { %v6489_v31 = vadd.f32 %v2171_v22, %v2095_v18  ;;  %v2451_v8 = vsub.f32 %v6491_v35, %v6485_v61 }
 0x2ca   : > { %v5333_v0 = vpop.f32.mrf.mxu0  ;;  %v6495_v40 = vpop.f32.mrf.mxu1 }
 0x2cb   : > { %v6500_v48 = vadd.f32 %v5333_v0, %v2106_v14  ;;  %v2449_v6 = vsub.f32 %v6493_v37, %v6489_v31  ;;  %v2493_v11 = vmul.f32 %v6514_v52, %v2451_v8  ;;  %v2114_v14 = vadd.f32 %v2113_v23, %v6481_v15 }
 0x2cc   : > { %v2174_v9 = vpop.f32.mrf.mxu0  ;;  %v6509_v47 = vpop.f32.mrf.mxu1 }
 0x2cd   : > { %v2452_v36 = vsub.f32 %v6497_v42, %v6500_v48  ;;  %v6518_v60 = vadd.f32 %v2174_v9, %v2098_v46  ;;  %v2491_v5 = vmul.f32 %v6514_v52, %v2449_v6  ;;  %v6566_v54 = vsub.f32 %v2493_v11, %v2477_v1 }
 0x2ce   : > { %v5336_v34 = vpop.f32.mrf.mxu0  ;;  %v6525_v27 = vpop.f32.mrf.mxu1 }
 0x2cf   : > { %v2494_v59 = vmul.f32 %v6507_v3, %v2452_v36  ;;  %v2450_v53 = vsub.f32 %v6511_v50, %v6518_v60  ;;  %v6545_v16 = vadd.f32 %v5336_v34, %v2119_v21  ;;  %v6568_v39 = vsub.f32 %v2491_v5, %v2475_v44  ;;  %v2482_v36 = vld [vmem:[%s6523_s19 + $0x38] sm:$0xff]  ;;  %v2481_v5 = vld [vmem:[%s6523_s19 + $0x30] sm:$0xff] }
 0x2d0   : > { %v2187_v24 = vpop.f32.mrf.mxu0  ;;  %v6537_v12 = vpop.f32.mrf.mxu1 }
 0x2d1   : > { %v2492_v29 = vmul.f32 %v6507_v3, %v2450_v53  ;;  %v6547_v28 = vadd.f32 %v2187_v24, %v2111_v55  ;;  %v6551_v62 = vsub.f32 %v2494_v59, %v2478_v49  ;;  %v2455_v0 = vsub.f32 %v6556_v43, %v6545_v16 }
 0x2d2   : > { %v5337_v18 = vpop.f32.mrf.mxu0  ;;  %v6553_v19 = vpop.f32.mrf.mxu1 }
 0x2d3   : > { %v6561_v22 = vsub.f32 %v2492_v29, %v2476_v13  ;;  %v2453_v30 = vsub.f32 %v6540_v4, %v6547_v28  ;;  %v6570_v2 = vadd.f32 %v5337_v18, %v2122_v51  ;;  %v6581_v41 = vpack.c.bf16 %v6551_v62, %v6566_v54 }
 0x2d4   : > { %v2190_v7 = vpop.f32.mrf.mxu0  ;;  %v6572_v58 = vpop.f32.mrf.mxu1  ;;  %v2497_v53 = vmul.f32 %v6514_v52, %v2455_v0 }
 0x2d5   : > { %v2456_v15 = vsub.f32 %v6559_v20, %v6570_v2  ;;  %v6585_v23 = vadd.f32 %v2190_v7, %v2114_v14  ;;  %v2529_v63 = vpack.c.bf16 %v6561_v22, %v6568_v39  ;;  %v2495_v6 = vmul.f32 %v6514_v52, %v2453_v30 }
 0x2d6   : > { %v5352_v46 = vpop.f32.mrf.mxu0  ;;  %v5362_v8 = vpop.f32.mrf.mxu1  ;;  %v2535_v11 = vunpack.c.l.bf16 %v6581_v41  ;;  %v6622_v0 = vsub.f32 %v2497_v53, %v2481_v5 }
 0x2d7   : > { %v2342_v9 = vadd.f32 %v5352_v46, %v6483_v17  ;;  %v2498_v33 = vmul.f32 %v6507_v3, %v2456_v15  ;;  %v2454_v34 = vsub.f32 %v6575_v32, %v6585_v23  ;;  %5370 = vmatprep.mubr.msk.bf16.mxu0 %vm643_vm0, %v2529_v63  ;;  %5380 = vmatprep.mubr.msk.bf16.mxu1 %vm643_vm0, %v2529_v63  ;;  %v2533_v49 = vunpack.c.l.bf16 %v2529_v63 }
 0x2d8   : > { %v2333_v21 = vpop.f32.mrf.mxu0  ;;  %v2410_v55 = vpop.f32.mrf.mxu1  ;;  %v2534_v59 = vunpack.c.h.bf16 %v2529_v63  ;;  %5371 = vmatmul.mubr.msk.bf16.vlgmr.msra.gmra.mxu0 %vm643_vm0, %v6581_v41  ;;  %5381 = vmatmul.mubr.msk.bf16.vlgmr.msra.gmra.mxu1 %vm643_vm0, %v6581_v41  ;;  %v6614_v51 = vsub.f32 %v2495_v6, %v2479_v57 }
 0x2d9   : > { %v2334_v17 = vadd.f32 %v2333_v21, %v6487_v26  ;;  %v2496_v13 = vmul.f32 %v6507_v3, %v2454_v34  ;;  %5389 = vmatpush3.bf16.msra.mxu0 %v6300_v25  ;;  %5399 = vmatpush3.bf16.msra.mxu1 %v6345_v10  ;;  %v6610_v44 = vsub.f32 %v2498_v33, %v2482_v36  ;;  %v2536_v10 = vunpack.c.h.bf16 %v6581_v41 }
 0x2da   : > { %v5353_v24 = vpop.f32.mrf.mxu0  ;;  %v5363_v1 = vpop.f32.mrf.mxu1  ;;  %v2443_v26 = vadd.f32 %v5362_v8, %v2342_v9  ;;  %5408 = vmatprep.subr.bf16.mxu0 %v6381_v56  ;;  %v2541_v25 = vsub.f32 %v6568_v39, %v2533_v49  ;;  %v2542_v7 = vsub.f32 %v6561_v22, %v2534_v59  ;;  %5418 = vmatprep.subr.bf16.mxu1 %v6381_v56 }
 0x2db   : > { %v2441_v29 = vadd.f32 %v2410_v55, %v2334_v17  ;;  %v2345_v45 = vadd.f32 %v5353_v24, %v6495_v40  ;;  %v6616_v18 = vsub.f32 %v2496_v13, %v2480_v38  ;;  %v2532_v41 = vpack.c.bf16 %v6610_v44, %v6622_v0 }
 0x2dc   : > { %v2336_v30 = vpop.f32.mrf.mxu0  ;;  %v2413_v14 = vpop.f32.mrf.mxu1  ;;  %v2459_v9 = vsub.f32 %v2443_v26, %v6491_v35  ;;  %v2549_v21 = vpack.c.bf16 %v2542_v7, %v2541_v25  ;;  %v2543_v59 = vsub.f32 %v6566_v54, %v2535_v11  ;;  %v2544_v35 = vsub.f32 %v6551_v62, %v2536_v10 }
 0x2dd   : > { %v2444_v15 = vadd.f32 %v5363_v1, %v2345_v45  ;;  %v2337_v40 = vadd.f32 %v2336_v30, %v6509_v47  ;;  %v2457_v46 = vsub.f32 %v2441_v29, %v6493_v37  ;;  %v2531_v6 = vpack.c.bf16 %v6616_v18, %v6614_v51  ;;  %v2484_v29 = vld [vmem:[%s6523_s19 + $0x48] sm:$0xff]  ;;  %v2486_v30 = vld [vmem:[%s6523_s19 + $0x58] sm:$0xff] }
 0x2de   : > { %v5356_v8 = vpop.f32.mrf.mxu0  ;;  %v5366_v63 = vpop.f32.mrf.mxu1  ;;  %v2467_v11 = vsub.f32 %v2459_v9, %v6485_v61  ;;  %v2550_v1 = vpack.c.bf16 %v2544_v35, %v2543_v59  ;;  %v2539_v7 = vunpack.c.l.bf16 %v2532_v41  ;;  %v2488_v35 = vld [vmem:[%s6523_s19 + $0x68] sm:$0xff] }
 0x2df   : > { %v2460_v36 = vsub.f32 %v2444_v15, %v6497_v42  ;;  %v2442_v33 = vadd.f32 %v2413_v14, %v2337_v40  ;;  %v2358_v34 = vadd.f32 %v5356_v8, %v6525_v27  ;;  %5374 = vmatprep.mubr.msk.bf16.mxu0 %vm643_vm0, %v2531_v6  ;;  %5384 = vmatprep.mubr.msk.bf16.mxu1 %vm643_vm0, %v2531_v6  ;;  %v2537_v55 = vunpack.c.l.bf16 %v2531_v6  ;;  %v2483_v15 = vld [vmem:[%s6523_s19 + $0x40] sm:$0xff] }
 0x2e0   : > { %v2349_v37 = vpop.f32.mrf.mxu0  ;;  %v2426_v47 = vpop.f32.mrf.mxu1  ;;  %v2538_v49 = vunpack.c.h.bf16 %v2531_v6  ;;  %5375 = vmatmul.mubr.msk.bf16.gmra.mxu0 %vm643_vm0, %v2532_v41  ;;  %v2465_v27 = vsub.f32 %v2457_v46, %v6489_v31  ;;  %5385 = vmatmul.mubr.msk.bf16.gmra.mxu1 %vm643_vm0, %v2532_v41  ;;  %v2509_v10 = vmul.f32 %v6514_v52, %v2467_v11  ;;  %v2540_v8 = vunpack.c.h.bf16 %v2532_v41 }
 0x2e1   : > { %v2468_v42 = vsub.f32 %v2460_v36, %v6500_v48  ;;  %v2458_v53 = vsub.f32 %v2442_v33, %v6511_v50  ;;  %v2350_v57 = vadd.f32 %v2349_v37, %v6537_v12  ;;  %5390 = vmatprep.mubr.msk.bf16.mxu0 %vm643_vm0, %v2549_v21  ;;  %v2447_v5 = vadd.f32 %v5366_v63, %v2358_v34  ;;  %v5645_v63 = vld [vmem:[%s7393_s5 + $0x38] sm:$0xff]  }
 0x2e2   : > { %v5357_v38 = vpop.f32.mrf.mxu0  ;;  %v5367_v17 = vpop.f32.mrf.mxu1  ;;  %v2545_v24 = vsub.f32 %v6614_v51, %v2537_v55  ;;  %v2546_v12 = vsub.f32 %v6616_v18, %v2538_v49  ;;  %v2547_v37 = vsub.f32 %v6622_v0, %v2539_v7  ;;  %v2487_v49 = vld [vmem:[%s6523_s19 + $0x60] sm:$0xff] }
 0x2e3   : > { %v2466_v48 = vsub.f32 %v2458_v53, %v6518_v60  ;;  %v2445_v50 = vadd.f32 %v2426_v47, %v2350_v57  ;;  %v2361_v13 = vadd.f32 %v5357_v38, %v6553_v19  ;;  %v2510_v26 = vmul.f32 %v6507_v3, %v2468_v42  ;;  %v2490_v42 = vld [vmem:[%s6523_s19 + $0x78] sm:$0xff] }
 0x2e4   : > { %v2352_v31 = vpop.f32.mrf.mxu0  ;;  %v2507_v60 = vmul.f32 %v6514_v52, %v2465_v27  ;;  %v2429_v25 = vpop.f32.mrf.mxu1  ;;  %v2463_v40 = vsub.f32 %v2447_v5, %v6556_v43  ;;  %v2551_v36 = vpack.c.bf16 %v2546_v12, %v2545_v24  ;;  %v2548_v47 = vsub.f32 %v6610_v44, %v2540_v8  ;;  %v5649_v8 = vld [vmem:[#allocation7 + $0x20] sm:$0xff]  }
 0x2e5   : > { %v2508_v45 = vmul.f32 %v6507_v3, %v2466_v48  ;;  %v2353_v61 = vadd.f32 %v2352_v31, %v6572_v58  ;;  %v2461_v19 = vsub.f32 %v2445_v50, %v6540_v4  ;;  %v2448_v14 = vadd.f32 %v5367_v17, %v2361_v13  ;;  %v2485_v58 = vld [vmem:[%s6523_s19 + $0x50] sm:$0xff] }
 0x2e6   : > { %v6665_v33 = vsub.f32 %v2510_v26, %v2486_v30  ;;  %v2515_v43 = vsub.f32 %v2507_v60, %v2483_v15  ;;  %v2552_v38 = vpack.c.bf16 %v2548_v47, %v2547_v37  ;;  %v2489_v17 = vld [vmem:[%s6523_s19 + $0x70] sm:$0xff] }
 0x2e7   : > { %v2446_v46 = vadd.f32 %v2429_v25, %v2353_v61  ;;  %v2516_v6 = vsub.f32 %v2508_v45, %v2484_v29  ;;  %v2469_v9 = vsub.f32 %v2461_v19, %v6547_v28  ;;  %v2464_v4 = vsub.f32 %v2448_v14, %v6559_v20 }
 0x2e8   : > { %5391 = vmatmul.mubr.msk.bf16.vlgmr.msra.gmra.mxu0 %vm643_vm0, %v2550_v1  ;;  %v6672_v28 = vsub.f32 %v2509_v10, %v2485_v58  ;;  %v2471_v20 = vsub.f32 %v2463_v40, %v6545_v16  ;;  %v6687_v16 = vld [vmem:[%s7393_s5 + $0x18] sm:$0xff]   ;;  %v2577_v10 = vadd.f32 %v2515_v43, %v6568_v39 }
 0x2e9   : > { %v2462_v34 = vsub.f32 %v2446_v46, %v6575_v32  ;;  %v2472_v41 = vsub.f32 %v2464_v4, %v6570_v2  ;;  %5409 = vmatpush3.bf16.msra.mxu0 %v6381_v56  ;;  %5394 = vmatprep.mubr.msk.bf16.mxu0 %vm643_vm0, %v2551_v36  ;;  %v2511_v32 = vmul.f32 %v6514_v52, %v2469_v9 }
 0x2ea   : > { %5428 = vmatprep.subr.bf16.mxu0 %v5645_v63  ;;  %v2553_v2 = vpack.c.bf16 %v2516_v6, %v2515_v43  ;;  %v2554_v55 = vpack.c.bf16 %v6665_v33, %v6672_v28  ;;  %v2513_v57 = vmul.f32 %v6514_v52, %v2471_v20  ;;  %v2578_v30 = vadd.f32 %v2516_v6, %v6561_v22 }
 0x2eb   : > { %v2470_v21 = vsub.f32 %v2462_v34, %v6585_v23  ;;  %v2514_v59 = vmul.f32 %v6507_v3, %v2472_v41  ;;  %v2519_v11 = vsub.f32 %v2511_v32, %v2487_v49  ;;  %v2580_v22 = vadd.f32 %v6665_v33, %v6551_v62 }
 0x2ec   : > { %5400 = vmatprep.mubr.msk.bf16.mxu1 %vm643_vm0, %v2553_v2  ;;  %v2557_v27 = vunpack.c.l.bf16 %v2553_v2  ;;  %v2558_v23 = vunpack.c.h.bf16 %v2553_v2  ;;  %v2521_v31 = vsub.f32 %v2513_v57, %v2489_v17  ;;  %v2559_v52 = vunpack.c.l.bf16 %v2554_v55 }
 0x2ed   : > { %v2512_v53 = vmul.f32 %v6507_v3, %v2470_v21  ;;  %5401 = vmatmul.mubr.msk.bf16.vlgmr.msra.gmra.mxu1 %vm643_vm0, %v2554_v55  ;;  %v2522_v5 = vsub.f32 %v2514_v59, %v2490_v42  ;;  %v2560_v24 = vunpack.c.h.bf16 %v2554_v55  ;;  %v2585_v15 = vpack.c.bf16 %v2578_v30, %v2577_v10  ;;  %v6739_v42 = vld [vmem:[#allocation7 + $0x28] sm:$0xff]  }
 0x2ee   : > { %5419 = vmatpush3.bf16.msra.mxu1 %v6381_v56  ;;  %v2565_v50 = vsub.f32 %v2515_v43, %v2557_v27  ;;  %v2566_v13 = vsub.f32 %v2516_v6, %v2558_v23  ;;  %v2567_v56 = vsub.f32 %v6672_v28, %v2559_v52  ;;  %v2581_v6 = vadd.f32 %v2519_v11, %v6614_v51 }
 0x2ef   : > { %v2520_v48 = vsub.f32 %v2512_v53, %v2488_v35  ;;  %5438 = vmatprep.subr.bf16.mxu1 %v6687_v16  ;;  %v2556_v12 = vpack.c.bf16 %v2522_v5, %v2521_v31  ;;  %v2568_v45 = vsub.f32 %v6665_v33, %v2560_v24  ;;  %v2589_v36 = vunpack.c.l.bf16 %v2585_v15 }
 0x2f0   : > { %5395 = vmatmul.mubr.msk.bf16.gmra.mxu0 %vm643_vm0, %v2552_v38  ;;  %v2573_v1 = vpack.c.bf16 %v2566_v13, %v2565_v50  ;;  %v2590_v34 = vunpack.c.h.bf16 %v2585_v15  ;;  %v2584_v62 = vadd.f32 %v2522_v5, %v6610_v44  ;;  %v2583_v33 = vadd.f32 %v2521_v31, %v6622_v0 }
 0x2f1   : > { %5410 = vmatprep.mubr.msk.bf16.mxu0 %vm643_vm0, %v2553_v2  ;;  %v2555_v3 = vpack.c.bf16 %v2520_v48, %v2519_v11  ;;  %v2574_v19 = vpack.c.bf16 %v2568_v45, %v2567_v56  ;;  %v2563_v14 = vunpack.c.l.bf16 %v2556_v12  ;;  %v2564_v25 = vunpack.c.h.bf16 %v2556_v12 }
 0x2f2   : > { %v2582_v39 = vadd.f32 %v2520_v48, %v6616_v18  ;;  %v2597_v51 = vsub.f32 %v2577_v10, %v2589_v36  ;;  %v2598_v18 = vsub.f32 %v2578_v30, %v2590_v34 }
 0x2f3   : > { %5404 = vmatprep.mubr.msk.bf16.mxu1 %vm643_vm0, %v2555_v3  ;;  %v2561_v26 = vunpack.c.l.bf16 %v2555_v3  ;;  %v2562_v29 = vunpack.c.h.bf16 %v2555_v3  ;;  %v2571_v40 = vsub.f32 %v2521_v31, %v2563_v14  ;;  %v2572_v46 = vsub.f32 %v2522_v5, %v2564_v25 }
 0x2f4   : > { %v2587_v4 = vpack.c.bf16 %v2582_v39, %v2581_v6  ;;  %v2605_v20 = vpack.c.bf16 %v2598_v18, %v2597_v51 }
 0x2f5   : > { %5405 = vmatmul.mubr.msk.bf16.gmra.mxu1 %vm643_vm0, %v2556_v12  ;;  %v2569_v61 = vsub.f32 %v2519_v11, %v2561_v26  ;;  %v2570_v60 = vsub.f32 %v2520_v48, %v2562_v29  ;;  %v2576_v58 = vpack.c.bf16 %v2572_v46, %v2571_v40 }
 0x2f6   : > { %5420 = vmatprep.mubr.msk.bf16.mxu1 %vm643_vm0, %v2573_v1  ;;  %v2593_v37 = vunpack.c.l.bf16 %v2587_v4  ;;  %v2594_v47 = vunpack.c.h.bf16 %v2587_v4 }
 0x2f7   : > { %v2575_v7 = vpack.c.bf16 %v2570_v60, %v2569_v61 }
 0x2f8   : > { %5411 = vmatmul.mubr.msk.bf16.vlgmr.msra.gmra.mxu0 %vm643_vm0, %v2554_v55  ;;  %v2601_v0 = vsub.f32 %v2581_v6, %v2593_v37  ;;  %v2602_v21 = vsub.f32 %v2582_v39, %v2594_v47 }
 0x2f9   : > { %5429 = vmatpush3.bf16.msra.mxu0 %v5645_v63  ;;  %5414 = vmatprep.mubr.msk.bf16.mxu0 %vm643_vm0, %v2555_v3  ;;  %v2579_v63 = vadd.f32 %v6672_v28, %v6566_v54  ;;  %v6726_v54 = vld [vmem:[#allocation7] sm:$0xff]   ;;  %v2588_v28 = vpack.c.bf16 %v2584_v62, %v2583_v33 }
 0x2fa   : > { %5448 = vmatprep.subr.bf16.mxu0 %v6687_v16  ;;  %v2607_v59 = vpack.c.bf16 %v2602_v21, %v2601_v0 }
 0x2fb   : > { %v2586_v9 = vpack.c.bf16 %v2580_v22, %v2579_v63  ;;  %v2595_v55 = vunpack.c.l.bf16 %v2588_v28  ;;  %v2596_v49 = vunpack.c.h.bf16 %v2588_v28 }
 0x2fd   : > { %5421 = vmatmul.mubr.msk.bf16.vlgmr.msra.gmra.mxu1 %vm643_vm0, %v2574_v19  ;;  %v2591_v43 = vunpack.c.l.bf16 %v2586_v9  ;;  %v2592_v41 = vunpack.c.h.bf16 %v2586_v9  ;;  %v2603_v35 = vsub.f32 %v2583_v33, %v2595_v55 }
 0x2fe   : > { %5424 = vmatprep.mubr.msk.bf16.mxu1 %vm643_vm0, %v2575_v7  ;;  %5439 = vmatpush3.bf16.msra.mxu1 %v6687_v16 }
 0x2ff   : > { %5458 = vmatprep.subr.bf16.mxu1 %v5649_v8  ;;  %v2599_v44 = vsub.f32 %v2579_v63, %v2591_v43  ;;  %v2600_v32 = vsub.f32 %v2580_v22, %v2592_v41 }
 0x300   : > { %5415 = vmatmul.mubr.msk.bf16.gmra.mxu0 %vm643_vm0, %v2556_v12 }
 0x301   : > { %5430 = vmatprep.mubr.msk.bf16.mxu0 %vm643_vm0, %v2585_v15  ;;  %v2606_v2 = vpack.c.bf16 %v2600_v32, %v2599_v44 }
 0x305   : > { %5425 = vmatmul.mubr.msk.bf16.gmra.mxu1 %vm643_vm0, %v2576_v58 }
 0x306   : > { %5440 = vmatprep.mubr.msk.bf16.mxu1 %vm643_vm0, %v2585_v15 }
 0x308   : > { %5431 = vmatmul.mubr.msk.bf16.vlgmr.msra.gmra.mxu0 %vm643_vm0, %v2586_v9 }
 0x309   : > { %5449 = vmatpush3.bf16.msra.mxu0 %v6687_v16  ;;  %5434 = vmatprep.mubr.msk.bf16.mxu0 %vm643_vm0, %v2587_v4  ;;  %v2604_v16 = vsub.f32 %v2584_v62, %v2596_v49 }
 0x30a   : > { %5468 = vmatprep.subr.bf16.mxu0 %v6726_v54 }
 0x30b   : > { %v2608_v53 = vpack.c.bf16 %v2604_v16, %v2603_v35 }
 0x30d   : > { %5441 = vmatmul.mubr.msk.bf16.vlgmr.msra.gmra.mxu1 %vm643_vm0, %v2586_v9 }
 0x30e   : > { %5444 = vmatprep.mubr.msk.bf16.mxu1 %vm643_vm0, %v2587_v4  ;;  %5459 = vmatpush3.bf16.msra.mxu1 %v5649_v8 }
 0x30f   : > { %5478 = vmatprep.subr.bf16.mxu1 %v6726_v54 }
 0x310   : > { %5435 = vmatmul.mubr.msk.bf16.gmra.mxu0 %vm643_vm0, %v2588_v28 }
 0x311   : > { %5450 = vmatprep.mubr.msk.bf16.mxu0 %vm643_vm0, %v2605_v20 }
 0x315   : > { %5445 = vmatmul.mubr.msk.bf16.gmra.mxu1 %vm643_vm0, %v2588_v28 }
 0x318   : > { %5451 = vmatmul.mubr.msk.bf16.vlgmr.msra.gmra.mxu0 %vm643_vm0, %v2606_v2 }
 0x319   : > { %5454 = vmatprep.mubr.msk.bf16.mxu0 %vm643_vm0, %v2607_v59  ;;  %5469 = vmatpush3.bf16.msra.mxu0 %v6726_v54 }
 0x31a   : > { %5488 = vmatprep.subr.bf16.mxu0 %v6739_v42 }
 0x320   : > { %5455 = vmatmul.mubr.msk.bf16.gmra.mxu0 %vm643_vm0, %v2608_v53 }
 0x398   : > { %v5372_v27 = vpop.f32.mrf.mxu0  ;;  %v5382_v23 = vpop.f32.mrf.mxu1 }
 0x399   : > { %v2729_v58 = vadd.f32 %v5382_v23, %v5372_v27 }
 0x39a   : > { %v2655_v57 = vpop.f32.mrf.mxu0  ;;  %v2720_v38 = vpop.f32.mrf.mxu1 }
 0x39b   : > { %v2721_v36 = vadd.f32 %v2720_v38, %v2655_v57 }
 0x39c   : > { %v5373_v17 = vpop.f32.mrf.mxu0  ;;  %v5383_v11 = vpop.f32.mrf.mxu1 }
 0x39d   : > { %v2732_v18 = vadd.f32 %v5383_v11, %v5373_v17 }
 0x39e   : > { %v2658_v48 = vpop.f32.mrf.mxu0  ;;  %v2723_v5 = vpop.f32.mrf.mxu1 }
 0x39f   : > { %v2724_v47 = vadd.f32 %v2723_v5, %v2658_v48 }
 0x3a0   : > { %v5376_v3 = vpop.f32.mrf.mxu0  ;;  %v5386_v50 = vpop.f32.mrf.mxu1 }
 0x3a1   : > { %v2745_v49 = vadd.f32 %v5386_v50, %v5376_v3 }
 0x3a2   : > { %v2671_v13 = vpop.f32.mrf.mxu0  ;;  %v2736_v31 = vpop.f32.mrf.mxu1 }
 0x3a3   : > { %v2737_v57 = vadd.f32 %v2736_v31, %v2671_v13 }
 0x3a4   : > { %v5377_v52 = vpop.f32.mrf.mxu0  ;;  %v5387_v12 = vpop.f32.mrf.mxu1 }
 0x3a5   : > { %v2748_v50 = vadd.f32 %v5387_v12, %v5377_v52 }
 0x3a6   : > { %v6743_v24 = vpop.f32.mrf.mxu0  ;;  %v6745_v29 = vpop.f32.mrf.mxu1 }
 0x3a7   : > { %v2740_v31 = vadd.f32 %v6745_v29, %v6743_v24 }
 0x3a8   : > { %v5392_v1 = vpop.f32.mrf.mxu0 }
 0x3a9   : > { %v6749_v34 = vadd.f32 %v5392_v1, %v2729_v58 }
 0x3aa   : > { %v2797_v26 = vpop.f32.mrf.mxu0 }
 0x3ab   : > { %v6753_v41 = vadd.f32 %v2797_v26, %v2721_v36 }
 0x3ac   : > { %v5393_v56 = vpop.f32.mrf.mxu0 }
 0x3ad   : > { %v5402_v45 = vpop.f32.mrf.mxu1  ;;  %v6759_v0 = vadd.f32 %v5393_v56, %v2732_v18 }
 0x3ae   : > { %v2800_v61 = vpop.f32.mrf.mxu0 }
 0x3af   : > { %v2882_v60 = vpop.f32.mrf.mxu1  ;;  %v6765_v16 = vadd.f32 %v2800_v61, %v2724_v47 }
 0x3b0   : > { %v5396_v30 = vpop.f32.mrf.mxu0 }
 0x3b1   : > { %v5403_v19 = vpop.f32.mrf.mxu1  ;;  %v6771_v11 = vadd.f32 %v5396_v30, %v2745_v49 }
 0x3b2   : > { %v2813_v14 = vpop.f32.mrf.mxu0 }
 0x3b3   : > { %v2885_v25 = vpop.f32.mrf.mxu1  ;;  %v6777_v56 = vadd.f32 %v2813_v14, %v2737_v57 }
 0x3b4   : > { %v5397_v7 = vpop.f32.mrf.mxu0 }
 0x3b5   : > { %v5406_v10 = vpop.f32.mrf.mxu1 }
 0x3b6   : > { %v6747_v15 = vpop.f32.mrf.mxu0 }
 0x3b7   : > { %v2898_v40 = vpop.f32.mrf.mxu1 }
 0x3b8   : > { %v5412_v46 = vpop.f32.mrf.mxu0 }
 0x3b9   : > { %v5407_v8 = vpop.f32.mrf.mxu1  ;;  %v2956_v6 = vadd.f32 %v5412_v46, %v5402_v45 }
 0x3ba   : > { %v2947_v22 = vpop.f32.mrf.mxu0 }
 0x3bb   : > { %v2901_v39 = vpop.f32.mrf.mxu1  ;;  %v2948_v62 = vadd.f32 %v2947_v22, %v2882_v60 }
 0x3bc   : > { %v5413_v63 = vpop.f32.mrf.mxu0 }
 0x3bd   : > { %v5422_v9 = vpop.f32.mrf.mxu1  ;;  %v2959_v28 = vadd.f32 %v5413_v63, %v5403_v19  ;;  %v6785_v19 = vadd.f32 %v5397_v7, %v2748_v50 }
 0x3be   : > { %v2950_v4 = vpop.f32.mrf.mxu0  ;;  %v6751_v51 = vadd.f32 %v5422_v9, %v2956_v6 }
 0x3bf   : > { %v3024_v33 = vpop.f32.mrf.mxu1  ;;  %v2951_v21 = vadd.f32 %v2950_v4, %v2885_v25 }
 0x3c0   : > { %v5416_v43 = vpop.f32.mrf.mxu0  ;;  %v6755_v20 = vadd.f32 %v3024_v33, %v2948_v62  ;;  %v3304_v37 = vadd.f32 %v6751_v51, %v6749_v34 }
 0x3c1   : > { %v5423_v44 = vpop.f32.mrf.mxu1  ;;  %v2972_v53 = vadd.f32 %v5416_v43, %v5406_v10 }
 0x3c2   : > { %v2963_v32 = vpop.f32.mrf.mxu0  ;;  %v6761_v2 = vadd.f32 %v5423_v44, %v2959_v28  ;;  %3358 = vxpose.xlu1.b32.start [1/2] (short) (narrow) %v3304_v37, 16  ;;  %v3302_v55 = vadd.f32 %v6755_v20, %v6753_v41 }
 0x3c3   : > { %v3027_v59 = vpop.f32.mrf.mxu1  ;;  %v2964_v48 = vadd.f32 %v2963_v32, %v2898_v40  ;;  %v6792_v40 = vadd.f32 %v6747_v15, %v2740_v31 }
 0x3c4   : > { %v5417_v35 = vpop.f32.mrf.mxu0  ;;  %v3305_v27 = vadd.f32 %v6761_v2, %v6759_v0  ;;  %v6769_v23 = vadd.f32 %v3027_v59, %v2951_v21  ;;  %3326 = vxpose.xlu0.b32.start [1/2] (short) (narrow) %v3302_v55, 16 }
 0x3c5   : > { %v5426_v38 = vpop.f32.mrf.mxu1  ;;  %v2975_v45 = vadd.f32 %v5417_v35, %v5407_v8 }
 0x3c6   : > { %v2966_v17 = vpop.f32.mrf.mxu0  ;;  %v3303_v5 = vadd.f32 %v6769_v23, %v6765_v16  ;;  %v6775_v3 = vadd.f32 %v5426_v38, %v2972_v53  ;;  %3359 = vxpose.xlu1.b32.end [2/2] (short) (narrow) %v3305_v27, 16 }
 0x3c7   : > { %v3040_v1 = vpop.f32.mrf.mxu1  ;;  %v2967_v25 = vadd.f32 %v2966_v17, %v2901_v39 }
 0x3c8   : > { %v5432_v26 = vpop.f32.mrf.mxu0  ;;  %v6779_v61 = vadd.f32 %v3040_v1, %v2964_v48  ;;  %3327 = vxpose.xlu0.b32.end [2/2] (short) (narrow) %v3303_v5, 16  ;;  %v3308_v13 = vadd.f32 %v6775_v3, %v6771_v11 }
 0x3c9   : > { %v5427_v60 = vpop.f32.mrf.mxu1 }
 0x3ca   : > { %v3115_v30 = vpop.f32.mrf.mxu0  ;;  %v6787_v52 = vadd.f32 %v5427_v60, %v2975_v45  ;;  %3422 = vxpose.xlu1.b32.start [1/2] (short) (narrow) %v3308_v13, 16  ;;  %v3306_v12 = vadd.f32 %v6779_v61, %v6777_v56 }
 0x3cb   : > { %v3043_v14 = vpop.f32.mrf.mxu1 }
 0x3cc   : > { %v5433_v10 = vpop.f32.mrf.mxu0  ;;  %v3309_v46 = vadd.f32 %v6787_v52, %v6785_v19  ;;  %v6796_v24 = vadd.f32 %v3043_v14, %v2967_v25  ;;  %3390 = vxpose.xlu0.b32.start [1/2] (short) (narrow) %v3306_v12, 16 }
 0x3cd   : > { %v5442_v29 = vpop.f32.mrf.mxu1 }
 0x3ce   : > { %v3118_v7 = vpop.f32.mrf.mxu0  ;;  %v3307_v8 = vadd.f32 %v6796_v24, %v6792_v40  ;;  %3423 = vxpose.xlu1.b32.end [2/2] (short) (narrow) %v3309_v46, 16  ;;  %v3195_v36 = vadd.f32 %v5442_v29, %v5432_v26 }
 0x3cf   : > { %v3186_v22 = vpop.f32.mrf.mxu1 }
 0x3d0   : > { %v5436_v39 = vpop.f32.mrf.mxu0  ;;  %3391 = vxpose.xlu0.b32.end [2/2] (short) (narrow) %v3307_v8, 16  ;;  %v3187_v18 = vadd.f32 %v3186_v22, %v3115_v30  ;;  %v5652_v8 = vld [vmem:[#allocation7 + $0x8] sm:$0xff]  }
 0x3d1   : > { %v5443_v63 = vpop.f32.mrf.mxu1 }
 0x3d2   : > { %v3131_v58 = vpop.f32.mrf.mxu0  ;;  %v3198_v37 = vadd.f32 %v5443_v63, %v5433_v10 }
 0x3d3   : > { %v3189_v6 = vpop.f32.mrf.mxu1 }
 0x3d4   : > { %v5437_v15 = vpop.f32.mrf.mxu0  ;;  %v3190_v21 = vadd.f32 %v3189_v6, %v3118_v7 }
 0x3d5   : > { %v5446_v9 = vpop.f32.mrf.mxu1 }
 0x3d6   : > { %v3134_v4 = vpop.f32.mrf.mxu0  ;;  %v3211_v27 = vadd.f32 %v5446_v9, %v5436_v39 }
 0x3d7   : > { %v3202_v43 = vpop.f32.mrf.mxu1 }
 0x3d8   : > { %v5452_v62 = vpop.f32.mrf.mxu0  ;;  %v3203_v5 = vadd.f32 %v3202_v43, %v3131_v58 }
 0x3d9   : > { %v3296_v33 = vadd.f32 %v5452_v62, %v3195_v36  ;;  %v5447_v35 = vpop.f32.mrf.mxu1 }
 0x3da   : > { %v3263_v28 = vpop.f32.mrf.mxu0 }
 0x3db   : > { %v3312_v47 = vsub.f32 %v3296_v33, %v6749_v34  ;;  %v3294_v44 = vadd.f32 %v3263_v28, %v3187_v18  ;;  %v3205_v1 = vpop.f32.mrf.mxu1 }
 0x3dc   : > { %v5453_v32 = vpop.f32.mrf.mxu0  ;;  %v3206_v60 = vadd.f32 %v3205_v1, %v3134_v4 }
 0x3dd   : > { %v3310_v55 = vsub.f32 %v3294_v44, %v6753_v41  ;;  %v3297_v49 = vadd.f32 %v5453_v32, %v3198_v37  ;;  %v3320_v59 = vadd.f32 %v3312_v47, %v6751_v51  ;;  %v3214_v51 = vadd.f32 %v5447_v35, %v5437_v15  ;;  %v5647_v44 = vld [vmem:[#allocation7 + $0x38] sm:$0xff]  }
 0x3de   : > { %v3266_v53 = vpop.f32.mrf.mxu0 }
 0x3df   : > { %v3313_v57 = vsub.f32 %v3297_v49, %v6759_v0  ;;  %v3295_v38 = vadd.f32 %v3266_v53, %v3190_v21  ;;  %3486 = vxpose.xlu1.b32.start [1/2] (short) (narrow) %v3320_v59, 16  ;;  %v3318_v17 = vadd.f32 %v3310_v55, %v6755_v20 }
 0x3e0   : > { %v5456_v48 = vpop.f32.mrf.mxu0 }
 0x3e1   : > { %v3311_v34 = vsub.f32 %v3295_v38, %v6765_v16  ;;  %v3300_v50 = vadd.f32 %v5456_v48, %v3211_v27  ;;  %3454 = vxpose.xlu0.b32.start [1/2] (short) (narrow) %v3318_v17, 16  ;;  %v3321_v41 = vadd.f32 %v3313_v57, %v6761_v2  ;;  %v5648_v48 = vld [vmem:[#allocation7 + $0x18] sm:$0xff]  }
 0x3e2   : > { %v3279_v26 = vpop.f32.mrf.mxu0 }
 0x3e3   : > { %v3316_v45 = vsub.f32 %v3300_v50, %v6771_v11  ;;  %v3298_v13 = vadd.f32 %v3279_v26, %v3203_v5  ;;  %3487 = vxpose.xlu1.b32.end [2/2] (short) (narrow) %v3321_v41, 16  ;;  %v3319_v0 = vadd.f32 %v3311_v34, %v6769_v23 }
 0x3e4   : > { %v5457_v31 = vpop.f32.mrf.mxu0 }
 0x3e5   : > { %v3314_v20 = vsub.f32 %v3298_v13, %v6777_v56  ;;  %v3301_v30 = vadd.f32 %v5457_v31, %v3214_v51  ;;  %3455 = vxpose.xlu0.b32.end [2/2] (short) (narrow) %v3319_v0, 16  ;;  %v3324_v16 = vadd.f32 %v3316_v45, %v6775_v3 }
 0x3e6   : > { %v3282_v25 = vpop.f32.mrf.mxu0 }
 0x3e7   : > { %v3317_v2 = vsub.f32 %v3301_v30, %v6785_v19  ;;  %v3299_v12 = vadd.f32 %v3282_v25, %v3206_v60  ;;  %3550 = vxpose.xlu1.b32.start [1/2] (short) (narrow) %v3324_v16, 16  ;;  %v3322_v14 = vadd.f32 %v3314_v20, %v6779_v61 }
 0x3e9   : > { %v3315_v11 = vsub.f32 %v3299_v12, %v6792_v40  ;;  %3518 = vxpose.xlu0.b32.start [1/2] (short) (narrow) %v3322_v14, 16  ;;  %v3325_v23 = vadd.f32 %v3317_v2, %v6787_v52 }
 0x3eb   : > { %3551 = vxpose.xlu1.b32.end [2/2] (short) (narrow) %v3325_v23, 16  ;;  %v3323_v10 = vadd.f32 %v3315_v11, %v6796_v24 }
 0x3ed   : > { %3519 = vxpose.xlu0.b32.end [2/2] (short) (narrow) %v3323_v10, 16 }
 0x43e   : > { %v6816_v56 = vpop.trf.xlu1 }
 0x440   : > { %v6818_v46 = vpop.trf.xlu0 }
 0x442   : > { %v6820_v3 = vpop.trf.xlu1 }
 0x443   : > { %v3589_v40 = vpack.c.bf16 %v6820_v3, %v6816_v56 }
 0x444   : > { %v6822_v19 = vpop.trf.xlu0 }
 0x445   : > { %v3588_v61 = vpack.c.bf16 %v6822_v19, %v6818_v46  ;;  %v3594_v15 = vunpack.c.l.bf16 %v3589_v40  ;;  %v3595_v9 = vunpack.c.h.bf16 %v3589_v40 }
 0x446   : > { %v6828_v29 = vpop.trf.xlu1 }
 0x447   : > { %v3592_v52 = vunpack.c.l.bf16 %v3588_v61  ;;  %v3593_v7 = vunpack.c.h.bf16 %v3588_v61  ;;  %5460 = vmatprep.mubr.msk.bf16.mxu1 %vm643_vm0, %v3588_v61  ;;  %5470 = vmatprep.mubr.msk.bf16.mxu0 %vm643_vm0, %v3588_v61  ;;  %v3602_v62 = vsub.f32 %v6816_v56, %v3594_v15  ;;  %v3603_v18 = vsub.f32 %v6820_v3, %v3595_v9 }
 0x448   : > { %5461 = vmatmul.mubr.msk.bf16.vlgmr.msra.gmra.mxu1 %vm643_vm0, %v3589_v40  ;;  %5471 = vmatmul.mubr.msk.bf16.vlgmr.msra.gmra.mxu0 %vm643_vm0, %v3589_v40  ;;  %v6834_v24 = vpop.trf.xlu0 }
 0x449   : > { %5479 = vmatpush3.bf16.msra.mxu1 %v6726_v54  ;;  %5489 = vmatpush3.bf16.msra.mxu0 %v6739_v42  ;;  %v3600_v22 = vsub.f32 %v6818_v46, %v3592_v52  ;;  %v3601_v39 = vsub.f32 %v6822_v19, %v3593_v7  ;;  %v3609_v28 = vpack.c.bf16 %v3603_v18, %v3602_v62 }
 0x44a   : > { %5498 = vmatprep.subr.bf16.mxu1 %v5652_v8  ;;  %5508 = vmatprep.subr.bf16.mxu0 %v5652_v8  ;;  %v6840_v63 = vpop.trf.xlu1 }
 0x44b   : > { %v3591_v54 = vpack.c.bf16 %v6840_v63, %v6828_v29  ;;  %v3608_v42 = vpack.c.bf16 %v3601_v39, %v3600_v22 }
 0x44c   : > { %v6842_v58 = vpop.trf.xlu0 }
 0x44d   : > { %v3590_v6 = vpack.c.bf16 %v6842_v58, %v6834_v24  ;;  %v3598_v37 = vunpack.c.l.bf16 %v3591_v54  ;;  %v3599_v47 = vunpack.c.h.bf16 %v3591_v54 }
 0x44f   : > { %v3596_v4 = vunpack.c.l.bf16 %v3590_v6  ;;  %v3597_v36 = vunpack.c.h.bf16 %v3590_v6  ;;  %5464 = vmatprep.mubr.msk.bf16.mxu1 %vm643_vm0, %v3590_v6  ;;  %5474 = vmatprep.mubr.msk.bf16.mxu0 %vm643_vm0, %v3590_v6  ;;  %v3606_v21 = vsub.f32 %v6828_v29, %v3598_v37  ;;  %v3607_v55 = vsub.f32 %v6840_v63, %v3599_v47 }
 0x450   : > { %5465 = vmatmul.mubr.msk.bf16.gmra.mxu1 %vm643_vm0, %v3591_v54  ;;  %5475 = vmatmul.mubr.msk.bf16.gmra.mxu0 %vm643_vm0, %v3591_v54 }
 0x451   : > { %5480 = vmatprep.mubr.msk.bf16.mxu1 %vm643_vm0, %v3608_v42  ;;  %v3604_v33 = vsub.f32 %v6834_v24, %v3596_v4  ;;  %v3605_v43 = vsub.f32 %v6842_v58, %v3597_v36  ;;  %v3611_v35 = vpack.c.bf16 %v3607_v55, %v3606_v21 }
 0x453   : > { %v3610_v32 = vpack.c.bf16 %v3605_v43, %v3604_v33 }
 0x458   : > { %5481 = vmatmul.mubr.msk.bf16.vlgmr.msra.gmra.mxu1 %vm643_vm0, %v3609_v28 }
 0x459   : > { %5499 = vmatpush3.bf16.msra.mxu1 %v5652_v8  ;;  %5484 = vmatprep.mubr.msk.bf16.mxu1 %vm643_vm0, %v3610_v32 }
 0x45a   : > { %5518 = vmatprep.subr.bf16.mxu1 %v5647_v44 }
 0x45b   : > { %v3502_v49 = vpop.trf.xlu1 }
 0x45d   : > { %v3470_v59 = vpop.trf.xlu0 }
 0x45e   : > { %v3636_v25 = vadd.f32 %v3470_v59, %v6818_v46  ;;  %v3638_v46 = vadd.f32 %v3502_v49, %v6816_v56 }
 0x45f   : > { %v3503_v53 = vpop.trf.xlu1 }
 0x460   : > { %5485 = vmatmul.mubr.msk.bf16.gmra.mxu1 %vm643_vm0, %v3611_v35  ;;  %v3613_v38 = vpack.c.bf16 %v3503_v53, %v3502_v49 }
 0x461   : > { %v3471_v27 = vpop.trf.xlu0 }
 0x462   : > { %v3612_v57 = vpack.c.bf16 %v3471_v27, %v3470_v59  ;;  %v3618_v13 = vunpack.c.l.bf16 %v3613_v38  ;;  %v3619_v0 = vunpack.c.h.bf16 %v3613_v38  ;;  %v3637_v20 = vadd.f32 %v3471_v27, %v6822_v19 }
 0x463   : > { %v3566_v17 = vpop.trf.xlu1  ;;  %v3639_v19 = vadd.f32 %v3503_v53, %v6820_v3 }
 0x464   : > { %5490 = vmatprep.mubr.msk.bf16.mxu0 %vm643_vm0, %v3612_v57  ;;  %5500 = vmatprep.mubr.msk.bf16.mxu1 %vm643_vm0, %v3612_v57  ;;  %v3616_v5 = vunpack.c.l.bf16 %v3612_v57  ;;  %v3617_v34 = vunpack.c.h.bf16 %v3612_v57  ;;  %v3626_v2 = vsub.f32 %v3502_v49, %v3618_v13  ;;  %v3627_v12 = vsub.f32 %v3503_v53, %v3619_v0 }
 0x465   : > { %5491 = vmatmul.mubr.msk.bf16.vlgmr.msra.gmra.mxu0 %vm643_vm0, %v3613_v38  ;;  %v3534_v50 = vpop.trf.xlu0  ;;  %v3644_v14 = vpack.c.bf16 %v3637_v20, %v3636_v25  ;;  %v3645_v22 = vpack.c.bf16 %v3639_v19, %v3638_v46 }
 0x466   : > { %5509 = vmatpush3.bf16.msra.mxu0 %v5652_v8  ;;  %v3624_v41 = vsub.f32 %v3470_v59, %v3616_v5  ;;  %v3625_v1 = vsub.f32 %v3471_v27, %v3617_v34  ;;  %v3633_v10 = vpack.c.bf16 %v3627_v12, %v3626_v2  ;;  %v3640_v8 = vadd.f32 %v3534_v50, %v6834_v24 }
 0x467   : > { %5528 = vmatprep.subr.bf16.mxu0 %v5648_v48  ;;  %v3567_v26 = vpop.trf.xlu1  ;;  %v3649_v15 = vunpack.c.h.bf16 %v3644_v14  ;;  %v3648_v3 = vunpack.c.l.bf16 %v3644_v14  ;;  %v3642_v24 = vadd.f32 %v3566_v17, %v6828_v29  ;;  %v3650_v4 = vunpack.c.l.bf16 %v3645_v22 }
 0x468   : > { %5501 = vmatmul.mubr.msk.bf16.vlgmr.msra.gmra.mxu1 %vm643_vm0, %v3613_v38  ;;  %v3615_v31 = vpack.c.bf16 %v3567_v26, %v3566_v17  ;;  %v3632_v60 = vpack.c.bf16 %v3625_v1, %v3624_v41  ;;  %v3643_v56 = vadd.f32 %v3567_v26, %v6840_v63  ;;  %v3651_v36 = vunpack.c.h.bf16 %v3645_v22 }
 0x469   : > { %v3535_v51 = vpop.trf.xlu0  ;;  %5519 = vmatpush3.bf16.msra.mxu1 %v5647_v44  ;;  %v3657_v54 = vsub.f32 %v3637_v20, %v3649_v15  ;;  %v3656_v42 = vsub.f32 %v3636_v25, %v3648_v3  ;;  %v3658_v28 = vsub.f32 %v3638_v46, %v3650_v4  ;;  %v5001_v46 = vld [vmem:[%s451_s21 + $0x8] sm:$0xff]   ;;  %v5002_v4 = vld [vmem:[%s451_s21 + $0x10] sm:$0xff]  }
 0x46a   : > { %v3614_v45 = vpack.c.bf16 %v3535_v51, %v3534_v50  ;;  %5538 = vmatprep.subr.bf16.mxu1 %v5648_v48  ;;  %v3622_v61 = vunpack.c.l.bf16 %v3615_v31  ;;  %v3623_v40 = vunpack.c.h.bf16 %v3615_v31  ;;  %v3641_v7 = vadd.f32 %v3535_v51, %v6842_v58 }
 0x46b   : > { %v3647_v62 = vpack.c.bf16 %v3643_v56, %v3642_v24  ;;  %v3664_v43 = vpack.c.bf16 %v3657_v54, %v3656_v42  ;;  %v3659_v63 = vsub.f32 %v3639_v19, %v3651_v36  ;;  %v4975_v15 = vunpack.c.l.bf16 %v5001_v46  ;;  %v5003_v54 = vld [vmem:[%s451_s21 + $0x18] sm:$0xff]   ;;  %v5006_v36 = vld [vmem:[%s451_s21 + $0x30] sm:$0xff]  }
 0x46c   : > { %5494 = vmatprep.mubr.msk.bf16.mxu0 %vm643_vm0, %v3614_v45  ;;  %5504 = vmatprep.mubr.msk.bf16.mxu1 %vm643_vm0, %v3614_v45  ;;  %v3620_v30 = vunpack.c.l.bf16 %v3614_v45  ;;  %v3621_v16 = vunpack.c.h.bf16 %v3614_v45  ;;  %v3630_v39 = vsub.f32 %v3566_v17, %v3622_v61  ;;  %v3631_v6 = vsub.f32 %v3567_v26, %v3623_v40 }
 0x46d   : > { %5495 = vmatmul.mubr.msk.bf16.gmra.mxu0 %vm643_vm0, %v3615_v31  ;;  %v3646_v9 = vpack.c.bf16 %v3641_v7, %v3640_v8  ;;  %v3665_v29 = vpack.c.bf16 %v3659_v63, %v3658_v28  ;;  %v3654_v44 = vunpack.c.l.bf16 %v3647_v62  ;;  %v3655_v32 = vunpack.c.h.bf16 %v3647_v62  ;;  %v6979_v63 = vld [vmem:[%s6030_s7 + $0x10] sm:$0xff] }
 0x46e   : > { %5510 = vmatprep.mubr.msk.bf16.mxu0 %vm643_vm0, %v3632_v60  ;;  %v3628_v11 = vsub.f32 %v3534_v50, %v3620_v30  ;;  %v3629_v23 = vsub.f32 %v3535_v51, %v3621_v16  ;;  %v3635_v58 = vpack.c.bf16 %v3631_v6, %v3630_v39  ;;  %v4970_v6 = vld [vmem:[%s451_s21] sm:$0xff]   ;;  %7444 = vst [vmem:[#allocation25_spill] sm:$0xff] %v6979_v63 }
 0x46f   : > { %v3652_v18 = vunpack.c.l.bf16 %v3646_v9  ;;  %v3653_v33 = vunpack.c.h.bf16 %v3646_v9  ;;  %v3662_v55 = vsub.f32 %v3642_v24, %v3654_v44  ;;  %v3663_v49 = vsub.f32 %v3643_v56, %v3655_v32  ;;  %v5007_v24 = vld [vmem:[%s451_s21 + $0x38] sm:$0xff]  }
 0x470   : > { %5505 = vmatmul.mubr.msk.bf16.gmra.mxu1 %vm643_vm0, %v3615_v31  ;;  %v3634_v52 = vpack.c.bf16 %v3629_v23, %v3628_v11  ;;  %v4971_v42 = vunpack.c.l.bf16 %v4970_v6  ;;  %v4983_v44 = vunpack.c.l.bf16 %v5003_v54 }
 0x471   : > { %5520 = vmatprep.mubr.msk.bf16.mxu1 %vm643_vm0, %v3644_v14  ;;  %v3660_v37 = vsub.f32 %v3640_v8, %v3652_v18  ;;  %v3661_v47 = vsub.f32 %v3641_v7, %v3653_v33  ;;  %v3667_v59 = vpack.c.bf16 %v3663_v49, %v3662_v55  ;;  %v5005_v8 = vld [vmem:[%s451_s21 + $0x28] sm:$0xff]   ;;  %v6987_v55 = vld [vmem:[%s6030_s7 + $0x50] sm:$0xff] }
 0x472   : > { %v4991_v56 = vunpack.c.l.bf16 %v5005_v8  ;;  %v4992_v28 = vunpack.c.h.bf16 %v5005_v8  ;;  %7446 = vst [vmem:[#allocation27_spill] sm:$0xff] %v6987_v55  ;;  %v4995_v8 = vunpack.c.l.bf16 %v5006_v36 }
 0x473   : > { %v3666_v21 = vpack.c.bf16 %v3661_v47, %v3660_v37  ;;  %v4459_v37 = vsub.f32 %v6979_v63, %v4975_v15  ;;  %v4972_v47 = vunpack.c.h.bf16 %v4970_v6  ;;  %v4984_v15 = vunpack.c.h.bf16 %v5003_v54 }
 0x474   : > { %v4515_v49 = vsub.f32 %v6987_v55, %v4991_v56  ;;  %v4980_v63 = vunpack.c.h.bf16 %v5002_v4  ;;  %v7003_v55 = vld [vmem:[%s6030_s7 + $0x18] sm:$0xff] }
 0x475   : > { %5511 = vmatmul.mubr.msk.bf16.vlgmr.msra.gmra.mxu0 %vm643_vm0, %v3633_v10  ;;  %7449 = vst [vmem:[#allocation30_spill] sm:$0xff] %v7003_v55 }
 0x476   : > { %5529 = vmatpush3.bf16.msra.mxu0 %v5648_v48  ;;  %5514 = vmatprep.mubr.msk.bf16.mxu0 %vm643_vm0, %v3634_v52 }
 0x478   : > { %5521 = vmatmul.mubr.msk.bf16.vlgmr.msra.gmra.mxu1 %vm643_vm0, %v3645_v22 }
 0x479   : > { %5539 = vmatpush3.bf16.msra.mxu1 %v5648_v48  ;;  %5524 = vmatprep.mubr.msk.bf16.mxu1 %vm643_vm0, %v3646_v9 }
 0x47d   : > { %5515 = vmatmul.mubr.msk.bf16.gmra.mxu0 %vm643_vm0, %v3635_v58 }
 0x47e   : > { %5530 = vmatprep.mubr.msk.bf16.mxu0 %vm643_vm0, %v3644_v14 }
 0x480   : > { %5525 = vmatmul.mubr.msk.bf16.gmra.mxu1 %vm643_vm0, %v3647_v62 }
 0x481   : > { %5540 = vmatprep.mubr.msk.bf16.mxu1 %vm643_vm0, %v3664_v43  ;;  %v4976_v43 = vunpack.c.h.bf16 %v5001_v46  ;;  %v4979_v46 = vunpack.c.l.bf16 %v5002_v4  ;;  %v7010_v4 = vmul.f32 0.1, %v4459_v37  ;;  %v7026_v37 = vmul.f32 0.1, %v4515_v49 }
 0x483   : > { %7451 = vst [vmem:[#allocation32_spill] sm:$0xff] %v7010_v4  ;;  %7456 = vst [vmem:[#allocation37_spill] sm:$0xff] %v7026_v37 }
 0x485   : > { %5531 = vmatmul.mubr.msk.bf16.vlgmr.msra.gmra.mxu0 %vm643_vm0, %v3645_v22 }
 0x486   : > { %5534 = vmatprep.mubr.msk.bf16.mxu0 %vm643_vm0, %v3646_v9  ;;  %v5004_v9 = vld [vmem:[%s451_s21 + $0x20] sm:$0xff]  }
 0x487   : > { %v4987_v33 = vunpack.c.l.bf16 %v5004_v9 }
 0x488   : > { %5541 = vmatmul.mubr.msk.bf16.vlgmr.msra.gmra.mxu1 %vm643_vm0, %v3665_v29  ;;  %v4988_v29 = vunpack.c.h.bf16 %v5004_v9  ;;  %v5000_v9 = vunpack.c.h.bf16 %v5007_v24 }
 0x489   : > { %5544 = vmatprep.mubr.msk.bf16.mxu1 %vm643_vm0, %v3666_v21 }
 0x48d   : > { %5535 = vmatmul.mubr.msk.bf16.gmra.mxu0 %vm643_vm0, %v3647_v62 }
 0x490   : > { %5545 = vmatmul.mubr.msk.bf16.gmra.mxu1 %vm643_vm0, %v3667_v59  ;;  %v4999_v59 = vunpack.c.l.bf16 %v5007_v24  ;;  %v4996_v24 = vunpack.c.h.bf16 %v5006_v36 }
 0x508   : > { %v6894_v35 = vpop.f32.mrf.mxu1  ;;  %v6896_v53 = vpop.f32.mrf.mxu0 }
 0x50a   : > { %v6898_v27 = vpop.f32.mrf.mxu1  ;;  %v6900_v57 = vpop.f32.mrf.mxu0 }
 0x50c   : > { %v6902_v38 = vpop.f32.mrf.mxu1  ;;  %v6904_v17 = vpop.f32.mrf.mxu0 }
 0x50e   : > { %v6906_v48 = vpop.f32.mrf.mxu1  ;;  %v6910_v34 = vpop.f32.mrf.mxu0 }
 0x510   : > { %v6908_v5 = vpop.f32.mrf.mxu1  ;;  %v6916_v1 = vpop.f32.mrf.mxu0 }
 0x512   : > { %v6912_v50 = vpop.f32.mrf.mxu1  ;;  %v6922_v45 = vpop.f32.mrf.mxu0 }
 0x514   : > { %v6914_v41 = vpop.f32.mrf.mxu1  ;;  %v6928_v31 = vpop.f32.mrf.mxu0 }
 0x516   : > { %v6918_v26 = vpop.f32.mrf.mxu1  ;;  %v6934_v30 = vpop.f32.mrf.mxu0 }
 0x518   : > { %v6920_v51 = vpop.f32.mrf.mxu1 }
 0x51a   : > { %v6924_v13 = vpop.f32.mrf.mxu1 }
 0x51c   : > { %v6926_v0 = vpop.f32.mrf.mxu1 }
 0x51e   : > { %v6930_v60 = vpop.f32.mrf.mxu1 }
 0x520   : > { %v6932_v20 = vpop.f32.mrf.mxu1 }
 0x522   : > { %v6936_v16 = vpop.f32.mrf.mxu1 }
 0x523   : > { %7438 = vst [vmem:[#allocation19_spill] sm:$0xff] %v6936_v16 }
 0x524   : > { %v6938_v25 = vpop.f32.mrf.mxu1 }
 0x525   : > { %7439 = vst [vmem:[#allocation20_spill] sm:$0xff] %v6938_v25  ;;  %v6940_v2 = vpop.f32.mrf.mxu0 }
 0x526   : > { %v6942_v12 = vpop.f32.mrf.mxu1 }
 0x527   : > { %7440 = vst [vmem:[#allocation21_spill] sm:$0xff] %v6942_v12  ;;  %v6944_v14 = vpop.f32.mrf.mxu0  ;;  %v4460_v12 = vsub.f32 %v7003_v55, %v4976_v43  ;;  %v7021_v43 = vld [vmem:[%s6030_s7 + $0x30] sm:$0xff] }
 0x528   : > { %v6946_v11 = vpop.f32.mrf.mxu1  ;;  %7454 = vst [vmem:[#allocation35_spill] sm:$0xff] %v7021_v43  ;;  %v4463_v55 = vsub.f32 %v7021_v43, %v4983_v44  ;;  %v7043_v44 = vld [vmem:[%s6030_s7 + $0x38] sm:$0xff] }
 0x529   : > { %v6948_v23 = vpop.f32.mrf.mxu0  ;;  %7461 = vst [vmem:[#allocation42_spill] sm:$0xff] %v7043_v44  ;;  %v4464_v49 = vsub.f32 %v7043_v44, %v4984_v15  ;;  %v7047_v43 = vld [vmem:[%s6030_s7 + $0x78] sm:$0xff] }
 0x52a   : > { %v6951_v10 = vpop.f32.mrf.mxu1  ;;  %7462 = vst [vmem:[#allocation43_spill] sm:$0xff] %v7047_v43  ;;  %v4520_v37 = vsub.f32 %v7047_v43, %v5000_v9  ;;  %v7070_v43 = vmul.f32 0.1, %v4463_v55  ;;  %v3788_v55 = vadd.f32 %v6896_v53, %v6894_v35 }
 0x52b   : > { %v6953_v19 = vpop.f32.mrf.mxu0 }
 0x52c   : > { %v6958_v61 = vpop.f32.mrf.mxu1 }
 0x52d   : > { %v6960_v40 = vpop.f32.mrf.mxu0  ;;  %v4018_v35 = vadd.f32 %v6958_v61, %v6948_v23 }
 0x52e   : > { %v6962_v52 = vpop.f32.mrf.mxu1 }
 0x52f   : > { %v6964_v7 = vpop.f32.mrf.mxu0 }
 0x530   : > { %v6966_v22 = vpop.f32.mrf.mxu1 }
 0x531   : > { %v6968_v39 = vpop.f32.mrf.mxu0 }
 0x532   : > { %7441 = vst [vmem:[#allocation22_spill] sm:$0xff] %v6968_v39  ;;  %v6970_v3 = vpop.f32.mrf.mxu1  ;;  %v6999_v39 = vld [vmem:[%s6030_s7 + $0x40] sm:$0xff] }
 0x533   : > { %v6972_v58 = vpop.f32.mrf.mxu0  ;;  %7448 = vst [vmem:[#allocation29_spill] sm:$0xff] %v6999_v39  ;;  %v4513_v56 = vsub.f32 %v6999_v39, %v4987_v33  ;;  %v7017_v33 = vld [vmem:[%s6030_s7 + $0x48] sm:$0xff]  ;;  %v4023_v23 = vadd.f32 %v6970_v3, %v6964_v7  ;;  %v7468_v3 = vld [vmem:[#allocation19_spill] sm:$0xff] }
 0x534   : > { %7442 = vst [vmem:[#allocation23_spill] sm:$0xff] %v6972_v58  ;;  %v6974_v62 = vpop.f32.mrf.mxu1  ;;  %v6991_v58 = vld [vmem:[%s6030_s7] sm:$0xff]  ;;  %7453 = vst [vmem:[#allocation34_spill] sm:$0xff] %v7017_v33  ;;  %v4514_v39 = vsub.f32 %v7017_v33, %v4988_v29 }
 0x535   : > { %7443 = vst [vmem:[#allocation24_spill] sm:$0xff] %v6974_v62  ;;  %v6976_v18 = vpop.f32.mrf.mxu0  ;;  %7447 = vst [vmem:[#allocation28_spill] sm:$0xff] %v6991_v58  ;;  %v4457_v6 = vsub.f32 %v6991_v58, %v4971_v42  ;;  %v7007_v42 = vld [vmem:[%s6030_s7 + $0x58] sm:$0xff]  ;;  %v7013_v58 = vld [vmem:[%s6030_s7 + $0x8] sm:$0xff] }
 0x536   : > { %v6982_v32 = vpop.f32.mrf.mxu1  ;;  %7450 = vst [vmem:[#allocation31_spill] sm:$0xff] %v7007_v42  ;;  %v4516_v54 = vsub.f32 %v7007_v42, %v4992_v28  ;;  %7452 = vst [vmem:[#allocation33_spill] sm:$0xff] %v7013_v58  ;;  %v4458_v25 = vsub.f32 %v7013_v58, %v4972_v47  ;;  %v7029_v42 = vld [vmem:[%s6030_s7 + $0x70] sm:$0xff]  ;;  %v7033_v47 = vld [vmem:[%s6030_s7 + $0x20] sm:$0xff]  ;;  %v7068_v9 = vmul.f32 0.1, %v4514_v39 }
 0x537   : > { %7445 = vst [vmem:[#allocation26_spill] sm:$0xff] %v6982_v32  ;;  %v6984_v21 = vpop.f32.mrf.mxu0  ;;  %7457 = vst [vmem:[#allocation38_spill] sm:$0xff] %v7029_v42  ;;  %v4519_v4 = vsub.f32 %v7029_v42, %v4999_v59  ;;  %v4461_v58 = vsub.f32 %v7033_v47, %v4979_v46  ;;  %v7037_v29 = vld [vmem:[%s6030_s7 + $0x60] sm:$0xff]  ;;  %v7040_v16 = vmul.f32 0.1, %v4457_v6  ;;  %v7051_v59 = vld [vmem:[%s6030_s7 + $0x28] sm:$0xff] }
 0x538   : > { %v6994_v32 = vpop.f32.mrf.mxu1  ;;  %7458 = vst [vmem:[#allocation39_spill] sm:$0xff] %v7033_v47  ;;  %7459 = vst [vmem:[#allocation40_spill] sm:$0xff] %v7037_v29  ;;  %v4517_v33 = vsub.f32 %v7037_v29, %v4995_v8  ;;  %v4462_v42 = vsub.f32 %v7051_v59, %v4980_v63  ;;  %v7056_v47 = vmul.f32 0.1, %v4513_v56  ;;  %v7058_v8 = vmul.f32 0.1, %v4460_v12 }
 0x539   : > { %v6996_v62 = vpop.f32.mrf.mxu0  ;;  %7460 = vst [vmem:[#allocation41_spill] sm:$0xff] %v7040_v16  ;;  %7463 = vst [vmem:[#allocation44_spill] sm:$0xff] %v7051_v59  ;;  %v7060_v6 = vmul.f32 0.1, %v4516_v54  ;;  %v7063_v29 = vld [vmem:[%s6030_s7 + $0x68] sm:$0xff]  ;;  %v4015_v54 = vadd.f32 %v6946_v11, %v6940_v2  ;;  %v3791_v2 = vadd.f32 %v6904_v17, %v6902_v38  ;;  %v3783_v11 = vadd.f32 %v6910_v34, %v6906_v48  ;;  %s7247_s7 = scalar_lea.vmem [#allocation8], %s4764_s24 }
 0x53a   : > { %v7024_v28 = vpop.f32.mrf.mxu1  ;;  %7465 = vst [vmem:[#allocation46_spill] sm:$0xff] %v7063_v29  ;;  %v4518_v15 = vsub.f32 %v7063_v29, %v4996_v24  ;;  %v7066_v44 = vmul.f32 0.1, %v4458_v25  ;;  %v7074_v16 = vmul.f32 0.1, %v4519_v4  ;;  %v3780_v24 = vadd.f32 %v6900_v57, %v6898_v27  ;;  %s4968_s24 = sshll.u32 %s5835_s27, 11 }
 0x53b   : > { %7455 = vst [vmem:[#allocation36_spill] sm:$0xff] %v7024_v28  ;;  %v4086_v36 = vpop.f32.mrf.mxu0  ;;  %7464 = vst [vmem:[#allocation45_spill] sm:$0xff] %v7060_v6  ;;  %v7076_v56 = vmul.f32 0.1, %v4461_v58  ;;  %v7078_v12 = vmul.f32 0.1, %v4517_v33  ;;  %v4007_v58 = vadd.f32 %v6951_v10, %v6944_v14  ;;  %v4116_v53 = vadd.f32 %v6976_v18, %v4015_v54  ;;  %s7326_s26 = scalar_lea.hbm %s7494_s6, %s4968_s24 }
 0x53c   : > { %v7054_v28 = vpop.f32.mrf.mxu1  ;;  %v7082_v6 = vmul.f32 0.1, %v4464_v49  ;;  %v7084_v25 = vmul.f32 0.1, %v4520_v37  ;;  %v7086_v39 = vmul.f32 0.1, %v4462_v42  ;;  %v3804_v27 = vadd.f32 %v6916_v1, %v6908_v5 }
 0x53d   : > { %v5516_v46 = vpop.f32.mrf.mxu0  ;;  %v7096_v29 = vmul.f32 0.1, %v4518_v15  ;;  %v3796_v57 = vadd.f32 %v6922_v45, %v6912_v50  ;;  %v4010_v14 = vadd.f32 %v6962_v52, %v6953_v19  ;;  %v7112_v10 = vadd.f32 %v6984_v21, %v4007_v58  ;;  %v7469_v18 = vld [vmem:[#allocation20_spill] sm:$0xff]  ;;  %v7471_v42 = vld [vmem:[#allocation21_spill] sm:$0xff]  ;;  %v7472_v37 = vld [vmem:[#allocation22_spill] sm:$0xff]  ;;  %s4579_s12 = sshll.u32 %s7247_s7, 4  ;;  %s7328_s12 = int_to_ptr.vmem [resolvable:$true] %s4579_s12 }
 0x53e   : > { %v7072_v63 = vpop.f32.mrf.mxu1  ;;  %7466 = vst [vmem:[#allocation47_spill] sm:$0xff] %v7086_v39  ;;  %v3807_v48 = vadd.f32 %v6928_v31, %v6914_v41  ;;  %v3889_v34 = vadd.f32 %v6920_v51, %v3788_v55  ;;  %v4031_v5 = vadd.f32 %v6966_v22, %v6960_v40  ;;  %v7124_v50 = vadd.f32 %v6996_v62, %v4018_v35  ;;  %v7473_v49 = vld [vmem:[#allocation24_spill] sm:$0xff]  ;;  %v7475_v15 = vld [vmem:[#allocation26_spill] sm:$0xff]  ;;  %s4563_s27 = scalar_lea.sflag [#allocation4], %s6024_s0  ;;  %s5755_s29 = scalar_lea.vmem %s7328_s12, 2048 }
 0x53f   : > { %v4099_v59 = vpop.f32.mrf.mxu0  ;;  %7467 = vst [vmem:[#allocation48_spill] sm:$0xff] %v7096_v29  ;;  %v3799_v1 = vadd.f32 %v6934_v30, %v6918_v26  ;;  %v3887_v45 = vadd.f32 %v6924_v13, %v3780_v24  ;;  %v7131_v19 = vadd.f32 %v4086_v36, %v4010_v14  ;;  %v7136_v51 = vadd.f32 %v6926_v0, %v3791_v2  ;;  %v7171_v2 = vld [vmem:[%s6056_s8] sm:$0xff]  ;;  %v7178_v14 = vld [vmem:[%s6056_s8 + $0x10] sm:$0xff]  ;;  %p5756_p1 = scmp.ne.s32.totalorder %s7328_s12, %s5755_s29  ;;  %p5762_p7 = scmp.lt.s32.totalorder %s7328_s12, %s5760_s11 }
 0x540   : > { %v7094_v4 = vpop.f32.mrf.mxu1  ;;  %v4363_v31 = vadd.f32 %v4116_v53, %v3889_v34  ;;  %v7138_v40 = vadd.f32 %v5516_v46, %v4031_v5  ;;  %v7142_v26 = vadd.f32 %v6930_v60, %v3783_v11  ;;  %v7145_v13 = vadd.f32 %v6932_v20, %v3804_v27  ;;  %v7474_v46 = vld [vmem:[#allocation23_spill] sm:$0xff]  ;;  %p5763_p2 = scmp.lt.s32.totalorder %s5761_s14, %s5755_s29 }
 0x541   : > { %v5517_v33 = vpop.f32.mrf.mxu0  ;;  %v4361_v30 = vadd.f32 %v7112_v10, %v3887_v45  ;;  %v7148_v7 = vadd.f32 %v4099_v59, %v4023_v23  ;;  %v7153_v62 = vadd.f32 %v7468_v3, %v3796_v57  ;;  %v4364_v60 = vadd.f32 %v7124_v50, %v7136_v51  ;;  %v7186_v3 = vld [vmem:[%s6056_s8 + $0x8] sm:$0xff]  ;;  %p5757_p4 = pnand %p5756_p1, %p5978_p0 }
 0x542   : > { %v7114_v38 = vpop.f32.mrf.mxu1  ;;  %v7470_v21 = vld [vmem:[#allocation36_spill] sm:$0xff]  ;;  %v7162_v36 = vadd.f32 %v7471_v42, %v3799_v1  ;;  %v4034_v59 = vadd.f32 %v7473_v49, %v7472_v37  ;;  %v4026_v54 = vadd.f32 %v7475_v15, %v7474_v46  ;;  %v4362_v55 = vadd.f32 %v7131_v19, %v7142_v26  ;;  %p5764_p6 = por %p5763_p2, %p5762_p7 }
 0x543   : > { %v7116_v17 = vpop.f32.mrf.mxu0  ;;  %v4387_v11 = vmul.f32 %v7171_v2, %v4363_v31  ;;  %v4367_v35 = vadd.f32 %v7138_v40, %v7145_v13  ;;  %v4385_v5 = vmul.f32 %v7171_v2, %v4361_v30  ;;  %v4417_v1 = vmul.f32 %v7178_v14, %v4361_v30  ;;  %p5758_p5 = pneg %p5757_p4 }
 0x544   : > { %v7133_v61 = vpop.f32.mrf.mxu1  ;;  %v4365_v23 = vadd.f32 %v7148_v7, %v7153_v62  ;;  %v7197_v30 = vadd.f32 %v5517_v33, %v4034_v59 }
 0x545   : > { %v5532_v41 = vpop.f32.mrf.mxu0  ;;  %p5765_p9 = pnand %p5764_p6, %p5758_p5 }
 0x546   : > { %v4254_v52 = vadd.f32 %v5532_v41, %v6994_v32  ;;  %v7150_v22 = vpop.f32.mrf.mxu1  ;;  %v7156_v32 = vadd.f32 %v7469_v18, %v3807_v48  ;;  %v4419_v48 = vmul.f32 %v7178_v14, %v4363_v31  ;;  %v4388_v18 = vmul.f32 %v7186_v3, %v4364_v60 }
 0x547   : > { %v4245_v0 = vpop.f32.mrf.mxu0  ;;  %v4386_v31 = vmul.f32 %v7186_v3, %v4362_v55 }
 0x548   : > { %v4246_v20 = vadd.f32 %v4245_v0, %v7470_v21  ;;  %v5542_v24 = vpop.f32.mrf.mxu1 }
 0x549   : > { %v5533_v58 = vpop.f32.mrf.mxu0  ;;  %v4355_v27 = vadd.f32 %v5542_v24, %v4254_v52  ;;  %v7190_v52 = vld [vmem:[%s6056_s8 + $0x18] sm:$0xff]  ;;  %v7201_v24 = vmul.f32 %v7171_v2, %v4367_v35 }
 0x54a   : > { %v4257_v57 = vadd.f32 %v5533_v58, %v7054_v28  ;;  %v4322_v41 = vpop.f32.mrf.mxu1  ;;  %v4420_v28 = vmul.f32 %v7190_v52, %v4364_v60  ;;  %v7195_v37 = vmul.f32 %v7190_v52, %v4362_v55  ;;  %v7207_v60 = vmul.f32 %v7171_v2, %v4365_v23 }
 0x54b   : > { %v4248_v0 = vpop.f32.mrf.mxu0  ;;  %v4371_v21 = vsub.f32 %v4355_v27, %v3889_v34  ;;  %v4353_v42 = vadd.f32 %v4322_v41, %v4246_v20  ;;  %v7204_v34 = vmul.f32 %v7178_v14, %v4367_v35  ;;  %v7210_v20 = vmul.f32 %v7178_v14, %v4365_v23 }
 0x54c   : > { %v4249_v49 = vadd.f32 %v4248_v0, %v7072_v63  ;;  %v5543_v46 = vpop.f32.mrf.mxu1  ;;  %v7219_v35 = vadd.f32 %v7197_v30, %v7156_v32 }
 0x54d   : > { %v5536_v15 = vpop.f32.mrf.mxu0  ;;  %v4379_v58 = vadd.f32 %v4371_v21, %v4116_v53  ;;  %v4369_v29 = vsub.f32 %v4353_v42, %v3887_v45  ;;  %v4356_v39 = vadd.f32 %v5543_v46, %v4257_v57  ;;  %v7222_v57 = vadd.f32 %v7116_v17, %v4026_v54  ;;  %v7476_v17 = vld [vmem:[#allocation32_spill] sm:$0xff] }
 0x54e   : > { %v4270_v33 = vadd.f32 %v5536_v15, %v7094_v4  ;;  %v4325_v63 = vpop.f32.mrf.mxu1 }
 0x54f   : > { %v4261_v59 = vpop.f32.mrf.mxu0  ;;  %v4395_v55 = vmul.f32 %v7178_v14, %v4379_v58  ;;  %v4411_v27 = vmul.f32 %v7171_v2, %v4379_v58  ;;  %v4377_v53 = vadd.f32 %v4369_v29, %v7112_v10  ;;  %v4372_v45 = vsub.f32 %v4356_v39, %v7136_v51 }
 0x550   : > { %v4354_v23 = vadd.f32 %v4325_v63, %v4249_v49  ;;  %v4262_v4 = vadd.f32 %v4261_v59, %v7114_v38  ;;  %v5546_v41 = vpop.f32.mrf.mxu1  ;;  %v7477_v49 = vld [vmem:[#allocation37_spill] sm:$0xff] }
 0x551   : > { %v5537_v0 = vpop.f32.mrf.mxu0  ;;  %v4403_v21 = vadd.f32 %v4395_v55, %v4387_v11  ;;  %v4427_v42 = vsub.f32 %v4411_v27, %v4419_v48  ;;  %v4393_v46 = vmul.f32 %v7178_v14, %v4377_v53  ;;  %v4409_v29 = vmul.f32 %v7171_v2, %v4377_v53 }
 0x552   : > { %v4380_v39 = vadd.f32 %v4372_v45, %v7124_v50  ;;  %v4370_v10 = vsub.f32 %v4354_v23, %v7142_v26  ;;  %v4359_v51 = vadd.f32 %v5546_v41, %v4270_v33  ;;  %v4273_v15 = vadd.f32 %v5537_v0, %v7133_v61  ;;  %v4338_v59 = vpop.f32.mrf.mxu1  ;;  %v7478_v33 = vld [vmem:[#allocation41_spill] sm:$0xff] }
 0x553   : > { %v4475_v54 = vadd.f32 %v7476_v17, %v4403_v21  ;;  %v4531_v58 = vadd.f32 %v7477_v49, %v4427_v42  ;;  %v4401_v38 = vadd.f32 %v4393_v46, %v4385_v5  ;;  %v4425_v63 = vsub.f32 %v4409_v29, %v4417_v1  ;;  %v7479_v41 = vld [vmem:[#allocation25_spill] sm:$0xff]  ;;  %v7480_v21 = vld [vmem:[#allocation27_spill] sm:$0xff] }
 0x554   : > { %v4396_v11 = vmul.f32 %v7190_v52, %v4380_v39  ;;  %v4412_v48 = vmul.f32 %v7186_v3, %v4380_v39  ;;  %v4378_v55 = vadd.f32 %v4370_v10, %v7131_v19  ;;  %v4375_v50 = vsub.f32 %v4359_v51, %v7145_v13  ;;  %v5547_v13 = vpop.f32.mrf.mxu1  ;;  %v7481_v39 = vld [vmem:[#allocation45_spill] sm:$0xff] }
 0x555   : > { %v4483_v27 = vmul.f32 0.5, %v4475_v54  ;;  %v4539_v26 = vmul.f32 0.5, %v4531_v58  ;;  %v4473_v53 = vadd.f32 %v7478_v33, %v4401_v38  ;;  %v4529_v61 = vadd.f32 %v7056_v47, %v4425_v63 }
 0x556   : > { %v4404_v45 = vadd.f32 %v4396_v11, %v4388_v18  ;;  %v4428_v23 = vsub.f32 %v4412_v48, %v4420_v28  ;;  %v4394_v5 = vmul.f32 %v7190_v52, %v4378_v55  ;;  %v4410_v1 = vmul.f32 %v7186_v3, %v4378_v55  ;;  %v4264_v18 = vpop.f32.mrf.mxu0  ;;  %v7482_v28 = vld [vmem:[#allocation28_spill] sm:$0xff] }
 0x557   : > { %v4491_v0 = vsub.f32 %v7479_v41, %v4483_v27  ;;  %v4547_v42 = vsub.f32 %v7480_v21, %v4539_v26  ;;  %v4481_v19 = vmul.f32 0.5, %v4473_v53  ;;  %v4537_v46 = vmul.f32 0.5, %v4529_v61 }
 0x558   : > { %v4476_v29 = vadd.f32 %v7058_v8, %v4404_v45  ;;  %v4532_v10 = vadd.f32 %v7481_v39, %v4428_v23  ;;  %v4402_v51 = vadd.f32 %v4394_v5, %v4386_v31  ;;  %v4426_v47 = vsub.f32 %v4410_v1, %v7195_v37  ;;  %v7483_v8 = vld [vmem:[#allocation29_spill] sm:$0xff]  ;;  %v7487_v5 = vld [vmem:[#allocation34_spill] sm:$0xff]  ;;  %v7488_v39 = vld [vmem:[#allocation35_spill] sm:$0xff] }
 0x559   : > { %4499 = vst.msk [vmem:[%s7247_s7 + $0x10] sm:$0xff] %vm643_vm0, %v4491_v0  ;;  %4952 = vst.msk [vmem:[%s7247_s7 + $0x50] sm:$0xff] %vm643_vm0, %v4547_v42  ;;  %v4489_v17 = vsub.f32 %v7482_v28, %v4481_v19  ;;  %v4545_v54 = vsub.f32 %v7483_v8, %v4537_v46  ;;  %v4383_v31 = vadd.f32 %v4375_v50, %v7138_v40 }
 0x55a   : > { %v4357_v49 = vadd.f32 %v4338_v59, %v4262_v4  ;;  %v4484_v37 = vmul.f32 0.5, %v4476_v29  ;;  %v4540_v58 = vmul.f32 0.5, %v4532_v10  ;;  %v4474_v38 = vadd.f32 %v7066_v44, %v4402_v51  ;;  %v4341_v4 = vpop.f32.mrf.mxu1  ;;  %v7484_v59 = vld [vmem:[#allocation30_spill] sm:$0xff]  ;;  %v7485_v44 = vld [vmem:[#allocation31_spill] sm:$0xff] }
 0x55b   : > { %v4530_v63 = vadd.f32 %v7068_v9, %v4426_v47  ;;  %4497 = vst.msk [vmem:[%s7247_s7] sm:$0xff] %vm643_vm0, %v4489_v17  ;;  %4950 = vst.msk [vmem:[%s7247_s7 + $0x40] sm:$0xff] %vm643_vm0, %v4545_v54  ;;  %v4399_v11 = vmul.f32 %v7178_v14, %v4383_v31  ;;  %v4415_v48 = vmul.f32 %v7171_v2, %v4383_v31  ;;  %v7489_v10 = vld [vmem:[#allocation38_spill] sm:$0xff]  ;;  %v7490_v54 = vld [vmem:[#allocation39_spill] sm:$0xff] }
 0x55c   : > { %v4373_v55 = vsub.f32 %v4357_v49, %v7153_v62  ;;  %v4265_v40 = vadd.f32 %v4264_v18, %v7150_v22  ;;  %v4492_v50 = vsub.f32 %v7484_v59, %v4484_v37  ;;  %v4548_v27 = vsub.f32 %v7485_v44, %v4540_v58  ;;  %v7486_v22 = vld [vmem:[#allocation33_spill] sm:$0xff]  ;;  %v7491_v49 = vld [vmem:[#allocation40_spill] sm:$0xff]  ;;  %v7492_v58 = vld [vmem:[#allocation47_spill] sm:$0xff] }
 0x55d   : > { %v4482_v9 = vmul.f32 0.5, %v4474_v38  ;;  %v4538_v26 = vmul.f32 0.5, %v4530_v63  ;;  %v4407_v33 = vadd.f32 %v4399_v11, %v7201_v24  ;;  %v4431_v53 = vsub.f32 %v4415_v48, %v7204_v34  ;;  %v7493_v63 = vld [vmem:[#allocation48_spill] sm:$0xff]  ;;  %v7496_v59 = vld [vmem:[#allocation43_spill] sm:$0xff] }
 0x55e   : > { %v4381_v61 = vadd.f32 %v4373_v55, %v7148_v7  ;;  %v4360_v45 = vadd.f32 %v5547_v13, %v4273_v15  ;;  %v4366_v62 = vadd.f32 %v7222_v57, %v7162_v36  ;;  %4500 = vst.msk [vmem:[%s7247_s7 + $0x18] sm:$0xff] %vm643_vm0, %v4492_v50  ;;  %4953 = vst.msk [vmem:[%s7247_s7 + $0x58] sm:$0xff] %vm643_vm0, %v4548_v27  ;;  %v7497_v44 = vld [vmem:[#allocation44_spill] sm:$0xff] }
 0x55f   : > { %v4490_v23 = vsub.f32 %v7486_v22, %v4482_v9  ;;  %v4546_v1 = vsub.f32 %v7487_v5, %v4538_v26  ;;  %v4358_v41 = vadd.f32 %v4341_v4, %v4265_v40  ;;  %v4479_v24 = vadd.f32 %v7070_v43, %v4407_v33  ;;  %v7495_v40 = vld [vmem:[#allocation42_spill] sm:$0xff] }
 0x560   : > { %v4535_v34 = vadd.f32 %v7074_v16, %v4431_v53  ;;  %v4397_v0 = vmul.f32 %v7178_v14, %v4381_v61  ;;  %v4413_v7 = vmul.f32 %v7171_v2, %v4381_v61  ;;  %v4392_v15 = vmul.f32 %v7186_v3, %v7219_v35  ;;  %v7498_v9 = vld [vmem:[#allocation46_spill] sm:$0xff] }
 0x561   : > { %v4424_v21 = vmul.f32 %v7190_v52, %v7219_v35  ;;  %4498 = vst.msk [vmem:[%s7247_s7 + $0x8] sm:$0xff] %vm643_vm0, %v4490_v23  ;;  %4951 = vst.msk [vmem:[%s7247_s7 + $0x48] sm:$0xff] %vm643_vm0, %v4546_v1  ;;  %v4376_v42 = vsub.f32 %v4360_v45, %v7156_v32  ;;  %v4374_v43 = vsub.f32 %v4358_v41, %v7162_v36  ;;  %v4487_v19 = vmul.f32 0.5, %v4479_v24 }
 0x562   : > { %v4543_v16 = vmul.f32 0.5, %v4535_v34  ;;  %v4405_v2 = vadd.f32 %v4397_v0, %v7207_v60  ;;  %v4429_v14 = vsub.f32 %v4413_v7, %v7210_v20  ;;  %v4390_v46 = vmul.f32 %v7186_v3, %v4366_v62 }
 0x563   : > { %v4422_v35 = vmul.f32 %v7190_v52, %v4366_v62  ;;  %v4384_v13 = vadd.f32 %v4376_v42, %v7197_v30  ;;  %v4382_v29 = vadd.f32 %v4374_v43, %v7222_v57  ;;  %v4495_v32 = vsub.f32 %v7488_v39, %v4487_v19 }
 0x564   : > { %v4551_v36 = vsub.f32 %v7489_v10, %v4543_v16  ;;  %v4477_v51 = vadd.f32 %v7076_v56, %v4405_v2  ;;  %v4533_v47 = vadd.f32 %v7078_v12, %v4429_v14 }
 0x565   : > { %v4400_v60 = vmul.f32 %v7190_v52, %v4384_v13  ;;  %v4416_v20 = vmul.f32 %v7186_v3, %v4384_v13  ;;  %v4398_v18 = vmul.f32 %v7190_v52, %v4382_v29  ;;  %v4414_v28 = vmul.f32 %v7186_v3, %v4382_v29  ;;  %4503 = vst.msk [vmem:[%s7247_s7 + $0x30] sm:$0xff] %vm643_vm0, %v4495_v32 }
 0x566   : > { %4956 = vst.msk [vmem:[%s7247_s7 + $0x70] sm:$0xff] %vm643_vm0, %v4551_v36  ;;  %v4485_v30 = vmul.f32 0.5, %v4477_v51  ;;  %v4541_v56 = vmul.f32 0.5, %v4533_v47 }
 0x567   : > { %v4408_v57 = vadd.f32 %v4400_v60, %v4392_v15  ;;  %v4432_v12 = vsub.f32 %v4416_v20, %v4424_v21  ;;  %v4406_v17 = vadd.f32 %v4398_v18, %v4390_v46  ;;  %v4430_v8 = vsub.f32 %v4414_v28, %v4422_v35 }
 0x568   : > { %v4493_v31 = vsub.f32 %v7490_v54, %v4485_v30  ;;  %v4549_v52 = vsub.f32 %v7491_v49, %v4541_v56 }
 0x569   : > { %v4480_v37 = vadd.f32 %v7082_v6, %v4408_v57  ;;  %v4536_v3 = vadd.f32 %v7084_v25, %v4432_v12  ;;  %v4478_v38 = vadd.f32 %v7492_v58, %v4406_v17  ;;  %v4534_v11 = vadd.f32 %v7493_v63, %v4430_v8 }
 0x56a   : > { %4501 = vst.msk [vmem:[%s7247_s7 + $0x20] sm:$0xff] %vm643_vm0, %v4493_v31  ;;  %4954 = vst.msk [vmem:[%s7247_s7 + $0x60] sm:$0xff] %vm643_vm0, %v4549_v52 }
 0x56b   : > { %v4488_v48 = vmul.f32 0.5, %v4480_v37  ;;  %v4544_v55 = vmul.f32 0.5, %v4536_v3  ;;  %v4486_v6 = vmul.f32 0.5, %v4478_v38  ;;  %v4542_v25 = vmul.f32 0.5, %v4534_v11 }
 0x56d   : > { %v4496_v4 = vsub.f32 %v7495_v40, %v4488_v48  ;;  %v4552_v50 = vsub.f32 %v7496_v59, %v4544_v55  ;;  %v4494_v27 = vsub.f32 %v7497_v44, %v4486_v6  ;;  %v4550_v26 = vsub.f32 %v7498_v9, %v4542_v25 }
 0x56f   : > { %4504 = vst.msk [vmem:[%s7247_s7 + $0x38] sm:$0xff] %vm643_vm0, %v4496_v4  ;;  %4957 = vst.msk [vmem:[%s7247_s7 + $0x78] sm:$0xff] %vm643_vm0, %v4552_v50 }
 0x570   : > { %4502 = vst.msk [vmem:[%s7247_s7 + $0x28] sm:$0xff] %vm643_vm0, %v4494_v27  ;;  %4955 = vst.msk [vmem:[%s7247_s7 + $0x68] sm:$0xff] %vm643_vm0, %v4550_v26 }
 0x571   : > { %5768 = shalt.err (!%p5765_p9)
}
 0x572   : > { %s5769_s9 = scalar_lea.hbm %s7326_s26, 2048  ;;  %s5773_s30 = scalar_lea.hbm %s7494_s6, 4096 }
 0x573   : > { %p5770_p12 = scmp.ne.s32.totalorder %s7326_s26, %s5769_s9  ;;  %p5774_p3 = scmp.lt.s32.totalorder %s7326_s26, %s7494_s6 }
 0x574   : > { %p5775_p8 = scmp.lt.s32.totalorder %s5773_s30, %s5769_s9 }
 0x575   : > { %p5771_p13 = pnand %p5770_p12, %p5978_p0 }
 0x576   : > { %p5776_p1 = por %p5775_p8, %p5774_p3 }
 0x577   : > { %p5772_p11 = pneg %p5771_p13 }
 0x579   : > { %p5777_p4 = pnand %p5776_p1, %p5772_p11 }
 0x57b   : > { %5780 = shalt.err (!%p5777_p4)
}
 0x57c   : > { %s5853_s20 = smov 128   ;;  %s5854_s13 = smov 8  }
 0x57d   : > { %5556 = dma.vmem_to_hbm [thread:$0]  (%p5978_p0), %s7328_s12, 2048, %s7326_s26, %s4563_s27, %s5853_s20, %s5853_s20, %s5854_s13  }
 0x57e PF: > { %s7499_s16 = sld [smem:[#allocation13_spill]] }
 0x57f   : > { %s7500_s21 = sld [smem:[#allocation16_spill]] }
 0x580   : > { %s7501_s7 = sld [smem:[#allocation15_spill]] }
 0x584   : > { %s4594_s24 = sand.u32 1, %s7499_s16  }
 0x585   : > { %p7502_p5 = scmp.ne.s32.totalorder %s7500_s21, 0  ;;  %s4595_s8 = scalar_lea.sflag [#allocation4], %s4594_s24 }
 0x587   : > { %p5570_p7 = pnand %p4756_p10, %p7502_p5 }
 0x589   : > { %p5571_p2 = pneg %p5570_p7 }
 0x58b   : > { %5818 = dma.done.wait (%p5571_p2), %s4595_s8, 2048  }
 0x58c   : > { %5820 = vsyncadd (%p5571_p2), %s4595_s8, 4294965248  ;;  %s26_s29 = sadd.s32 1, %s7501_s7   ;;  %s7503_s22 = sld [smem:[#allocation14_spill]] }
 0x58d   : > { %p23_p6 = scmp.ge.s32.totalorder %s26_s29, 4   ;;  %s7504_s26 = sld [smem:[#allocation18_spill]] }
 0x58e   : > { %s7505_s23 = sld [smem:[#allocation17_spill]]  ;;  %s7506_s24 = smov %s5827_s25 }
 0x58f   : > { %s7508_s27 = smov %s5839_s28 }
 0x590   :  { %25 = sbr.rel (!%p23_p6) target bundleno = 12 (0xc), region = 135 }
 0x592   : > { %s7507_s25 = smov %s7503_s22 }
 0x594   : > { %s7509_s28 = smov %s7505_s23 }
 0x595   :  { %4600 = vsyncpa [#allocation3], 1 }
 0x596   :  { %4602 = vsyncpa [#allocation3 + $0x1], 1 }
 0x597   :  { %4603 = vsyncpa [#allocation6], 1 }
 0x598   :  { %4605 = vsyncpa [#allocation6 + $0x1], 1 }
 0x599   :  { %4606 = vsyncpa [#allocation4], 1 }
 0x59a   :  { %4608 = vsyncpa [#allocation4 + $0x1], 1 }

// kernel: tpu_custom_call.1
= control target key start
LH: loop header
LB: loop body
LE: loop exit
PB: predicated region body
PF: predicated region fallthrough
CT: control target
= control target key end

     0   :  { %s7388_s0 = inlined_call_operand.hbm [shape: f32[2,8,16,16], index: 0, kind: input, shape index: {}, may-alias: {0,7}]   ;;  %s7389_s1 = inlined_call_operand.vmem [shape: bf16[2,8,16,16], index: 1, kind: input, shape index: {}]   ;;  %s7390_s2 = inlined_call_operand.vmem [shape: f32[2,2,16,16], index: 2, kind: input, shape index: {}]   ;;  %s7391_s3 = inlined_call_operand.hbm [shape: f32[2,16,16], index: 3, kind: input, shape index: {}]   ;;  %s7392_s4 = inlined_call_operand.vmem [shape: f32[2,8,16,16], index: 4, kind: input, shape index: {}]   ;;  %s7393_s5 = inlined_call_operand.vmem [shape: bf16[8,16,16], index: 5, kind: input, shape index: {}]   ;;  %s7394_s6 = inlined_call_operand.hbm [shape: bf16[8,16,16], index: 6, kind: input, shape index: {}]   ;;  %s7395_s7 = inlined_call_operand.hbm [shape: f32[2,8,16,16], index: 7, kind: output, shape index: {}, may-alias: {0,7}]  }
   0x1   :  { %7419 = sst [smem:[#allocation49_spill]] %s7388_s0 }
   0x2   :  { %7420 = sst [smem:[#allocation50_spill]] %s7394_s6 }
   0x3   :  { %7421 = sst [smem:[#allocation51_spill]] %s7395_s7 }
   0x4   :  { %12 = vsyncpa [#allocation3], 0 }
   0x5   :  { %14 = vsyncpa [#allocation3 + $0x1], 0 }
   0x6   :  { %15 = vsyncpa [#allocation6], 0 }
   0x7   :  { %17 = vsyncpa [#allocation6 + $0x1], 0 }
   0x8   :  { %18 = vsyncpa [#allocation4], 0 }
   0x9   :  { %20 = vsyncpa [#allocation4 + $0x1], 0  ;;  %s5895_s24 = smov 0   ;;  %s5897_s25 = smov 0  }
   0xa   :  { %s5899_s26 = smov 0   ;;  %s5901_s27 = smov 0  }
   0xb   :  { %s5903_s28 = smov 0   ;;  %s5905_s29 = smov 0  }
   0xc LB: > { %7422 = sst [smem:[#allocation13_spill]] %s5823_s24  ;;  %s5926_s30 = sadd.s32 4294967295, %s5843_s29   ;;  %s5843_s29 = sphi %s5905_s29, %s26_s29   ;;  %s5839_s28 = sphi %s5903_s28, %s7509_s28   ;;  %s5835_s27 = sphi %s5901_s27, %s7508_s27   ;;  %s5831_s26 = sphi %s5899_s26, %s7504_s26   ;;  %s5827_s25 = sphi %s5897_s25, %s7507_s25   ;;  %s5823_s24 = sphi %s5895_s24, %s7506_s24  }
   0xd   : > { %7423 = sst [smem:[#allocation14_spill]] %s5831_s26  ;;  %s4753_s8 = sadd.s32 4294967294, %s5843_s29  }
   0xe   : > { %7424 = sst [smem:[#allocation15_spill]] %s5843_s29  ;;  %p60_p0 = scmp.ne.s32.totalorder %s5827_s25, %s5823_s24 }
   0xf   : > { %p61_p1 = scmp.eq.s32.totalorder %s5926_s30, 0  ;;  %p242_p3 = scmp.eq.s32.totalorder %s4753_s8, 1 }
  0x10   : > { %p4754_p5 = scmp.ge.s32.totalorder %s5843_s29, 1  ;;  %p249_p7 = scmp.lt.s32.totalorder %s5843_s29, 3 }
  0x11   : > { %p5935_p4 = por %p61_p1, %p60_p0  ;;  %p5940_p6 = por %p242_p3, %p60_p0 }
  0x12   : > { %p5945_p8 = pnand %p4754_p5, %p249_p7  ;;  %s5845_s12 = smov [#allocation7]  }
  0x13   : > { %s7426_s10 = scalar_select %p5940_p6, 1, 0 }
  0x14   : > { %s264_s13 = sshll.u32 %s5845_s12, 4  ;;  %p5558_p9 = pneg %p5945_p8  ;;  %s265_s13 = int_to_ptr.vmem [resolvable:$true] %s264_s13 }
  0x15   : > { %7427 = sst [smem:[#allocation16_spill]] %s7426_s10  ;;  %p4756_p10 = scmp.ge.s32.totalorder %s5843_s29, 2 }
  0x16   : > { %p5954_p11 = pnand %p5558_p9, %p61_p1  ;;  %s38_s15 = sadd.s32 1, %s5839_s28 }
  0x17   : > { %s5684_s16 = scalar_lea.vmem %s265_s13, 1024  ;;  %p5692_p5 = scmp.lt.s32.totalorder %s265_s13, %s265_s13 }
  0x18   : > { %p5675_p12 = pneg %p5954_p11  ;;  %p5685_p13 = scmp.ne.s32.totalorder %s265_s13, %s5684_s16 }
  0x19   : > { %p5693_p7 = scmp.lt.s32.totalorder %s5684_s16, %s5684_s16 }
  0x1a   : > { %p5687_p0 = pnand %p5685_p13, %p5675_p12 }
  0x1b   : > { %p5694_p2 = por %p5693_p7, %p5692_p5 }
  0x1c   : > { %p5688_p3 = pneg %p5687_p0 }
  0x1e   : > { %p5695_p6 = pnand %p5694_p2, %p5688_p3 }
  0x20   : > { %5698 = shalt.err (!%p5695_p6)
}
  0x21   : > { %s5846_s17 = smov 64   ;;  %s5847_s18 = smov 4  }
  0x22   : > { %s7430_s6 = sld [smem:[#allocation50_spill]]  ;;  %p40_p2 = scmp.ge.s32.totalorder %s38_s15, 2 }
  0x23   : > { %s47_s21 = sadd.s32 1, %s5831_s26  ;;  %p54_p6 = scmp.ne.s32.totalorder %s5831_s26, %s5827_s25 }
  0x24   : > { %p55_p9 = scmp.eq.s32.totalorder %s5843_s29, 0  ;;  %s7511_s15 = smov (%p40_p2, %s38_s15), 0 }
  0x25   : > { %7431 = sst [smem:[#allocation17_spill]] %s7511_s15  ;;  %p7433_p13 = scmp.eq.s32.totalorder %s5926_s30, 1 }
  0x26   : > { %p5972_p12 = por %p55_p9, %p54_p6  ;;  %s42_s8 = ssub.s32 %s5839_s28, %s7511_s15 }
  0x27   : > { %p5978_p0 = por %p7433_p13, %p54_p6  ;;  %p45_p3 = scmp.eq.s32.totalorder %s42_s8, 0 }
  0x28   : > { %5561 = dma.hbm_to_vmem [thread:$0]  (!%p5954_p11), %s7430_s6, 1024, %s265_s13, [#allocation6], %s5846_s17, %s5846_s17, %s5847_s18  }
  0x29   : > { %p5574_p11 = scmp.lt.s32.totalorder %s5843_s29, 2  ;;  %s5986_s12 = sand.u32 1, %s5831_s26  }
  0x2a   : > { %s4757_s13 = sshll.u32 %s5986_s12, 7  ;;  %s4963_s16 = sshll.u32 %s5839_s28, 11 }
  0x2b   : > { %s5990_s14 = scalar_select %p45_p3, %s5831_s26, %s47_s21  }
  0x2c   : > { %s7436_s0 = sld [smem:[#allocation49_spill]]  ;;  %s282_s20 = scalar_lea.vmem [#allocation2], %s4757_s13 }
  0x2d   : > { %7435 = sst [smem:[#allocation18_spill]] %s5990_s14  ;;  %s292_s6 = sshll.u32 %s282_s20, 4  ;;  %s293_s6 = int_to_ptr.vmem [resolvable:$true] %s292_s6 }
  0x2e   : > { %p5998_p5 = pnand %p5574_p11, %p5972_p12  ;;  %s324_s8 = sand.u32 1, %s5843_s29  }
  0x2f   : > { %s279_s10 = scalar_lea.sflag [#allocation3], %s5986_s12  ;;  %s5712_s21 = scalar_lea.vmem %s293_s6, 2048 }
  0x30   : > { %p5701_p7 = pneg %p5998_p5  ;;  %p5713_p2 = scmp.ne.s32.totalorder %s293_s6, %s5712_s21 }
  0x31   : > { %s5848_s13 = smov [#allocation2]  }
  0x32   : > { %s291_s19 = scalar_lea.hbm %s7436_s0, %s4963_s16  ;;  %p5715_p6 = pnand %p5713_p2, %p5701_p7 }
  0x33   : > { %s5717_s16 = sshll.u32 %s5848_s13, 4  ;;  %s5718_s16 = int_to_ptr.vmem [resolvable:$false] %s5717_s16 }
  0x34   : > { %p5716_p9 = pneg %p5715_p6  ;;  %s5719_s22 = scalar_lea.vmem %s5718_s16, 4096 }
  0x35   : > { %p5720_p12 = scmp.lt.s32.totalorder %s293_s6, %s5718_s16  ;;  %p5721_p13 = scmp.lt.s32.totalorder %s5719_s22, %s5712_s21 }
  0x37   : > { %p5722_p11 = por %p5721_p13, %p5720_p12 }
  0x39   : > { %p5723_p3 = pnand %p5722_p11, %p5716_p9 }
  0x3b   : > { %5726 = shalt.err (!%p5723_p3)
}
  0x3c   : > { %s5849_s17 = smov 128   ;;  %s5850_s18 = smov 8  }
  0x3d   : > { %5565 = dma.hbm_to_vmem [thread:$0]  (!%p5998_p5), %s291_s19, 2048, %s293_s6, %s279_s10, %s5849_s17, %s5849_s17, %s5850_s18  }
  0x3e   : > { %s4760_s20 = sshll.u32 %s5986_s12, 4  ;;  %s4964_s0 = sshll.u32 %s5839_s28, 8 }
  0x3f   : > { %s334_s13 = scalar_lea.hbm %s7391_s3, %s4964_s0  ;;  %s328_s29 = scalar_lea.vmem [#allocation5], %s4760_s20 }
  0x40   : > { %s335_s16 = sshll.u32 %s328_s29, 4  ;;  %s325_s21 = scalar_lea.sflag [#allocation6], %s324_s8  ;;  %s336_s16 = int_to_ptr.vmem [resolvable:$true] %s335_s16 }
  0x41   : > { %s5740_s22 = scalar_lea.vmem %s336_s16, 256  ;;  %s5851_s24 = smov [#allocation5]  }
  0x42   : > { %p5741_p2 = scmp.ne.s32.totalorder %s336_s16, %s5740_s22  ;;  %s5745_s7 = sshll.u32 %s5851_s24, 4  ;;  %s5746_s7 = int_to_ptr.vmem [resolvable:$false] %s5745_s7 }
  0x43   : > { %s5747_s6 = scalar_lea.vmem %s5746_s7, 512  ;;  %p5748_p12 = scmp.lt.s32.totalorder %s336_s16, %s5746_s7 }
  0x44   : > { %p5743_p6 = pnand %p5741_p2, %p5701_p7  ;;  %p5749_p13 = scmp.lt.s32.totalorder %s5747_s6, %s5740_s22 }
  0x46   : > { %p5744_p9 = pneg %p5743_p6  ;;  %p5750_p11 = por %p5749_p13, %p5748_p12 }
  0x48   : > { %p5751_p3 = pnand %p5750_p11, %p5744_p9 }
  0x4a   : > { %5754 = shalt.err (!%p5751_p3)
}
  0x4b   : > { %5568 = dma.hbm_to_vmem [thread:$0]  (!%p5998_p5), %s334_s13, 256, %s336_s16, %s325_s21, %s5849_s17, %s5849_s17, %s5850_s18  }
  0x4c   : > { %361 = sbr.rel (%p5945_p8) target bundleno = 1406 (0x57e), region = 48 }
  0x51   : > { %s6024_s0 = sand.u32 1, %s5827_s25  }
  0x52   : > { %s4764_s24 = sshll.u32 %s6024_s0, 7  ;;  %s364_s26 = scalar_lea.sflag [#allocation3], %s6024_s0 }
  0x53   : > { %s6030_s7 = scalar_lea.vmem [#allocation2], %s4764_s24 }
  0x54   : > { %5806 = dma.done.wait (%p5935_p4), %s364_s26, 2048  }
  0x55   : > { %5808 = vsyncadd (%p5935_p4), %s364_s26, 4294965248  ;;  %s372_s29 = sand.u32 1, %s5926_s30   ;;  %s4765_s10 = sshll.u32 %s6024_s0, 4 }
  0x56   : > { %s373_s11 = scalar_lea.sflag [#allocation6], %s372_s29  ;;  %s6038_s15 = scalar_lea.vmem [#allocation5], %s4765_s10 }
  0x57   : > { %5810 = dma.done.wait (%p5935_p4), %s373_s11, 256  }
  0x58   : > { %5812 = vsyncadd (%p5935_p4), %s373_s11, 4294967040 }
  0x59   : > { %5814 = dma.done.wait (%p61_p1), [#allocation6], 1024  }
  0x5a   : > { %5816 = vsyncadd (%p61_p1), [#allocation6], 4294966272  ;;  %p443_p8 = scmp.lt.s32.totalorder %s5835_s27, 1  ;;  %v5633_v0 = vld [vmem:[#allocation7 + $0x20] sm:$0xff]   ;;  %v6064_v3 = vld [vmem:[%s6030_s7 + $0x8] sm:$0xff]  ;;  %vm643_vm0 = vcmask 130048  }
  0x5b   : > { %v6058_v1 = vld [vmem:[#allocation7] sm:$0xff]   ;;  %5188 = vmatprep.subr.bf16.mxu0 %v5633_v0  ;;  %v6069_v5 = vld [vmem:[%s6030_s7 + $0x48] sm:$0xff]  ;;  %v473_v12 = vld [vmem:[%s6030_s7 + $0x10] sm:$0xff]  ;;  %s7494_s6 = sld [smem:[#allocation51_spill]]  ;;  %s5852_s10 = smov [#allocation8]  }
  0x5c   : > { %s6050_s12 = scalar_select %p443_p8, %s5835_s27, 1  ;;  %v6061_v2 = vld [vmem:[%s6030_s7] sm:$0xff]  ;;  %5189 = vmatpush3.bf16.msra.mxu0 %v5633_v0  ;;  %5198 = vmatprep.subr.bf16.mxu1 %v6058_v1  ;;  %v474_v15 = vld [vmem:[%s6030_s7 + $0x18] sm:$0xff]  ;;  %v481_v16 = vld [vmem:[%s6030_s7 + $0x50] sm:$0xff] }
  0x5d   : > { %v479_v4 = vld [vmem:[%s6030_s7 + $0x40] sm:$0xff]  ;;  %5199 = vmatpush3.bf16.msra.mxu1 %v6058_v1  ;;  %5208 = vmatprep.subr.bf16.mxu0 %v6058_v1  ;;  %v482_v17 = vld [vmem:[%s6030_s7 + $0x58] sm:$0xff]  ;;  %v5635_v22 = vld [vmem:[#allocation7 + $0x28] sm:$0xff]  }
  0x5e   : > { %s4966_s14 = sshll.u32 %s6050_s12, 5  ;;  %v475_v25 = vld [vmem:[%s6030_s7 + $0x20] sm:$0xff]  ;;  %v476_v26 = vld [vmem:[%s6030_s7 + $0x28] sm:$0xff]  ;;  %5218 = vmatprep.subr.bf16.mxu1 %v5635_v22  ;;  %v6115_v33 = vld [vmem:[%s6030_s7 + $0x30] sm:$0xff]  ;;  %s4967_s11 = sshll.u32 %s6050_s12, 7 }
  0x5f   : > { %s6056_s8 = scalar_lea.vmem %s7390_s2, %s4966_s14  ;;  %v483_v27 = vld [vmem:[%s6030_s7 + $0x60] sm:$0xff]  ;;  %v484_v30 = vld [vmem:[%s6030_s7 + $0x68] sm:$0xff]  ;;  %v6118_v34 = vld [vmem:[%s6030_s7 + $0x38] sm:$0xff]  ;;  %s6523_s19 = scalar_lea.vmem %s7392_s4, %s4967_s11 }
  0x60   : > { %v6072_v6 = vld [vmem:[%s6056_s8] sm:$0xff]  ;;  %v6075_v7 = vld [vmem:[%s6056_s8 + $0x8] sm:$0xff]  ;;  %v6079_v8 = vld [vmem:[%s6056_s8 + $0x10] sm:$0xff]  ;;  %s4965_s20 = sshll.u32 %s6050_s12, 6  ;;  %s5759_s11 = sshll.u32 %s5852_s10, 4  ;;  %s5760_s11 = int_to_ptr.vmem [resolvable:$false] %s5759_s11 }
  0x61   : > { %v6082_v9 = vld [vmem:[%s6056_s8 + $0x18] sm:$0xff]  ;;  %v492_v10 = vmul.f32 %v6072_v6, %v6061_v2  ;;  %v493_v11 = vmul.f32 %v6075_v7, %v6064_v3  ;;  %v500_v13 = vmul.f32 %v6079_v8, %v479_v4  ;;  %v494_v18 = vmul.f32 %v6072_v6, %v473_v12  ;;  %v6125_v38 = vld [vmem:[%s6030_s7 + $0x70] sm:$0xff]  ;;  %v6137_v45 = vld [vmem:[#allocation7 + $0x8] sm:$0xff]   ;;  %s451_s21 = scalar_lea.vmem %s7389_s1, %s4965_s20  ;;  %s5761_s14 = scalar_lea.vmem %s5760_s11, 4096 }
  0x62   : > { %v501_v14 = vmul.f32 %v6082_v9, %v6069_v5  ;;  %v495_v19 = vmul.f32 %v6075_v7, %v474_v15  ;;  %v502_v20 = vmul.f32 %v6079_v8, %v481_v16  ;;  %v503_v21 = vmul.f32 %v6082_v9, %v482_v17  ;;  %v6128_v39 = vld [vmem:[%s6030_s7 + $0x78] sm:$0xff] }
  0x63   : > { %v6100_v23 = vsub.f32 %v492_v10, %v500_v13  ;;  %v496_v31 = vmul.f32 %v6072_v6, %v475_v25  ;;  %v497_v32 = vmul.f32 %v6075_v7, %v476_v26  ;;  %v518_v36 = vmul.f32 %v6079_v8, %v473_v12 }
  0x64   : > { %v6102_v24 = vsub.f32 %v493_v11, %v501_v14  ;;  %v6107_v28 = vsub.f32 %v494_v18, %v502_v20  ;;  %v6109_v29 = vsub.f32 %v495_v19, %v503_v21  ;;  %v504_v37 = vmul.f32 %v6079_v8, %v483_v27 }
  0x65   : > { %v524_v40 = vmul.f32 %v6072_v6, %v479_v4  ;;  %v519_v41 = vmul.f32 %v6082_v9, %v474_v15  ;;  %v505_v43 = vmul.f32 %v6082_v9, %v484_v30  ;;  %v498_v44 = vmul.f32 %v6072_v6, %v6115_v33 }
  0x66   : > { %v557_v35 = vpack.c.bf16 %v6102_v24, %v6100_v23  ;;  %v558_v42 = vpack.c.bf16 %v6109_v29, %v6107_v28  ;;  %v526_v46 = vmul.f32 %v6072_v6, %v481_v16  ;;  %v6142_v47 = vsub.f32 %v496_v31, %v504_v37 }
  0x67   : > { %v499_v48 = vmul.f32 %v6075_v7, %v6118_v34  ;;  %v527_v50 = vmul.f32 %v6075_v7, %v482_v17  ;;  %v6149_v51 = vsub.f32 %v497_v32, %v505_v43  ;;  %v506_v52 = vmul.f32 %v6079_v8, %v6125_v38 }
  0x68   : > { %5190 = vmatprep.mubr.msk.bf16.mxu0 %vm643_vm0, %v557_v35  ;;  %5200 = vmatprep.mubr.msk.bf16.mxu1 %vm643_vm0, %v557_v35  ;;  %v561_v49 = vunpack.c.l.bf16 %v557_v35  ;;  %v507_v53 = vmul.f32 %v6082_v9, %v6128_v39  ;;  %v562_v54 = vunpack.c.h.bf16 %v557_v35  ;;  %v516_v56 = vmul.f32 %v6079_v8, %v6061_v2 }
  0x69   : > { %5191 = vmatmul.mubr.msk.bf16.vlgmr.msra.gmra.mxu0 %vm643_vm0, %v558_v42  ;;  %5201 = vmatmul.mubr.msk.bf16.vlgmr.msra.gmra.mxu1 %vm643_vm0, %v558_v42  ;;  %v563_v57 = vunpack.c.l.bf16 %v558_v42  ;;  %v564_v58 = vunpack.c.h.bf16 %v558_v42  ;;  %v559_v59 = vpack.c.bf16 %v6149_v51, %v6142_v47  ;;  %v6161_v60 = vsub.f32 %v498_v44, %v506_v52 }
  0x6a   : > { %5209 = vmatpush3.bf16.msra.mxu0 %v6058_v1  ;;  %5219 = vmatpush3.bf16.msra.mxu1 %v5635_v22  ;;  %v569_v55 = vsub.f32 %v6100_v23, %v561_v49  ;;  %v6164_v61 = vsub.f32 %v499_v48, %v507_v53  ;;  %v570_v62 = vsub.f32 %v6102_v24, %v562_v54  ;;  %v5638_v48 = vld [vmem:[#allocation7 + $0x10] sm:$0xff]  }
  0x6b   : > { %5228 = vmatprep.subr.bf16.mxu0 %v6137_v45  ;;  %v517_v63 = vmul.f32 %v6082_v9, %v6064_v3  ;;  %v525_v0 = vmul.f32 %v6075_v7, %v6069_v5  ;;  %5238 = vmatprep.subr.bf16.mxu1 %v6137_v45  ;;  %v6172_v1 = vadd.f32 %v526_v46, %v518_v36  ;;  %v565_v12 = vunpack.c.l.bf16 %v559_v59  ;;  %v5637_v46 = vld [vmem:[#allocation7 + $0x30] sm:$0xff]  }
  0x6c   : > { %v6174_v2 = vadd.f32 %v527_v50, %v519_v41  ;;  %5194 = vmatprep.mubr.msk.bf16.mxu0 %vm643_vm0, %v559_v59  ;;  %5204 = vmatprep.mubr.msk.bf16.mxu1 %vm643_vm0, %v559_v59  ;;  %v6178_v4 = vadd.f32 %v524_v40, %v516_v56  ;;  %v560_v10 = vpack.c.bf16 %v6164_v61, %v6161_v60  ;;  %v566_v5 = vunpack.c.h.bf16 %v559_v59 }
  0x6d   : > { %v577_v11 = vpack.c.bf16 %v570_v62, %v569_v55  ;;  %v6182_v3 = vadd.f32 %v525_v0, %v517_v63  ;;  %v520_v13 = vmul.f32 %v6079_v8, %v475_v25  ;;  %v521_v14 = vmul.f32 %v6082_v9, %v476_v26 }
  0x6e   : > { %v528_v15 = vmul.f32 %v6072_v6, %v483_v27  ;;  %v571_v16 = vsub.f32 %v6107_v28, %v563_v57  ;;  %v572_v17 = vsub.f32 %v6109_v29, %v564_v58  ;;  %v529_v19 = vmul.f32 %v6075_v7, %v484_v30 }
  0x6f   : > { %v581_v18 = vpack.c.bf16 %v6182_v3, %v6178_v4  ;;  %v573_v20 = vsub.f32 %v6142_v47, %v565_v12  ;;  %v574_v21 = vsub.f32 %v6149_v51, %v566_v5  ;;  %v582_v27 = vpack.c.bf16 %v6174_v2, %v6172_v1 }
  0x70   : > { %v6198_v22 = vadd.f32 %v528_v15, %v520_v13  ;;  %v6200_v25 = vadd.f32 %v529_v19, %v521_v14  ;;  %v578_v26 = vpack.c.bf16 %v572_v17, %v571_v16  ;;  %v567_v30 = vunpack.c.l.bf16 %v560_v10 }
  0x71   : > { %5195 = vmatmul.mubr.msk.bf16.gmra.mxu0 %vm643_vm0, %v560_v10  ;;  %5205 = vmatmul.mubr.msk.bf16.gmra.mxu1 %vm643_vm0, %v560_v10  ;;  %v568_v31 = vunpack.c.h.bf16 %v560_v10  ;;  %v522_v32 = vmul.f32 %v6079_v8, %v6115_v33  ;;  %v523_v35 = vmul.f32 %v6082_v9, %v6118_v34  ;;  %v530_v36 = vmul.f32 %v6072_v6, %v6125_v38 }
  0x72   : > { %5210 = vmatprep.mubr.msk.bf16.mxu0 %vm643_vm0, %v577_v11  ;;  %5220 = vmatprep.mubr.msk.bf16.mxu1 %vm643_vm0, %v581_v18  ;;  %v531_v37 = vmul.f32 %v6075_v7, %v6128_v39  ;;  %v585_v40 = vunpack.c.l.bf16 %v581_v18  ;;  %v586_v41 = vunpack.c.h.bf16 %v581_v18  ;;  %v579_v42 = vpack.c.bf16 %v574_v21, %v573_v20 }
  0x73   : > { %v583_v43 = vpack.c.bf16 %v6200_v25, %v6198_v22  ;;  %v575_v44 = vsub.f32 %v6161_v60, %v567_v30  ;;  %v576_v8 = vsub.f32 %v6164_v61, %v568_v31  ;;  %v538_v6 = vadd.f32 %v530_v36, %v522_v32  ;;  %v6267_v36 = vld [vmem:[%s7393_s5 + $0x20] sm:$0xff]  }
  0x74   : > { %v539_v9 = vadd.f32 %v531_v37, %v523_v35  ;;  %v593_v7 = vsub.f32 %v6178_v4, %v585_v40  ;;  %v594_v33 = vsub.f32 %v6182_v3, %v586_v41  ;;  %v587_v39 = vunpack.c.l.bf16 %v582_v27 }
  0x75   : > { %v580_v34 = vpack.c.bf16 %v576_v8, %v575_v44  ;;  %v588_v49 = vunpack.c.h.bf16 %v582_v27  ;;  %v589_v52 = vunpack.c.l.bf16 %v583_v43  ;;  %v590_v53 = vunpack.c.h.bf16 %v583_v43 }
  0x76   : > { %v584_v38 = vpack.c.bf16 %v539_v9, %v538_v6  ;;  %v601_v50 = vpack.c.bf16 %v594_v33, %v593_v7  ;;  %v605_v10 = vadd.f32 %v6178_v4, %v6100_v23  ;;  %v606_v11 = vadd.f32 %v6182_v3, %v6102_v24 }
  0x77   : > { %v596_v54 = vsub.f32 %v6174_v2, %v588_v49  ;;  %v597_v55 = vsub.f32 %v6198_v22, %v589_v52  ;;  %v598_v56 = vsub.f32 %v6200_v25, %v590_v53  ;;  %v607_v13 = vadd.f32 %v6172_v1, %v6107_v28 }
  0x78   : > { %v591_v58 = vunpack.c.l.bf16 %v584_v38  ;;  %v592_v59 = vunpack.c.h.bf16 %v584_v38  ;;  %v613_v5 = vpack.c.bf16 %v606_v11, %v605_v10  ;;  %v608_v14 = vadd.f32 %v6174_v2, %v6109_v29 }
  0x79   : > { %5211 = vmatmul.mubr.msk.bf16.vlgmr.msra.gmra.mxu0 %vm643_vm0, %v578_v26  ;;  %5221 = vmatmul.mubr.msk.bf16.vlgmr.msra.gmra.mxu1 %vm643_vm0, %v582_v27  ;;  %v603_v62 = vpack.c.bf16 %v598_v56, %v597_v55  ;;  %v609_v23 = vadd.f32 %v6198_v22, %v6142_v47  ;;  %v610_v24 = vadd.f32 %v6200_v25, %v6149_v51 }
  0x7a   : > { %5229 = vmatpush3.bf16.msra.mxu0 %v6137_v45  ;;  %5239 = vmatpush3.bf16.msra.mxu1 %v6137_v45  ;;  %v595_v45 = vsub.f32 %v6172_v1, %v587_v39  ;;  %v599_v63 = vsub.f32 %v538_v6, %v591_v58  ;;  %v600_v0 = vsub.f32 %v539_v9, %v592_v59  ;;  %v617_v28 = vunpack.c.l.bf16 %v613_v5 }
  0x7b   : > { %5214 = vmatprep.mubr.msk.bf16.mxu0 %vm643_vm0, %v579_v42  ;;  %5224 = vmatprep.mubr.msk.bf16.mxu1 %vm643_vm0, %v583_v43  ;;  %v614_v4 = vpack.c.bf16 %v608_v14, %v607_v13  ;;  %v615_v3 = vpack.c.bf16 %v610_v24, %v609_v23  ;;  %v618_v1 = vunpack.c.h.bf16 %v613_v5  ;;  %v611_v29 = vadd.f32 %v538_v6, %v6161_v60 }
  0x7c   : > { %5248 = vmatprep.subr.bf16.mxu0 %v5637_v46  ;;  %5258 = vmatprep.subr.bf16.mxu1 %v5638_v48  ;;  %v602_v57 = vpack.c.bf16 %v596_v54, %v595_v45  ;;  %v604_v12 = vpack.c.bf16 %v600_v0, %v599_v63  ;;  %v612_v2 = vadd.f32 %v539_v9, %v6164_v61 }
  0x7d   : > { %v625_v15 = vsub.f32 %v605_v10, %v617_v28  ;;  %v626_v47 = vsub.f32 %v606_v11, %v618_v1  ;;  %v619_v16 = vunpack.c.l.bf16 %v614_v4  ;;  %v620_v17 = vunpack.c.h.bf16 %v614_v4 }
  0x7e   : > { %v616_v51 = vpack.c.bf16 %v612_v2, %v611_v29  ;;  %v621_v19 = vunpack.c.l.bf16 %v615_v3  ;;  %v622_v20 = vunpack.c.h.bf16 %v615_v3 }
  0x7f   : > { %v627_v60 = vsub.f32 %v607_v13, %v619_v16  ;;  %v628_v21 = vsub.f32 %v608_v14, %v620_v17 }
  0x80   : > { %v629_v61 = vsub.f32 %v609_v23, %v621_v19  ;;  %v630_v22 = vsub.f32 %v610_v24, %v622_v20  ;;  %v623_v26 = vunpack.c.l.bf16 %v616_v51 }
  0x81   : > { %5215 = vmatmul.mubr.msk.bf16.gmra.mxu0 %vm643_vm0, %v580_v34  ;;  %5225 = vmatmul.mubr.msk.bf16.gmra.mxu1 %vm643_vm0, %v584_v38  ;;  %v634_v25 = vpack.c.bf16 %v628_v21, %v627_v60 }
  0x82   : > { %5230 = vmatprep.mubr.msk.bf16.mxu0 %vm643_vm0, %v581_v18  ;;  %5240 = vmatprep.mubr.msk.bf16.mxu1 %vm643_vm0, %v601_v50  ;;  %v633_v18 = vpack.c.bf16 %v626_v47, %v625_v15  ;;  %v635_v30 = vpack.c.bf16 %v630_v22, %v629_v61  ;;  %v631_v31 = vsub.f32 %v611_v29, %v623_v26 }
  0x89   : > { %5231 = vmatmul.mubr.msk.bf16.vlgmr.msra.gmra.mxu0 %vm643_vm0, %v582_v27  ;;  %5241 = vmatmul.mubr.msk.bf16.vlgmr.msra.gmra.mxu1 %vm643_vm0, %v602_v57  ;;  %v624_v27 = vunpack.c.h.bf16 %v616_v51 }
  0x8a   : > { %5249 = vmatpush3.bf16.msra.mxu0 %v5637_v46  ;;  %5234 = vmatprep.mubr.msk.bf16.mxu0 %vm643_vm0, %v583_v43 }
  0x8b   : > { %5244 = vmatprep.mubr.msk.bf16.mxu1 %vm643_vm0, %v603_v62  ;;  %5259 = vmatpush3.bf16.msra.mxu1 %v5638_v48  ;;  %v632_v32 = vsub.f32 %v612_v2, %v624_v27 }
  0x8c   : > { %5268 = vmatprep.subr.bf16.mxu0 %v5638_v48  ;;  %5278 = vmatprep.subr.bf16.mxu1 %v6267_v36 }
  0x8d   : > { %v636_v35 = vpack.c.bf16 %v632_v32, %v631_v31 }
  0x91   : > { %5235 = vmatmul.mubr.msk.bf16.gmra.mxu0 %vm643_vm0, %v584_v38  ;;  %5245 = vmatmul.mubr.msk.bf16.gmra.mxu1 %vm643_vm0, %v604_v12 }
  0x92   : > { %5250 = vmatprep.mubr.msk.bf16.mxu0 %vm643_vm0, %v613_v5  ;;  %5260 = vmatprep.mubr.msk.bf16.mxu1 %vm643_vm0, %v613_v5 }
  0x99   : > { %5251 = vmatmul.mubr.msk.bf16.vlgmr.msra.gmra.mxu0 %vm643_vm0, %v614_v4  ;;  %5261 = vmatmul.mubr.msk.bf16.vlgmr.msra.gmra.mxu1 %vm643_vm0, %v614_v4 }
  0x9a   : > { %5269 = vmatpush3.bf16.msra.mxu0 %v5638_v48  ;;  %5254 = vmatprep.mubr.msk.bf16.mxu0 %vm643_vm0, %v615_v3 }
  0x9b   : > { %5264 = vmatprep.mubr.msk.bf16.mxu1 %vm643_vm0, %v615_v3  ;;  %5279 = vmatpush3.bf16.msra.mxu1 %v6267_v36 }
  0xa1   : > { %5255 = vmatmul.mubr.msk.bf16.gmra.mxu0 %vm643_vm0, %v616_v51  ;;  %5265 = vmatmul.mubr.msk.bf16.gmra.mxu1 %vm643_vm0, %v616_v51 }
  0xa2   : > { %5270 = vmatprep.mubr.msk.bf16.mxu0 %vm643_vm0, %v633_v18 }
  0xa9   : > { %5271 = vmatmul.mubr.msk.bf16.vlgmr.msra.gmra.mxu0 %vm643_vm0, %v634_v25  ;;  %v6300_v25 = vld [vmem:[%s7393_s5] sm:$0xff]  }
  0xaa   : > { %5274 = vmatprep.mubr.msk.bf16.mxu0 %vm643_vm0, %v635_v30  ;;  %5288 = vmatprep.subr.bf16.mxu0 %v6300_v25 }
  0xab   : > { %5289 = vmatpush3.bf16.msra.mxu0 %v6300_v25  ;;  %5298 = vmatprep.subr.bf16.mxu1 %v6300_v25 }
  0xb1   : > { %5275 = vmatmul.mubr.msk.bf16.gmra.mxu0 %vm643_vm0, %v636_v35 }
 0x129   : > { %v5192_v37 = vpop.f32.mrf.mxu0  ;;  %v5202_v40 = vpop.f32.mrf.mxu1 }
 0x12a   : > { %v770_v13 = vadd.f32 %v5202_v40, %v5192_v37 }
 0x12b   : > { %v690_v41 = vpop.f32.mrf.mxu0  ;;  %v761_v42 = vpop.f32.mrf.mxu1 }
 0x12c   : > { %v762_v4 = vadd.f32 %v761_v42, %v690_v41 }
 0x12d   : > { %v5193_v43 = vpop.f32.mrf.mxu0  ;;  %v5203_v44 = vpop.f32.mrf.mxu1 }
 0x12e   : > { %v773_v29 = vadd.f32 %v5203_v44, %v5193_v43 }
 0x12f   : > { %v693_v46 = vpop.f32.mrf.mxu0  ;;  %v764_v48 = vpop.f32.mrf.mxu1 }
 0x130   : > { %v765_v18 = vadd.f32 %v764_v48, %v693_v46 }
 0x131   : > { %v5196_v8 = vpop.f32.mrf.mxu0  ;;  %v5206_v6 = vpop.f32.mrf.mxu1 }
 0x132   : > { %v786_v26 = vadd.f32 %v5206_v6, %v5196_v8 }
 0x133   : > { %v706_v9 = vpop.f32.mrf.mxu0  ;;  %v777_v7 = vpop.f32.mrf.mxu1 }
 0x134   : > { %v778_v40 = vadd.f32 %v777_v7, %v706_v9 }
 0x135   : > { %v6271_v33 = vpop.f32.mrf.mxu0  ;;  %v6273_v34 = vpop.f32.mrf.mxu1 }
 0x136   : > { %v789_v8 = vadd.f32 %v6273_v34, %v6271_v33 }
 0x137   : > { %v6275_v38 = vpop.f32.mrf.mxu0  ;;  %v6277_v39 = vpop.f32.mrf.mxu1 }
 0x139   : > { %v5212_v49 = vpop.f32.mrf.mxu0  ;;  %v5222_v50 = vpop.f32.mrf.mxu1 }
 0x13a   : > { %v6281_v3 = vadd.f32 %v5212_v49, %v770_v13 }
 0x13b   : > { %v838_v52 = vpop.f32.mrf.mxu0  ;;  %v929_v53 = vpop.f32.mrf.mxu1 }
 0x13c   : > { %v6285_v47 = vadd.f32 %v838_v52, %v762_v4 }
 0x13d   : > { %v5213_v45 = vpop.f32.mrf.mxu0  ;;  %v5223_v54 = vpop.f32.mrf.mxu1 }
 0x13e   : > { %v6291_v60 = vadd.f32 %v5213_v45, %v773_v29 }
 0x13f   : > { %v841_v55 = vpop.f32.mrf.mxu0  ;;  %v932_v56 = vpop.f32.mrf.mxu1 }
 0x140   : > { %v6302_v27 = vadd.f32 %v841_v55, %v765_v18 }
 0x141   : > { %v5216_v57 = vpop.f32.mrf.mxu0  ;;  %v5226_v58 = vpop.f32.mrf.mxu1 }
 0x142   : > { %v6311_v43 = vadd.f32 %v5216_v57, %v786_v26 }
 0x143   : > { %v854_v59 = vpop.f32.mrf.mxu0  ;;  %v945_v62 = vpop.f32.mrf.mxu1 }
 0x144   : > { %v6319_v7 = vadd.f32 %v854_v59, %v778_v40 }
 0x145   : > { %v5217_v63 = vpop.f32.mrf.mxu0  ;;  %v5227_v0 = vpop.f32.mrf.mxu1 }
 0x146   : > { %v6327_v55 = vadd.f32 %v5217_v63, %v789_v8 }
 0x147   : > { %v6279_v10 = vpop.f32.mrf.mxu0  ;;  %v948_v11 = vpop.f32.mrf.mxu1 }
 0x149   : > { %v5232_v12 = vpop.f32.mrf.mxu0  ;;  %v5242_v5 = vpop.f32.mrf.mxu1 }
 0x14a   : > { %v1009_v14 = vadd.f32 %v5232_v12, %v5222_v50 }
 0x14b   : > { %v1000_v23 = vpop.f32.mrf.mxu0  ;;  %v1077_v24 = vpop.f32.mrf.mxu1 }
 0x14c   : > { %v6283_v28 = vadd.f32 %v5242_v5, %v1009_v14  ;;  %v1001_v1 = vadd.f32 %v1000_v23, %v929_v53  ;;  %v781_v53 = vadd.f32 %v6277_v39, %v6275_v38 }
 0x14d   : > { %v5233_v2 = vpop.f32.mrf.mxu0  ;;  %v5243_v15 = vpop.f32.mrf.mxu1 }
 0x14e   : > { %v6287_v51 = vadd.f32 %v1077_v24, %v1001_v1  ;;  %v1012_v16 = vadd.f32 %v5233_v2, %v5223_v54  ;;  %v1357_v17 = vsub.f32 %v6281_v3, %v6283_v28  ;;  %v6334_v59 = vadd.f32 %v6279_v10, %v781_v53  ;;  %v6345_v10 = vld [vmem:[%s7393_s5 + $0x28] sm:$0xff]  }
 0x14f   : > { %v1003_v19 = vpop.f32.mrf.mxu0  ;;  %v1080_v20 = vpop.f32.mrf.mxu1  ;;  %5308 = vmatprep.subr.bf16.mxu0 %v6345_v10 }
 0x150   : > { %v6293_v21 = vadd.f32 %v5243_v15, %v1012_v16  ;;  %v1004_v61 = vadd.f32 %v1003_v19, %v932_v56  ;;  %1411 = vxpose.xlu1.b32.start [1/2] (short) (narrow) %v1357_v17, 16  ;;  %v1355_v22 = vsub.f32 %v6285_v47, %v6287_v51 }
 0x151   : > { %v5236_v30 = vpop.f32.mrf.mxu0  ;;  %v5246_v31 = vpop.f32.mrf.mxu1 }
 0x152   : > { %v6304_v32 = vadd.f32 %v1080_v20, %v1004_v61  ;;  %v1025_v35 = vadd.f32 %v5236_v30, %v5226_v58  ;;  %1379 = vxpose.xlu0.b32.start [1/2] (short) (narrow) %v1355_v22, 16  ;;  %v1358_v37 = vsub.f32 %v6291_v60, %v6293_v21 }
 0x153   : > { %v1016_v41 = vpop.f32.mrf.mxu0  ;;  %v1093_v42 = vpop.f32.mrf.mxu1 }
 0x154   : > { %v6313_v44 = vadd.f32 %v5246_v31, %v1025_v35  ;;  %v1017_v46 = vadd.f32 %v1016_v41, %v945_v62  ;;  %1412 = vxpose.xlu1.b32.end [2/2] (short) (narrow) %v1358_v37, 16  ;;  %v1356_v48 = vsub.f32 %v6302_v27, %v6304_v32 }
 0x155   : > { %v5237_v6 = vpop.f32.mrf.mxu0  ;;  %v5247_v9 = vpop.f32.mrf.mxu1 }
 0x156   : > { %v6321_v49 = vadd.f32 %v1093_v42, %v1017_v46  ;;  %v1028_v50 = vadd.f32 %v5237_v6, %v5227_v0  ;;  %1380 = vxpose.xlu0.b32.end [2/2] (short) (narrow) %v1356_v48, 16  ;;  %v1361_v52 = vsub.f32 %v6311_v43, %v6313_v44 }
 0x157   : > { %v1019_v45 = vpop.f32.mrf.mxu0  ;;  %v1096_v54 = vpop.f32.mrf.mxu1 }
 0x158   : > { %v6329_v56 = vadd.f32 %v5247_v9, %v1028_v50  ;;  %v1020_v33 = vadd.f32 %v1019_v45, %v948_v11  ;;  %1475 = vxpose.xlu1.b32.start [1/2] (short) (narrow) %v1361_v52, 16  ;;  %v1359_v34 = vsub.f32 %v6319_v7, %v6321_v49 }
 0x159   : > { %v5252_v57 = vpop.f32.mrf.mxu0  ;;  %v5262_v58 = vpop.f32.mrf.mxu1 }
 0x15a   : > { %v1362_v62 = vsub.f32 %v6327_v55, %v6329_v56  ;;  %v6338_v38 = vadd.f32 %v1096_v54, %v1020_v33  ;;  %1443 = vxpose.xlu0.b32.start [1/2] (short) (narrow) %v1359_v34, 16  ;;  %v1248_v29 = vadd.f32 %v5262_v58, %v5252_v57 }
 0x15b   : > { %v1168_v39 = vpop.f32.mrf.mxu0  ;;  %v1239_v63 = vpop.f32.mrf.mxu1 }
 0x15c   : > { %v1360_v0 = vsub.f32 %v6334_v59, %v6338_v38  ;;  %1476 = vxpose.xlu1.b32.end [2/2] (short) (narrow) %v1362_v62, 16  ;;  %v1240_v15 = vadd.f32 %v1239_v63, %v1168_v39 }
 0x15d   : > { %v5253_v11 = vpop.f32.mrf.mxu0  ;;  %v5263_v12 = vpop.f32.mrf.mxu1 }
 0x15e   : > { %1444 = vxpose.xlu0.b32.end [2/2] (short) (narrow) %v1360_v0, 16  ;;  %v1251_v19 = vadd.f32 %v5263_v12, %v5253_v11 }
 0x15f   : > { %v1171_v5 = vpop.f32.mrf.mxu0  ;;  %v1242_v14 = vpop.f32.mrf.mxu1 }
 0x160   : > { %v1243_v26 = vadd.f32 %v1242_v14, %v1171_v5 }
 0x161   : > { %v5256_v13 = vpop.f32.mrf.mxu0  ;;  %v5266_v4 = vpop.f32.mrf.mxu1 }
 0x162   : > { %v1264_v41 = vadd.f32 %v5266_v4, %v5256_v13 }
 0x163   : > { %v1184_v23 = vpop.f32.mrf.mxu0  ;;  %v1255_v17 = vpop.f32.mrf.mxu1 }
 0x164   : > { %v1256_v6 = vadd.f32 %v1255_v17, %v1184_v23 }
 0x165   : > { %v5257_v24 = vpop.f32.mrf.mxu0  ;;  %v5267_v37 = vpop.f32.mrf.mxu1 }
 0x167   : > { %v1187_v1 = vpop.f32.mrf.mxu0  ;;  %v1258_v50 = vpop.f32.mrf.mxu1 }
 0x168   : > { %v1259_v33 = vadd.f32 %v1258_v50, %v1187_v1 }
 0x169   : > { %v5272_v2 = vpop.f32.mrf.mxu0 }
 0x16a   : > { %v1349_v16 = vadd.f32 %v5272_v2, %v1248_v29 }
 0x16b   : > { %v1316_v18 = vpop.f32.mrf.mxu0 }
 0x16c   : > { %v1365_v20 = vsub.f32 %v1349_v16, %v6281_v3  ;;  %v1347_v61 = vadd.f32 %v1316_v18, %v1240_v15 }
 0x16d   : > { %v5273_v22 = vpop.f32.mrf.mxu0 }
 0x16e   : > { %v1363_v30 = vsub.f32 %v1347_v61, %v6285_v47  ;;  %v1350_v31 = vadd.f32 %v5273_v22, %v1251_v19  ;;  %v1373_v35 = vsub.f32 %v1365_v20, %v6283_v28  ;;  %v1267_v28 = vadd.f32 %v5267_v37, %v5257_v24 }
 0x16f   : > { %v1319_v40 = vpop.f32.mrf.mxu0 }
 0x170   : > { %v1366_v42 = vsub.f32 %v1350_v31, %v6291_v60  ;;  %v1348_v46 = vadd.f32 %v1319_v40, %v1243_v26  ;;  %1539 = vxpose.xlu1.b32.start [1/2] (short) (narrow) %v1373_v35, 16  ;;  %v1371_v48 = vsub.f32 %v1363_v30, %v6287_v51  ;;  %v5643_v30 = vld [vmem:[%s7393_s5 + $0x30] sm:$0xff]  }
 0x171   : > { %v5276_v8 = vpop.f32.mrf.mxu0 }
 0x172   : > { %v1364_v3 = vsub.f32 %v1348_v46, %v6302_v27  ;;  %v1353_v9 = vadd.f32 %v5276_v8, %v1264_v41  ;;  %1507 = vxpose.xlu0.b32.start [1/2] (short) (narrow) %v1371_v48, 16  ;;  %v1374_v47 = vsub.f32 %v1366_v42, %v6293_v21 }
 0x173   : > { %v1332_v52 = vpop.f32.mrf.mxu0 }
 0x174   : > { %v1369_v53 = vsub.f32 %v1353_v9, %v6311_v43  ;;  %v1351_v45 = vadd.f32 %v1332_v52, %v1256_v6  ;;  %1540 = vxpose.xlu1.b32.end [2/2] (short) (narrow) %v1374_v47, 16  ;;  %v1372_v60 = vsub.f32 %v1364_v3, %v6304_v32  ;;  %v5644_v9 = vld [vmem:[%s7393_s5 + $0x10] sm:$0xff]  }
 0x175   : > { %v5277_v54 = vpop.f32.mrf.mxu0 }
 0x176   : > { %v1367_v51 = vsub.f32 %v1351_v45, %v6319_v7  ;;  %v1354_v34 = vadd.f32 %v5277_v54, %v1267_v28  ;;  %1508 = vxpose.xlu0.b32.end [2/2] (short) (narrow) %v1372_v60, 16  ;;  %v1377_v27 = vsub.f32 %v1369_v53, %v6313_v44 }
 0x177   : > { %v1335_v57 = vpop.f32.mrf.mxu0 }
 0x178   : > { %v1370_v21 = vsub.f32 %v1354_v34, %v6327_v55  ;;  %v1352_v58 = vadd.f32 %v1335_v57, %v1259_v33  ;;  %1603 = vxpose.xlu1.b32.start [1/2] (short) (narrow) %v1377_v27, 16  ;;  %v1375_v62 = vsub.f32 %v1367_v51, %v6321_v49 }
 0x17a   : > { %v1368_v43 = vsub.f32 %v1352_v58, %v6334_v59  ;;  %1571 = vxpose.xlu0.b32.start [1/2] (short) (narrow) %v1375_v62, 16  ;;  %v1378_v32 = vsub.f32 %v1370_v21, %v6329_v56  ;;  %v6381_v56 = vld [vmem:[%s7393_s5 + $0x8] sm:$0xff]  }
 0x17c   : > { %1604 = vxpose.xlu1.b32.end [2/2] (short) (narrow) %v1378_v32, 16  ;;  %v1376_v39 = vsub.f32 %v1368_v43, %v6338_v38 }
 0x17e   : > { %1572 = vxpose.xlu0.b32.end [2/2] (short) (narrow) %v1376_v39, 16 }
 0x1cc   : > { %v6364_v7 = vpop.trf.xlu1 }
 0x1ce   : > { %v6366_v63 = vpop.trf.xlu0 }
 0x1d0   : > { %v6368_v44 = vpop.trf.xlu1 }
 0x1d1   : > { %v1653_v59 = vpack.c.bf16 %v6368_v44, %v6364_v7 }
 0x1d2   : > { %v6370_v55 = vpop.trf.xlu0 }
 0x1d3   : > { %v1652_v49 = vpack.c.bf16 %v6370_v55, %v6366_v63  ;;  %v1658_v4 = vunpack.c.l.bf16 %v1653_v59  ;;  %v1659_v1 = vunpack.c.h.bf16 %v1653_v59 }
 0x1d4   : > { %v6376_v0 = vpop.trf.xlu1 }
 0x1d5   : > { %v1656_v38 = vunpack.c.l.bf16 %v1652_v49  ;;  %v1657_v11 = vunpack.c.h.bf16 %v1652_v49  ;;  %5280 = vmatprep.mubr.msk.bf16.mxu1 %vm643_vm0, %v1652_v49  ;;  %5290 = vmatprep.mubr.msk.bf16.mxu0 %vm643_vm0, %v1652_v49  ;;  %v1666_v17 = vsub.f32 %v6364_v7, %v1658_v4  ;;  %v1667_v18 = vsub.f32 %v6368_v44, %v1659_v1 }
 0x1d6   : > { %5281 = vmatmul.mubr.msk.bf16.vlgmr.msra.gmra.mxu1 %vm643_vm0, %v1653_v59  ;;  %5291 = vmatmul.mubr.msk.bf16.vlgmr.msra.gmra.mxu0 %vm643_vm0, %v1653_v59  ;;  %v6387_v12 = vpop.trf.xlu0 }
 0x1d7   : > { %5299 = vmatpush3.bf16.msra.mxu1 %v6300_v25  ;;  %5309 = vmatpush3.bf16.msra.mxu0 %v6345_v10  ;;  %v1664_v5 = vsub.f32 %v6366_v63, %v1656_v38  ;;  %v1665_v13 = vsub.f32 %v6370_v55, %v1657_v11  ;;  %v1673_v61 = vpack.c.bf16 %v1667_v18, %v1666_v17 }
 0x1d8   : > { %5318 = vmatprep.subr.bf16.mxu1 %v6381_v56  ;;  %5328 = vmatprep.subr.bf16.mxu0 %v6381_v56  ;;  %v6395_v14 = vpop.trf.xlu1 }
 0x1d9   : > { %v1655_v29 = vpack.c.bf16 %v6395_v14, %v6376_v0  ;;  %v1672_v2 = vpack.c.bf16 %v1665_v13, %v1664_v5 }
 0x1da   : > { %v6397_v23 = vpop.trf.xlu0 }
 0x1db   : > { %v1654_v24 = vpack.c.bf16 %v6397_v23, %v6387_v12  ;;  %v1662_v22 = vunpack.c.l.bf16 %v1655_v29  ;;  %v1663_v26 = vunpack.c.h.bf16 %v1655_v29 }
 0x1dd   : > { %v1660_v15 = vunpack.c.l.bf16 %v1654_v24  ;;  %v1661_v16 = vunpack.c.h.bf16 %v1654_v24  ;;  %5284 = vmatprep.mubr.msk.bf16.mxu1 %vm643_vm0, %v1654_v24  ;;  %5294 = vmatprep.mubr.msk.bf16.mxu0 %vm643_vm0, %v1654_v24  ;;  %v1670_v35 = vsub.f32 %v6376_v0, %v1662_v22  ;;  %v1671_v37 = vsub.f32 %v6395_v14, %v1663_v26 }
 0x1de   : > { %5285 = vmatmul.mubr.msk.bf16.gmra.mxu1 %vm643_vm0, %v1655_v29  ;;  %5295 = vmatmul.mubr.msk.bf16.gmra.mxu0 %vm643_vm0, %v1655_v29 }
 0x1df   : > { %5300 = vmatprep.mubr.msk.bf16.mxu1 %vm643_vm0, %v1672_v2  ;;  %v1668_v19 = vsub.f32 %v6387_v12, %v1660_v15  ;;  %v1669_v20 = vsub.f32 %v6397_v23, %v1661_v16  ;;  %v1675_v40 = vpack.c.bf16 %v1671_v37, %v1670_v35 }
 0x1e1   : > { %v1674_v31 = vpack.c.bf16 %v1669_v20, %v1668_v19 }
 0x1e6   : > { %5301 = vmatmul.mubr.msk.bf16.vlgmr.msra.gmra.mxu1 %vm643_vm0, %v1673_v61 }
 0x1e7   : > { %5304 = vmatprep.mubr.msk.bf16.mxu1 %vm643_vm0, %v1674_v31  ;;  %5319 = vmatpush3.bf16.msra.mxu1 %v6381_v56 }
 0x1e8   : > { %5338 = vmatprep.subr.bf16.mxu1 %v5643_v30 }
 0x1ec   : > { %v1555_v41 = vpop.trf.xlu1 }
 0x1ee   : > { %5305 = vmatmul.mubr.msk.bf16.gmra.mxu1 %vm643_vm0, %v1675_v40  ;;  %v1523_v42 = vpop.trf.xlu0 }
 0x1ef   : > { %v1700_v33 = vadd.f32 %v1523_v42, %v6366_v63 }
 0x1f0   : > { %v1556_v46 = vpop.trf.xlu1 }
 0x1f1   : > { %v1677_v6 = vpack.c.bf16 %v1556_v46, %v1555_v41  ;;  %v1703_v32 = vadd.f32 %v1556_v46, %v6368_v44 }
 0x1f2   : > { %v1524_v48 = vpop.trf.xlu0 }
 0x1f3   : > { %v1676_v8 = vpack.c.bf16 %v1524_v48, %v1523_v42  ;;  %v1701_v45 = vadd.f32 %v1524_v48, %v6370_v55  ;;  %v1682_v34 = vunpack.c.l.bf16 %v1677_v6  ;;  %v1683_v27 = vunpack.c.h.bf16 %v1677_v6 }
 0x1f4   : > { %v1619_v3 = vpop.trf.xlu1  ;;  %v1702_v55 = vadd.f32 %v1555_v41, %v6364_v7 }
 0x1f5   : > { %5310 = vmatprep.mubr.msk.bf16.mxu0 %vm643_vm0, %v1676_v8  ;;  %5320 = vmatprep.mubr.msk.bf16.mxu1 %vm643_vm0, %v1676_v8  ;;  %v1680_v47 = vunpack.c.l.bf16 %v1676_v8  ;;  %v1681_v50 = vunpack.c.h.bf16 %v1676_v8  ;;  %v1708_v58 = vpack.c.bf16 %v1701_v45, %v1700_v33  ;;  %v1690_v39 = vsub.f32 %v1555_v41, %v1682_v34 }
 0x1f6   : > { %5311 = vmatmul.mubr.msk.bf16.vlgmr.msra.gmra.mxu0 %vm643_vm0, %v1677_v6  ;;  %5321 = vmatmul.mubr.msk.bf16.vlgmr.msra.gmra.mxu1 %vm643_vm0, %v1677_v6  ;;  %v1587_v52 = vpop.trf.xlu0  ;;  %v1691_v63 = vsub.f32 %v1556_v46, %v1683_v27  ;;  %v1709_v11 = vpack.c.bf16 %v1703_v32, %v1702_v55  ;;  %v1706_v17 = vadd.f32 %v1619_v3, %v6376_v0 }
 0x1f7   : > { %5329 = vmatpush3.bf16.msra.mxu0 %v6381_v56  ;;  %5339 = vmatpush3.bf16.msra.mxu1 %v5643_v30  ;;  %v1688_v28 = vsub.f32 %v1523_v42, %v1680_v47  ;;  %v1689_v53 = vsub.f32 %v1524_v48, %v1681_v50  ;;  %v1704_v13 = vadd.f32 %v1587_v52, %v6387_v12  ;;  %v1713_v1 = vunpack.c.h.bf16 %v1708_v58 }
 0x1f8   : > { %5348 = vmatprep.subr.bf16.mxu0 %v5644_v9  ;;  %v1620_v60 = vpop.trf.xlu1  ;;  %5358 = vmatprep.subr.bf16.mxu1 %v5644_v9  ;;  %v1697_v5 = vpack.c.bf16 %v1691_v63, %v1690_v39  ;;  %v1712_v29 = vunpack.c.l.bf16 %v1708_v58  ;;  %v1714_v18 = vunpack.c.l.bf16 %v1709_v11  ;;  %v1715_v19 = vunpack.c.h.bf16 %v1709_v11 }
 0x1f9   : > { %v1679_v57 = vpack.c.bf16 %v1620_v60, %v1619_v3  ;;  %v1696_v21 = vpack.c.bf16 %v1689_v53, %v1688_v28  ;;  %v1721_v12 = vsub.f32 %v1701_v45, %v1713_v1 }
 0x1fa   : > { %v1588_v54 = vpop.trf.xlu0  ;;  %v1720_v16 = vsub.f32 %v1700_v33, %v1712_v29  ;;  %v1723_v31 = vsub.f32 %v1703_v32, %v1715_v19 }
 0x1fb   : > { %v1678_v51 = vpack.c.bf16 %v1588_v54, %v1587_v52  ;;  %v1705_v38 = vadd.f32 %v1588_v54, %v6397_v23  ;;  %v1686_v24 = vunpack.c.l.bf16 %v1679_v57  ;;  %v1687_v4 = vunpack.c.h.bf16 %v1679_v57 }
 0x1fc   : > { %v1707_v23 = vadd.f32 %v1620_v60, %v6395_v14  ;;  %v1728_v26 = vpack.c.bf16 %v1721_v12, %v1720_v16  ;;  %v1722_v14 = vsub.f32 %v1702_v55, %v1714_v18 }
 0x1fd   : > { %v1684_v62 = vunpack.c.l.bf16 %v1678_v51  ;;  %5314 = vmatprep.mubr.msk.bf16.mxu0 %vm643_vm0, %v1678_v51  ;;  %5324 = vmatprep.mubr.msk.bf16.mxu1 %vm643_vm0, %v1678_v51  ;;  %v1685_v43 = vunpack.c.h.bf16 %v1678_v51  ;;  %v1710_v2 = vpack.c.bf16 %v1705_v38, %v1704_v13  ;;  %v1694_v7 = vsub.f32 %v1619_v3, %v1686_v24 }
 0x1fe   : > { %5315 = vmatmul.mubr.msk.bf16.gmra.mxu0 %vm643_vm0, %v1679_v57  ;;  %5325 = vmatmul.mubr.msk.bf16.gmra.mxu1 %vm643_vm0, %v1679_v57  ;;  %v1695_v15 = vsub.f32 %v1620_v60, %v1687_v4  ;;  %v1711_v61 = vpack.c.bf16 %v1707_v23, %v1706_v17  ;;  %v1729_v0 = vpack.c.bf16 %v1723_v31, %v1722_v14 }
 0x1ff   : > { %5330 = vmatprep.mubr.msk.bf16.mxu0 %vm643_vm0, %v1696_v21  ;;  %5340 = vmatprep.mubr.msk.bf16.mxu1 %vm643_vm0, %v1708_v58  ;;  %v1692_v49 = vsub.f32 %v1587_v52, %v1684_v62  ;;  %v1693_v59 = vsub.f32 %v1588_v54, %v1685_v43  ;;  %v1717_v22 = vunpack.c.h.bf16 %v1710_v2  ;;  %v1716_v30 = vunpack.c.l.bf16 %v1710_v2 }
 0x200   : > { %v1699_v20 = vpack.c.bf16 %v1695_v15, %v1694_v7  ;;  %v1719_v40 = vunpack.c.h.bf16 %v1711_v61  ;;  %v1718_v41 = vunpack.c.l.bf16 %v1711_v61 }
 0x201   : > { %v1698_v44 = vpack.c.bf16 %v1693_v59, %v1692_v49  ;;  %v1725_v35 = vsub.f32 %v1705_v38, %v1717_v22  ;;  %v1724_v37 = vsub.f32 %v1704_v13, %v1716_v30 }
 0x202   : > { %v1727_v46 = vsub.f32 %v1707_v23, %v1719_v40  ;;  %v1726_v48 = vsub.f32 %v1706_v17, %v1718_v41 }
 0x203   : > { %v1730_v42 = vpack.c.bf16 %v1725_v35, %v1724_v37 }
 0x204   : > { %v1731_v8 = vpack.c.bf16 %v1727_v46, %v1726_v48 }
 0x206   : > { %5331 = vmatmul.mubr.msk.bf16.vlgmr.msra.gmra.mxu0 %vm643_vm0, %v1697_v5  ;;  %5341 = vmatmul.mubr.msk.bf16.vlgmr.msra.gmra.mxu1 %vm643_vm0, %v1709_v11 }
 0x207   : > { %5349 = vmatpush3.bf16.msra.mxu0 %v5644_v9  ;;  %5334 = vmatprep.mubr.msk.bf16.mxu0 %vm643_vm0, %v1698_v44 }
 0x208   : > { %5344 = vmatprep.mubr.msk.bf16.mxu1 %vm643_vm0, %v1710_v2  ;;  %5359 = vmatpush3.bf16.msra.mxu1 %v5644_v9 }
 0x209   : > { %5368 = vmatprep.subr.bf16.mxu0 %v6267_v36  ;;  %5378 = vmatprep.subr.bf16.mxu1 %v6300_v25 }
 0x20e   : > { %5335 = vmatmul.mubr.msk.bf16.gmra.mxu0 %vm643_vm0, %v1699_v20  ;;  %5345 = vmatmul.mubr.msk.bf16.gmra.mxu1 %vm643_vm0, %v1711_v61 }
 0x20f   : > { %5350 = vmatprep.mubr.msk.bf16.mxu0 %vm643_vm0, %v1708_v58  ;;  %5360 = vmatprep.mubr.msk.bf16.mxu1 %vm643_vm0, %v1728_v26 }
 0x216   : > { %5351 = vmatmul.mubr.msk.bf16.vlgmr.msra.gmra.mxu0 %vm643_vm0, %v1709_v11  ;;  %5361 = vmatmul.mubr.msk.bf16.vlgmr.msra.gmra.mxu1 %vm643_vm0, %v1729_v0 }
 0x217   : > { %5354 = vmatprep.mubr.msk.bf16.mxu0 %vm643_vm0, %v1710_v2  ;;  %5364 = vmatprep.mubr.msk.bf16.mxu1 %vm643_vm0, %v1730_v42 }
 0x218   : > { %5369 = vmatpush3.bf16.msra.mxu0 %v6267_v36  ;;  %5379 = vmatpush3.bf16.msra.mxu1 %v6300_v25 }
 0x219   : > { %5388 = vmatprep.subr.bf16.mxu0 %v6300_v25  ;;  %5398 = vmatprep.subr.bf16.mxu1 %v6345_v10 }
 0x21e   : > { %5355 = vmatmul.mubr.msk.bf16.gmra.mxu0 %vm643_vm0, %v1711_v61  ;;  %5365 = vmatmul.mubr.msk.bf16.gmra.mxu1 %vm643_vm0, %v1731_v8 }
 0x296   : > { %v5282_v6 = vpop.f32.mrf.mxu1  ;;  %v5292_v3 = vpop.f32.mrf.mxu0 }
 0x297   : > { %v1864_v19 = vadd.f32 %v5292_v3, %v5282_v6  ;;  %v6507_v3 = vld [vmem:[%s6038_s15 + $0x8] sm:$0xff] }
 0x298   : > { %v1784_v9 = vpop.f32.mrf.mxu1  ;;  %v1855_v50 = vpop.f32.mrf.mxu0 }
 0x299   : > { %v1856_v20 = vadd.f32 %v1855_v50, %v1784_v9 }
 0x29a   : > { %v5283_v47 = vpop.f32.mrf.mxu1  ;;  %v5293_v36 = vpop.f32.mrf.mxu0 }
 0x29b   : > { %v1867_v30 = vadd.f32 %v5293_v36, %v5283_v47 }
 0x29c   : > { %v1787_v52 = vpop.f32.mrf.mxu1  ;;  %v1858_v60 = vpop.f32.mrf.mxu0 }
 0x29d   : > { %v1859_v41 = vadd.f32 %v1858_v60, %v1787_v52  ;;  %v6514_v52 = vld [vmem:[%s6038_s15] sm:$0xff] }
 0x29e   : > { %v6463_v28 = vpop.f32.mrf.mxu1  ;;  %v6469_v51 = vpop.f32.mrf.mxu0 }
 0x2a0   : > { %v1800_v53 = vpop.f32.mrf.mxu1  ;;  %v1871_v57 = vpop.f32.mrf.mxu0 }
 0x2a2   : > { %v6465_v45 = vpop.f32.mrf.mxu1  ;;  %v5297_v62 = vpop.f32.mrf.mxu0 }
 0x2a4   : > { %v6467_v54 = vpop.f32.mrf.mxu1  ;;  %v6477_v39 = vpop.f32.mrf.mxu0 }
 0x2a6   : > { %v5302_v33 = vpop.f32.mrf.mxu1 }
 0x2a7   : > { %v6491_v35 = vadd.f32 %v5302_v33, %v1864_v19  ;;  %v1872_v33 = vadd.f32 %v1871_v57, %v1800_v53  ;;  %v1880_v57 = vadd.f32 %v6469_v51, %v6463_v28 }
 0x2a8   : > { %v1932_v34 = vpop.f32.mrf.mxu1 }
 0x2a9   : > { %v6493_v37 = vadd.f32 %v1932_v34, %v1856_v20 }
 0x2aa   : > { %v5303_v27 = vpop.f32.mrf.mxu1 }
 0x2ab   : > { %v6497_v42 = vadd.f32 %v5303_v27, %v1867_v30 }
 0x2ac   : > { %v1935_v21 = vpop.f32.mrf.mxu1 }
 0x2ad   : > { %v6511_v50 = vadd.f32 %v1935_v21, %v1859_v41 }
 0x2ae   : > { %v6471_v58 = vpop.f32.mrf.mxu1 }
 0x2b0   : > { %v6473_v43 = vpop.f32.mrf.mxu1 }
 0x2b2   : > { %v6475_v32 = vpop.f32.mrf.mxu1 }
 0x2b4   : > { %v6479_v63 = vpop.f32.mrf.mxu1 }
 0x2b6   : > { %v5312_v55 = vpop.f32.mrf.mxu0  ;;  %v5322_v49 = vpop.f32.mrf.mxu1 }
 0x2b7   : > { %v2103_v12 = vadd.f32 %v5322_v49, %v5312_v55  ;;  %v2478_v49 = vld [vmem:[%s6523_s19 + $0x18] sm:$0xff] }
 0x2b8   : > { %v2023_v59 = vpop.f32.mrf.mxu0  ;;  %v2094_v38 = vpop.f32.mrf.mxu1 }
 0x2b9   : > { %v2095_v18 = vadd.f32 %v2094_v38, %v2023_v59  ;;  %v1883_v38 = vadd.f32 %v5297_v62, %v6465_v45  ;;  %v1875_v45 = vadd.f32 %v6477_v39, %v6467_v54 }
 0x2ba   : > { %v5313_v11 = vpop.f32.mrf.mxu0  ;;  %v5323_v5 = vpop.f32.mrf.mxu1 }
 0x2bb   : > { %v2106_v14 = vadd.f32 %v5323_v5, %v5313_v11  ;;  %v6559_v20 = vadd.f32 %v6475_v32, %v1883_v38  ;;  %v6575_v32 = vadd.f32 %v6479_v63, %v1875_v45  ;;  %v2480_v38 = vld [vmem:[%s6523_s19 + $0x28] sm:$0xff] }
 0x2bc   : > { %v2026_v13 = vpop.f32.mrf.mxu0  ;;  %v2097_v24 = vpop.f32.mrf.mxu1 }
 0x2bd   : > { %v2098_v46 = vadd.f32 %v2097_v24, %v2026_v13  ;;  %v2476_v13 = vld [vmem:[%s6523_s19 + $0x8] sm:$0xff] }
 0x2be   : > { %v5316_v4 = vpop.f32.mrf.mxu0  ;;  %v5326_v1 = vpop.f32.mrf.mxu1 }
 0x2bf   : > { %v2119_v21 = vadd.f32 %v5326_v1, %v5316_v4  ;;  %v6540_v4 = vadd.f32 %v6473_v43, %v1872_v33  ;;  %v2477_v1 = vld [vmem:[%s6523_s19 + $0x10] sm:$0xff]  ;;  %v6556_v43 = vadd.f32 %v6471_v58, %v1880_v57  ;;  %v2479_v57 = vld [vmem:[%s6523_s19 + $0x20] sm:$0xff] }
 0x2c0   : > { %v2039_v44 = vpop.f32.mrf.mxu0  ;;  %v2110_v29 = vpop.f32.mrf.mxu1 }
 0x2c1   : > { %v2111_v55 = vadd.f32 %v2110_v29, %v2039_v44  ;;  %v2475_v44 = vld [vmem:[%s6523_s19] sm:$0xff] }
 0x2c2   : > { %v5317_v2 = vpop.f32.mrf.mxu0  ;;  %v5327_v7 = vpop.f32.mrf.mxu1 }
 0x2c3   : > { %v2122_v51 = vadd.f32 %v5327_v7, %v5317_v2 }
 0x2c4   : > { %v6481_v15 = vpop.f32.mrf.mxu0  ;;  %v2113_v23 = vpop.f32.mrf.mxu1 }
 0x2c6   : > { %v5332_v16 = vpop.f32.mrf.mxu0  ;;  %v6483_v17 = vpop.f32.mrf.mxu1 }
 0x2c7   : > { %v6485_v61 = vadd.f32 %v5332_v16, %v2103_v12 }
 0x2c8   : > { %v2171_v22 = vpop.f32.mrf.mxu0  ;;  %v6487_v26 = vpop.f32.mrf.mxu1 }
 0x2c9   : > { %v6489_v31 = vadd.f32 %v2171_v22, %v2095_v18  ;;  %v2451_v8 = vsub.f32 %v6491_v35, %v6485_v61 }
 0x2ca   : > { %v5333_v0 = vpop.f32.mrf.mxu0  ;;  %v6495_v40 = vpop.f32.mrf.mxu1 }
 0x2cb   : > { %v6500_v48 = vadd.f32 %v5333_v0, %v2106_v14  ;;  %v2449_v6 = vsub.f32 %v6493_v37, %v6489_v31  ;;  %v2493_v11 = vmul.f32 %v6514_v52, %v2451_v8  ;;  %v2114_v14 = vadd.f32 %v2113_v23, %v6481_v15 }
 0x2cc   : > { %v2174_v9 = vpop.f32.mrf.mxu0  ;;  %v6509_v47 = vpop.f32.mrf.mxu1 }
 0x2cd   : > { %v2452_v36 = vsub.f32 %v6497_v42, %v6500_v48  ;;  %v6518_v60 = vadd.f32 %v2174_v9, %v2098_v46  ;;  %v2491_v5 = vmul.f32 %v6514_v52, %v2449_v6  ;;  %v6566_v54 = vsub.f32 %v2493_v11, %v2477_v1 }
 0x2ce   : > { %v5336_v34 = vpop.f32.mrf.mxu0  ;;  %v6525_v27 = vpop.f32.mrf.mxu1 }
 0x2cf   : > { %v2494_v59 = vmul.f32 %v6507_v3, %v2452_v36  ;;  %v2450_v53 = vsub.f32 %v6511_v50, %v6518_v60  ;;  %v6545_v16 = vadd.f32 %v5336_v34, %v2119_v21  ;;  %v6568_v39 = vsub.f32 %v2491_v5, %v2475_v44  ;;  %v2482_v36 = vld [vmem:[%s6523_s19 + $0x38] sm:$0xff]  ;;  %v2481_v5 = vld [vmem:[%s6523_s19 + $0x30] sm:$0xff] }
 0x2d0   : > { %v2187_v24 = vpop.f32.mrf.mxu0  ;;  %v6537_v12 = vpop.f32.mrf.mxu1 }
 0x2d1   : > { %v2492_v29 = vmul.f32 %v6507_v3, %v2450_v53  ;;  %v6547_v28 = vadd.f32 %v2187_v24, %v2111_v55  ;;  %v6551_v62 = vsub.f32 %v2494_v59, %v2478_v49  ;;  %v2455_v0 = vsub.f32 %v6556_v43, %v6545_v16 }
 0x2d2   : > { %v5337_v18 = vpop.f32.mrf.mxu0  ;;  %v6553_v19 = vpop.f32.mrf.mxu1 }
 0x2d3   : > { %v6561_v22 = vsub.f32 %v2492_v29, %v2476_v13  ;;  %v2453_v30 = vsub.f32 %v6540_v4, %v6547_v28  ;;  %v6570_v2 = vadd.f32 %v5337_v18, %v2122_v51  ;;  %v6581_v41 = vpack.c.bf16 %v6551_v62, %v6566_v54 }
 0x2d4   : > { %v2190_v7 = vpop.f32.mrf.mxu0  ;;  %v6572_v58 = vpop.f32.mrf.mxu1  ;;  %v2497_v53 = vmul.f32 %v6514_v52, %v2455_v0 }
 0x2d5   : > { %v2456_v15 = vsub.f32 %v6559_v20, %v6570_v2  ;;  %v6585_v23 = vadd.f32 %v2190_v7, %v2114_v14  ;;  %v2529_v63 = vpack.c.bf16 %v6561_v22, %v6568_v39  ;;  %v2495_v6 = vmul.f32 %v6514_v52, %v2453_v30 }
 0x2d6   : > { %v5352_v46 = vpop.f32.mrf.mxu0  ;;  %v5362_v8 = vpop.f32.mrf.mxu1  ;;  %v2535_v11 = vunpack.c.l.bf16 %v6581_v41  ;;  %v6622_v0 = vsub.f32 %v2497_v53, %v2481_v5 }
 0x2d7   : > { %v2342_v9 = vadd.f32 %v5352_v46, %v6483_v17  ;;  %v2498_v33 = vmul.f32 %v6507_v3, %v2456_v15  ;;  %v2454_v34 = vsub.f32 %v6575_v32, %v6585_v23  ;;  %5370 = vmatprep.mubr.msk.bf16.mxu0 %vm643_vm0, %v2529_v63  ;;  %5380 = vmatprep.mubr.msk.bf16.mxu1 %vm643_vm0, %v2529_v63  ;;  %v2533_v49 = vunpack.c.l.bf16 %v2529_v63 }
 0x2d8   : > { %v2333_v21 = vpop.f32.mrf.mxu0  ;;  %v2410_v55 = vpop.f32.mrf.mxu1  ;;  %v2534_v59 = vunpack.c.h.bf16 %v2529_v63  ;;  %5371 = vmatmul.mubr.msk.bf16.vlgmr.msra.gmra.mxu0 %vm643_vm0, %v6581_v41  ;;  %5381 = vmatmul.mubr.msk.bf16.vlgmr.msra.gmra.mxu1 %vm643_vm0, %v6581_v41  ;;  %v6614_v51 = vsub.f32 %v2495_v6, %v2479_v57 }
 0x2d9   : > { %v2334_v17 = vadd.f32 %v2333_v21, %v6487_v26  ;;  %v2496_v13 = vmul.f32 %v6507_v3, %v2454_v34  ;;  %5389 = vmatpush3.bf16.msra.mxu0 %v6300_v25  ;;  %5399 = vmatpush3.bf16.msra.mxu1 %v6345_v10  ;;  %v6610_v44 = vsub.f32 %v2498_v33, %v2482_v36  ;;  %v2536_v10 = vunpack.c.h.bf16 %v6581_v41 }
 0x2da   : > { %v5353_v24 = vpop.f32.mrf.mxu0  ;;  %v5363_v1 = vpop.f32.mrf.mxu1  ;;  %v2443_v26 = vadd.f32 %v5362_v8, %v2342_v9  ;;  %5408 = vmatprep.subr.bf16.mxu0 %v6381_v56  ;;  %v2541_v25 = vsub.f32 %v6568_v39, %v2533_v49  ;;  %v2542_v7 = vsub.f32 %v6561_v22, %v2534_v59  ;;  %5418 = vmatprep.subr.bf16.mxu1 %v6381_v56 }
 0x2db   : > { %v2441_v29 = vadd.f32 %v2410_v55, %v2334_v17  ;;  %v2345_v45 = vadd.f32 %v5353_v24, %v6495_v40  ;;  %v6616_v18 = vsub.f32 %v2496_v13, %v2480_v38  ;;  %v2532_v41 = vpack.c.bf16 %v6610_v44, %v6622_v0 }
 0x2dc   : > { %v2336_v30 = vpop.f32.mrf.mxu0  ;;  %v2413_v14 = vpop.f32.mrf.mxu1  ;;  %v2459_v9 = vsub.f32 %v2443_v26, %v6491_v35  ;;  %v2549_v21 = vpack.c.bf16 %v2542_v7, %v2541_v25  ;;  %v2543_v59 = vsub.f32 %v6566_v54, %v2535_v11  ;;  %v2544_v35 = vsub.f32 %v6551_v62, %v2536_v10 }
 0x2dd   : > { %v2444_v15 = vadd.f32 %v5363_v1, %v2345_v45  ;;  %v2337_v40 = vadd.f32 %v2336_v30, %v6509_v47  ;;  %v2457_v46 = vsub.f32 %v2441_v29, %v6493_v37  ;;  %v2531_v6 = vpack.c.bf16 %v6616_v18, %v6614_v51  ;;  %v2484_v29 = vld [vmem:[%s6523_s19 + $0x48] sm:$0xff]  ;;  %v2486_v30 = vld [vmem:[%s6523_s19 + $0x58] sm:$0xff] }
 0x2de   : > { %v5356_v8 = vpop.f32.mrf.mxu0  ;;  %v5366_v63 = vpop.f32.mrf.mxu1  ;;  %v2467_v11 = vsub.f32 %v2459_v9, %v6485_v61  ;;  %v2550_v1 = vpack.c.bf16 %v2544_v35, %v2543_v59  ;;  %v2539_v7 = vunpack.c.l.bf16 %v2532_v41  ;;  %v2488_v35 = vld [vmem:[%s6523_s19 + $0x68] sm:$0xff] }
 0x2df   : > { %v2460_v36 = vsub.f32 %v2444_v15, %v6497_v42  ;;  %v2442_v33 = vadd.f32 %v2413_v14, %v2337_v40  ;;  %v2358_v34 = vadd.f32 %v5356_v8, %v6525_v27  ;;  %5374 = vmatprep.mubr.msk.bf16.mxu0 %vm643_vm0, %v2531_v6  ;;  %5384 = vmatprep.mubr.msk.bf16.mxu1 %vm643_vm0, %v2531_v6  ;;  %v2537_v55 = vunpack.c.l.bf16 %v2531_v6  ;;  %v2483_v15 = vld [vmem:[%s6523_s19 + $0x40] sm:$0xff] }
 0x2e0   : > { %v2349_v37 = vpop.f32.mrf.mxu0  ;;  %v2426_v47 = vpop.f32.mrf.mxu1  ;;  %v2538_v49 = vunpack.c.h.bf16 %v2531_v6  ;;  %5375 = vmatmul.mubr.msk.bf16.gmra.mxu0 %vm643_vm0, %v2532_v41  ;;  %v2465_v27 = vsub.f32 %v2457_v46, %v6489_v31  ;;  %5385 = vmatmul.mubr.msk.bf16.gmra.mxu1 %vm643_vm0, %v2532_v41  ;;  %v2509_v10 = vmul.f32 %v6514_v52, %v2467_v11  ;;  %v2540_v8 = vunpack.c.h.bf16 %v2532_v41 }
 0x2e1   : > { %v2468_v42 = vsub.f32 %v2460_v36, %v6500_v48  ;;  %v2458_v53 = vsub.f32 %v2442_v33, %v6511_v50  ;;  %v2350_v57 = vadd.f32 %v2349_v37, %v6537_v12  ;;  %5390 = vmatprep.mubr.msk.bf16.mxu0 %vm643_vm0, %v2549_v21  ;;  %v2447_v5 = vadd.f32 %v5366_v63, %v2358_v34  ;;  %v5645_v63 = vld [vmem:[%s7393_s5 + $0x38] sm:$0xff]  }
 0x2e2   : > { %v5357_v38 = vpop.f32.mrf.mxu0  ;;  %v5367_v17 = vpop.f32.mrf.mxu1  ;;  %v2545_v24 = vsub.f32 %v6614_v51, %v2537_v55  ;;  %v2546_v12 = vsub.f32 %v6616_v18, %v2538_v49  ;;  %v2547_v37 = vsub.f32 %v6622_v0, %v2539_v7  ;;  %v2487_v49 = vld [vmem:[%s6523_s19 + $0x60] sm:$0xff] }
 0x2e3   : > { %v2466_v48 = vsub.f32 %v2458_v53, %v6518_v60  ;;  %v2445_v50 = vadd.f32 %v2426_v47, %v2350_v57  ;;  %v2361_v13 = vadd.f32 %v5357_v38, %v6553_v19  ;;  %v2510_v26 = vmul.f32 %v6507_v3, %v2468_v42  ;;  %v2490_v42 = vld [vmem:[%s6523_s19 + $0x78] sm:$0xff] }
 0x2e4   : > { %v2352_v31 = vpop.f32.mrf.mxu0  ;;  %v2507_v60 = vmul.f32 %v6514_v52, %v2465_v27  ;;  %v2429_v25 = vpop.f32.mrf.mxu1  ;;  %v2463_v40 = vsub.f32 %v2447_v5, %v6556_v43  ;;  %v2551_v36 = vpack.c.bf16 %v2546_v12, %v2545_v24  ;;  %v2548_v47 = vsub.f32 %v6610_v44, %v2540_v8  ;;  %v5649_v8 = vld [vmem:[#allocation7 + $0x20] sm:$0xff]  }
 0x2e5   : > { %v2508_v45 = vmul.f32 %v6507_v3, %v2466_v48  ;;  %v2353_v61 = vadd.f32 %v2352_v31, %v6572_v58  ;;  %v2461_v19 = vsub.f32 %v2445_v50, %v6540_v4  ;;  %v2448_v14 = vadd.f32 %v5367_v17, %v2361_v13  ;;  %v2485_v58 = vld [vmem:[%s6523_s19 + $0x50] sm:$0xff] }
 0x2e6   : > { %v6665_v33 = vsub.f32 %v2510_v26, %v2486_v30  ;;  %v2515_v43 = vsub.f32 %v2507_v60, %v2483_v15  ;;  %v2552_v38 = vpack.c.bf16 %v2548_v47, %v2547_v37  ;;  %v2489_v17 = vld [vmem:[%s6523_s19 + $0x70] sm:$0xff] }
 0x2e7   : > { %v2446_v46 = vadd.f32 %v2429_v25, %v2353_v61  ;;  %v2516_v6 = vsub.f32 %v2508_v45, %v2484_v29  ;;  %v2469_v9 = vsub.f32 %v2461_v19, %v6547_v28  ;;  %v2464_v4 = vsub.f32 %v2448_v14, %v6559_v20 }
 0x2e8   : > { %5391 = vmatmul.mubr.msk.bf16.vlgmr.msra.gmra.mxu0 %vm643_vm0, %v2550_v1  ;;  %v6672_v28 = vsub.f32 %v2509_v10, %v2485_v58  ;;  %v2471_v20 = vsub.f32 %v2463_v40, %v6545_v16  ;;  %v6687_v16 = vld [vmem:[%s7393_s5 + $0x18] sm:$0xff]   ;;  %v2577_v10 = vadd.f32 %v2515_v43, %v6568_v39 }
 0x2e9   : > { %v2462_v34 = vsub.f32 %v2446_v46, %v6575_v32  ;;  %v2472_v41 = vsub.f32 %v2464_v4, %v6570_v2  ;;  %5409 = vmatpush3.bf16.msra.mxu0 %v6381_v56  ;;  %5394 = vmatprep.mubr.msk.bf16.mxu0 %vm643_vm0, %v2551_v36  ;;  %v2511_v32 = vmul.f32 %v6514_v52, %v2469_v9 }
 0x2ea   : > { %5428 = vmatprep.subr.bf16.mxu0 %v5645_v63  ;;  %v2553_v2 = vpack.c.bf16 %v2516_v6, %v2515_v43  ;;  %v2554_v55 = vpack.c.bf16 %v6665_v33, %v6672_v28  ;;  %v2513_v57 = vmul.f32 %v6514_v52, %v2471_v20  ;;  %v2578_v30 = vadd.f32 %v2516_v6, %v6561_v22 }
 0x2eb   : > { %v2470_v21 = vsub.f32 %v2462_v34, %v6585_v23  ;;  %v2514_v59 = vmul.f32 %v6507_v3, %v2472_v41  ;;  %v2519_v11 = vsub.f32 %v2511_v32, %v2487_v49  ;;  %v2580_v22 = vadd.f32 %v6665_v33, %v6551_v62 }
 0x2ec   : > { %5400 = vmatprep.mubr.msk.bf16.mxu1 %vm643_vm0, %v2553_v2  ;;  %v2557_v27 = vunpack.c.l.bf16 %v2553_v2  ;;  %v2558_v23 = vunpack.c.h.bf16 %v2553_v2  ;;  %v2521_v31 = vsub.f32 %v2513_v57, %v2489_v17  ;;  %v2559_v52 = vunpack.c.l.bf16 %v2554_v55 }
 0x2ed   : > { %v2512_v53 = vmul.f32 %v6507_v3, %v2470_v21  ;;  %5401 = vmatmul.mubr.msk.bf16.vlgmr.msra.gmra.mxu1 %vm643_vm0, %v2554_v55  ;;  %v2522_v5 = vsub.f32 %v2514_v59, %v2490_v42  ;;  %v2560_v24 = vunpack.c.h.bf16 %v2554_v55  ;;  %v2585_v15 = vpack.c.bf16 %v2578_v30, %v2577_v10  ;;  %v6739_v42 = vld [vmem:[#allocation7 + $0x28] sm:$0xff]  }
 0x2ee   : > { %5419 = vmatpush3.bf16.msra.mxu1 %v6381_v56  ;;  %v2565_v50 = vsub.f32 %v2515_v43, %v2557_v27  ;;  %v2566_v13 = vsub.f32 %v2516_v6, %v2558_v23  ;;  %v2567_v56 = vsub.f32 %v6672_v28, %v2559_v52  ;;  %v2581_v6 = vadd.f32 %v2519_v11, %v6614_v51 }
 0x2ef   : > { %v2520_v48 = vsub.f32 %v2512_v53, %v2488_v35  ;;  %5438 = vmatprep.subr.bf16.mxu1 %v6687_v16  ;;  %v2556_v12 = vpack.c.bf16 %v2522_v5, %v2521_v31  ;;  %v2568_v45 = vsub.f32 %v6665_v33, %v2560_v24  ;;  %v2589_v36 = vunpack.c.l.bf16 %v2585_v15 }
 0x2f0   : > { %5395 = vmatmul.mubr.msk.bf16.gmra.mxu0 %vm643_vm0, %v2552_v38  ;;  %v2573_v1 = vpack.c.bf16 %v2566_v13, %v2565_v50  ;;  %v2590_v34 = vunpack.c.h.bf16 %v2585_v15  ;;  %v2584_v62 = vadd.f32 %v2522_v5, %v6610_v44  ;;  %v2583_v33 = vadd.f32 %v2521_v31, %v6622_v0 }
 0x2f1   : > { %5410 = vmatprep.mubr.msk.bf16.mxu0 %vm643_vm0, %v2553_v2  ;;  %v2555_v3 = vpack.c.bf16 %v2520_v48, %v2519_v11  ;;  %v2574_v19 = vpack.c.bf16 %v2568_v45, %v2567_v56  ;;  %v2563_v14 = vunpack.c.l.bf16 %v2556_v12  ;;  %v2564_v25 = vunpack.c.h.bf16 %v2556_v12 }
 0x2f2   : > { %v2582_v39 = vadd.f32 %v2520_v48, %v6616_v18  ;;  %v2597_v51 = vsub.f32 %v2577_v10, %v2589_v36  ;;  %v2598_v18 = vsub.f32 %v2578_v30, %v2590_v34 }
 0x2f3   : > { %5404 = vmatprep.mubr.msk.bf16.mxu1 %vm643_vm0, %v2555_v3  ;;  %v2561_v26 = vunpack.c.l.bf16 %v2555_v3  ;;  %v2562_v29 = vunpack.c.h.bf16 %v2555_v3  ;;  %v2571_v40 = vsub.f32 %v2521_v31, %v2563_v14  ;;  %v2572_v46 = vsub.f32 %v2522_v5, %v2564_v25 }
 0x2f4   : > { %v2587_v4 = vpack.c.bf16 %v2582_v39, %v2581_v6  ;;  %v2605_v20 = vpack.c.bf16 %v2598_v18, %v2597_v51 }
 0x2f5   : > { %5405 = vmatmul.mubr.msk.bf16.gmra.mxu1 %vm643_vm0, %v2556_v12  ;;  %v2569_v61 = vsub.f32 %v2519_v11, %v2561_v26  ;;  %v2570_v60 = vsub.f32 %v2520_v48, %v2562_v29  ;;  %v2576_v58 = vpack.c.bf16 %v2572_v46, %v2571_v40 }
 0x2f6   : > { %5420 = vmatprep.mubr.msk.bf16.mxu1 %vm643_vm0, %v2573_v1  ;;  %v2593_v37 = vunpack.c.l.bf16 %v2587_v4  ;;  %v2594_v47 = vunpack.c.h.bf16 %v2587_v4 }
 0x2f7   : > { %v2575_v7 = vpack.c.bf16 %v2570_v60, %v2569_v61 }
 0x2f8   : > { %5411 = vmatmul.mubr.msk.bf16.vlgmr.msra.gmra.mxu0 %vm643_vm0, %v2554_v55  ;;  %v2601_v0 = vsub.f32 %v2581_v6, %v2593_v37  ;;  %v2602_v21 = vsub.f32 %v2582_v39, %v2594_v47 }
 0x2f9   : > { %5429 = vmatpush3.bf16.msra.mxu0 %v5645_v63  ;;  %5414 = vmatprep.mubr.msk.bf16.mxu0 %vm643_vm0, %v2555_v3  ;;  %v2579_v63 = vadd.f32 %v6672_v28, %v6566_v54  ;;  %v6726_v54 = vld [vmem:[#allocation7] sm:$0xff]   ;;  %v2588_v28 = vpack.c.bf16 %v2584_v62, %v2583_v33 }
 0x2fa   : > { %5448 = vmatprep.subr.bf16.mxu0 %v6687_v16  ;;  %v2607_v59 = vpack.c.bf16 %v2602_v21, %v2601_v0 }
 0x2fb   : > { %v2586_v9 = vpack.c.bf16 %v2580_v22, %v2579_v63  ;;  %v2595_v55 = vunpack.c.l.bf16 %v2588_v28  ;;  %v2596_v49 = vunpack.c.h.bf16 %v2588_v28 }
 0x2fd   : > { %5421 = vmatmul.mubr.msk.bf16.vlgmr.msra.gmra.mxu1 %vm643_vm0, %v2574_v19  ;;  %v2591_v43 = vunpack.c.l.bf16 %v2586_v9  ;;  %v2592_v41 = vunpack.c.h.bf16 %v2586_v9  ;;  %v2603_v35 = vsub.f32 %v2583_v33, %v2595_v55 }
 0x2fe   : > { %5424 = vmatprep.mubr.msk.bf16.mxu1 %vm643_vm0, %v2575_v7  ;;  %5439 = vmatpush3.bf16.msra.mxu1 %v6687_v16 }
 0x2ff   : > { %5458 = vmatprep.subr.bf16.mxu1 %v5649_v8  ;;  %v2599_v44 = vsub.f32 %v2579_v63, %v2591_v43  ;;  %v2600_v32 = vsub.f32 %v2580_v22, %v2592_v41 }
 0x300   : > { %5415 = vmatmul.mubr.msk.bf16.gmra.mxu0 %vm643_vm0, %v2556_v12 }
 0x301   : > { %5430 = vmatprep.mubr.msk.bf16.mxu0 %vm643_vm0, %v2585_v15  ;;  %v2606_v2 = vpack.c.bf16 %v2600_v32, %v2599_v44 }
 0x305   : > { %5425 = vmatmul.mubr.msk.bf16.gmra.mxu1 %vm643_vm0, %v2576_v58 }
 0x306   : > { %5440 = vmatprep.mubr.msk.bf16.mxu1 %vm643_vm0, %v2585_v15 }
 0x308   : > { %5431 = vmatmul.mubr.msk.bf16.vlgmr.msra.gmra.mxu0 %vm643_vm0, %v2586_v9 }
 0x309   : > { %5449 = vmatpush3.bf16.msra.mxu0 %v6687_v16  ;;  %5434 = vmatprep.mubr.msk.bf16.mxu0 %vm643_vm0, %v2587_v4  ;;  %v2604_v16 = vsub.f32 %v2584_v62, %v2596_v49 }
 0x30a   : > { %5468 = vmatprep.subr.bf16.mxu0 %v6726_v54 }
 0x30b   : > { %v2608_v53 = vpack.c.bf16 %v2604_v16, %v2603_v35 }
 0x30d   : > { %5441 = vmatmul.mubr.msk.bf16.vlgmr.msra.gmra.mxu1 %vm643_vm0, %v2586_v9 }
 0x30e   : > { %5444 = vmatprep.mubr.msk.bf16.mxu1 %vm643_vm0, %v2587_v4  ;;  %5459 = vmatpush3.bf16.msra.mxu1 %v5649_v8 }
 0x30f   : > { %5478 = vmatprep.subr.bf16.mxu1 %v6726_v54 }
 0x310   : > { %5435 = vmatmul.mubr.msk.bf16.gmra.mxu0 %vm643_vm0, %v2588_v28 }
 0x311   : > { %5450 = vmatprep.mubr.msk.bf16.mxu0 %vm643_vm0, %v2605_v20 }
 0x315   : > { %5445 = vmatmul.mubr.msk.bf16.gmra.mxu1 %vm643_vm0, %v2588_v28 }
 0x318   : > { %5451 = vmatmul.mubr.msk.bf16.vlgmr.msra.gmra.mxu0 %vm643_vm0, %v2606_v2 }
 0x319   : > { %5454 = vmatprep.mubr.msk.bf16.mxu0 %vm643_vm0, %v2607_v59  ;;  %5469 = vmatpush3.bf16.msra.mxu0 %v6726_v54 }
 0x31a   : > { %5488 = vmatprep.subr.bf16.mxu0 %v6739_v42 }
 0x320   : > { %5455 = vmatmul.mubr.msk.bf16.gmra.mxu0 %vm643_vm0, %v2608_v53 }
 0x398   : > { %v5372_v27 = vpop.f32.mrf.mxu0  ;;  %v5382_v23 = vpop.f32.mrf.mxu1 }
 0x399   : > { %v2729_v58 = vadd.f32 %v5382_v23, %v5372_v27 }
 0x39a   : > { %v2655_v57 = vpop.f32.mrf.mxu0  ;;  %v2720_v38 = vpop.f32.mrf.mxu1 }
 0x39b   : > { %v2721_v36 = vadd.f32 %v2720_v38, %v2655_v57 }
 0x39c   : > { %v5373_v17 = vpop.f32.mrf.mxu0  ;;  %v5383_v11 = vpop.f32.mrf.mxu1 }
 0x39d   : > { %v2732_v18 = vadd.f32 %v5383_v11, %v5373_v17 }
 0x39e   : > { %v2658_v48 = vpop.f32.mrf.mxu0  ;;  %v2723_v5 = vpop.f32.mrf.mxu1 }
 0x39f   : > { %v2724_v47 = vadd.f32 %v2723_v5, %v2658_v48 }
 0x3a0   : > { %v5376_v3 = vpop.f32.mrf.mxu0  ;;  %v5386_v50 = vpop.f32.mrf.mxu1 }
 0x3a1   : > { %v2745_v49 = vadd.f32 %v5386_v50, %v5376_v3 }
 0x3a2   : > { %v2671_v13 = vpop.f32.mrf.mxu0  ;;  %v2736_v31 = vpop.f32.mrf.mxu1 }
 0x3a3   : > { %v2737_v57 = vadd.f32 %v2736_v31, %v2671_v13 }
 0x3a4   : > { %v5377_v52 = vpop.f32.mrf.mxu0  ;;  %v5387_v12 = vpop.f32.mrf.mxu1 }
 0x3a5   : > { %v2748_v50 = vadd.f32 %v5387_v12, %v5377_v52 }
 0x3a6   : > { %v6743_v24 = vpop.f32.mrf.mxu0  ;;  %v6745_v29 = vpop.f32.mrf.mxu1 }
 0x3a7   : > { %v2740_v31 = vadd.f32 %v6745_v29, %v6743_v24 }
 0x3a8   : > { %v5392_v1 = vpop.f32.mrf.mxu0 }
 0x3a9   : > { %v6749_v34 = vadd.f32 %v5392_v1, %v2729_v58 }
 0x3aa   : > { %v2797_v26 = vpop.f32.mrf.mxu0 }
 0x3ab   : > { %v6753_v41 = vadd.f32 %v2797_v26, %v2721_v36 }
 0x3ac   : > { %v5393_v56 = vpop.f32.mrf.mxu0 }
 0x3ad   : > { %v5402_v45 = vpop.f32.mrf.mxu1  ;;  %v6759_v0 = vadd.f32 %v5393_v56, %v2732_v18 }
 0x3ae   : > { %v2800_v61 = vpop.f32.mrf.mxu0 }
 0x3af   : > { %v2882_v60 = vpop.f32.mrf.mxu1  ;;  %v6765_v16 = vadd.f32 %v2800_v61, %v2724_v47 }
 0x3b0   : > { %v5396_v30 = vpop.f32.mrf.mxu0 }
 0x3b1   : > { %v5403_v19 = vpop.f32.mrf.mxu1  ;;  %v6771_v11 = vadd.f32 %v5396_v30, %v2745_v49 }
 0x3b2   : > { %v2813_v14 = vpop.f32.mrf.mxu0 }
 0x3b3   : > { %v2885_v25 = vpop.f32.mrf.mxu1  ;;  %v6777_v56 = vadd.f32 %v2813_v14, %v2737_v57 }
 0x3b4   : > { %v5397_v7 = vpop.f32.mrf.mxu0 }
 0x3b5   : > { %v5406_v10 = vpop.f32.mrf.mxu1 }
 0x3b6   : > { %v6747_v15 = vpop.f32.mrf.mxu0 }
 0x3b7   : > { %v2898_v40 = vpop.f32.mrf.mxu1 }
 0x3b8   : > { %v5412_v46 = vpop.f32.mrf.mxu0 }
 0x3b9   : > { %v5407_v8 = vpop.f32.mrf.mxu1  ;;  %v2956_v6 = vadd.f32 %v5412_v46, %v5402_v45 }
 0x3ba   : > { %v2947_v22 = vpop.f32.mrf.mxu0 }
 0x3bb   : > { %v2901_v39 = vpop.f32.mrf.mxu1  ;;  %v2948_v62 = vadd.f32 %v2947_v22, %v2882_v60 }
 0x3bc   : > { %v5413_v63 = vpop.f32.mrf.mxu0 }
 0x3bd   : > { %v5422_v9 = vpop.f32.mrf.mxu1  ;;  %v2959_v28 = vadd.f32 %v5413_v63, %v5403_v19  ;;  %v6785_v19 = vadd.f32 %v5397_v7, %v2748_v50 }
 0x3be   : > { %v2950_v4 = vpop.f32.mrf.mxu0  ;;  %v6751_v51 = vadd.f32 %v5422_v9, %v2956_v6 }
 0x3bf   : > { %v3024_v33 = vpop.f32.mrf.mxu1  ;;  %v2951_v21 = vadd.f32 %v2950_v4, %v2885_v25 }
 0x3c0   : > { %v5416_v43 = vpop.f32.mrf.mxu0  ;;  %v6755_v20 = vadd.f32 %v3024_v33, %v2948_v62  ;;  %v3304_v37 = vadd.f32 %v6751_v51, %v6749_v34 }
 0x3c1   : > { %v5423_v44 = vpop.f32.mrf.mxu1  ;;  %v2972_v53 = vadd.f32 %v5416_v43, %v5406_v10 }
 0x3c2   : > { %v2963_v32 = vpop.f32.mrf.mxu0  ;;  %v6761_v2 = vadd.f32 %v5423_v44, %v2959_v28  ;;  %3358 = vxpose.xlu1.b32.start [1/2] (short) (narrow) %v3304_v37, 16  ;;  %v3302_v55 = vadd.f32 %v6755_v20, %v6753_v41 }
 0x3c3   : > { %v3027_v59 = vpop.f32.mrf.mxu1  ;;  %v2964_v48 = vadd.f32 %v2963_v32, %v2898_v40  ;;  %v6792_v40 = vadd.f32 %v6747_v15, %v2740_v31 }
 0x3c4   : > { %v5417_v35 = vpop.f32.mrf.mxu0  ;;  %v3305_v27 = vadd.f32 %v6761_v2, %v6759_v0  ;;  %v6769_v23 = vadd.f32 %v3027_v59, %v2951_v21  ;;  %3326 = vxpose.xlu0.b32.start [1/2] (short) (narrow) %v3302_v55, 16 }
 0x3c5   : > { %v5426_v38 = vpop.f32.mrf.mxu1  ;;  %v2975_v45 = vadd.f32 %v5417_v35, %v5407_v8 }
 0x3c6   : > { %v2966_v17 = vpop.f32.mrf.mxu0  ;;  %v3303_v5 = vadd.f32 %v6769_v23, %v6765_v16  ;;  %v6775_v3 = vadd.f32 %v5426_v38, %v2972_v53  ;;  %3359 = vxpose.xlu1.b32.end [2/2] (short) (narrow) %v3305_v27, 16 }
 0x3c7   : > { %v3040_v1 = vpop.f32.mrf.mxu1  ;;  %v2967_v25 = vadd.f32 %v2966_v17, %v2901_v39 }
 0x3c8   : > { %v5432_v26 = vpop.f32.mrf.mxu0  ;;  %v6779_v61 = vadd.f32 %v3040_v1, %v2964_v48  ;;  %3327 = vxpose.xlu0.b32.end [2/2] (short) (narrow) %v3303_v5, 16  ;;  %v3308_v13 = vadd.f32 %v6775_v3, %v6771_v11 }
 0x3c9   : > { %v5427_v60 = vpop.f32.mrf.mxu1 }
 0x3ca   : > { %v3115_v30 = vpop.f32.mrf.mxu0  ;;  %v6787_v52 = vadd.f32 %v5427_v60, %v2975_v45  ;;  %3422 = vxpose.xlu1.b32.start [1/2] (short) (narrow) %v3308_v13, 16  ;;  %v3306_v12 = vadd.f32 %v6779_v61, %v6777_v56 }
 0x3cb   : > { %v3043_v14 = vpop.f32.mrf.mxu1 }
 0x3cc   : > { %v5433_v10 = vpop.f32.mrf.mxu0  ;;  %v3309_v46 = vadd.f32 %v6787_v52, %v6785_v19  ;;  %v6796_v24 = vadd.f32 %v3043_v14, %v2967_v25  ;;  %3390 = vxpose.xlu0.b32.start [1/2] (short) (narrow) %v3306_v12, 16 }
 0x3cd   : > { %v5442_v29 = vpop.f32.mrf.mxu1 }
 0x3ce   : > { %v3118_v7 = vpop.f32.mrf.mxu0  ;;  %v3307_v8 = vadd.f32 %v6796_v24, %v6792_v40  ;;  %3423 = vxpose.xlu1.b32.end [2/2] (short) (narrow) %v3309_v46, 16  ;;  %v3195_v36 = vadd.f32 %v5442_v29, %v5432_v26 }
 0x3cf   : > { %v3186_v22 = vpop.f32.mrf.mxu1 }
 0x3d0   : > { %v5436_v39 = vpop.f32.mrf.mxu0  ;;  %3391 = vxpose.xlu0.b32.end [2/2] (short) (narrow) %v3307_v8, 16  ;;  %v3187_v18 = vadd.f32 %v3186_v22, %v3115_v30  ;;  %v5652_v8 = vld [vmem:[#allocation7 + $0x8] sm:$0xff]  }
 0x3d1   : > { %v5443_v63 = vpop.f32.mrf.mxu1 }
 0x3d2   : > { %v3131_v58 = vpop.f32.mrf.mxu0  ;;  %v3198_v37 = vadd.f32 %v5443_v63, %v5433_v10 }
 0x3d3   : > { %v3189_v6 = vpop.f32.mrf.mxu1 }
 0x3d4   : > { %v5437_v15 = vpop.f32.mrf.mxu0  ;;  %v3190_v21 = vadd.f32 %v3189_v6, %v3118_v7 }
 0x3d5   : > { %v5446_v9 = vpop.f32.mrf.mxu1 }
 0x3d6   : > { %v3134_v4 = vpop.f32.mrf.mxu0  ;;  %v3211_v27 = vadd.f32 %v5446_v9, %v5436_v39 }
 0x3d7   : > { %v3202_v43 = vpop.f32.mrf.mxu1 }
 0x3d8   : > { %v5452_v62 = vpop.f32.mrf.mxu0  ;;  %v3203_v5 = vadd.f32 %v3202_v43, %v3131_v58 }
 0x3d9   : > { %v3296_v33 = vadd.f32 %v5452_v62, %v3195_v36  ;;  %v5447_v35 = vpop.f32.mrf.mxu1 }
 0x3da   : > { %v3263_v28 = vpop.f32.mrf.mxu0 }
 0x3db   : > { %v3312_v47 = vsub.f32 %v3296_v33, %v6749_v34  ;;  %v3294_v44 = vadd.f32 %v3263_v28, %v3187_v18  ;;  %v3205_v1 = vpop.f32.mrf.mxu1 }
 0x3dc   : > { %v5453_v32 = vpop.f32.mrf.mxu0  ;;  %v3206_v60 = vadd.f32 %v3205_v1, %v3134_v4 }
 0x3dd   : > { %v3310_v55 = vsub.f32 %v3294_v44, %v6753_v41  ;;  %v3297_v49 = vadd.f32 %v5453_v32, %v3198_v37  ;;  %v3320_v59 = vadd.f32 %v3312_v47, %v6751_v51  ;;  %v3214_v51 = vadd.f32 %v5447_v35, %v5437_v15  ;;  %v5647_v44 = vld [vmem:[#allocation7 + $0x38] sm:$0xff]  }
 0x3de   : > { %v3266_v53 = vpop.f32.mrf.mxu0 }
 0x3df   : > { %v3313_v57 = vsub.f32 %v3297_v49, %v6759_v0  ;;  %v3295_v38 = vadd.f32 %v3266_v53, %v3190_v21  ;;  %3486 = vxpose.xlu1.b32.start [1/2] (short) (narrow) %v3320_v59, 16  ;;  %v3318_v17 = vadd.f32 %v3310_v55, %v6755_v20 }
 0x3e0   : > { %v5456_v48 = vpop.f32.mrf.mxu0 }
 0x3e1   : > { %v3311_v34 = vsub.f32 %v3295_v38, %v6765_v16  ;;  %v3300_v50 = vadd.f32 %v5456_v48, %v3211_v27  ;;  %3454 = vxpose.xlu0.b32.start [1/2] (short) (narrow) %v3318_v17, 16  ;;  %v3321_v41 = vadd.f32 %v3313_v57, %v6761_v2  ;;  %v5648_v48 = vld [vmem:[#allocation7 + $0x18] sm:$0xff]  }
 0x3e2   : > { %v3279_v26 = vpop.f32.mrf.mxu0 }
 0x3e3   : > { %v3316_v45 = vsub.f32 %v3300_v50, %v6771_v11  ;;  %v3298_v13 = vadd.f32 %v3279_v26, %v3203_v5  ;;  %3487 = vxpose.xlu1.b32.end [2/2] (short) (narrow) %v3321_v41, 16  ;;  %v3319_v0 = vadd.f32 %v3311_v34, %v6769_v23 }
 0x3e4   : > { %v5457_v31 = vpop.f32.mrf.mxu0 }
 0x3e5   : > { %v3314_v20 = vsub.f32 %v3298_v13, %v6777_v56  ;;  %v3301_v30 = vadd.f32 %v5457_v31, %v3214_v51  ;;  %3455 = vxpose.xlu0.b32.end [2/2] (short) (narrow) %v3319_v0, 16  ;;  %v3324_v16 = vadd.f32 %v3316_v45, %v6775_v3 }
 0x3e6   : > { %v3282_v25 = vpop.f32.mrf.mxu0 }
 0x3e7   : > { %v3317_v2 = vsub.f32 %v3301_v30, %v6785_v19  ;;  %v3299_v12 = vadd.f32 %v3282_v25, %v3206_v60  ;;  %3550 = vxpose.xlu1.b32.start [1/2] (short) (narrow) %v3324_v16, 16  ;;  %v3322_v14 = vadd.f32 %v3314_v20, %v6779_v61 }
 0x3e9   : > { %v3315_v11 = vsub.f32 %v3299_v12, %v6792_v40  ;;  %3518 = vxpose.xlu0.b32.start [1/2] (short) (narrow) %v3322_v14, 16  ;;  %v3325_v23 = vadd.f32 %v3317_v2, %v6787_v52 }
 0x3eb   : > { %3551 = vxpose.xlu1.b32.end [2/2] (short) (narrow) %v3325_v23, 16  ;;  %v3323_v10 = vadd.f32 %v3315_v11, %v6796_v24 }
 0x3ed   : > { %3519 = vxpose.xlu0.b32.end [2/2] (short) (narrow) %v3323_v10, 16 }
 0x43e   : > { %v6816_v56 = vpop.trf.xlu1 }
 0x440   : > { %v6818_v46 = vpop.trf.xlu0 }
 0x442   : > { %v6820_v3 = vpop.trf.xlu1 }
 0x443   : > { %v3589_v40 = vpack.c.bf16 %v6820_v3, %v6816_v56 }
 0x444   : > { %v6822_v19 = vpop.trf.xlu0 }
 0x445   : > { %v3588_v61 = vpack.c.bf16 %v6822_v19, %v6818_v46  ;;  %v3594_v15 = vunpack.c.l.bf16 %v3589_v40  ;;  %v3595_v9 = vunpack.c.h.bf16 %v3589_v40 }
 0x446   : > { %v6828_v29 = vpop.trf.xlu1 }
 0x447   : > { %v3592_v52 = vunpack.c.l.bf16 %v3588_v61  ;;  %v3593_v7 = vunpack.c.h.bf16 %v3588_v61  ;;  %5460 = vmatprep.mubr.msk.bf16.mxu1 %vm643_vm0, %v3588_v61  ;;  %5470 = vmatprep.mubr.msk.bf16.mxu0 %vm643_vm0, %v3588_v61  ;;  %v3602_v62 = vsub.f32 %v6816_v56, %v3594_v15  ;;  %v3603_v18 = vsub.f32 %v6820_v3, %v3595_v9 }
 0x448   : > { %5461 = vmatmul.mubr.msk.bf16.vlgmr.msra.gmra.mxu1 %vm643_vm0, %v3589_v40  ;;  %5471 = vmatmul.mubr.msk.bf16.vlgmr.msra.gmra.mxu0 %vm643_vm0, %v3589_v40  ;;  %v6834_v24 = vpop.trf.xlu0 }
 0x449   : > { %5479 = vmatpush3.bf16.msra.mxu1 %v6726_v54  ;;  %5489 = vmatpush3.bf16.msra.mxu0 %v6739_v42  ;;  %v3600_v22 = vsub.f32 %v6818_v46, %v3592_v52  ;;  %v3601_v39 = vsub.f32 %v6822_v19, %v3593_v7  ;;  %v3609_v28 = vpack.c.bf16 %v3603_v18, %v3602_v62 }
 0x44a   : > { %5498 = vmatprep.subr.bf16.mxu1 %v5652_v8  ;;  %5508 = vmatprep.subr.bf16.mxu0 %v5652_v8  ;;  %v6840_v63 = vpop.trf.xlu1 }
 0x44b   : > { %v3591_v54 = vpack.c.bf16 %v6840_v63, %v6828_v29  ;;  %v3608_v42 = vpack.c.bf16 %v3601_v39, %v3600_v22 }
 0x44c   : > { %v6842_v58 = vpop.trf.xlu0 }
 0x44d   : > { %v3590_v6 = vpack.c.bf16 %v6842_v58, %v6834_v24  ;;  %v3598_v37 = vunpack.c.l.bf16 %v3591_v54  ;;  %v3599_v47 = vunpack.c.h.bf16 %v3591_v54 }
 0x44f   : > { %v3596_v4 = vunpack.c.l.bf16 %v3590_v6  ;;  %v3597_v36 = vunpack.c.h.bf16 %v3590_v6  ;;  %5464 = vmatprep.mubr.msk.bf16.mxu1 %vm643_vm0, %v3590_v6  ;;  %5474 = vmatprep.mubr.msk.bf16.mxu0 %vm643_vm0, %v3590_v6  ;;  %v3606_v21 = vsub.f32 %v6828_v29, %v3598_v37  ;;  %v3607_v55 = vsub.f32 %v6840_v63, %v3599_v47 }
 0x450   : > { %5465 = vmatmul.mubr.msk.bf16.gmra.mxu1 %vm643_vm0, %v3591_v54  ;;  %5475 = vmatmul.mubr.msk.bf16.gmra.mxu0 %vm643_vm0, %v3591_v54 }
 0x451   : > { %5480 = vmatprep.mubr.msk.bf16.mxu1 %vm643_vm0, %v3608_v42  ;;  %v3604_v33 = vsub.f32 %v6834_v24, %v3596_v4  ;;  %v3605_v43 = vsub.f32 %v6842_v58, %v3597_v36  ;;  %v3611_v35 = vpack.c.bf16 %v3607_v55, %v3606_v21 }
 0x453   : > { %v3610_v32 = vpack.c.bf16 %v3605_v43, %v3604_v33 }
 0x458   : > { %5481 = vmatmul.mubr.msk.bf16.vlgmr.msra.gmra.mxu1 %vm643_vm0, %v3609_v28 }
 0x459   : > { %5499 = vmatpush3.bf16.msra.mxu1 %v5652_v8  ;;  %5484 = vmatprep.mubr.msk.bf16.mxu1 %vm643_vm0, %v3610_v32 }
 0x45a   : > { %5518 = vmatprep.subr.bf16.mxu1 %v5647_v44 }
 0x45b   : > { %v3502_v49 = vpop.trf.xlu1 }
 0x45d   : > { %v3470_v59 = vpop.trf.xlu0 }
 0x45e   : > { %v3636_v25 = vadd.f32 %v3470_v59, %v6818_v46  ;;  %v3638_v46 = vadd.f32 %v3502_v49, %v6816_v56 }
 0x45f   : > { %v3503_v53 = vpop.trf.xlu1 }
 0x460   : > { %5485 = vmatmul.mubr.msk.bf16.gmra.mxu1 %vm643_vm0, %v3611_v35  ;;  %v3613_v38 = vpack.c.bf16 %v3503_v53, %v3502_v49 }
 0x461   : > { %v3471_v27 = vpop.trf.xlu0 }
 0x462   : > { %v3612_v57 = vpack.c.bf16 %v3471_v27, %v3470_v59  ;;  %v3618_v13 = vunpack.c.l.bf16 %v3613_v38  ;;  %v3619_v0 = vunpack.c.h.bf16 %v3613_v38  ;;  %v3637_v20 = vadd.f32 %v3471_v27, %v6822_v19 }
 0x463   : > { %v3566_v17 = vpop.trf.xlu1  ;;  %v3639_v19 = vadd.f32 %v3503_v53, %v6820_v3 }
 0x464   : > { %5490 = vmatprep.mubr.msk.bf16.mxu0 %vm643_vm0, %v3612_v57  ;;  %5500 = vmatprep.mubr.msk.bf16.mxu1 %vm643_vm0, %v3612_v57  ;;  %v3616_v5 = vunpack.c.l.bf16 %v3612_v57  ;;  %v3617_v34 = vunpack.c.h.bf16 %v3612_v57  ;;  %v3626_v2 = vsub.f32 %v3502_v49, %v3618_v13  ;;  %v3627_v12 = vsub.f32 %v3503_v53, %v3619_v0 }
 0x465   : > { %5491 = vmatmul.mubr.msk.bf16.vlgmr.msra.gmra.mxu0 %vm643_vm0, %v3613_v38  ;;  %v3534_v50 = vpop.trf.xlu0  ;;  %v3644_v14 = vpack.c.bf16 %v3637_v20, %v3636_v25  ;;  %v3645_v22 = vpack.c.bf16 %v3639_v19, %v3638_v46 }
 0x466   : > { %5509 = vmatpush3.bf16.msra.mxu0 %v5652_v8  ;;  %v3624_v41 = vsub.f32 %v3470_v59, %v3616_v5  ;;  %v3625_v1 = vsub.f32 %v3471_v27, %v3617_v34  ;;  %v3633_v10 = vpack.c.bf16 %v3627_v12, %v3626_v2  ;;  %v3640_v8 = vadd.f32 %v3534_v50, %v6834_v24 }
 0x467   : > { %5528 = vmatprep.subr.bf16.mxu0 %v5648_v48  ;;  %v3567_v26 = vpop.trf.xlu1  ;;  %v3649_v15 = vunpack.c.h.bf16 %v3644_v14  ;;  %v3648_v3 = vunpack.c.l.bf16 %v3644_v14  ;;  %v3642_v24 = vadd.f32 %v3566_v17, %v6828_v29  ;;  %v3650_v4 = vunpack.c.l.bf16 %v3645_v22 }
 0x468   : > { %5501 = vmatmul.mubr.msk.bf16.vlgmr.msra.gmra.mxu1 %vm643_vm0, %v3613_v38  ;;  %v3615_v31 = vpack.c.bf16 %v3567_v26, %v3566_v17  ;;  %v3632_v60 = vpack.c.bf16 %v3625_v1, %v3624_v41  ;;  %v3643_v56 = vadd.f32 %v3567_v26, %v6840_v63  ;;  %v3651_v36 = vunpack.c.h.bf16 %v3645_v22 }
 0x469   : > { %v3535_v51 = vpop.trf.xlu0  ;;  %5519 = vmatpush3.bf16.msra.mxu1 %v5647_v44  ;;  %v3657_v54 = vsub.f32 %v3637_v20, %v3649_v15  ;;  %v3656_v42 = vsub.f32 %v3636_v25, %v3648_v3  ;;  %v3658_v28 = vsub.f32 %v3638_v46, %v3650_v4  ;;  %v5001_v46 = vld [vmem:[%s451_s21 + $0x8] sm:$0xff]   ;;  %v5002_v4 = vld [vmem:[%s451_s21 + $0x10] sm:$0xff]  }
 0x46a   : > { %v3614_v45 = vpack.c.bf16 %v3535_v51, %v3534_v50  ;;  %5538 = vmatprep.subr.bf16.mxu1 %v5648_v48  ;;  %v3622_v61 = vunpack.c.l.bf16 %v3615_v31  ;;  %v3623_v40 = vunpack.c.h.bf16 %v3615_v31  ;;  %v3641_v7 = vadd.f32 %v3535_v51, %v6842_v58 }
 0x46b   : > { %v3647_v62 = vpack.c.bf16 %v3643_v56, %v3642_v24  ;;  %v3664_v43 = vpack.c.bf16 %v3657_v54, %v3656_v42  ;;  %v3659_v63 = vsub.f32 %v3639_v19, %v3651_v36  ;;  %v4975_v15 = vunpack.c.l.bf16 %v5001_v46  ;;  %v5003_v54 = vld [vmem:[%s451_s21 + $0x18] sm:$0xff]   ;;  %v5006_v36 = vld [vmem:[%s451_s21 + $0x30] sm:$0xff]  }
 0x46c   : > { %5494 = vmatprep.mubr.msk.bf16.mxu0 %vm643_vm0, %v3614_v45  ;;  %5504 = vmatprep.mubr.msk.bf16.mxu1 %vm643_vm0, %v3614_v45  ;;  %v3620_v30 = vunpack.c.l.bf16 %v3614_v45  ;;  %v3621_v16 = vunpack.c.h.bf16 %v3614_v45  ;;  %v3630_v39 = vsub.f32 %v3566_v17, %v3622_v61  ;;  %v3631_v6 = vsub.f32 %v3567_v26, %v3623_v40 }
 0x46d   : > { %5495 = vmatmul.mubr.msk.bf16.gmra.mxu0 %vm643_vm0, %v3615_v31  ;;  %v3646_v9 = vpack.c.bf16 %v3641_v7, %v3640_v8  ;;  %v3665_v29 = vpack.c.bf16 %v3659_v63, %v3658_v28  ;;  %v3654_v44 = vunpack.c.l.bf16 %v3647_v62  ;;  %v3655_v32 = vunpack.c.h.bf16 %v3647_v62  ;;  %v6979_v63 = vld [vmem:[%s6030_s7 + $0x10] sm:$0xff] }
 0x46e   : > { %5510 = vmatprep.mubr.msk.bf16.mxu0 %vm643_vm0, %v3632_v60  ;;  %v3628_v11 = vsub.f32 %v3534_v50, %v3620_v30  ;;  %v3629_v23 = vsub.f32 %v3535_v51, %v3621_v16  ;;  %v3635_v58 = vpack.c.bf16 %v3631_v6, %v3630_v39  ;;  %v4970_v6 = vld [vmem:[%s451_s21] sm:$0xff]   ;;  %7444 = vst [vmem:[#allocation25_spill] sm:$0xff] %v6979_v63 }
 0x46f   : > { %v3652_v18 = vunpack.c.l.bf16 %v3646_v9  ;;  %v3653_v33 = vunpack.c.h.bf16 %v3646_v9  ;;  %v3662_v55 = vsub.f32 %v3642_v24, %v3654_v44  ;;  %v3663_v49 = vsub.f32 %v3643_v56, %v3655_v32  ;;  %v5007_v24 = vld [vmem:[%s451_s21 + $0x38] sm:$0xff]  }
 0x470   : > { %5505 = vmatmul.mubr.msk.bf16.gmra.mxu1 %vm643_vm0, %v3615_v31  ;;  %v3634_v52 = vpack.c.bf16 %v3629_v23, %v3628_v11  ;;  %v4971_v42 = vunpack.c.l.bf16 %v4970_v6  ;;  %v4983_v44 = vunpack.c.l.bf16 %v5003_v54 }
 0x471   : > { %5520 = vmatprep.mubr.msk.bf16.mxu1 %vm643_vm0, %v3644_v14  ;;  %v3660_v37 = vsub.f32 %v3640_v8, %v3652_v18  ;;  %v3661_v47 = vsub.f32 %v3641_v7, %v3653_v33  ;;  %v3667_v59 = vpack.c.bf16 %v3663_v49, %v3662_v55  ;;  %v5005_v8 = vld [vmem:[%s451_s21 + $0x28] sm:$0xff]   ;;  %v6987_v55 = vld [vmem:[%s6030_s7 + $0x50] sm:$0xff] }
 0x472   : > { %v4991_v56 = vunpack.c.l.bf16 %v5005_v8  ;;  %v4992_v28 = vunpack.c.h.bf16 %v5005_v8  ;;  %7446 = vst [vmem:[#allocation27_spill] sm:$0xff] %v6987_v55  ;;  %v4995_v8 = vunpack.c.l.bf16 %v5006_v36 }
 0x473   : > { %v3666_v21 = vpack.c.bf16 %v3661_v47, %v3660_v37  ;;  %v4459_v37 = vsub.f32 %v6979_v63, %v4975_v15  ;;  %v4972_v47 = vunpack.c.h.bf16 %v4970_v6  ;;  %v4984_v15 = vunpack.c.h.bf16 %v5003_v54 }
 0x474   : > { %v4515_v49 = vsub.f32 %v6987_v55, %v4991_v56  ;;  %v4980_v63 = vunpack.c.h.bf16 %v5002_v4  ;;  %v7003_v55 = vld [vmem:[%s6030_s7 + $0x18] sm:$0xff] }
 0x475   : > { %5511 = vmatmul.mubr.msk.bf16.vlgmr.msra.gmra.mxu0 %vm643_vm0, %v3633_v10  ;;  %7449 = vst [vmem:[#allocation30_spill] sm:$0xff] %v7003_v55 }
 0x476   : > { %5529 = vmatpush3.bf16.msra.mxu0 %v5648_v48  ;;  %5514 = vmatprep.mubr.msk.bf16.mxu0 %vm643_vm0, %v3634_v52 }
 0x478   : > { %5521 = vmatmul.mubr.msk.bf16.vlgmr.msra.gmra.mxu1 %vm643_vm0, %v3645_v22 }
 0x479   : > { %5539 = vmatpush3.bf16.msra.mxu1 %v5648_v48  ;;  %5524 = vmatprep.mubr.msk.bf16.mxu1 %vm643_vm0, %v3646_v9 }
 0x47d   : > { %5515 = vmatmul.mubr.msk.bf16.gmra.mxu0 %vm643_vm0, %v3635_v58 }
 0x47e   : > { %5530 = vmatprep.mubr.msk.bf16.mxu0 %vm643_vm0, %v3644_v14 }
 0x480   : > { %5525 = vmatmul.mubr.msk.bf16.gmra.mxu1 %vm643_vm0, %v3647_v62 }
 0x481   : > { %5540 = vmatprep.mubr.msk.bf16.mxu1 %vm643_vm0, %v3664_v43  ;;  %v4976_v43 = vunpack.c.h.bf16 %v5001_v46  ;;  %v4979_v46 = vunpack.c.l.bf16 %v5002_v4  ;;  %v7010_v4 = vmul.f32 0.1, %v4459_v37  ;;  %v7026_v37 = vmul.f32 0.1, %v4515_v49 }
 0x483   : > { %7451 = vst [vmem:[#allocation32_spill] sm:$0xff] %v7010_v4  ;;  %7456 = vst [vmem:[#allocation37_spill] sm:$0xff] %v7026_v37 }
 0x485   : > { %5531 = vmatmul.mubr.msk.bf16.vlgmr.msra.gmra.mxu0 %vm643_vm0, %v3645_v22 }
 0x486   : > { %5534 = vmatprep.mubr.msk.bf16.mxu0 %vm643_vm0, %v3646_v9  ;;  %v5004_v9 = vld [vmem:[%s451_s21 + $0x20] sm:$0xff]  }
 0x487   : > { %v4987_v33 = vunpack.c.l.bf16 %v5004_v9 }
 0x488   : > { %5541 = vmatmul.mubr.msk.bf16.vlgmr.msra.gmra.mxu1 %vm643_vm0, %v3665_v29  ;;  %v4988_v29 = vunpack.c.h.bf16 %v5004_v9  ;;  %v5000_v9 = vunpack.c.h.bf16 %v5007_v24 }
 0x489   : > { %5544 = vmatprep.mubr.msk.bf16.mxu1 %vm643_vm0, %v3666_v21 }
 0x48d   : > { %5535 = vmatmul.mubr.msk.bf16.gmra.mxu0 %vm643_vm0, %v3647_v62 }
 0x490   : > { %5545 = vmatmul.mubr.msk.bf16.gmra.mxu1 %vm643_vm0, %v3667_v59  ;;  %v4999_v59 = vunpack.c.l.bf16 %v5007_v24  ;;  %v4996_v24 = vunpack.c.h.bf16 %v5006_v36 }
 0x508   : > { %v6894_v35 = vpop.f32.mrf.mxu1  ;;  %v6896_v53 = vpop.f32.mrf.mxu0 }
 0x50a   : > { %v6898_v27 = vpop.f32.mrf.mxu1  ;;  %v6900_v57 = vpop.f32.mrf.mxu0 }
 0x50c   : > { %v6902_v38 = vpop.f32.mrf.mxu1  ;;  %v6904_v17 = vpop.f32.mrf.mxu0 }
 0x50e   : > { %v6906_v48 = vpop.f32.mrf.mxu1  ;;  %v6910_v34 = vpop.f32.mrf.mxu0 }
 0x510   : > { %v6908_v5 = vpop.f32.mrf.mxu1  ;;  %v6916_v1 = vpop.f32.mrf.mxu0 }
 0x512   : > { %v6912_v50 = vpop.f32.mrf.mxu1  ;;  %v6922_v45 = vpop.f32.mrf.mxu0 }
 0x514   : > { %v6914_v41 = vpop.f32.mrf.mxu1  ;;  %v6928_v31 = vpop.f32.mrf.mxu0 }
 0x516   : > { %v6918_v26 = vpop.f32.mrf.mxu1  ;;  %v6934_v30 = vpop.f32.mrf.mxu0 }
 0x518   : > { %v6920_v51 = vpop.f32.mrf.mxu1 }
 0x51a   : > { %v6924_v13 = vpop.f32.mrf.mxu1 }
 0x51c   : > { %v6926_v0 = vpop.f32.mrf.mxu1 }
 0x51e   : > { %v6930_v60 = vpop.f32.mrf.mxu1 }
 0x520   : > { %v6932_v20 = vpop.f32.mrf.mxu1 }
 0x522   : > { %v6936_v16 = vpop.f32.mrf.mxu1 }
 0x523   : > { %7438 = vst [vmem:[#allocation19_spill] sm:$0xff] %v6936_v16 }
 0x524   : > { %v6938_v25 = vpop.f32.mrf.mxu1 }
 0x525   : > { %7439 = vst [vmem:[#allocation20_spill] sm:$0xff] %v6938_v25  ;;  %v6940_v2 = vpop.f32.mrf.mxu0 }
 0x526   : > { %v6942_v12 = vpop.f32.mrf.mxu1 }
 0x527   : > { %7440 = vst [vmem:[#allocation21_spill] sm:$0xff] %v6942_v12  ;;  %v6944_v14 = vpop.f32.mrf.mxu0  ;;  %v4460_v12 = vsub.f32 %v7003_v55, %v4976_v43  ;;  %v7021_v43 = vld [vmem:[%s6030_s7 + $0x30] sm:$0xff] }
 0x528   : > { %v6946_v11 = vpop.f32.mrf.mxu1  ;;  %7454 = vst [vmem:[#allocation35_spill] sm:$0xff] %v7021_v43  ;;  %v4463_v55 = vsub.f32 %v7021_v43, %v4983_v44  ;;  %v7043_v44 = vld [vmem:[%s6030_s7 + $0x38] sm:$0xff] }
 0x529   : > { %v6948_v23 = vpop.f32.mrf.mxu0  ;;  %7461 = vst [vmem:[#allocation42_spill] sm:$0xff] %v7043_v44  ;;  %v4464_v49 = vsub.f32 %v7043_v44, %v4984_v15  ;;  %v7047_v43 = vld [vmem:[%s6030_s7 + $0x78] sm:$0xff] }
 0x52a   : > { %v6951_v10 = vpop.f32.mrf.mxu1  ;;  %7462 = vst [vmem:[#allocation43_spill] sm:$0xff] %v7047_v43  ;;  %v4520_v37 = vsub.f32 %v7047_v43, %v5000_v9  ;;  %v7070_v43 = vmul.f32 0.1, %v4463_v55  ;;  %v3788_v55 = vadd.f32 %v6896_v53, %v6894_v35 }
 0x52b   : > { %v6953_v19 = vpop.f32.mrf.mxu0 }
 0x52c   : > { %v6958_v61 = vpop.f32.mrf.mxu1 }
 0x52d   : > { %v6960_v40 = vpop.f32.mrf.mxu0  ;;  %v4018_v35 = vadd.f32 %v6958_v61, %v6948_v23 }
 0x52e   : > { %v6962_v52 = vpop.f32.mrf.mxu1 }
 0x52f   : > { %v6964_v7 = vpop.f32.mrf.mxu0 }
 0x530   : > { %v6966_v22 = vpop.f32.mrf.mxu1 }
 0x531   : > { %v6968_v39 = vpop.f32.mrf.mxu0 }
 0x532   : > { %7441 = vst [vmem:[#allocation22_spill] sm:$0xff] %v6968_v39  ;;  %v6970_v3 = vpop.f32.mrf.mxu1  ;;  %v6999_v39 = vld [vmem:[%s6030_s7 + $0x40] sm:$0xff] }
 0x533   : > { %v6972_v58 = vpop.f32.mrf.mxu0  ;;  %7448 = vst [vmem:[#allocation29_spill] sm:$0xff] %v6999_v39  ;;  %v4513_v56 = vsub.f32 %v6999_v39, %v4987_v33  ;;  %v7017_v33 = vld [vmem:[%s6030_s7 + $0x48] sm:$0xff]  ;;  %v4023_v23 = vadd.f32 %v6970_v3, %v6964_v7  ;;  %v7468_v3 = vld [vmem:[#allocation19_spill] sm:$0xff] }
 0x534   : > { %7442 = vst [vmem:[#allocation23_spill] sm:$0xff] %v6972_v58  ;;  %v6974_v62 = vpop.f32.mrf.mxu1  ;;  %v6991_v58 = vld [vmem:[%s6030_s7] sm:$0xff]  ;;  %7453 = vst [vmem:[#allocation34_spill] sm:$0xff] %v7017_v33  ;;  %v4514_v39 = vsub.f32 %v7017_v33, %v4988_v29 }
 0x535   : > { %7443 = vst [vmem:[#allocation24_spill] sm:$0xff] %v6974_v62  ;;  %v6976_v18 = vpop.f32.mrf.mxu0  ;;  %7447 = vst [vmem:[#allocation28_spill] sm:$0xff] %v6991_v58  ;;  %v4457_v6 = vsub.f32 %v6991_v58, %v4971_v42  ;;  %v7007_v42 = vld [vmem:[%s6030_s7 + $0x58] sm:$0xff]  ;;  %v7013_v58 = vld [vmem:[%s6030_s7 + $0x8] sm:$0xff] }
 0x536   : > { %v6982_v32 = vpop.f32.mrf.mxu1  ;;  %7450 = vst [vmem:[#allocation31_spill] sm:$0xff] %v7007_v42  ;;  %v4516_v54 = vsub.f32 %v7007_v42, %v4992_v28  ;;  %7452 = vst [vmem:[#allocation33_spill] sm:$0xff] %v7013_v58  ;;  %v4458_v25 = vsub.f32 %v7013_v58, %v4972_v47  ;;  %v7029_v42 = vld [vmem:[%s6030_s7 + $0x70] sm:$0xff]  ;;  %v7033_v47 = vld [vmem:[%s6030_s7 + $0x20] sm:$0xff]  ;;  %v7068_v9 = vmul.f32 0.1, %v4514_v39 }
 0x537   : > { %7445 = vst [vmem:[#allocation26_spill] sm:$0xff] %v6982_v32  ;;  %v6984_v21 = vpop.f32.mrf.mxu0  ;;  %7457 = vst [vmem:[#allocation38_spill] sm:$0xff] %v7029_v42  ;;  %v4519_v4 = vsub.f32 %v7029_v42, %v4999_v59  ;;  %v4461_v58 = vsub.f32 %v7033_v47, %v4979_v46  ;;  %v7037_v29 = vld [vmem:[%s6030_s7 + $0x60] sm:$0xff]  ;;  %v7040_v16 = vmul.f32 0.1, %v4457_v6  ;;  %v7051_v59 = vld [vmem:[%s6030_s7 + $0x28] sm:$0xff] }
 0x538   : > { %v6994_v32 = vpop.f32.mrf.mxu1  ;;  %7458 = vst [vmem:[#allocation39_spill] sm:$0xff] %v7033_v47  ;;  %7459 = vst [vmem:[#allocation40_spill] sm:$0xff] %v7037_v29  ;;  %v4517_v33 = vsub.f32 %v7037_v29, %v4995_v8  ;;  %v4462_v42 = vsub.f32 %v7051_v59, %v4980_v63  ;;  %v7056_v47 = vmul.f32 0.1, %v4513_v56  ;;  %v7058_v8 = vmul.f32 0.1, %v4460_v12 }
 0x539   : > { %v6996_v62 = vpop.f32.mrf.mxu0  ;;  %7460 = vst [vmem:[#allocation41_spill] sm:$0xff] %v7040_v16  ;;  %7463 = vst [vmem:[#allocation44_spill] sm:$0xff] %v7051_v59  ;;  %v7060_v6 = vmul.f32 0.1, %v4516_v54  ;;  %v7063_v29 = vld [vmem:[%s6030_s7 + $0x68] sm:$0xff]  ;;  %v4015_v54 = vadd.f32 %v6946_v11, %v6940_v2  ;;  %v3791_v2 = vadd.f32 %v6904_v17, %v6902_v38  ;;  %v3783_v11 = vadd.f32 %v6910_v34, %v6906_v48  ;;  %s7247_s7 = scalar_lea.vmem [#allocation8], %s4764_s24 }
 0x53a   : > { %v7024_v28 = vpop.f32.mrf.mxu1  ;;  %7465 = vst [vmem:[#allocation46_spill] sm:$0xff] %v7063_v29  ;;  %v4518_v15 = vsub.f32 %v7063_v29, %v4996_v24  ;;  %v7066_v44 = vmul.f32 0.1, %v4458_v25  ;;  %v7074_v16 = vmul.f32 0.1, %v4519_v4  ;;  %v3780_v24 = vadd.f32 %v6900_v57, %v6898_v27  ;;  %s4968_s24 = sshll.u32 %s5835_s27, 11 }
 0x53b   : > { %7455 = vst [vmem:[#allocation36_spill] sm:$0xff] %v7024_v28  ;;  %v4086_v36 = vpop.f32.mrf.mxu0  ;;  %7464 = vst [vmem:[#allocation45_spill] sm:$0xff] %v7060_v6  ;;  %v7076_v56 = vmul.f32 0.1, %v4461_v58  ;;  %v7078_v12 = vmul.f32 0.1, %v4517_v33  ;;  %v4007_v58 = vadd.f32 %v6951_v10, %v6944_v14  ;;  %v4116_v53 = vadd.f32 %v6976_v18, %v4015_v54  ;;  %s7326_s26 = scalar_lea.hbm %s7494_s6, %s4968_s24 }
 0x53c   : > { %v7054_v28 = vpop.f32.mrf.mxu1  ;;  %v7082_v6 = vmul.f32 0.1, %v4464_v49  ;;  %v7084_v25 = vmul.f32 0.1, %v4520_v37  ;;  %v7086_v39 = vmul.f32 0.1, %v4462_v42  ;;  %v3804_v27 = vadd.f32 %v6916_v1, %v6908_v5 }
 0x53d   : > { %v5516_v46 = vpop.f32.mrf.mxu0  ;;  %v7096_v29 = vmul.f32 0.1, %v4518_v15  ;;  %v3796_v57 = vadd.f32 %v6922_v45, %v6912_v50  ;;  %v4010_v14 = vadd.f32 %v6962_v52, %v6953_v19  ;;  %v7112_v10 = vadd.f32 %v6984_v21, %v4007_v58  ;;  %v7469_v18 = vld [vmem:[#allocation20_spill] sm:$0xff]  ;;  %v7471_v42 = vld [vmem:[#allocation21_spill] sm:$0xff]  ;;  %v7472_v37 = vld [vmem:[#allocation22_spill] sm:$0xff]  ;;  %s4579_s12 = sshll.u32 %s7247_s7, 4  ;;  %s7328_s12 = int_to_ptr.vmem [resolvable:$true] %s4579_s12 }
 0x53e   : > { %v7072_v63 = vpop.f32.mrf.mxu1  ;;  %7466 = vst [vmem:[#allocation47_spill] sm:$0xff] %v7086_v39  ;;  %v3807_v48 = vadd.f32 %v6928_v31, %v6914_v41  ;;  %v3889_v34 = vadd.f32 %v6920_v51, %v3788_v55  ;;  %v4031_v5 = vadd.f32 %v6966_v22, %v6960_v40  ;;  %v7124_v50 = vadd.f32 %v6996_v62, %v4018_v35  ;;  %v7473_v49 = vld [vmem:[#allocation24_spill] sm:$0xff]  ;;  %v7475_v15 = vld [vmem:[#allocation26_spill] sm:$0xff]  ;;  %s4563_s27 = scalar_lea.sflag [#allocation4], %s6024_s0  ;;  %s5755_s29 = scalar_lea.vmem %s7328_s12, 2048 }
 0x53f   : > { %v4099_v59 = vpop.f32.mrf.mxu0  ;;  %7467 = vst [vmem:[#allocation48_spill] sm:$0xff] %v7096_v29  ;;  %v3799_v1 = vadd.f32 %v6934_v30, %v6918_v26  ;;  %v3887_v45 = vadd.f32 %v6924_v13, %v3780_v24  ;;  %v7131_v19 = vadd.f32 %v4086_v36, %v4010_v14  ;;  %v7136_v51 = vadd.f32 %v6926_v0, %v3791_v2  ;;  %v7171_v2 = vld [vmem:[%s6056_s8] sm:$0xff]  ;;  %v7178_v14 = vld [vmem:[%s6056_s8 + $0x10] sm:$0xff]  ;;  %p5756_p1 = scmp.ne.s32.totalorder %s7328_s12, %s5755_s29  ;;  %p5762_p7 = scmp.lt.s32.totalorder %s7328_s12, %s5760_s11 }
 0x540   : > { %v7094_v4 = vpop.f32.mrf.mxu1  ;;  %v4363_v31 = vadd.f32 %v4116_v53, %v3889_v34  ;;  %v7138_v40 = vadd.f32 %v5516_v46, %v4031_v5  ;;  %v7142_v26 = vadd.f32 %v6930_v60, %v3783_v11  ;;  %v7145_v13 = vadd.f32 %v6932_v20, %v3804_v27  ;;  %v7474_v46 = vld [vmem:[#allocation23_spill] sm:$0xff]  ;;  %p5763_p2 = scmp.lt.s32.totalorder %s5761_s14, %s5755_s29 }
 0x541   : > { %v5517_v33 = vpop.f32.mrf.mxu0  ;;  %v4361_v30 = vadd.f32 %v7112_v10, %v3887_v45  ;;  %v7148_v7 = vadd.f32 %v4099_v59, %v4023_v23  ;;  %v7153_v62 = vadd.f32 %v7468_v3, %v3796_v57  ;;  %v4364_v60 = vadd.f32 %v7124_v50, %v7136_v51  ;;  %v7186_v3 = vld [vmem:[%s6056_s8 + $0x8] sm:$0xff]  ;;  %p5757_p4 = pnand %p5756_p1, %p5978_p0 }
 0x542   : > { %v7114_v38 = vpop.f32.mrf.mxu1  ;;  %v7470_v21 = vld [vmem:[#allocation36_spill] sm:$0xff]  ;;  %v7162_v36 = vadd.f32 %v7471_v42, %v3799_v1  ;;  %v4034_v59 = vadd.f32 %v7473_v49, %v7472_v37  ;;  %v4026_v54 = vadd.f32 %v7475_v15, %v7474_v46  ;;  %v4362_v55 = vadd.f32 %v7131_v19, %v7142_v26  ;;  %p5764_p6 = por %p5763_p2, %p5762_p7 }
 0x543   : > { %v7116_v17 = vpop.f32.mrf.mxu0  ;;  %v4387_v11 = vmul.f32 %v7171_v2, %v4363_v31  ;;  %v4367_v35 = vadd.f32 %v7138_v40, %v7145_v13  ;;  %v4385_v5 = vmul.f32 %v7171_v2, %v4361_v30  ;;  %v4417_v1 = vmul.f32 %v7178_v14, %v4361_v30  ;;  %p5758_p5 = pneg %p5757_p4 }
 0x544   : > { %v7133_v61 = vpop.f32.mrf.mxu1  ;;  %v4365_v23 = vadd.f32 %v7148_v7, %v7153_v62  ;;  %v7197_v30 = vadd.f32 %v5517_v33, %v4034_v59 }
 0x545   : > { %v5532_v41 = vpop.f32.mrf.mxu0  ;;  %p5765_p9 = pnand %p5764_p6, %p5758_p5 }
 0x546   : > { %v4254_v52 = vadd.f32 %v5532_v41, %v6994_v32  ;;  %v7150_v22 = vpop.f32.mrf.mxu1  ;;  %v7156_v32 = vadd.f32 %v7469_v18, %v3807_v48  ;;  %v4419_v48 = vmul.f32 %v7178_v14, %v4363_v31  ;;  %v4388_v18 = vmul.f32 %v7186_v3, %v4364_v60 }
 0x547   : > { %v4245_v0 = vpop.f32.mrf.mxu0  ;;  %v4386_v31 = vmul.f32 %v7186_v3, %v4362_v55 }
 0x548   : > { %v4246_v20 = vadd.f32 %v4245_v0, %v7470_v21  ;;  %v5542_v24 = vpop.f32.mrf.mxu1 }
 0x549   : > { %v5533_v58 = vpop.f32.mrf.mxu0  ;;  %v4355_v27 = vadd.f32 %v5542_v24, %v4254_v52  ;;  %v7190_v52 = vld [vmem:[%s6056_s8 + $0x18] sm:$0xff]  ;;  %v7201_v24 = vmul.f32 %v7171_v2, %v4367_v35 }
 0x54a   : > { %v4257_v57 = vadd.f32 %v5533_v58, %v7054_v28  ;;  %v4322_v41 = vpop.f32.mrf.mxu1  ;;  %v4420_v28 = vmul.f32 %v7190_v52, %v4364_v60  ;;  %v7195_v37 = vmul.f32 %v7190_v52, %v4362_v55  ;;  %v7207_v60 = vmul.f32 %v7171_v2, %v4365_v23 }
 0x54b   : > { %v4248_v0 = vpop.f32.mrf.mxu0  ;;  %v4371_v21 = vsub.f32 %v4355_v27, %v3889_v34  ;;  %v4353_v42 = vadd.f32 %v4322_v41, %v4246_v20  ;;  %v7204_v34 = vmul.f32 %v7178_v14, %v4367_v35  ;;  %v7210_v20 = vmul.f32 %v7178_v14, %v4365_v23 }
 0x54c   : > { %v4249_v49 = vadd.f32 %v4248_v0, %v7072_v63  ;;  %v5543_v46 = vpop.f32.mrf.mxu1  ;;  %v7219_v35 = vadd.f32 %v7197_v30, %v7156_v32 }
 0x54d   : > { %v5536_v15 = vpop.f32.mrf.mxu0  ;;  %v4379_v58 = vadd.f32 %v4371_v21, %v4116_v53  ;;  %v4369_v29 = vsub.f32 %v4353_v42, %v3887_v45  ;;  %v4356_v39 = vadd.f32 %v5543_v46, %v4257_v57  ;;  %v7222_v57 = vadd.f32 %v7116_v17, %v4026_v54  ;;  %v7476_v17 = vld [vmem:[#allocation32_spill] sm:$0xff] }
 0x54e   : > { %v4270_v33 = vadd.f32 %v5536_v15, %v7094_v4  ;;  %v4325_v63 = vpop.f32.mrf.mxu1 }
 0x54f   : > { %v4261_v59 = vpop.f32.mrf.mxu0  ;;  %v4395_v55 = vmul.f32 %v7178_v14, %v4379_v58  ;;  %v4411_v27 = vmul.f32 %v7171_v2, %v4379_v58  ;;  %v4377_v53 = vadd.f32 %v4369_v29, %v7112_v10  ;;  %v4372_v45 = vsub.f32 %v4356_v39, %v7136_v51 }
 0x550   : > { %v4354_v23 = vadd.f32 %v4325_v63, %v4249_v49  ;;  %v4262_v4 = vadd.f32 %v4261_v59, %v7114_v38  ;;  %v5546_v41 = vpop.f32.mrf.mxu1  ;;  %v7477_v49 = vld [vmem:[#allocation37_spill] sm:$0xff] }
 0x551   : > { %v5537_v0 = vpop.f32.mrf.mxu0  ;;  %v4403_v21 = vadd.f32 %v4395_v55, %v4387_v11  ;;  %v4427_v42 = vsub.f32 %v4411_v27, %v4419_v48  ;;  %v4393_v46 = vmul.f32 %v7178_v14, %v4377_v53  ;;  %v4409_v29 = vmul.f32 %v7171_v2, %v4377_v53 }
 0x552   : > { %v4380_v39 = vadd.f32 %v4372_v45, %v7124_v50  ;;  %v4370_v10 = vsub.f32 %v4354_v23, %v7142_v26  ;;  %v4359_v51 = vadd.f32 %v5546_v41, %v4270_v33  ;;  %v4273_v15 = vadd.f32 %v5537_v0, %v7133_v61  ;;  %v4338_v59 = vpop.f32.mrf.mxu1  ;;  %v7478_v33 = vld [vmem:[#allocation41_spill] sm:$0xff] }
 0x553   : > { %v4475_v54 = vadd.f32 %v7476_v17, %v4403_v21  ;;  %v4531_v58 = vadd.f32 %v7477_v49, %v4427_v42  ;;  %v4401_v38 = vadd.f32 %v4393_v46, %v4385_v5  ;;  %v4425_v63 = vsub.f32 %v4409_v29, %v4417_v1  ;;  %v7479_v41 = vld [vmem:[#allocation25_spill] sm:$0xff]  ;;  %v7480_v21 = vld [vmem:[#allocation27_spill] sm:$0xff] }
 0x554   : > { %v4396_v11 = vmul.f32 %v7190_v52, %v4380_v39  ;;  %v4412_v48 = vmul.f32 %v7186_v3, %v4380_v39  ;;  %v4378_v55 = vadd.f32 %v4370_v10, %v7131_v19  ;;  %v4375_v50 = vsub.f32 %v4359_v51, %v7145_v13  ;;  %v5547_v13 = vpop.f32.mrf.mxu1  ;;  %v7481_v39 = vld [vmem:[#allocation45_spill] sm:$0xff] }
 0x555   : > { %v4483_v27 = vmul.f32 0.5, %v4475_v54  ;;  %v4539_v26 = vmul.f32 0.5, %v4531_v58  ;;  %v4473_v53 = vadd.f32 %v7478_v33, %v4401_v38  ;;  %v4529_v61 = vadd.f32 %v7056_v47, %v4425_v63 }
 0x556   : > { %v4404_v45 = vadd.f32 %v4396_v11, %v4388_v18  ;;  %v4428_v23 = vsub.f32 %v4412_v48, %v4420_v28  ;;  %v4394_v5 = vmul.f32 %v7190_v52, %v4378_v55  ;;  %v4410_v1 = vmul.f32 %v7186_v3, %v4378_v55  ;;  %v4264_v18 = vpop.f32.mrf.mxu0  ;;  %v7482_v28 = vld [vmem:[#allocation28_spill] sm:$0xff] }
 0x557   : > { %v4491_v0 = vsub.f32 %v7479_v41, %v4483_v27  ;;  %v4547_v42 = vsub.f32 %v7480_v21, %v4539_v26  ;;  %v4481_v19 = vmul.f32 0.5, %v4473_v53  ;;  %v4537_v46 = vmul.f32 0.5, %v4529_v61 }
 0x558   : > { %v4476_v29 = vadd.f32 %v7058_v8, %v4404_v45  ;;  %v4532_v10 = vadd.f32 %v7481_v39, %v4428_v23  ;;  %v4402_v51 = vadd.f32 %v4394_v5, %v4386_v31  ;;  %v4426_v47 = vsub.f32 %v4410_v1, %v7195_v37  ;;  %v7483_v8 = vld [vmem:[#allocation29_spill] sm:$0xff]  ;;  %v7487_v5 = vld [vmem:[#allocation34_spill] sm:$0xff]  ;;  %v7488_v39 = vld [vmem:[#allocation35_spill] sm:$0xff] }
 0x559   : > { %4499 = vst.msk [vmem:[%s7247_s7 + $0x10] sm:$0xff] %vm643_vm0, %v4491_v0  ;;  %4952 = vst.msk [vmem:[%s7247_s7 + $0x50] sm:$0xff] %vm643_vm0, %v4547_v42  ;;  %v4489_v17 = vsub.f32 %v7482_v28, %v4481_v19  ;;  %v4545_v54 = vsub.f32 %v7483_v8, %v4537_v46  ;;  %v4383_v31 = vadd.f32 %v4375_v50, %v7138_v40 }
 0x55a   : > { %v4357_v49 = vadd.f32 %v4338_v59, %v4262_v4  ;;  %v4484_v37 = vmul.f32 0.5, %v4476_v29  ;;  %v4540_v58 = vmul.f32 0.5, %v4532_v10  ;;  %v4474_v38 = vadd.f32 %v7066_v44, %v4402_v51  ;;  %v4341_v4 = vpop.f32.mrf.mxu1  ;;  %v7484_v59 = vld [vmem:[#allocation30_spill] sm:$0xff]  ;;  %v7485_v44 = vld [vmem:[#allocation31_spill] sm:$0xff] }
 0x55b   : > { %v4530_v63 = vadd.f32 %v7068_v9, %v4426_v47  ;;  %4497 = vst.msk [vmem:[%s7247_s7] sm:$0xff] %vm643_vm0, %v4489_v17  ;;  %4950 = vst.msk [vmem:[%s7247_s7 + $0x40] sm:$0xff] %vm643_vm0, %v4545_v54  ;;  %v4399_v11 = vmul.f32 %v7178_v14, %v4383_v31  ;;  %v4415_v48 = vmul.f32 %v7171_v2, %v4383_v31  ;;  %v7489_v10 = vld [vmem:[#allocation38_spill] sm:$0xff]  ;;  %v7490_v54 = vld [vmem:[#allocation39_spill] sm:$0xff] }
 0x55c   : > { %v4373_v55 = vsub.f32 %v4357_v49, %v7153_v62  ;;  %v4265_v40 = vadd.f32 %v4264_v18, %v7150_v22  ;;  %v4492_v50 = vsub.f32 %v7484_v59, %v4484_v37  ;;  %v4548_v27 = vsub.f32 %v7485_v44, %v4540_v58  ;;  %v7486_v22 = vld [vmem:[#allocation33_spill] sm:$0xff]  ;;  %v7491_v49 = vld [vmem:[#allocation40_spill] sm:$0xff]  ;;  %v7492_v58 = vld [vmem:[#allocation47_spill] sm:$0xff] }
 0x55d   : > { %v4482_v9 = vmul.f32 0.5, %v4474_v38  ;;  %v4538_v26 = vmul.f32 0.5, %v4530_v63  ;;  %v4407_v33 = vadd.f32 %v4399_v11, %v7201_v24  ;;  %v4431_v53 = vsub.f32 %v4415_v48, %v7204_v34  ;;  %v7493_v63 = vld [vmem:[#allocation48_spill] sm:$0xff]  ;;  %v7496_v59 = vld [vmem:[#allocation43_spill] sm:$0xff] }
 0x55e   : > { %v4381_v61 = vadd.f32 %v4373_v55, %v7148_v7  ;;  %v4360_v45 = vadd.f32 %v5547_v13, %v4273_v15  ;;  %v4366_v62 = vadd.f32 %v7222_v57, %v7162_v36  ;;  %4500 = vst.msk [vmem:[%s7247_s7 + $0x18] sm:$0xff] %vm643_vm0, %v4492_v50  ;;  %4953 = vst.msk [vmem:[%s7247_s7 + $0x58] sm:$0xff] %vm643_vm0, %v4548_v27  ;;  %v7497_v44 = vld [vmem:[#allocation44_spill] sm:$0xff] }
 0x55f   : > { %v4490_v23 = vsub.f32 %v7486_v22, %v4482_v9  ;;  %v4546_v1 = vsub.f32 %v7487_v5, %v4538_v26  ;;  %v4358_v41 = vadd.f32 %v4341_v4, %v4265_v40  ;;  %v4479_v24 = vadd.f32 %v7070_v43, %v4407_v33  ;;  %v7495_v40 = vld [vmem:[#allocation42_spill] sm:$0xff] }
 0x560   : > { %v4535_v34 = vadd.f32 %v7074_v16, %v4431_v53  ;;  %v4397_v0 = vmul.f32 %v7178_v14, %v4381_v61  ;;  %v4413_v7 = vmul.f32 %v7171_v2, %v4381_v61  ;;  %v4392_v15 = vmul.f32 %v7186_v3, %v7219_v35  ;;  %v7498_v9 = vld [vmem:[#allocation46_spill] sm:$0xff] }
 0x561   : > { %v4424_v21 = vmul.f32 %v7190_v52, %v7219_v35  ;;  %4498 = vst.msk [vmem:[%s7247_s7 + $0x8] sm:$0xff] %vm643_vm0, %v4490_v23  ;;  %4951 = vst.msk [vmem:[%s7247_s7 + $0x48] sm:$0xff] %vm643_vm0, %v4546_v1  ;;  %v4376_v42 = vsub.f32 %v4360_v45, %v7156_v32  ;;  %v4374_v43 = vsub.f32 %v4358_v41, %v7162_v36  ;;  %v4487_v19 = vmul.f32 0.5, %v4479_v24 }
 0x562   : > { %v4543_v16 = vmul.f32 0.5, %v4535_v34  ;;  %v4405_v2 = vadd.f32 %v4397_v0, %v7207_v60  ;;  %v4429_v14 = vsub.f32 %v4413_v7, %v7210_v20  ;;  %v4390_v46 = vmul.f32 %v7186_v3, %v4366_v62 }
 0x563   : > { %v4422_v35 = vmul.f32 %v7190_v52, %v4366_v62  ;;  %v4384_v13 = vadd.f32 %v4376_v42, %v7197_v30  ;;  %v4382_v29 = vadd.f32 %v4374_v43, %v7222_v57  ;;  %v4495_v32 = vsub.f32 %v7488_v39, %v4487_v19 }
 0x564   : > { %v4551_v36 = vsub.f32 %v7489_v10, %v4543_v16  ;;  %v4477_v51 = vadd.f32 %v7076_v56, %v4405_v2  ;;  %v4533_v47 = vadd.f32 %v7078_v12, %v4429_v14 }
 0x565   : > { %v4400_v60 = vmul.f32 %v7190_v52, %v4384_v13  ;;  %v4416_v20 = vmul.f32 %v7186_v3, %v4384_v13  ;;  %v4398_v18 = vmul.f32 %v7190_v52, %v4382_v29  ;;  %v4414_v28 = vmul.f32 %v7186_v3, %v4382_v29  ;;  %4503 = vst.msk [vmem:[%s7247_s7 + $0x30] sm:$0xff] %vm643_vm0, %v4495_v32 }
 0x566   : > { %4956 = vst.msk [vmem:[%s7247_s7 + $0x70] sm:$0xff] %vm643_vm0, %v4551_v36  ;;  %v4485_v30 = vmul.f32 0.5, %v4477_v51  ;;  %v4541_v56 = vmul.f32 0.5, %v4533_v47 }
 0x567   : > { %v4408_v57 = vadd.f32 %v4400_v60, %v4392_v15  ;;  %v4432_v12 = vsub.f32 %v4416_v20, %v4424_v21  ;;  %v4406_v17 = vadd.f32 %v4398_v18, %v4390_v46  ;;  %v4430_v8 = vsub.f32 %v4414_v28, %v4422_v35 }
 0x568   : > { %v4493_v31 = vsub.f32 %v7490_v54, %v4485_v30  ;;  %v4549_v52 = vsub.f32 %v7491_v49, %v4541_v56 }
 0x569   : > { %v4480_v37 = vadd.f32 %v7082_v6, %v4408_v57  ;;  %v4536_v3 = vadd.f32 %v7084_v25, %v4432_v12  ;;  %v4478_v38 = vadd.f32 %v7492_v58, %v4406_v17  ;;  %v4534_v11 = vadd.f32 %v7493_v63, %v4430_v8 }
 0x56a   : > { %4501 = vst.msk [vmem:[%s7247_s7 + $0x20] sm:$0xff] %vm643_vm0, %v4493_v31  ;;  %4954 = vst.msk [vmem:[%s7247_s7 + $0x60] sm:$0xff] %vm643_vm0, %v4549_v52 }
 0x56b   : > { %v4488_v48 = vmul.f32 0.5, %v4480_v37  ;;  %v4544_v55 = vmul.f32 0.5, %v4536_v3  ;;  %v4486_v6 = vmul.f32 0.5, %v4478_v38  ;;  %v4542_v25 = vmul.f32 0.5, %v4534_v11 }
 0x56d   : > { %v4496_v4 = vsub.f32 %v7495_v40, %v4488_v48  ;;  %v4552_v50 = vsub.f32 %v7496_v59, %v4544_v55  ;;  %v4494_v27 = vsub.f32 %v7497_v44, %v4486_v6  ;;  %v4550_v26 = vsub.f32 %v7498_v9, %v4542_v25 }
 0x56f   : > { %4504 = vst.msk [vmem:[%s7247_s7 + $0x38] sm:$0xff] %vm643_vm0, %v4496_v4  ;;  %4957 = vst.msk [vmem:[%s7247_s7 + $0x78] sm:$0xff] %vm643_vm0, %v4552_v50 }
 0x570   : > { %4502 = vst.msk [vmem:[%s7247_s7 + $0x28] sm:$0xff] %vm643_vm0, %v4494_v27  ;;  %4955 = vst.msk [vmem:[%s7247_s7 + $0x68] sm:$0xff] %vm643_vm0, %v4550_v26 }
 0x571   : > { %5768 = shalt.err (!%p5765_p9)
}
 0x572   : > { %s5769_s9 = scalar_lea.hbm %s7326_s26, 2048  ;;  %s5773_s30 = scalar_lea.hbm %s7494_s6, 4096 }
 0x573   : > { %p5770_p12 = scmp.ne.s32.totalorder %s7326_s26, %s5769_s9  ;;  %p5774_p3 = scmp.lt.s32.totalorder %s7326_s26, %s7494_s6 }
 0x574   : > { %p5775_p8 = scmp.lt.s32.totalorder %s5773_s30, %s5769_s9 }
 0x575   : > { %p5771_p13 = pnand %p5770_p12, %p5978_p0 }
 0x576   : > { %p5776_p1 = por %p5775_p8, %p5774_p3 }
 0x577   : > { %p5772_p11 = pneg %p5771_p13 }
 0x579   : > { %p5777_p4 = pnand %p5776_p1, %p5772_p11 }
 0x57b   : > { %5780 = shalt.err (!%p5777_p4)
}
 0x57c   : > { %s5853_s20 = smov 128   ;;  %s5854_s13 = smov 8  }
 0x57d   : > { %5556 = dma.vmem_to_hbm [thread:$0]  (%p5978_p0), %s7328_s12, 2048, %s7326_s26, %s4563_s27, %s5853_s20, %s5853_s20, %s5854_s13  }
 0x57e PF: > { %s7499_s16 = sld [smem:[#allocation13_spill]] }
 0x57f   : > { %s7500_s21 = sld [smem:[#allocation16_spill]] }
 0x580   : > { %s7501_s7 = sld [smem:[#allocation15_spill]] }
 0x584   : > { %s4594_s24 = sand.u32 1, %s7499_s16  }
 0x585   : > { %p7502_p5 = scmp.ne.s32.totalorder %s7500_s21, 0  ;;  %s4595_s8 = scalar_lea.sflag [#allocation4], %s4594_s24 }
 0x587   : > { %p5570_p7 = pnand %p4756_p10, %p7502_p5 }
 0x589   : > { %p5571_p2 = pneg %p5570_p7 }
 0x58b   : > { %5818 = dma.done.wait (%p5571_p2), %s4595_s8, 2048  }
 0x58c   : > { %5820 = vsyncadd (%p5571_p2), %s4595_s8, 4294965248  ;;  %s26_s29 = sadd.s32 1, %s7501_s7   ;;  %s7503_s22 = sld [smem:[#allocation14_spill]] }
 0x58d   : > { %p23_p6 = scmp.ge.s32.totalorder %s26_s29, 4   ;;  %s7504_s26 = sld [smem:[#allocation18_spill]] }
 0x58e   : > { %s7505_s23 = sld [smem:[#allocation17_spill]]  ;;  %s7506_s24 = smov %s5827_s25 }
 0x58f   : > { %s7508_s27 = smov %s5839_s28 }
 0x590   :  { %25 = sbr.rel (!%p23_p6) target bundleno = 12 (0xc), region = 135 }
 0x592   : > { %s7507_s25 = smov %s7503_s22 }
 0x594   : > { %s7509_s28 = smov %s7505_s23 }
 0x595   :  { %4600 = vsyncpa [#allocation3], 1 }
 0x596   :  { %4602 = vsyncpa [#allocation3 + $0x1], 1 }
 0x597   :  { %4603 = vsyncpa [#allocation6], 1 }
 0x598   :  { %4605 = vsyncpa [#allocation6 + $0x1], 1 }
 0x599   :  { %4606 = vsyncpa [#allocation4], 1 }
 0x59a   :  { %4608 = vsyncpa [#allocation4 + $0x1], 1 }

</bundles_post_ra>
